<compile_context>
chip_gen: v7x
topology: tpu7x:2x2x1
jax: 0.10.0
libtpu: 0.0.40
codegen_flags: <defaults>
</compile_context>

<pallas_src>
import functools

import jax
import jax.numpy as jnp
from jax.experimental import pallas as pl
from jax.experimental.pallas import tpu as pltpu

_ACTS = {
    "relu": lambda x: jnp.maximum(x, 0.0),
    "tanh": jnp.tanh,
    "sigmoid": jax.nn.sigmoid,
}

_VMEM = pl.BlockSpec(memory_space=pltpu.MemorySpace.VMEM)


# ---------------- Pallas kernels ----------------

def _conv_act_pool_kernel(p_ref, w_ref, b_ref, o_ref, *, act, rows_out):
    """conv (as matmul on pool-tap-ordered patches) + bias + act + maxpool(2,2).

    p_ref rows are ordered (pool_tap, n, ph, pw); the four taps of each 2x2
    pooling window are therefore four contiguous row blocks of the matmul
    result, so the pool is a plain elementwise max (no strided access).
    """
    a = _ACTS[act](
        jnp.dot(p_ref[...], w_ref[...], preferred_element_type=jnp.float32)
        + b_ref[...])
    r = rows_out
    o_ref[...] = jnp.maximum(jnp.maximum(a[0:r], a[r:2 * r]),
                             jnp.maximum(a[2 * r:3 * r], a[3 * r:4 * r]))


def _conv_pool_mlp_kernel(p_ref, w2_ref, b2_ref,
                          w1d_ref, b1d_ref, w2d_ref, b2d_ref, w3d_ref, b3d_ref,
                          o_ref, *, act, batch):
    """conv2 + act + pool2 + dense1 + act + dense2 + act + dense3 (logits).

    Everything after the conv2 matmul stays as VMEM-resident values; only the
    final (batch, num_classes) logits are stored.
    """
    f = _ACTS[act]
    a = f(jnp.dot(p_ref[...], w2_ref[...], preferred_element_type=jnp.float32)
          + b2_ref[...])                                  # (4*16*batch, 16)
    r = 16 * batch
    # maxpool2: four contiguous row blocks -> rows ordered (qh*4+qw, n)
    pooled = jnp.maximum(jnp.maximum(a[0:r], a[r:2 * r]),
                         jnp.maximum(a[2 * r:3 * r], a[3 * r:4 * r]))
    # dense1 == sum over the 16 pooled spatial positions of
    # (batch,16)@(16,120) matmuls; w1d rows were permuted at init so no
    # in-kernel flatten / transpose of the activations is needed.
    h = b1d_ref[...]                                      # (1, 120), broadcasts
    for p in range(16):
        h = h + jnp.dot(pooled[p * batch:(p + 1) * batch, :],
                        w1d_ref[p * 16:(p + 1) * 16, :],
                        preferred_element_type=jnp.float32)
    h = f(h)
    h = f(jnp.dot(h, w2d_ref[...], preferred_element_type=jnp.float32)
          + b2d_ref[...])
    o_ref[...] = (jnp.dot(h, w3d_ref[...], preferred_element_type=jnp.float32)
                  + b3d_ref[...])


# ---------------- Host-side patch building (tiny XLA fusions) ----------------

def _conv1_patches(x):
    """x: (N, C, H, W) -> (4*N*(OH/2)*(OW/2), 25*C).

    Rows ordered (tap, n, ph, pw); cols ordered (kh, kw, ci) to match w1p."""
    N, C, H, W = x.shape
    OH, OW = H - 4, W - 4
    PH, PW = OH // 2, OW // 2
    wins = jnp.stack([x[:, :, kh:kh + OH, kw:kw + OW]
                      for kh in range(5) for kw in range(5)], axis=0)
    taps = jnp.stack([wins[:, :, :, ti::2, tj::2]
                      for ti in range(2) for tj in range(2)], axis=0)
    # (tap, khkw, n, ci, ph, pw) -> (tap, n, ph, pw, khkw, ci)
    return taps.transpose(0, 2, 4, 5, 1, 3).reshape(4 * N * PH * PW, 25 * C)


def _conv2_patches(h1):
    """h1: (N, 12, 12, 6) -> (4*4*4*N, 150).

    Rows ordered (tap, qh, qw, n); cols ordered (kh, kw, ci) to match w2p."""
    N, H, W, C = h1.shape
    OH, OW = H - 4, W - 4
    QH, QW = OH // 2, OW // 2
    wins = jnp.stack([h1[:, kh:kh + OH, kw:kw + OW, :]
                      for kh in range(5) for kw in range(5)], axis=0)
    taps = jnp.stack([wins[:, :, ti::2, tj::2, :]
                      for ti in range(2) for tj in range(2)], axis=0)
    # (tap, khkw, n, qh, qw, ci) -> (tap, qh, qw, n, khkw, ci)
    return taps.transpose(0, 3, 4, 2, 1, 5).reshape(4 * QH * QW * N, 25 * C)


# ---------------- Forward ----------------

@functools.partial(jax.jit, static_argnames=("act",))
def lenet5_forward(x, pp, act="relu"):
    act = act.lower()
    assert act in _ACTS
    n0 = x.shape[0]
    pad = (-n0) % 8                      # keep in-kernel row slices 8-aligned
    if pad:
        x = jnp.pad(x, ((0, pad), (0, 0), (0, 0), (0, 0)))
    N = x.shape[0]

    # stage 1: conv1 + act + pool1 in one fused kernel
    p1 = _conv1_patches(x)                                    # (4*N*144, 25*C)
    h1 = pl.pallas_call(
        functools.partial(_conv_act_pool_kernel, act=act, rows_out=N * 144),
        out_shape=jax.ShapeDtypeStruct((N * 144, 6), jnp.float32),
        in_specs=[_VMEM, _VMEM, _VMEM],
        out_specs=_VMEM,
    )(p1, pp["w1p"], pp["b1p"])                               # rows (n,ph,pw)

    # stage 2: conv2 + act + pool2 + 3 dense layers in one fused kernel
    p2 = _conv2_patches(h1.reshape(N, 12, 12, 6))             # (4*16*N, 150)
    num_classes = pp["w3d"].shape[1]
    logits = pl.pallas_call(
        functools.partial(_conv_pool_mlp_kernel, act=act, batch=N),
        out_shape=jax.ShapeDtypeStruct((N, num_classes), jnp.float32),
        in_specs=[_VMEM] * 9,
        out_specs=_VMEM,
    )(p2, pp["w2p"], pp["b2p"], pp["w1d"], pp["b1d"],
      pp["w2d"], pp["b2d"], pp["w3d"], pp["b3d"])
    return logits[:n0]


# ---------------- Parameters ----------------

def init_params(key, in_channels, num_classes):
    """PyTorch-layout LeNet5 parameters (uniform, fan-in scaled)."""
    def u(k, shape, fan_in):
        bound = 1.0 / jnp.sqrt(jnp.float32(fan_in))
        return jax.random.uniform(k, shape, jnp.float32, -bound, bound)

    ks = jax.random.split(key, 10)
    return {
        "cw1": u(ks[0], (6, in_channels, 5, 5), in_channels * 25),
        "cb1": u(ks[1], (6,), in_channels * 25),
        "cw2": u(ks[2], (16, 6, 5, 5), 6 * 25),
        "cb2": u(ks[3], (16,), 6 * 25),
        "dw1": u(ks[4], (120, 4 * 4 * 16), 4 * 4 * 16),
        "db1": u(ks[5], (120,), 4 * 4 * 16),
        "dw2": u(ks[6], (82, 120), 120),
        "db2": u(ks[7], (82,), 120),
        "dw3": u(ks[8], (num_classes, 82), 82),
        "db3": u(ks[9], (num_classes,), 82),
    }


def prepare_params(p):
    """One-time re-layout of the PyTorch-style weights for the fused kernels."""
    C = p["cw1"].shape[1]
    return {
        # conv weights -> (kh*kw*ci, co), matching patch column order
        "w1p": p["cw1"].transpose(2, 3, 1, 0).reshape(25 * C, 6),
        "b1p": p["cb1"].reshape(1, 6),
        "w2p": p["cw2"].transpose(2, 3, 1, 0).reshape(25 * 6, 16),
        "b2p": p["cb2"].reshape(1, 16),
        # dense1 rows permuted to ((qh*4+qw)*16 + co, :) so the kernel consumes
        # the pooled activations (rows=(pos,n), cols=co) with no flatten.
        "w1d": p["dw1"].reshape(120, 16, 4, 4).transpose(2, 3, 1, 0).reshape(256, 120),
        "b1d": p["db1"].reshape(1, 120),
        "w2d": p["dw2"].T, "b2d": p["db2"].reshape(1, 82),
        "w3d": p["dw3"].T, "b3d": p["db3"].reshape(1, -1),
    }


if __name__ == "__main__":
    # dense1 expects 4*4*16 features -> input spatial must be 28x28.
    in_channels, num_classes, batch = 1, 10, 8
    key = jax.random.PRNGKey(0)
    pkey, xkey = jax.random.split(key)
    params = prepare_params(init_params(pkey, in_channels, num_classes))
    x = jax.random.normal(xkey, (batch, in_channels, 28, 28), dtype=jnp.float32)

    out = lenet5_forward(x, params, act="relu")
    out = jax.block_until_ready(out)
    assert out.shape == (batch, num_classes)
    print("KERNEL_OK")
</pallas_src>

<mosaic_0001>
module attributes {stable_mosaic.version = 11 : i64} {
  func.func @_conv_act_pool_kernel(%arg0: memref<4608x25xf32, #tpu.memory_space<vmem>>, %arg1: memref<25x6xf32, #tpu.memory_space<vmem>>, %arg2: memref<1x6xf32, #tpu.memory_space<vmem>>, %arg3: memref<1152x6xf32, #tpu.memory_space<vmem>>) attributes {dimension_semantics = [], scalar_prefetch = 0 : i64, scratch_operands = 0 : i64, tpu.core_type = #tpu.core_type<tc>} {
    %c0 = arith.constant 0 : index
    %c0_0 = arith.constant 0 : index
    %0 = vector.load %arg0[%c0, %c0_0] : memref<4608x25xf32, #tpu.memory_space<vmem>>, vector<4608x25xf32>
    %c0_1 = arith.constant 0 : index
    %c0_2 = arith.constant 0 : index
    %1 = vector.load %arg1[%c0_1, %c0_2] : memref<25x6xf32, #tpu.memory_space<vmem>>, vector<25x6xf32>
    %cst = arith.constant dense<0.000000e+00> : vector<4608x6xf32>
    %2 = tpu.matmul %0, %1, %cst {dimension_numbers = #tpu.dot_dimension_numbers<[1], [0], [0], [1], [0, 0, 1, 1], [], []>} : vector<4608x25xf32>, vector<25x6xf32>, vector<4608x6xf32> -> vector<4608x6xf32>
    %c0_3 = arith.constant 0 : index
    %c0_4 = arith.constant 0 : index
    %3 = vector.load %arg2[%c0_3, %c0_4] : memref<1x6xf32, #tpu.memory_space<vmem>>, vector<1x6xf32>
    %4 = vector.broadcast %3 : vector<1x6xf32> to vector<4608x6xf32>
    %5 = arith.addf %2, %4 : vector<4608x6xf32>
    %cst_5 = arith.constant 0.000000e+00 : f32
    %6 = vector.broadcast %cst_5 : f32 to vector<4608x6xf32>
    %7 = arith.maximumf %5, %6 : vector<4608x6xf32>
    %8 = vector.extract_strided_slice %7 {offsets = [0, 0], sizes = [1152, 6], strides = [1, 1]} : vector<4608x6xf32> to vector<1152x6xf32>
    %9 = vector.extract_strided_slice %7 {offsets = [1152, 0], sizes = [1152, 6], strides = [1, 1]} : vector<4608x6xf32> to vector<1152x6xf32>
    %10 = arith.maximumf %8, %9 : vector<1152x6xf32>
    %11 = vector.extract_strided_slice %7 {offsets = [2304, 0], sizes = [1152, 6], strides = [1, 1]} : vector<4608x6xf32> to vector<1152x6xf32>
    %12 = vector.extract_strided_slice %7 {offsets = [3456, 0], sizes = [1152, 6], strides = [1, 1]} : vector<4608x6xf32> to vector<1152x6xf32>
    %13 = arith.maximumf %11, %12 : vector<1152x6xf32>
    %14 = arith.maximumf %10, %13 : vector<1152x6xf32>
    %c0_6 = arith.constant 0 : index
    %c0_7 = arith.constant 0 : index
    %15 = vector.load %arg3[%c0_6, %c0_7] : memref<1152x6xf32, #tpu.memory_space<vmem>>, vector<1152x6xf32>
    tpu.vector_store %arg3[%c0_6, %c0_7], %14 {strides = array<i32>} : memref<1152x6xf32, #tpu.memory_space<vmem>>, vector<1152x6xf32>,
    return
  }
}

module attributes {stable_mosaic.version = 11 : i64} {
  func.func @_conv_pool_mlp_kernel(%arg0: memref<512x150xf32, #tpu.memory_space<vmem>>, %arg1: memref<150x16xf32, #tpu.memory_space<vmem>>, %arg2: memref<1x16xf32, #tpu.memory_space<vmem>>, %arg3: memref<256x120xf32, #tpu.memory_space<vmem>>, %arg4: memref<1x120xf32, #tpu.memory_space<vmem>>, %arg5: memref<120x82xf32, #tpu.memory_space<vmem>>, %arg6: memref<1x82xf32, #tpu.memory_space<vmem>>, %arg7: memref<82x10xf32, #tpu.memory_space<vmem>>, %arg8: memref<1x10xf32, #tpu.memory_space<vmem>>, %arg9: memref<8x10xf32, #tpu.memory_space<vmem>>) attributes {dimension_semantics = [], scalar_prefetch = 0 : i64, scratch_operands = 0 : i64, tpu.core_type = #tpu.core_type<tc>} {
    %c0 = arith.constant 0 : index
    %c0_0 = arith.constant 0 : index
    %0 = vector.load %arg0[%c0, %c0_0] : memref<512x150xf32, #tpu.memory_space<vmem>>, vector<512x150xf32>
    %c0_1 = arith.constant 0 : index
    %c0_2 = arith.constant 0 : index
    %1 = vector.load %arg1[%c0_1, %c0_2] : memref<150x16xf32, #tpu.memory_space<vmem>>, vector<150x16xf32>
    %cst = arith.constant dense<0.000000e+00> : vector<512x16xf32>
    %2 = tpu.matmul %0, %1, %cst {dimension_numbers = #tpu.dot_dimension_numbers<[1], [0], [0], [1], [0, 0, 1, 1], [], []>} : vector<512x150xf32>, vector<150x16xf32>, vector<512x16xf32> -> vector<512x16xf32>
    %c0_3 = arith.constant 0 : index
    %c0_4 = arith.constant 0 : index
    %3 = vector.load %arg2[%c0_3, %c0_4] : memref<1x16xf32, #tpu.memory_space<vmem>>, vector<1x16xf32>
    %4 = vector.broadcast %3 : vector<1x16xf32> to vector<512x16xf32>
    %5 = arith.addf %2, %4 : vector<512x16xf32>
    %cst_5 = arith.constant 0.000000e+00 : f32
    %6 = vector.broadcast %cst_5 : f32 to vector<512x16xf32>
    %7 = arith.maximumf %5, %6 : vector<512x16xf32>
    %8 = vector.extract_strided_slice %7 {offsets = [0, 0], sizes = [128, 16], strides = [1, 1]} : vector<512x16xf32> to vector<128x16xf32>
    %9 = vector.extract_strided_slice %7 {offsets = [128, 0], sizes = [128, 16], strides = [1, 1]} : vector<512x16xf32> to vector<128x16xf32>
    %10 = arith.maximumf %8, %9 : vector<128x16xf32>
    %11 = vector.extract_strided_slice %7 {offsets = [256, 0], sizes = [128, 16], strides = [1, 1]} : vector<512x16xf32> to vector<128x16xf32>
    %12 = vector.extract_strided_slice %7 {offsets = [384, 0], sizes = [128, 16], strides = [1, 1]} : vector<512x16xf32> to vector<128x16xf32>
    %13 = arith.maximumf %11, %12 : vector<128x16xf32>
    %14 = arith.maximumf %10, %13 : vector<128x16xf32>
    %c0_6 = arith.constant 0 : index
    %c0_7 = arith.constant 0 : index
    %15 = vector.load %arg4[%c0_6, %c0_7] : memref<1x120xf32, #tpu.memory_space<vmem>>, vector<1x120xf32>
    %16 = vector.extract_strided_slice %14 {offsets = [0, 0], sizes = [8, 16], strides = [1, 1]} : vector<128x16xf32> to vector<8x16xf32>
    %c0_8 = arith.constant 0 : index
    %c0_9 = arith.constant 0 : index
    %17 = vector.load %arg3[%c0_8, %c0_9] : memref<256x120xf32, #tpu.memory_space<vmem>>, vector<16x120xf32>
    %cst_10 = arith.constant dense<0.000000e+00> : vector<8x120xf32>
    %18 = tpu.matmul %16, %17, %cst_10 {dimension_numbers = #tpu.dot_dimension_numbers<[1], [0], [0], [1], [0, 0, 1, 1], [], []>} : vector<8x16xf32>, vector<16x120xf32>, vector<8x120xf32> -> vector<8x120xf32>
    %19 = vector.broadcast %15 : vector<1x120xf32> to vector<8x120xf32>
    %20 = arith.addf %19, %18 : vector<8x120xf32>
    %21 = vector.extract_strided_slice %14 {offsets = [8, 0], sizes = [8, 16], strides = [1, 1]} : vector<128x16xf32> to vector<8x16xf32>
    %c16 = arith.constant 16 : index
    %c0_11 = arith.constant 0 : index
    %22 = vector.load %arg3[%c16, %c0_11] : memref<256x120xf32, #tpu.memory_space<vmem>>, vector<16x120xf32>
    %cst_12 = arith.constant dense<0.000000e+00> : vector<8x120xf32>
    %23 = tpu.matmul %21, %22, %cst_12 {dimension_numbers = #tpu.dot_dimension_numbers<[1], [0], [0], [1], [0, 0, 1, 1], [], []>} : vector<8x16xf32>, vector<16x120xf32>, vector<8x120xf32> -> vector<8x120xf32>
    %24 = arith.addf %20, %23 : vector<8x120xf32>
    %25 = vector.extract_strided_slice %14 {offsets = [16, 0], sizes = [8, 16], strides = [1, 1]} : vector<128x16xf32> to vector<8x16xf32>
    %c32 = arith.constant 32 : index
    %c0_13 = arith.constant 0 : index
    %26 = vector.load %arg3[%c32, %c0_13] : memref<256x120xf32, #tpu.memory_space<vmem>>, vector<16x120xf32>
    %cst_14 = arith.constant dense<0.000000e+00> : vector<8x120xf32>
    %27 = tpu.matmul %25, %26, %cst_14 {dimension_numbers = #tpu.dot_dimension_numbers<[1], [0], [0], [1], [0, 0, 1, 1], [], []>} : vector<8x16xf32>, vector<16x120xf32>, vector<8x120xf32> -> vector<8x120xf32>
    %28 = arith.addf %24, %27 : vector<8x120xf32>
    %29 = vector.extract_strided_slice %14 {offsets = [24, 0], sizes = [8, 16], strides = [1, 1]} : vector<128x16xf32> to vector<8x16xf32>
    %c48 = arith.constant 48 : index
    %c0_15 = arith.constant 0 : index
    %30 = vector.load %arg3[%c48, %c0_15] : memref<256x120xf32, #tpu.memory_space<vmem>>, vector<16x120xf32>
    %cst_16 = arith.constant dense<0.000000e+00> : vector<8x120xf32>
    %31 = tpu.matmul %29, %30, %cst_16 {dimension_numbers = #tpu.dot_dimension_numbers<[1], [0], [0], [1], [0, 0, 1, 1], [], []>} : vector<8x16xf32>, vector<16x120xf32>, vector<8x120xf32> -> vector<8x120xf32>
    %32 = arith.addf %28, %31 : vector<8x120xf32>
    %33 = vector.extract_strided_slice %14 {offsets = [32, 0], sizes = [8, 16], strides = [1, 1]} : vector<128x16xf32> to vector<8x16xf32>
    %c64 = arith.constant 64 : index
    %c0_17 = arith.constant 0 : index
    %34 = vector.load %arg3[%c64, %c0_17] : memref<256x120xf32, #tpu.memory_space<vmem>>, vector<16x120xf32>
    %cst_18 = arith.constant dense<0.000000e+00> : vector<8x120xf32>
    %35 = tpu.matmul %33, %34, %cst_18 {dimension_numbers = #tpu.dot_dimension_numbers<[1], [0], [0], [1], [0, 0, 1, 1], [], []>} : vector<8x16xf32>, vector<16x120xf32>, vector<8x120xf32> -> vector<8x120xf32>
    %36 = arith.addf %32, %35 : vector<8x120xf32>
    %37 = vector.extract_strided_slice %14 {offsets = [40, 0], sizes = [8, 16], strides = [1, 1]} : vector<128x16xf32> to vector<8x16xf32>
    %c80 = arith.constant 80 : index
    %c0_19 = arith.constant 0 : index
    %38 = vector.load %arg3[%c80, %c0_19] : memref<256x120xf32, #tpu.memory_space<vmem>>, vector<16x120xf32>
    %cst_20 = arith.constant dense<0.000000e+00> : vector<8x120xf32>
    %39 = tpu.matmul %37, %38, %cst_20 {dimension_numbers = #tpu.dot_dimension_numbers<[1], [0], [0], [1], [0, 0, 1, 1], [], []>} : vector<8x16xf32>, vector<16x120xf32>, vector<8x120xf32> -> vector<8x120xf32>
    %40 = arith.addf %36, %39 : vector<8x120xf32>
    %41 = vector.extract_strided_slice %14 {offsets = [48, 0], sizes = [8, 16], strides = [1, 1]} : vector<128x16xf32> to vector<8x16xf32>
    %c96 = arith.constant 96 : index
    %c0_21 = arith.constant 0 : index
    %42 = vector.load %arg3[%c96, %c0_21] : memref<256x120xf32, #tpu.memory_space<vmem>>, vector<16x120xf32>
    %cst_22 = arith.constant dense<0.000000e+00> : vector<8x120xf32>
    %43 = tpu.matmul %41, %42, %cst_22 {dimension_numbers = #tpu.dot_dimension_numbers<[1], [0], [0], [1], [0, 0, 1, 1], [], []>} : vector<8x16xf32>, vector<16x120xf32>, vector<8x120xf32> -> vector<8x120xf32>
    %44 = arith.addf %40, %43 : vector<8x120xf32>
    %45 = vector.extract_strided_slice %14 {offsets = [56, 0], sizes = [8, 16], strides = [1, 1]} : vector<128x16xf32> to vector<8x16xf32>
    %c112 = arith.constant 112 : index
    %c0_23 = arith.constant 0 : index
    %46 = vector.load %arg3[%c112, %c0_23] : memref<256x120xf32, #tpu.memory_space<vmem>>, vector<16x120xf32>
    %cst_24 = arith.constant dense<0.000000e+00> : vector<8x120xf32>
    %47 = tpu.matmul %45, %46, %cst_24 {dimension_numbers = #tpu.dot_dimension_numbers<[1], [0], [0], [1], [0, 0, 1, 1], [], []>} : vector<8x16xf32>, vector<16x120xf32>, vector<8x120xf32> -> vector<8x120xf32>
    %48 = arith.addf %44, %47 : vector<8x120xf32>
    %49 = vector.extract_strided_slice %14 {offsets = [64, 0], sizes = [8, 16], strides = [1, 1]} : vector<128x16xf32> to vector<8x16xf32>
    %c128 = arith.constant 128 : index
    %c0_25 = arith.constant 0 : index
    %50 = vector.load %arg3[%c128, %c0_25] : memref<256x120xf32, #tpu.memory_space<vmem>>, vector<16x120xf32>
    %cst_26 = arith.constant dense<0.000000e+00> : vector<8x120xf32>
    %51 = tpu.matmul %49, %50, %cst_26 {dimension_numbers = #tpu.dot_dimension_numbers<[1], [0], [0], [1], [0, 0, 1, 1], [], []>} : vector<8x16xf32>, vector<16x120xf32>, vector<8x120xf32> -> vector<8x120xf32>
    %52 = arith.addf %48, %51 : vector<8x120xf32>
    %53 = vector.extract_strided_slice %14 {offsets = [72, 0], sizes = [8, 16], strides = [1, 1]} : vector<128x16xf32> to vector<8x16xf32>
    %c144 = arith.constant 144 : index
    %c0_27 = arith.constant 0 : index
    %54 = vector.load %arg3[%c144, %c0_27] : memref<256x120xf32, #tpu.memory_space<vmem>>, vector<16x120xf32>
    %cst_28 = arith.constant dense<0.000000e+00> : vector<8x120xf32>
    %55 = tpu.matmul %53, %54, %cst_28 {dimension_numbers = #tpu.dot_dimension_numbers<[1], [0], [0], [1], [0, 0, 1, 1], [], []>} : vector<8x16xf32>, vector<16x120xf32>, vector<8x120xf32> -> vector<8x120xf32>
    %56 = arith.addf %52, %55 : vector<8x120xf32>
    %57 = vector.extract_strided_slice %14 {offsets = [80, 0], sizes = [8, 16], strides = [1, 1]} : vector<128x16xf32> to vector<8x16xf32>
    %c160 = arith.constant 160 : index
    %c0_29 = arith.constant 0 : index
    %58 = vector.load %arg3[%c160, %c0_29] : memref<256x120xf32, #tpu.memory_space<vmem>>, vector<16x120xf32>
    %cst_30 = arith.constant dense<0.000000e+00> : vector<8x120xf32>
    %59 = tpu.matmul %57, %58, %cst_30 {dimension_numbers = #tpu.dot_dimension_numbers<[1], [0], [0], [1], [0, 0, 1, 1], [], []>} : vector<8x16xf32>, vector<16x120xf32>, vector<8x120xf32> -> vector<8x120xf32>
    %60 = arith.addf %56, %59 : vector<8x120xf32>
    %61 = vector.extract_strided_slice %14 {offsets = [88, 0], sizes = [8, 16], strides = [1, 1]} : vector<128x16xf32> to vector<8x16xf32>
    %c176 = arith.constant 176 : index
    %c0_31 = arith.constant 0 : index
    %62 = vector.load %arg3[%c176, %c0_31] : memref<256x120xf32, #tpu.memory_space<vmem>>, vector<16x120xf32>
    %cst_32 = arith.constant dense<0.000000e+00> : vector<8x120xf32>
    %63 = tpu.matmul %61, %62, %cst_32 {dimension_numbers = #tpu.dot_dimension_numbers<[1], [0], [0], [1], [0, 0, 1, 1], [], []>} : vector<8x16xf32>, vector<16x120xf32>, vector<8x120xf32> -> vector<8x120xf32>
    %64 = arith.addf %60, %63 : vector<8x120xf32>
    %65 = vector.extract_strided_slice %14 {offsets = [96, 0], sizes = [8, 16], strides = [1, 1]} : vector<128x16xf32> to vector<8x16xf32>
    %c192 = arith.constant 192 : index
    %c0_33 = arith.constant 0 : index
    %66 = vector.load %arg3[%c192, %c0_33] : memref<256x120xf32, #tpu.memory_space<vmem>>, vector<16x120xf32>
    %cst_34 = arith.constant dense<0.000000e+00> : vector<8x120xf32>
    %67 = tpu.matmul %65, %66, %cst_34 {dimension_numbers = #tpu.dot_dimension_numbers<[1], [0], [0], [1], [0, 0, 1, 1], [], []>} : vector<8x16xf32>, vector<16x120xf32>, vector<8x120xf32> -> vector<8x120xf32>
    %68 = arith.addf %64, %67 : vector<8x120xf32>
    %69 = vector.extract_strided_slice %14 {offsets = [104, 0], sizes = [8, 16], strides = [1, 1]} : vector<128x16xf32> to vector<8x16xf32>
    %c208 = arith.constant 208 : index
    %c0_35 = arith.constant 0 : index
    %70 = vector.load %arg3[%c208, %c0_35] : memref<256x120xf32, #tpu.memory_space<vmem>>, vector<16x120xf32>
    %cst_36 = arith.constant dense<0.000000e+00> : vector<8x120xf32>
    %71 = tpu.matmul %69, %70, %cst_36 {dimension_numbers = #tpu.dot_dimension_numbers<[1], [0], [0], [1], [0, 0, 1, 1], [], []>} : vector<8x16xf32>, vector<16x120xf32>, vector<8x120xf32> -> vector<8x120xf32>
    %72 = arith.addf %68, %71 : vector<8x120xf32>
    %73 = vector.extract_strided_slice %14 {offsets = [112, 0], sizes = [8, 16], strides = [1, 1]} : vector<128x16xf32> to vector<8x16xf32>
    %c224 = arith.constant 224 : index
    %c0_37 = arith.constant 0 : index
    %74 = vector.load %arg3[%c224, %c0_37] : memref<256x120xf32, #tpu.memory_space<vmem>>, vector<16x120xf32>
    %cst_38 = arith.constant dense<0.000000e+00> : vector<8x120xf32>
    %75 = tpu.matmul %73, %74, %cst_38 {dimension_numbers = #tpu.dot_dimension_numbers<[1], [0], [0], [1], [0, 0, 1, 1], [], []>} : vector<8x16xf32>, vector<16x120xf32>, vector<8x120xf32> -> vector<8x120xf32>
    %76 = arith.addf %72, %75 : vector<8x120xf32>
    %77 = vector.extract_strided_slice %14 {offsets = [120, 0], sizes = [8, 16], strides = [1, 1]} : vector<128x16xf32> to vector<8x16xf32>
    %c240 = arith.constant 240 : index
    %c0_39 = arith.constant 0 : index
    %78 = vector.load %arg3[%c240, %c0_39] : memref<256x120xf32, #tpu.memory_space<vmem>>, vector<16x120xf32>
    %cst_40 = arith.constant dense<0.000000e+00> : vector<8x120xf32>
    %79 = tpu.matmul %77, %78, %cst_40 {dimension_numbers = #tpu.dot_dimension_numbers<[1], [0], [0], [1], [0, 0, 1, 1], [], []>} : vector<8x16xf32>, vector<16x120xf32>, vector<8x120xf32> -> vector<8x120xf32>
    %80 = arith.addf %76, %79 : vector<8x120xf32>
    %cst_41 = arith.constant 0.000000e+00 : f32
    %81 = vector.broadcast %cst_41 : f32 to vector<8x120xf32>
    %82 = arith.maximumf %80, %81 : vector<8x120xf32>
    %c0_42 = arith.constant 0 : index
    %c0_43 = arith.constant 0 : index
    %83 = vector.load %arg5[%c0_42, %c0_43] : memref<120x82xf32, #tpu.memory_space<vmem>>, vector<120x82xf32>
    %cst_44 = arith.constant dense<0.000000e+00> : vector<8x82xf32>
    %84 = tpu.matmul %82, %83, %cst_44 {dimension_numbers = #tpu.dot_dimension_numbers<[1], [0], [0], [1], [0, 0, 1, 1], [], []>} : vector<8x120xf32>, vector<120x82xf32>, vector<8x82xf32> -> vector<8x82xf32>
    %c0_45 = arith.constant 0 : index
    %c0_46 = arith.constant 0 : index
    %85 = vector.load %arg6[%c0_45, %c0_46] : memref<1x82xf32, #tpu.memory_space<vmem>>, vector<1x82xf32>
    %86 = vector.broadcast %85 : vector<1x82xf32> to vector<8x82xf32>
    %87 = arith.addf %84, %86 : vector<8x82xf32>
    %cst_47 = arith.constant 0.000000e+00 : f32
    %88 = vector.broadcast %cst_47 : f32 to vector<8x82xf32>
    %89 = arith.maximumf %87, %88 : vector<8x82xf32>
    %c0_48 = arith.constant 0 : index
    %c0_49 = arith.constant 0 : index
    %90 = vector.load %arg7[%c0_48, %c0_49] : memref<82x10xf32, #tpu.memory_space<vmem>>, vector<82x10xf32>
    %cst_50 = arith.constant dense<0.000000e+00> : vector<8x10xf32>
    %91 = tpu.matmul %89, %90, %cst_50 {dimension_numbers = #tpu.dot_dimension_numbers<[1], [0], [0], [1], [0, 0, 1, 1], [], []>} : vector<8x82xf32>, vector<82x10xf32>, vector<8x10xf32> -> vector<8x10xf32>
    %c0_51 = arith.constant 0 : index
    %c0_52 = arith.constant 0 : index
    %92 = vector.load %arg8[%c0_51, %c0_52] : memref<1x10xf32, #tpu.memory_space<vmem>>, vector<1x10xf32>
    %93 = vector.broadcast %92 : vector<1x10xf32> to vector<8x10xf32>
    %94 = arith.addf %91, %93 : vector<8x10xf32>
    %c0_53 = arith.constant 0 : index
    %c0_54 = arith.constant 0 : index
    %95 = vector.load %arg9[%c0_53, %c0_54] : memref<8x10xf32, #tpu.memory_space<vmem>>, vector<8x10xf32>
    tpu.vector_store %arg9[%c0_53, %c0_54], %94 {strides = array<i32>} : memref<8x10xf32, #tpu.memory_space<vmem>>, vector<8x10xf32>,
    return
  }
}

</mosaic_0001>

<bundles_post_ra>
// kernel: lenet5_forward.2
= control target key start
LH: loop header
LB: loop body
LE: loop exit
PB: predicated region body
PF: predicated region fallthrough
CT: control target
= control target key end

     0   :  { %vm2330_vm0 = vcmask 1040384   ;;  %vm601_vm1 = vcmask 203776   ;;  %vm8485_vm2 = vmmov 1   ;;  %vm6287_vm4 = vcmask 48128   ;;  %s14286_s1 = inlined_call_operand.vmem [shape: f32[25,6], index: 1, kind: input, shape index: {}]   ;;  %s14287_s0 = inlined_call_operand.vmem [shape: f32[4608,25], index: 0, kind: input, shape index: {}]   ;;  %s14288_s2 = inlined_call_operand.vmem [shape: f32[1,6], index: 2, kind: input, shape index: {}]   ;;  %s14289_s3 = inlined_call_operand.vmem [shape: f32[1152,6], index: 3, kind: output, shape index: {}]  }
   0x1   :  { %v590_v0 = vld [vmem:[%s14286_s1] sm:$0xff]  ;;  %v591_v1 = vld [vmem:[%s14286_s1 + $0x8] sm:$0xff]  ;;  %v592_v2 = vld [vmem:[%s14286_s1 + $0x10] sm:$0xff] }
   0x2   :  { %v8466_v3 = vpack.c.bf16 %v591_v1, %v590_v0  ;;  %v593_v4 = vld [vmem:[%s14286_s1 + $0x18] sm:$0x1]  ;;  %v14_v5 = vld [vmem:[%s14287_s0] sm:$0xff]  ;;  %vm8471_vm3 = vmpackc.low %vm2330_vm0, %vm8485_vm2 }
   0x3   :  { %v8470_v6 = vpack.c.bf16 %v593_v4, %v592_v2  ;;  %7602 = vmatprep.mubr.msk.f32.mxu0 %vm601_vm1, %v14_v5  ;;  %v302_v7 = vld [vmem:[%s14287_s0 + $0x900] sm:$0xff]  ;;  %v15_v8 = vld [vmem:[%s14287_s0 + $0x8] sm:$0xff]  ;;  %v16_v10 = vld [vmem:[%s14287_s0 + $0x10] sm:$0xff] }
   0x4   :  { %8467 = vmatprep.subr.bf16.mxu0 %v8466_v3  ;;  %8476 = vmatprep.subr.bf16.mxu1 %v8466_v3  ;;  %v303_v9 = vld [vmem:[%s14287_s0 + $0x908] sm:$0xff]  ;;  %v304_v11 = vld [vmem:[%s14287_s0 + $0x910] sm:$0xff]  ;;  %v17_v12 = vld [vmem:[%s14287_s0 + $0x18] sm:$0xff] }
   0x5   :  { %8469 = vmatpush3.bf16.msra.mxu0 %v8466_v3  ;;  %8478 = vmatpush3.bf16.msra.mxu1 %v8466_v3  ;;  %v305_v13 = vld [vmem:[%s14287_s0 + $0x918] sm:$0xff]  ;;  %v18_v14 = vld [vmem:[%s14287_s0 + $0x20] sm:$0xff]  ;;  %v19_v16 = vld [vmem:[%s14287_s0 + $0x28] sm:$0xff] }
   0x6   :  { %8472 = vmatprep.subr.msk.bf16.mxu0 %vm8471_vm3, %v8470_v6  ;;  %8477 = vmatprep.subr.msk.bf16.mxu1 %vm8471_vm3, %v8470_v6  ;;  %v306_v15 = vld [vmem:[%s14287_s0 + $0x920] sm:$0xff]  ;;  %v307_v17 = vld [vmem:[%s14287_s0 + $0x928] sm:$0xff]  ;;  %v20_v18 = vld [vmem:[%s14287_s0 + $0x30] sm:$0xff] }
   0x7   :  { %8034 = vmatprep.mubr.msk.f32.mxu1 %vm601_vm1, %v302_v7  ;;  %v308_v19 = vld [vmem:[%s14287_s0 + $0x930] sm:$0xff]  ;;  %v21_v20 = vld [vmem:[%s14287_s0 + $0x38] sm:$0xff]  ;;  %v22_v22 = vld [vmem:[%s14287_s0 + $0x40] sm:$0xff] }
   0x8   :  { %v309_v21 = vld [vmem:[%s14287_s0 + $0x938] sm:$0xff]  ;;  %v310_v23 = vld [vmem:[%s14287_s0 + $0x940] sm:$0xff]  ;;  %v23_v24 = vld [vmem:[%s14287_s0 + $0x48] sm:$0xff] }
   0x9   :  { %8475 = vmatpush3.bf16.msk.msra.mxu0 %vm8471_vm3, %v8470_v6  ;;  %8479 = vmatpush3.bf16.msk.msra.mxu1 %vm8471_vm3, %v8470_v6  ;;  %v311_v25 = vld [vmem:[%s14287_s0 + $0x948] sm:$0xff]  ;;  %v24_v26 = vld [vmem:[%s14287_s0 + $0x50] sm:$0xff]  ;;  %v25_v28 = vld [vmem:[%s14287_s0 + $0x58] sm:$0xff] }
   0xa   :  { %v312_v27 = vld [vmem:[%s14287_s0 + $0x950] sm:$0xff]  ;;  %v313_v29 = vld [vmem:[%s14287_s0 + $0x958] sm:$0xff]  ;;  %v26_v30 = vld [vmem:[%s14287_s0 + $0x60] sm:$0xff] }
   0xb   :  { %v314_v31 = vld [vmem:[%s14287_s0 + $0x960] sm:$0xff]  ;;  %v27_v32 = vld [vmem:[%s14287_s0 + $0x68] sm:$0xff]  ;;  %v28_v34 = vld [vmem:[%s14287_s0 + $0x70] sm:$0xff] }
   0xc   :  { %7603 = vmatmul.mubr.msk.f32.vlgmr.msra.gmra.mrb[0].mxu0 %vm601_vm1, %v15_v8  ;;  %8035 = vmatmul.mubr.msk.f32.vlgmr.msra.gmra.mrb[0].mxu1 %vm601_vm1, %v303_v9  ;;  %v315_v33 = vld [vmem:[%s14287_s0 + $0x968] sm:$0xff]  ;;  %v316_v35 = vld [vmem:[%s14287_s0 + $0x970] sm:$0xff]  ;;  %v29_v36 = vld [vmem:[%s14287_s0 + $0x78] sm:$0xff] }
   0xd   :  { %7605 = vmatprep.mubr.msk.f32.mxu0 %vm601_vm1, %v16_v10  ;;  %8037 = vmatprep.mubr.msk.f32.mxu1 %vm601_vm1, %v304_v11  ;;  %v317_v37 = vld [vmem:[%s14287_s0 + $0x978] sm:$0xff]  ;;  %v30_v38 = vld [vmem:[%s14287_s0 + $0x80] sm:$0xff]  ;;  %v31_v40 = vld [vmem:[%s14287_s0 + $0x88] sm:$0xff] }
   0xe   :  { %v318_v39 = vld [vmem:[%s14287_s0 + $0x980] sm:$0xff]  ;;  %v319_v41 = vld [vmem:[%s14287_s0 + $0x988] sm:$0xff]  ;;  %v32_v42 = vld [vmem:[%s14287_s0 + $0x90] sm:$0xff] }
   0xf   :  { %v320_v43 = vld [vmem:[%s14287_s0 + $0x990] sm:$0xff]  ;;  %v33_v44 = vld [vmem:[%s14287_s0 + $0x98] sm:$0xff]  ;;  %v34_v46 = vld [vmem:[%s14287_s0 + $0xa0] sm:$0xff] }
  0x10   :  { %7606 = vmatmul.mubr.msk.f32.gmra.mrb[2].mxu0 %vm601_vm1, %v17_v12  ;;  %8038 = vmatmul.mubr.msk.f32.gmra.mrb[2].mxu1 %vm601_vm1, %v305_v13  ;;  %v321_v45 = vld [vmem:[%s14287_s0 + $0x998] sm:$0xff]  ;;  %v322_v47 = vld [vmem:[%s14287_s0 + $0x9a0] sm:$0xff]  ;;  %v35_v48 = vld [vmem:[%s14287_s0 + $0xa8] sm:$0xff] }
  0x11   :  { %7608 = vmatprep.mubr.msk.f32.mxu0 %vm601_vm1, %v18_v14  ;;  %8040 = vmatprep.mubr.msk.f32.mxu1 %vm601_vm1, %v306_v15  ;;  %v323_v49 = vld [vmem:[%s14287_s0 + $0x9a8] sm:$0xff]  ;;  %v36_v50 = vld [vmem:[%s14287_s0 + $0xb0] sm:$0xff]  ;;  %v37_v52 = vld [vmem:[%s14287_s0 + $0xb8] sm:$0xff] }
  0x12   :  { %v324_v51 = vld [vmem:[%s14287_s0 + $0x9b0] sm:$0xff]  ;;  %v325_v53 = vld [vmem:[%s14287_s0 + $0x9b8] sm:$0xff]  ;;  %v38_v54 = vld [vmem:[%s14287_s0 + $0xc0] sm:$0xff] }
  0x13   :  { %v326_v55 = vld [vmem:[%s14287_s0 + $0x9c0] sm:$0xff]  ;;  %v39_v56 = vld [vmem:[%s14287_s0 + $0xc8] sm:$0xff]  ;;  %v40_v58 = vld [vmem:[%s14287_s0 + $0xd0] sm:$0xff] }
  0x14   :  { %7609 = vmatmul.mubr.msk.f32.gmra.mrb[4].mxu0 %vm601_vm1, %v19_v16  ;;  %8041 = vmatmul.mubr.msk.f32.gmra.mrb[4].mxu1 %vm601_vm1, %v307_v17  ;;  %v327_v57 = vld [vmem:[%s14287_s0 + $0x9c8] sm:$0xff]  ;;  %v328_v59 = vld [vmem:[%s14287_s0 + $0x9d0] sm:$0xff]  ;;  %v41_v60 = vld [vmem:[%s14287_s0 + $0xd8] sm:$0xff] }
  0x15   :  { %7611 = vmatprep.mubr.msk.f32.mxu0 %vm601_vm1, %v20_v18  ;;  %8043 = vmatprep.mubr.msk.f32.mxu1 %vm601_vm1, %v308_v19  ;;  %v329_v61 = vld [vmem:[%s14287_s0 + $0x9d8] sm:$0xff]  ;;  %v42_v62 = vld [vmem:[%s14287_s0 + $0xe0] sm:$0xff]  ;;  %v43_v0 = vld [vmem:[%s14287_s0 + $0xe8] sm:$0xff] }
  0x16   :  { %v330_v63 = vld [vmem:[%s14287_s0 + $0x9e0] sm:$0xff]  ;;  %v331_v1 = vld [vmem:[%s14287_s0 + $0x9e8] sm:$0xff]  ;;  %v44_v2 = vld [vmem:[%s14287_s0 + $0xf0] sm:$0xff] }
  0x17   :  { %v332_v3 = vld [vmem:[%s14287_s0 + $0x9f0] sm:$0xff]  ;;  %v45_v4 = vld [vmem:[%s14287_s0 + $0xf8] sm:$0xff]  ;;  %v46_v6 = vld [vmem:[%s14287_s0 + $0x100] sm:$0xff] }
  0x18   :  { %7612 = vmatmul.mubr.msk.f32.gmra.mrb[6].mxu0 %vm601_vm1, %v21_v20  ;;  %8044 = vmatmul.mubr.msk.f32.gmra.mrb[6].mxu1 %vm601_vm1, %v309_v21  ;;  %v333_v5 = vld [vmem:[%s14287_s0 + $0x9f8] sm:$0xff]  ;;  %v334_v7 = vld [vmem:[%s14287_s0 + $0xa00] sm:$0xff]  ;;  %v47_v8 = vld [vmem:[%s14287_s0 + $0x108] sm:$0xff] }
  0x19   :  { %7614 = vmatprep.mubr.msk.f32.mxu0 %vm601_vm1, %v22_v22  ;;  %8046 = vmatprep.mubr.msk.f32.mxu1 %vm601_vm1, %v310_v23  ;;  %v335_v9 = vld [vmem:[%s14287_s0 + $0xa08] sm:$0xff]  ;;  %v48_v10 = vld [vmem:[%s14287_s0 + $0x110] sm:$0xff]  ;;  %v49_v12 = vld [vmem:[%s14287_s0 + $0x118] sm:$0xff] }
  0x1a   :  { %v336_v11 = vld [vmem:[%s14287_s0 + $0xa10] sm:$0xff]  ;;  %v337_v13 = vld [vmem:[%s14287_s0 + $0xa18] sm:$0xff]  ;;  %v50_v14 = vld [vmem:[%s14287_s0 + $0x120] sm:$0xff] }
  0x1b   :  { %v338_v15 = vld [vmem:[%s14287_s0 + $0xa20] sm:$0xff]  ;;  %v51_v16 = vld [vmem:[%s14287_s0 + $0x128] sm:$0xff]  ;;  %v52_v18 = vld [vmem:[%s14287_s0 + $0x130] sm:$0xff] }
  0x1c   :  { %7615 = vmatmul.mubr.msk.f32.gmra.mrb[8].mxu0 %vm601_vm1, %v23_v24  ;;  %8047 = vmatmul.mubr.msk.f32.gmra.mrb[8].mxu1 %vm601_vm1, %v311_v25  ;;  %v339_v17 = vld [vmem:[%s14287_s0 + $0xa28] sm:$0xff]  ;;  %v340_v19 = vld [vmem:[%s14287_s0 + $0xa30] sm:$0xff]  ;;  %v53_v20 = vld [vmem:[%s14287_s0 + $0x138] sm:$0xff] }
  0x1d   :  { %7617 = vmatprep.mubr.msk.f32.mxu0 %vm601_vm1, %v24_v26  ;;  %8049 = vmatprep.mubr.msk.f32.mxu1 %vm601_vm1, %v312_v27  ;;  %v341_v21 = vld [vmem:[%s14287_s0 + $0xa38] sm:$0xff]  ;;  %v54_v22 = vld [vmem:[%s14287_s0 + $0x140] sm:$0xff]  ;;  %v55_v24 = vld [vmem:[%s14287_s0 + $0x148] sm:$0xff] }
  0x1e   :  { %v342_v23 = vld [vmem:[%s14287_s0 + $0xa40] sm:$0xff]  ;;  %v343_v25 = vld [vmem:[%s14287_s0 + $0xa48] sm:$0xff]  ;;  %v56_v26 = vld [vmem:[%s14287_s0 + $0x150] sm:$0xff] }
  0x1f   :  { %v344_v27 = vld [vmem:[%s14287_s0 + $0xa50] sm:$0xff] }
  0x20   :  { %7618 = vmatmul.mubr.msk.f32.gmra.mrb[10].mxu0 %vm601_vm1, %v25_v28  ;;  %8050 = vmatmul.mubr.msk.f32.gmra.mrb[10].mxu1 %vm601_vm1, %v313_v29  ;;  %v57_v28 = vld [vmem:[%s14287_s0 + $0x158] sm:$0xff] }
  0x21   :  { %7620 = vmatprep.mubr.msk.f32.mxu0 %vm601_vm1, %v26_v30  ;;  %8052 = vmatprep.mubr.msk.f32.mxu1 %vm601_vm1, %v314_v31  ;;  %v345_v29 = vld [vmem:[%s14287_s0 + $0xa58] sm:$0xff]  ;;  %v58_v30 = vld [vmem:[%s14287_s0 + $0x160] sm:$0xff] }
  0x22   :  { %v346_v31 = vld [vmem:[%s14287_s0 + $0xa60] sm:$0xff] }
  0x24   :  { %7621 = vmatmul.mubr.msk.f32.gmra.mrb[12].mxu0 %vm601_vm1, %v27_v32  ;;  %8053 = vmatmul.mubr.msk.f32.gmra.mrb[12].mxu1 %vm601_vm1, %v315_v33  ;;  %v59_v32 = vld [vmem:[%s14287_s0 + $0x168] sm:$0xff] }
  0x25   :  { %7623 = vmatprep.mubr.msk.f32.mxu0 %vm601_vm1, %v28_v34  ;;  %8055 = vmatprep.mubr.msk.f32.mxu1 %vm601_vm1, %v316_v35  ;;  %v347_v33 = vld [vmem:[%s14287_s0 + $0xa68] sm:$0xff]  ;;  %v60_v34 = vld [vmem:[%s14287_s0 + $0x170] sm:$0xff] }
  0x26   :  { %v348_v35 = vld [vmem:[%s14287_s0 + $0xa70] sm:$0xff] }
  0x28   :  { %7624 = vmatmul.mubr.msk.f32.gmra.mrb[14].mxu0 %vm601_vm1, %v29_v36  ;;  %8056 = vmatmul.mubr.msk.f32.gmra.mrb[14].mxu1 %vm601_vm1, %v317_v37  ;;  %v61_v36 = vld [vmem:[%s14287_s0 + $0x178] sm:$0xff] }
  0x29   :  { %7626 = vmatprep.mubr.msk.f32.mxu0 %vm601_vm1, %v30_v38  ;;  %8058 = vmatprep.mubr.msk.f32.mxu1 %vm601_vm1, %v318_v39  ;;  %v349_v37 = vld [vmem:[%s14287_s0 + $0xa78] sm:$0xff]  ;;  %v62_v38 = vld [vmem:[%s14287_s0 + $0x180] sm:$0xff] }
  0x2a   :  { %v350_v39 = vld [vmem:[%s14287_s0 + $0xa80] sm:$0xff] }
  0x2c   :  { %7627 = vmatmul.mubr.msk.f32.gmra.mrb[16].mxu0 %vm601_vm1, %v31_v40  ;;  %8059 = vmatmul.mubr.msk.f32.gmra.mrb[16].mxu1 %vm601_vm1, %v319_v41  ;;  %v63_v40 = vld [vmem:[%s14287_s0 + $0x188] sm:$0xff] }
  0x2d   :  { %7629 = vmatprep.mubr.msk.f32.mxu0 %vm601_vm1, %v32_v42  ;;  %8061 = vmatprep.mubr.msk.f32.mxu1 %vm601_vm1, %v320_v43  ;;  %v351_v41 = vld [vmem:[%s14287_s0 + $0xa88] sm:$0xff]  ;;  %v64_v42 = vld [vmem:[%s14287_s0 + $0x190] sm:$0xff] }
  0x2e   :  { %v352_v43 = vld [vmem:[%s14287_s0 + $0xa90] sm:$0xff] }
  0x30   :  { %7630 = vmatmul.mubr.msk.f32.gmra.mrb[18].mxu0 %vm601_vm1, %v33_v44  ;;  %8062 = vmatmul.mubr.msk.f32.gmra.mrb[18].mxu1 %vm601_vm1, %v321_v45  ;;  %v65_v44 = vld [vmem:[%s14287_s0 + $0x198] sm:$0xff] }
  0x31   :  { %7632 = vmatprep.mubr.msk.f32.mxu0 %vm601_vm1, %v34_v46  ;;  %8064 = vmatprep.mubr.msk.f32.mxu1 %vm601_vm1, %v322_v47  ;;  %v353_v45 = vld [vmem:[%s14287_s0 + $0xa98] sm:$0xff]  ;;  %v66_v46 = vld [vmem:[%s14287_s0 + $0x1a0] sm:$0xff] }
  0x32   :  { %v354_v47 = vld [vmem:[%s14287_s0 + $0xaa0] sm:$0xff] }
  0x34   :  { %7633 = vmatmul.mubr.msk.f32.gmra.mrb[20].mxu0 %vm601_vm1, %v35_v48  ;;  %8065 = vmatmul.mubr.msk.f32.gmra.mrb[20].mxu1 %vm601_vm1, %v323_v49  ;;  %v67_v48 = vld [vmem:[%s14287_s0 + $0x1a8] sm:$0xff] }
  0x35   :  { %7635 = vmatprep.mubr.msk.f32.mxu0 %vm601_vm1, %v36_v50  ;;  %8067 = vmatprep.mubr.msk.f32.mxu1 %vm601_vm1, %v324_v51  ;;  %v355_v49 = vld [vmem:[%s14287_s0 + $0xaa8] sm:$0xff]  ;;  %v68_v50 = vld [vmem:[%s14287_s0 + $0x1b0] sm:$0xff] }
  0x36   :  { %v356_v51 = vld [vmem:[%s14287_s0 + $0xab0] sm:$0xff] }
  0x38   :  { %7636 = vmatmul.mubr.msk.f32.gmra.mrb[22].mxu0 %vm601_vm1, %v37_v52  ;;  %8068 = vmatmul.mubr.msk.f32.gmra.mrb[22].mxu1 %vm601_vm1, %v325_v53  ;;  %v69_v52 = vld [vmem:[%s14287_s0 + $0x1b8] sm:$0xff] }
  0x39   :  { %7638 = vmatprep.mubr.msk.f32.mxu0 %vm601_vm1, %v38_v54  ;;  %8070 = vmatprep.mubr.msk.f32.mxu1 %vm601_vm1, %v326_v55  ;;  %v357_v53 = vld [vmem:[%s14287_s0 + $0xab8] sm:$0xff]  ;;  %v70_v54 = vld [vmem:[%s14287_s0 + $0x1c0] sm:$0xff] }
  0x3a   :  { %v358_v55 = vld [vmem:[%s14287_s0 + $0xac0] sm:$0xff] }
  0x3c   :  { %7639 = vmatmul.mubr.msk.f32.gmra.mrb[24].mxu0 %vm601_vm1, %v39_v56  ;;  %8071 = vmatmul.mubr.msk.f32.gmra.mrb[24].mxu1 %vm601_vm1, %v327_v57  ;;  %v71_v56 = vld [vmem:[%s14287_s0 + $0x1c8] sm:$0xff] }
  0x3d   :  { %7641 = vmatprep.mubr.msk.f32.mxu0 %vm601_vm1, %v40_v58  ;;  %8073 = vmatprep.mubr.msk.f32.mxu1 %vm601_vm1, %v328_v59  ;;  %v359_v57 = vld [vmem:[%s14287_s0 + $0xac8] sm:$0xff]  ;;  %v72_v58 = vld [vmem:[%s14287_s0 + $0x1d0] sm:$0xff] }
  0x3e   :  { %v360_v59 = vld [vmem:[%s14287_s0 + $0xad0] sm:$0xff] }
  0x40   :  { %7642 = vmatmul.mubr.msk.f32.gmra.mrb[26].mxu0 %vm601_vm1, %v41_v60  ;;  %8074 = vmatmul.mubr.msk.f32.gmra.mrb[26].mxu1 %vm601_vm1, %v329_v61  ;;  %v73_v60 = vld [vmem:[%s14287_s0 + $0x1d8] sm:$0xff] }
  0x41   :  { %7644 = vmatprep.mubr.msk.f32.mxu0 %vm601_vm1, %v42_v62  ;;  %8076 = vmatprep.mubr.msk.f32.mxu1 %vm601_vm1, %v330_v63  ;;  %v361_v61 = vld [vmem:[%s14287_s0 + $0xad8] sm:$0xff]  ;;  %v74_v62 = vld [vmem:[%s14287_s0 + $0x1e0] sm:$0xff] }
  0x42   :  { %v362_v63 = vld [vmem:[%s14287_s0 + $0xae0] sm:$0xff] }
  0x44   :  { %7645 = vmatmul.mubr.msk.f32.gmra.mrb[28].mxu0 %vm601_vm1, %v43_v0  ;;  %8077 = vmatmul.mubr.msk.f32.gmra.mrb[28].mxu1 %vm601_vm1, %v331_v1  ;;  %v75_v0 = vld [vmem:[%s14287_s0 + $0x1e8] sm:$0xff] }
  0x45   :  { %7647 = vmatprep.mubr.msk.f32.mxu0 %vm601_vm1, %v44_v2  ;;  %8079 = vmatprep.mubr.msk.f32.mxu1 %vm601_vm1, %v332_v3  ;;  %v363_v1 = vld [vmem:[%s14287_s0 + $0xae8] sm:$0xff]  ;;  %v76_v2 = vld [vmem:[%s14287_s0 + $0x1f0] sm:$0xff] }
  0x46   :  { %v364_v3 = vld [vmem:[%s14287_s0 + $0xaf0] sm:$0xff] }
  0x48   :  { %7648 = vmatmul.mubr.msk.f32.gmra.mrb[30].mxu0 %vm601_vm1, %v45_v4  ;;  %8080 = vmatmul.mubr.msk.f32.gmra.mrb[30].mxu1 %vm601_vm1, %v333_v5  ;;  %v77_v4 = vld [vmem:[%s14287_s0 + $0x1f8] sm:$0xff] }
  0x49   :  { %7650 = vmatprep.mubr.msk.f32.mxu0 %vm601_vm1, %v46_v6  ;;  %8082 = vmatprep.mubr.msk.f32.mxu1 %vm601_vm1, %v334_v7  ;;  %v365_v5 = vld [vmem:[%s14287_s0 + $0xaf8] sm:$0xff]  ;;  %v78_v6 = vld [vmem:[%s14287_s0 + $0x200] sm:$0xff] }
  0x4a   :  { %v366_v7 = vld [vmem:[%s14287_s0 + $0xb00] sm:$0xff] }
  0x4c   :  { %7651 = vmatmul.mubr.msk.f32.gmra.mrb[32].mxu0 %vm601_vm1, %v47_v8  ;;  %8083 = vmatmul.mubr.msk.f32.gmra.mrb[32].mxu1 %vm601_vm1, %v335_v9  ;;  %v79_v8 = vld [vmem:[%s14287_s0 + $0x208] sm:$0xff] }
  0x4d   :  { %7653 = vmatprep.mubr.msk.f32.mxu0 %vm601_vm1, %v48_v10  ;;  %8085 = vmatprep.mubr.msk.f32.mxu1 %vm601_vm1, %v336_v11  ;;  %v367_v9 = vld [vmem:[%s14287_s0 + $0xb08] sm:$0xff]  ;;  %v80_v10 = vld [vmem:[%s14287_s0 + $0x210] sm:$0xff] }
  0x4e   :  { %v368_v11 = vld [vmem:[%s14287_s0 + $0xb10] sm:$0xff] }
  0x50   :  { %7654 = vmatmul.mubr.msk.f32.gmra.mrb[34].mxu0 %vm601_vm1, %v49_v12  ;;  %8086 = vmatmul.mubr.msk.f32.gmra.mrb[34].mxu1 %vm601_vm1, %v337_v13  ;;  %v81_v12 = vld [vmem:[%s14287_s0 + $0x218] sm:$0xff] }
  0x51   :  { %7656 = vmatprep.mubr.msk.f32.mxu0 %vm601_vm1, %v50_v14  ;;  %8088 = vmatprep.mubr.msk.f32.mxu1 %vm601_vm1, %v338_v15  ;;  %v369_v13 = vld [vmem:[%s14287_s0 + $0xb18] sm:$0xff]  ;;  %v82_v14 = vld [vmem:[%s14287_s0 + $0x220] sm:$0xff] }
  0x52   :  { %v370_v15 = vld [vmem:[%s14287_s0 + $0xb20] sm:$0xff] }
  0x54   :  { %7657 = vmatmul.mubr.msk.f32.gmra.mrb[36].mxu0 %vm601_vm1, %v51_v16  ;;  %8089 = vmatmul.mubr.msk.f32.gmra.mrb[36].mxu1 %vm601_vm1, %v339_v17  ;;  %v83_v16 = vld [vmem:[%s14287_s0 + $0x228] sm:$0xff] }
  0x55   :  { %7659 = vmatprep.mubr.msk.f32.mxu0 %vm601_vm1, %v52_v18  ;;  %8091 = vmatprep.mubr.msk.f32.mxu1 %vm601_vm1, %v340_v19  ;;  %v371_v17 = vld [vmem:[%s14287_s0 + $0xb28] sm:$0xff]  ;;  %v84_v18 = vld [vmem:[%s14287_s0 + $0x230] sm:$0xff] }
  0x56   :  { %v372_v19 = vld [vmem:[%s14287_s0 + $0xb30] sm:$0xff] }
  0x58   :  { %7660 = vmatmul.mubr.msk.f32.gmra.mrb[38].mxu0 %vm601_vm1, %v53_v20  ;;  %8092 = vmatmul.mubr.msk.f32.gmra.mrb[38].mxu1 %vm601_vm1, %v341_v21  ;;  %v85_v20 = vld [vmem:[%s14287_s0 + $0x238] sm:$0xff] }
  0x59   :  { %7662 = vmatprep.mubr.msk.f32.mxu0 %vm601_vm1, %v54_v22  ;;  %8094 = vmatprep.mubr.msk.f32.mxu1 %vm601_vm1, %v342_v23  ;;  %v373_v21 = vld [vmem:[%s14287_s0 + $0xb38] sm:$0xff]  ;;  %v86_v22 = vld [vmem:[%s14287_s0 + $0x240] sm:$0xff] }
  0x5a   :  { %v374_v23 = vld [vmem:[%s14287_s0 + $0xb40] sm:$0xff] }
  0x5c   :  { %7663 = vmatmul.mubr.msk.f32.gmra.mrb[40].mxu0 %vm601_vm1, %v55_v24  ;;  %8095 = vmatmul.mubr.msk.f32.gmra.mrb[40].mxu1 %vm601_vm1, %v343_v25  ;;  %v87_v24 = vld [vmem:[%s14287_s0 + $0x248] sm:$0xff] }
  0x5d   :  { %7665 = vmatprep.mubr.msk.f32.mxu0 %vm601_vm1, %v56_v26  ;;  %8097 = vmatprep.mubr.msk.f32.mxu1 %vm601_vm1, %v344_v27  ;;  %v375_v25 = vld [vmem:[%s14287_s0 + $0xb48] sm:$0xff]  ;;  %v88_v26 = vld [vmem:[%s14287_s0 + $0x250] sm:$0xff] }
  0x5e   :  { %v376_v27 = vld [vmem:[%s14287_s0 + $0xb50] sm:$0xff] }
  0x60   :  { %7666 = vmatmul.mubr.msk.f32.gmra.mrb[42].mxu0 %vm601_vm1, %v57_v28  ;;  %8098 = vmatmul.mubr.msk.f32.gmra.mrb[42].mxu1 %vm601_vm1, %v345_v29  ;;  %v89_v28 = vld [vmem:[%s14287_s0 + $0x258] sm:$0xff] }
  0x61   :  { %7668 = vmatprep.mubr.msk.f32.mxu0 %vm601_vm1, %v58_v30  ;;  %8100 = vmatprep.mubr.msk.f32.mxu1 %vm601_vm1, %v346_v31  ;;  %v377_v29 = vld [vmem:[%s14287_s0 + $0xb58] sm:$0xff]  ;;  %v90_v30 = vld [vmem:[%s14287_s0 + $0x260] sm:$0xff] }
  0x62   :  { %v378_v31 = vld [vmem:[%s14287_s0 + $0xb60] sm:$0xff] }
  0x64   :  { %7669 = vmatmul.mubr.msk.f32.gmra.mrb[44].mxu0 %vm601_vm1, %v59_v32  ;;  %8101 = vmatmul.mubr.msk.f32.gmra.mrb[44].mxu1 %vm601_vm1, %v347_v33  ;;  %v91_v32 = vld [vmem:[%s14287_s0 + $0x268] sm:$0xff] }
  0x65   :  { %7671 = vmatprep.mubr.msk.f32.mxu0 %vm601_vm1, %v60_v34  ;;  %8103 = vmatprep.mubr.msk.f32.mxu1 %vm601_vm1, %v348_v35  ;;  %v379_v33 = vld [vmem:[%s14287_s0 + $0xb68] sm:$0xff]  ;;  %v92_v34 = vld [vmem:[%s14287_s0 + $0x270] sm:$0xff] }
  0x66   :  { %v380_v35 = vld [vmem:[%s14287_s0 + $0xb70] sm:$0xff] }
  0x68   :  { %7672 = vmatmul.mubr.msk.f32.gmra.mrb[46].mxu0 %vm601_vm1, %v61_v36  ;;  %8104 = vmatmul.mubr.msk.f32.gmra.mrb[46].mxu1 %vm601_vm1, %v349_v37  ;;  %v93_v36 = vld [vmem:[%s14287_s0 + $0x278] sm:$0xff] }
  0x69   :  { %7674 = vmatprep.mubr.msk.f32.mxu0 %vm601_vm1, %v62_v38  ;;  %8106 = vmatprep.mubr.msk.f32.mxu1 %vm601_vm1, %v350_v39  ;;  %v381_v37 = vld [vmem:[%s14287_s0 + $0xb78] sm:$0xff]  ;;  %v94_v38 = vld [vmem:[%s14287_s0 + $0x280] sm:$0xff] }
  0x6a   :  { %v382_v39 = vld [vmem:[%s14287_s0 + $0xb80] sm:$0xff] }
  0x6c   :  { %7675 = vmatmul.mubr.msk.f32.gmra.mrb[48].mxu0 %vm601_vm1, %v63_v40  ;;  %8107 = vmatmul.mubr.msk.f32.gmra.mrb[48].mxu1 %vm601_vm1, %v351_v41  ;;  %v95_v40 = vld [vmem:[%s14287_s0 + $0x288] sm:$0xff] }
  0x6d   :  { %7677 = vmatprep.mubr.msk.f32.mxu0 %vm601_vm1, %v64_v42  ;;  %8109 = vmatprep.mubr.msk.f32.mxu1 %vm601_vm1, %v352_v43  ;;  %v383_v41 = vld [vmem:[%s14287_s0 + $0xb88] sm:$0xff]  ;;  %v96_v42 = vld [vmem:[%s14287_s0 + $0x290] sm:$0xff] }
  0x6e   :  { %v384_v43 = vld [vmem:[%s14287_s0 + $0xb90] sm:$0xff] }
  0x70   :  { %7678 = vmatmul.mubr.msk.f32.gmra.mrb[50].mxu0 %vm601_vm1, %v65_v44  ;;  %8110 = vmatmul.mubr.msk.f32.gmra.mrb[50].mxu1 %vm601_vm1, %v353_v45  ;;  %v97_v44 = vld [vmem:[%s14287_s0 + $0x298] sm:$0xff] }
  0x71   :  { %7680 = vmatprep.mubr.msk.f32.mxu0 %vm601_vm1, %v66_v46  ;;  %8112 = vmatprep.mubr.msk.f32.mxu1 %vm601_vm1, %v354_v47  ;;  %v385_v45 = vld [vmem:[%s14287_s0 + $0xb98] sm:$0xff]  ;;  %v98_v46 = vld [vmem:[%s14287_s0 + $0x2a0] sm:$0xff] }
  0x72   :  { %v386_v47 = vld [vmem:[%s14287_s0 + $0xba0] sm:$0xff] }
  0x74   :  { %7681 = vmatmul.mubr.msk.f32.gmra.mrb[52].mxu0 %vm601_vm1, %v67_v48  ;;  %8113 = vmatmul.mubr.msk.f32.gmra.mrb[52].mxu1 %vm601_vm1, %v355_v49  ;;  %v99_v48 = vld [vmem:[%s14287_s0 + $0x2a8] sm:$0xff] }
  0x75   :  { %7683 = vmatprep.mubr.msk.f32.mxu0 %vm601_vm1, %v68_v50  ;;  %8115 = vmatprep.mubr.msk.f32.mxu1 %vm601_vm1, %v356_v51  ;;  %v387_v49 = vld [vmem:[%s14287_s0 + $0xba8] sm:$0xff]  ;;  %v100_v50 = vld [vmem:[%s14287_s0 + $0x2b0] sm:$0xff] }
  0x76   :  { %v388_v51 = vld [vmem:[%s14287_s0 + $0xbb0] sm:$0xff] }
  0x78   :  { %7684 = vmatmul.mubr.msk.f32.gmra.mrb[54].mxu0 %vm601_vm1, %v69_v52  ;;  %8116 = vmatmul.mubr.msk.f32.gmra.mrb[54].mxu1 %vm601_vm1, %v357_v53  ;;  %v101_v52 = vld [vmem:[%s14287_s0 + $0x2b8] sm:$0xff] }
  0x79   :  { %7686 = vmatprep.mubr.msk.f32.mxu0 %vm601_vm1, %v70_v54  ;;  %8118 = vmatprep.mubr.msk.f32.mxu1 %vm601_vm1, %v358_v55  ;;  %v389_v53 = vld [vmem:[%s14287_s0 + $0xbb8] sm:$0xff]  ;;  %v102_v54 = vld [vmem:[%s14287_s0 + $0x2c0] sm:$0xff] }
  0x7a   :  { %v390_v55 = vld [vmem:[%s14287_s0 + $0xbc0] sm:$0xff] }
  0x7c   :  { %7687 = vmatmul.mubr.msk.f32.gmra.mrb[56].mxu0 %vm601_vm1, %v71_v56  ;;  %8119 = vmatmul.mubr.msk.f32.gmra.mrb[56].mxu1 %vm601_vm1, %v359_v57  ;;  %v103_v56 = vld [vmem:[%s14287_s0 + $0x2c8] sm:$0xff] }
  0x7d   :  { %7689 = vmatprep.mubr.msk.f32.mxu0 %vm601_vm1, %v72_v58  ;;  %8121 = vmatprep.mubr.msk.f32.mxu1 %vm601_vm1, %v360_v59  ;;  %v391_v57 = vld [vmem:[%s14287_s0 + $0xbc8] sm:$0xff]  ;;  %v104_v58 = vld [vmem:[%s14287_s0 + $0x2d0] sm:$0xff] }
  0x7e   :  { %v392_v59 = vld [vmem:[%s14287_s0 + $0xbd0] sm:$0xff] }
  0x80   :  { %7690 = vmatmul.mubr.msk.f32.gmra.mrb[58].mxu0 %vm601_vm1, %v73_v60  ;;  %8122 = vmatmul.mubr.msk.f32.gmra.mrb[58].mxu1 %vm601_vm1, %v361_v61  ;;  %v105_v60 = vld [vmem:[%s14287_s0 + $0x2d8] sm:$0xff] }
  0x81   :  { %7692 = vmatprep.mubr.msk.f32.mxu0 %vm601_vm1, %v74_v62  ;;  %8124 = vmatprep.mubr.msk.f32.mxu1 %vm601_vm1, %v362_v63  ;;  %v393_v61 = vld [vmem:[%s14287_s0 + $0xbd8] sm:$0xff]  ;;  %v106_v62 = vld [vmem:[%s14287_s0 + $0x2e0] sm:$0xff] }
  0x82   :  { %v394_v63 = vld [vmem:[%s14287_s0 + $0xbe0] sm:$0xff] }
  0x84   :  { %7693 = vmatmul.mubr.msk.f32.gmra.mrb[60].mxu0 %vm601_vm1, %v75_v0  ;;  %8125 = vmatmul.mubr.msk.f32.gmra.mrb[60].mxu1 %vm601_vm1, %v363_v1  ;;  %v107_v0 = vld [vmem:[%s14287_s0 + $0x2e8] sm:$0xff] }
  0x85   :  { %7695 = vmatprep.mubr.msk.f32.mxu0 %vm601_vm1, %v76_v2  ;;  %8127 = vmatprep.mubr.msk.f32.mxu1 %vm601_vm1, %v364_v3  ;;  %v395_v1 = vld [vmem:[%s14287_s0 + $0xbe8] sm:$0xff]  ;;  %v108_v2 = vld [vmem:[%s14287_s0 + $0x2f0] sm:$0xff] }
  0x86   :  { %v396_v3 = vld [vmem:[%s14287_s0 + $0xbf0] sm:$0xff] }
  0x88   :  { %7696 = vmatmul.mubr.msk.f32.gmra.mrb[62].mxu0 %vm601_vm1, %v77_v4  ;;  %8128 = vmatmul.mubr.msk.f32.gmra.mrb[62].mxu1 %vm601_vm1, %v365_v5  ;;  %v109_v4 = vld [vmem:[%s14287_s0 + $0x2f8] sm:$0xff] }
  0x89   :  { %7698 = vmatprep.mubr.msk.f32.mxu0 %vm601_vm1, %v78_v6  ;;  %8130 = vmatprep.mubr.msk.f32.mxu1 %vm601_vm1, %v366_v7  ;;  %v397_v5 = vld [vmem:[%s14287_s0 + $0xbf8] sm:$0xff]  ;;  %v110_v6 = vld [vmem:[%s14287_s0 + $0x300] sm:$0xff] }
  0x8a   :  { %v398_v7 = vld [vmem:[%s14287_s0 + $0xc00] sm:$0xff] }
  0x8c   :  { %7699 = vmatmul.mubr.msk.f32.gmra.mrb[64].mxu0 %vm601_vm1, %v79_v8  ;;  %8131 = vmatmul.mubr.msk.f32.gmra.mrb[64].mxu1 %vm601_vm1, %v367_v9  ;;  %v111_v8 = vld [vmem:[%s14287_s0 + $0x308] sm:$0xff] }
  0x8d   :  { %7701 = vmatprep.mubr.msk.f32.mxu0 %vm601_vm1, %v80_v10  ;;  %8133 = vmatprep.mubr.msk.f32.mxu1 %vm601_vm1, %v368_v11  ;;  %v399_v9 = vld [vmem:[%s14287_s0 + $0xc08] sm:$0xff]  ;;  %v112_v10 = vld [vmem:[%s14287_s0 + $0x310] sm:$0xff] }
  0x8e   :  { %v400_v11 = vld [vmem:[%s14287_s0 + $0xc10] sm:$0xff] }
  0x90   :  { %7702 = vmatmul.mubr.msk.f32.gmra.mrb[66].mxu0 %vm601_vm1, %v81_v12  ;;  %8134 = vmatmul.mubr.msk.f32.gmra.mrb[66].mxu1 %vm601_vm1, %v369_v13  ;;  %v113_v12 = vld [vmem:[%s14287_s0 + $0x318] sm:$0xff] }
  0x91   :  { %7704 = vmatprep.mubr.msk.f32.mxu0 %vm601_vm1, %v82_v14  ;;  %8136 = vmatprep.mubr.msk.f32.mxu1 %vm601_vm1, %v370_v15  ;;  %v401_v13 = vld [vmem:[%s14287_s0 + $0xc18] sm:$0xff]  ;;  %v114_v14 = vld [vmem:[%s14287_s0 + $0x320] sm:$0xff] }
  0x92   :  { %v402_v15 = vld [vmem:[%s14287_s0 + $0xc20] sm:$0xff] }
  0x94   :  { %7705 = vmatmul.mubr.msk.f32.gmra.mrb[68].mxu0 %vm601_vm1, %v83_v16  ;;  %8137 = vmatmul.mubr.msk.f32.gmra.mrb[68].mxu1 %vm601_vm1, %v371_v17  ;;  %v115_v16 = vld [vmem:[%s14287_s0 + $0x328] sm:$0xff] }
  0x95   :  { %7707 = vmatprep.mubr.msk.f32.mxu0 %vm601_vm1, %v84_v18  ;;  %8139 = vmatprep.mubr.msk.f32.mxu1 %vm601_vm1, %v372_v19  ;;  %v403_v17 = vld [vmem:[%s14287_s0 + $0xc28] sm:$0xff]  ;;  %v116_v18 = vld [vmem:[%s14287_s0 + $0x330] sm:$0xff] }
  0x96   :  { %v404_v19 = vld [vmem:[%s14287_s0 + $0xc30] sm:$0xff] }
  0x98   :  { %7708 = vmatmul.mubr.msk.f32.gmra.mrb[70].mxu0 %vm601_vm1, %v85_v20  ;;  %8140 = vmatmul.mubr.msk.f32.gmra.mrb[70].mxu1 %vm601_vm1, %v373_v21  ;;  %v117_v20 = vld [vmem:[%s14287_s0 + $0x338] sm:$0xff] }
  0x99   :  { %7710 = vmatprep.mubr.msk.f32.mxu0 %vm601_vm1, %v86_v22  ;;  %8142 = vmatprep.mubr.msk.f32.mxu1 %vm601_vm1, %v374_v23  ;;  %v405_v21 = vld [vmem:[%s14287_s0 + $0xc38] sm:$0xff]  ;;  %v118_v22 = vld [vmem:[%s14287_s0 + $0x340] sm:$0xff] }
  0x9a   :  { %v406_v23 = vld [vmem:[%s14287_s0 + $0xc40] sm:$0xff] }
  0x9c   :  { %7711 = vmatmul.mubr.msk.f32.gmra.mrb[72].mxu0 %vm601_vm1, %v87_v24  ;;  %8143 = vmatmul.mubr.msk.f32.gmra.mrb[72].mxu1 %vm601_vm1, %v375_v25  ;;  %v119_v24 = vld [vmem:[%s14287_s0 + $0x348] sm:$0xff] }
  0x9d   :  { %7713 = vmatprep.mubr.msk.f32.mxu0 %vm601_vm1, %v88_v26  ;;  %8145 = vmatprep.mubr.msk.f32.mxu1 %vm601_vm1, %v376_v27  ;;  %v407_v25 = vld [vmem:[%s14287_s0 + $0xc48] sm:$0xff]  ;;  %v120_v26 = vld [vmem:[%s14287_s0 + $0x350] sm:$0xff] }
  0x9e   :  { %v408_v27 = vld [vmem:[%s14287_s0 + $0xc50] sm:$0xff] }
  0xa0   :  { %7714 = vmatmul.mubr.msk.f32.gmra.mrb[74].mxu0 %vm601_vm1, %v89_v28  ;;  %8146 = vmatmul.mubr.msk.f32.gmra.mrb[74].mxu1 %vm601_vm1, %v377_v29  ;;  %v121_v28 = vld [vmem:[%s14287_s0 + $0x358] sm:$0xff] }
  0xa1   :  { %7716 = vmatprep.mubr.msk.f32.mxu0 %vm601_vm1, %v90_v30  ;;  %8148 = vmatprep.mubr.msk.f32.mxu1 %vm601_vm1, %v378_v31  ;;  %v409_v29 = vld [vmem:[%s14287_s0 + $0xc58] sm:$0xff]  ;;  %v122_v30 = vld [vmem:[%s14287_s0 + $0x360] sm:$0xff] }
  0xa2   :  { %v410_v31 = vld [vmem:[%s14287_s0 + $0xc60] sm:$0xff] }
  0xa4   :  { %7717 = vmatmul.mubr.msk.f32.gmra.mrb[76].mxu0 %vm601_vm1, %v91_v32  ;;  %8149 = vmatmul.mubr.msk.f32.gmra.mrb[76].mxu1 %vm601_vm1, %v379_v33 }
  0xa5   :  { %7719 = vmatprep.mubr.msk.f32.mxu0 %vm601_vm1, %v92_v34  ;;  %8151 = vmatprep.mubr.msk.f32.mxu1 %vm601_vm1, %v380_v35 }
  0xa8   :  { %7720 = vmatmul.mubr.msk.f32.gmra.mrb[78].mxu0 %vm601_vm1, %v93_v36  ;;  %8152 = vmatmul.mubr.msk.f32.gmra.mrb[78].mxu1 %vm601_vm1, %v381_v37  ;;  %v123_v36 = vld [vmem:[%s14287_s0 + $0x368] sm:$0xff] }
  0xa9   :  { %7722 = vmatprep.mubr.msk.f32.mxu0 %vm601_vm1, %v94_v38  ;;  %8154 = vmatprep.mubr.msk.f32.mxu1 %vm601_vm1, %v382_v39  ;;  %v411_v37 = vld [vmem:[%s14287_s0 + $0xc68] sm:$0xff]  ;;  %v124_v38 = vld [vmem:[%s14287_s0 + $0x370] sm:$0xff] }
  0xaa   :  { %v412_v39 = vld [vmem:[%s14287_s0 + $0xc70] sm:$0xff] }
  0xac   :  { %7723 = vmatmul.mubr.msk.f32.gmra.mrb[80].mxu0 %vm601_vm1, %v95_v40  ;;  %8155 = vmatmul.mubr.msk.f32.gmra.mrb[80].mxu1 %vm601_vm1, %v383_v41 }
  0xad   :  { %7725 = vmatprep.mubr.msk.f32.mxu0 %vm601_vm1, %v96_v42  ;;  %8157 = vmatprep.mubr.msk.f32.mxu1 %vm601_vm1, %v384_v43 }
  0xb0   :  { %7726 = vmatmul.mubr.msk.f32.gmra.mrb[82].mxu0 %vm601_vm1, %v97_v44  ;;  %8158 = vmatmul.mubr.msk.f32.gmra.mrb[82].mxu1 %vm601_vm1, %v385_v45  ;;  %v125_v44 = vld [vmem:[%s14287_s0 + $0x378] sm:$0xff] }
  0xb1   :  { %7728 = vmatprep.mubr.msk.f32.mxu0 %vm601_vm1, %v98_v46  ;;  %8160 = vmatprep.mubr.msk.f32.mxu1 %vm601_vm1, %v386_v47  ;;  %v413_v45 = vld [vmem:[%s14287_s0 + $0xc78] sm:$0xff]  ;;  %v126_v46 = vld [vmem:[%s14287_s0 + $0x380] sm:$0xff] }
  0xb2   :  { %v414_v47 = vld [vmem:[%s14287_s0 + $0xc80] sm:$0xff] }
  0xb4   :  { %7729 = vmatmul.mubr.msk.f32.gmra.mrb[84].mxu0 %vm601_vm1, %v99_v48  ;;  %8161 = vmatmul.mubr.msk.f32.gmra.mrb[84].mxu1 %vm601_vm1, %v387_v49 }
  0xb5   :  { %7731 = vmatprep.mubr.msk.f32.mxu0 %vm601_vm1, %v100_v50  ;;  %8163 = vmatprep.mubr.msk.f32.mxu1 %vm601_vm1, %v388_v51 }
  0xb8   :  { %7732 = vmatmul.mubr.msk.f32.gmra.mrb[86].mxu0 %vm601_vm1, %v101_v52  ;;  %8164 = vmatmul.mubr.msk.f32.gmra.mrb[86].mxu1 %vm601_vm1, %v389_v53  ;;  %v127_v52 = vld [vmem:[%s14287_s0 + $0x388] sm:$0xff] }
  0xb9   :  { %7734 = vmatprep.mubr.msk.f32.mxu0 %vm601_vm1, %v102_v54  ;;  %8166 = vmatprep.mubr.msk.f32.mxu1 %vm601_vm1, %v390_v55  ;;  %v415_v53 = vld [vmem:[%s14287_s0 + $0xc88] sm:$0xff]  ;;  %v128_v54 = vld [vmem:[%s14287_s0 + $0x390] sm:$0xff] }
  0xba   :  { %v416_v55 = vld [vmem:[%s14287_s0 + $0xc90] sm:$0xff] }
  0xbc   :  { %7735 = vmatmul.mubr.msk.f32.gmra.mrb[88].mxu0 %vm601_vm1, %v103_v56  ;;  %8167 = vmatmul.mubr.msk.f32.gmra.mrb[88].mxu1 %vm601_vm1, %v391_v57 }
  0xbd   :  { %7737 = vmatprep.mubr.msk.f32.mxu0 %vm601_vm1, %v104_v58  ;;  %8169 = vmatprep.mubr.msk.f32.mxu1 %vm601_vm1, %v392_v59 }
  0xc0   :  { %7738 = vmatmul.mubr.msk.f32.gmra.mrb[90].mxu0 %vm601_vm1, %v105_v60  ;;  %8170 = vmatmul.mubr.msk.f32.gmra.mrb[90].mxu1 %vm601_vm1, %v393_v61  ;;  %v129_v60 = vld [vmem:[%s14287_s0 + $0x398] sm:$0xff] }
  0xc1   :  { %7740 = vmatprep.mubr.msk.f32.mxu0 %vm601_vm1, %v106_v62  ;;  %8172 = vmatprep.mubr.msk.f32.mxu1 %vm601_vm1, %v394_v63  ;;  %v417_v61 = vld [vmem:[%s14287_s0 + $0xc98] sm:$0xff]  ;;  %v130_v62 = vld [vmem:[%s14287_s0 + $0x3a0] sm:$0xff] }
  0xc2   :  { %v418_v63 = vld [vmem:[%s14287_s0 + $0xca0] sm:$0xff] }
  0xc4   :  { %7741 = vmatmul.mubr.msk.f32.gmra.mrb[92].mxu0 %vm601_vm1, %v107_v0  ;;  %8173 = vmatmul.mubr.msk.f32.gmra.mrb[92].mxu1 %vm601_vm1, %v395_v1 }
  0xc5   :  { %7743 = vmatprep.mubr.msk.f32.mxu0 %vm601_vm1, %v108_v2  ;;  %8175 = vmatprep.mubr.msk.f32.mxu1 %vm601_vm1, %v396_v3 }
  0xc8   :  { %7744 = vmatmul.mubr.msk.f32.gmra.mrb[94].mxu0 %vm601_vm1, %v109_v4  ;;  %8176 = vmatmul.mubr.msk.f32.gmra.mrb[94].mxu1 %vm601_vm1, %v397_v5  ;;  %v131_v4 = vld [vmem:[%s14287_s0 + $0x3a8] sm:$0xff] }
  0xc9   :  { %7746 = vmatprep.mubr.msk.f32.mxu0 %vm601_vm1, %v110_v6  ;;  %8178 = vmatprep.mubr.msk.f32.mxu1 %vm601_vm1, %v398_v7  ;;  %v419_v5 = vld [vmem:[%s14287_s0 + $0xca8] sm:$0xff]  ;;  %v132_v6 = vld [vmem:[%s14287_s0 + $0x3b0] sm:$0xff] }
  0xca   :  { %v420_v7 = vld [vmem:[%s14287_s0 + $0xcb0] sm:$0xff] }
  0xcc   :  { %7747 = vmatmul.mubr.msk.f32.gmra.mrb[96].mxu0 %vm601_vm1, %v111_v8  ;;  %8179 = vmatmul.mubr.msk.f32.gmra.mrb[96].mxu1 %vm601_vm1, %v399_v9 }
  0xcd   :  { %7749 = vmatprep.mubr.msk.f32.mxu0 %vm601_vm1, %v112_v10  ;;  %8181 = vmatprep.mubr.msk.f32.mxu1 %vm601_vm1, %v400_v11 }
  0xd0   :  { %7750 = vmatmul.mubr.msk.f32.gmra.mrb[98].mxu0 %vm601_vm1, %v113_v12  ;;  %8182 = vmatmul.mubr.msk.f32.gmra.mrb[98].mxu1 %vm601_vm1, %v401_v13  ;;  %v133_v12 = vld [vmem:[%s14287_s0 + $0x3b8] sm:$0xff] }
  0xd1   :  { %7752 = vmatprep.mubr.msk.f32.mxu0 %vm601_vm1, %v114_v14  ;;  %8184 = vmatprep.mubr.msk.f32.mxu1 %vm601_vm1, %v402_v15  ;;  %v421_v13 = vld [vmem:[%s14287_s0 + $0xcb8] sm:$0xff]  ;;  %v134_v14 = vld [vmem:[%s14287_s0 + $0x3c0] sm:$0xff] }
  0xd2   :  { %v422_v15 = vld [vmem:[%s14287_s0 + $0xcc0] sm:$0xff] }
  0xd4   :  { %7753 = vmatmul.mubr.msk.f32.gmra.mrb[100].mxu0 %vm601_vm1, %v115_v16  ;;  %8185 = vmatmul.mubr.msk.f32.gmra.mrb[100].mxu1 %vm601_vm1, %v403_v17 }
  0xd5   :  { %7755 = vmatprep.mubr.msk.f32.mxu0 %vm601_vm1, %v116_v18  ;;  %8187 = vmatprep.mubr.msk.f32.mxu1 %vm601_vm1, %v404_v19 }
  0xd8   :  { %7756 = vmatmul.mubr.msk.f32.gmra.mrb[102].mxu0 %vm601_vm1, %v117_v20  ;;  %8188 = vmatmul.mubr.msk.f32.gmra.mrb[102].mxu1 %vm601_vm1, %v405_v21  ;;  %v135_v20 = vld [vmem:[%s14287_s0 + $0x3c8] sm:$0xff] }
  0xd9   :  { %7758 = vmatprep.mubr.msk.f32.mxu0 %vm601_vm1, %v118_v22  ;;  %8190 = vmatprep.mubr.msk.f32.mxu1 %vm601_vm1, %v406_v23  ;;  %v423_v21 = vld [vmem:[%s14287_s0 + $0xcc8] sm:$0xff]  ;;  %v136_v22 = vld [vmem:[%s14287_s0 + $0x3d0] sm:$0xff] }
  0xda   :  { %v424_v23 = vld [vmem:[%s14287_s0 + $0xcd0] sm:$0xff] }
  0xdc   :  { %7759 = vmatmul.mubr.msk.f32.gmra.mrb[104].mxu0 %vm601_vm1, %v119_v24  ;;  %8191 = vmatmul.mubr.msk.f32.gmra.mrb[104].mxu1 %vm601_vm1, %v407_v25 }
  0xdd   :  { %7761 = vmatprep.mubr.msk.f32.mxu0 %vm601_vm1, %v120_v26  ;;  %8193 = vmatprep.mubr.msk.f32.mxu1 %vm601_vm1, %v408_v27 }
  0xdf   :  { %v9386_v32 = vpop.f32.mrb[0].mxu0  ;;  %v9388_v33 = vpop.f32.mrb[0].mxu1 }
  0xe0   :  { %v9390_v34 = vpop.f32.mrb[1].mxu0  ;;  %7762 = vmatmul.mubr.msk.f32.gmra.mrb[106].mxu0 %vm601_vm1, %v121_v28  ;;  %v9393_v35 = vpop.f32.mrb[1].mxu1  ;;  %8194 = vmatmul.mubr.msk.f32.gmra.mrb[106].mxu1 %vm601_vm1, %v409_v29  ;;  %v137_v28 = vld [vmem:[%s14287_s0 + $0x3d8] sm:$0xff] }
  0xe1   :  { %7764 = vmatprep.mubr.msk.f32.mxu0 %vm601_vm1, %v122_v30  ;;  %8196 = vmatprep.mubr.msk.f32.mxu1 %vm601_vm1, %v410_v31  ;;  %v425_v29 = vld [vmem:[%s14287_s0 + $0xcd8] sm:$0xff]  ;;  %v138_v30 = vld [vmem:[%s14287_s0 + $0x3e0] sm:$0xff] }
  0xe2   :  { %v426_v31 = vld [vmem:[%s14287_s0 + $0xce0] sm:$0xff] }
  0xe3   :  { %v9410_v40 = vpop.f32.mrb[2].mxu0  ;;  %v9412_v41 = vpop.f32.mrb[2].mxu1 }
  0xe4   :  { %v9414_v42 = vpop.f32.mrb[3].mxu0  ;;  %7765 = vmatmul.mubr.msk.f32.gmra.mrb[108].mxu0 %vm601_vm1, %v123_v36  ;;  %v9417_v43 = vpop.f32.mrb[3].mxu1  ;;  %8197 = vmatmul.mubr.msk.f32.gmra.mrb[108].mxu1 %vm601_vm1, %v411_v37 }
  0xe5   :  { %7767 = vmatprep.mubr.msk.f32.mxu0 %vm601_vm1, %v124_v38  ;;  %8199 = vmatprep.mubr.msk.f32.mxu1 %vm601_vm1, %v412_v39 }
  0xe7   :  { %v9434_v48 = vpop.f32.mrb[4].mxu0  ;;  %v9436_v49 = vpop.f32.mrb[4].mxu1 }
  0xe8   :  { %v9438_v50 = vpop.f32.mrb[5].mxu0  ;;  %7768 = vmatmul.mubr.msk.f32.gmra.mrb[110].mxu0 %vm601_vm1, %v125_v44  ;;  %v9441_v51 = vpop.f32.mrb[5].mxu1  ;;  %8200 = vmatmul.mubr.msk.f32.gmra.mrb[110].mxu1 %vm601_vm1, %v413_v45  ;;  %v139_v44 = vld [vmem:[%s14287_s0 + $0x3e8] sm:$0xff] }
  0xe9   :  { %7770 = vmatprep.mubr.msk.f32.mxu0 %vm601_vm1, %v126_v46  ;;  %8202 = vmatprep.mubr.msk.f32.mxu1 %vm601_vm1, %v414_v47  ;;  %v427_v45 = vld [vmem:[%s14287_s0 + $0xce8] sm:$0xff]  ;;  %v140_v46 = vld [vmem:[%s14287_s0 + $0x3f0] sm:$0xff] }
  0xea   :  { %v428_v47 = vld [vmem:[%s14287_s0 + $0xcf0] sm:$0xff] }
  0xeb   :  { %v9458_v56 = vpop.f32.mrb[6].mxu0  ;;  %v9460_v57 = vpop.f32.mrb[6].mxu1 }
  0xec   :  { %v9462_v58 = vpop.f32.mrb[7].mxu0  ;;  %7771 = vmatmul.mubr.msk.f32.gmra.mrb[112].mxu0 %vm601_vm1, %v127_v52  ;;  %v9465_v59 = vpop.f32.mrb[7].mxu1  ;;  %8203 = vmatmul.mubr.msk.f32.gmra.mrb[112].mxu1 %vm601_vm1, %v415_v53 }
  0xed   :  { %7773 = vmatprep.mubr.msk.f32.mxu0 %vm601_vm1, %v128_v54  ;;  %8205 = vmatprep.mubr.msk.f32.mxu1 %vm601_vm1, %v416_v55 }
  0xef   :  { %v9482_v0 = vpop.f32.mrb[8].mxu0  ;;  %v9484_v1 = vpop.f32.mrb[8].mxu1 }
  0xf0   :  { %v9486_v2 = vpop.f32.mrb[9].mxu0  ;;  %7774 = vmatmul.mubr.msk.f32.gmra.mrb[114].mxu0 %vm601_vm1, %v129_v60  ;;  %v9489_v3 = vpop.f32.mrb[9].mxu1  ;;  %8206 = vmatmul.mubr.msk.f32.gmra.mrb[114].mxu1 %vm601_vm1, %v417_v61  ;;  %v141_v60 = vld [vmem:[%s14287_s0 + $0x3f8] sm:$0xff] }
  0xf1   :  { %7776 = vmatprep.mubr.msk.f32.mxu0 %vm601_vm1, %v130_v62  ;;  %8208 = vmatprep.mubr.msk.f32.mxu1 %vm601_vm1, %v418_v63  ;;  %v429_v61 = vld [vmem:[%s14287_s0 + $0xcf8] sm:$0xff]  ;;  %v142_v62 = vld [vmem:[%s14287_s0 + $0x400] sm:$0xff] }
  0xf2   :  { %v430_v63 = vld [vmem:[%s14287_s0 + $0xd00] sm:$0xff] }
  0xf3   :  { %v9506_v8 = vpop.f32.mrb[10].mxu0  ;;  %v9508_v9 = vpop.f32.mrb[10].mxu1 }
  0xf4   :  { %v9510_v10 = vpop.f32.mrb[11].mxu0  ;;  %7777 = vmatmul.mubr.msk.f32.gmra.mrb[116].mxu0 %vm601_vm1, %v131_v4  ;;  %v9513_v11 = vpop.f32.mrb[11].mxu1  ;;  %8209 = vmatmul.mubr.msk.f32.gmra.mrb[116].mxu1 %vm601_vm1, %v419_v5 }
  0xf5   :  { %7779 = vmatprep.mubr.msk.f32.mxu0 %vm601_vm1, %v132_v6  ;;  %8211 = vmatprep.mubr.msk.f32.mxu1 %vm601_vm1, %v420_v7 }
  0xf7   :  { %v9530_v16 = vpop.f32.mrb[12].mxu0  ;;  %v9532_v17 = vpop.f32.mrb[12].mxu1 }
  0xf8   :  { %v9534_v18 = vpop.f32.mrb[13].mxu0  ;;  %7780 = vmatmul.mubr.msk.f32.gmra.mrb[118].mxu0 %vm601_vm1, %v133_v12  ;;  %v9537_v19 = vpop.f32.mrb[13].mxu1  ;;  %8212 = vmatmul.mubr.msk.f32.gmra.mrb[118].mxu1 %vm601_vm1, %v421_v13  ;;  %v143_v12 = vld [vmem:[%s14287_s0 + $0x408] sm:$0xff] }
  0xf9   :  { %7782 = vmatprep.mubr.msk.f32.mxu0 %vm601_vm1, %v134_v14  ;;  %8214 = vmatprep.mubr.msk.f32.mxu1 %vm601_vm1, %v422_v15  ;;  %v431_v13 = vld [vmem:[%s14287_s0 + $0xd08] sm:$0xff]  ;;  %v144_v14 = vld [vmem:[%s14287_s0 + $0x410] sm:$0xff] }
  0xfa   :  { %v432_v15 = vld [vmem:[%s14287_s0 + $0xd10] sm:$0xff] }
  0xfb   :  { %v9554_v24 = vpop.f32.mrb[14].mxu0  ;;  %v9556_v25 = vpop.f32.mrb[14].mxu1 }
  0xfc   :  { %v9558_v26 = vpop.f32.mrb[15].mxu0  ;;  %7783 = vmatmul.mubr.msk.f32.gmra.mrb[120].mxu0 %vm601_vm1, %v135_v20  ;;  %v9561_v27 = vpop.f32.mrb[15].mxu1  ;;  %8215 = vmatmul.mubr.msk.f32.gmra.mrb[120].mxu1 %vm601_vm1, %v423_v21 }
  0xfd   :  { %7785 = vmatprep.mubr.msk.f32.mxu0 %vm601_vm1, %v136_v22  ;;  %8217 = vmatprep.mubr.msk.f32.mxu1 %vm601_vm1, %v424_v23 }
  0xff   :  { %v9578_v36 = vpop.f32.mrb[16].mxu0  ;;  %v9580_v37 = vpop.f32.mrb[16].mxu1 }
 0x100   :  { %v9582_v38 = vpop.f32.mrb[17].mxu0  ;;  %7786 = vmatmul.mubr.msk.f32.gmra.mrb[122].mxu0 %vm601_vm1, %v137_v28  ;;  %v9585_v39 = vpop.f32.mrb[17].mxu1  ;;  %8218 = vmatmul.mubr.msk.f32.gmra.mrb[122].mxu1 %vm601_vm1, %v425_v29  ;;  %v145_v28 = vld [vmem:[%s14287_s0 + $0x418] sm:$0xff] }
 0x101   :  { %7788 = vmatprep.mubr.msk.f32.mxu0 %vm601_vm1, %v138_v30  ;;  %8220 = vmatprep.mubr.msk.f32.mxu1 %vm601_vm1, %v426_v31  ;;  %v433_v29 = vld [vmem:[%s14287_s0 + $0xd18] sm:$0xff]  ;;  %v146_v30 = vld [vmem:[%s14287_s0 + $0x420] sm:$0xff] }
 0x102   :  { %v434_v31 = vld [vmem:[%s14287_s0 + $0xd20] sm:$0xff] }
 0x103   :  { %v9602_v52 = vpop.f32.mrb[18].mxu0  ;;  %v9604_v53 = vpop.f32.mrb[18].mxu1 }
 0x104   :  { %v9606_v54 = vpop.f32.mrb[19].mxu0  ;;  %7789 = vmatmul.mubr.msk.f32.gmra.mrb[124].mxu0 %vm601_vm1, %v139_v44  ;;  %v9609_v55 = vpop.f32.mrb[19].mxu1  ;;  %8221 = vmatmul.mubr.msk.f32.gmra.mrb[124].mxu1 %vm601_vm1, %v427_v45 }
 0x105   :  { %7791 = vmatprep.mubr.msk.f32.mxu0 %vm601_vm1, %v140_v46  ;;  %8223 = vmatprep.mubr.msk.f32.mxu1 %vm601_vm1, %v428_v47 }
 0x107   :  { %v9626_v4 = vpop.f32.mrb[20].mxu0  ;;  %v9628_v5 = vpop.f32.mrb[20].mxu1 }
 0x108   :  { %v9630_v6 = vpop.f32.mrb[21].mxu0  ;;  %7792 = vmatmul.mubr.msk.f32.gmra.mrb[126].mxu0 %vm601_vm1, %v141_v60  ;;  %v9633_v7 = vpop.f32.mrb[21].mxu1  ;;  %8224 = vmatmul.mubr.msk.f32.gmra.mrb[126].mxu1 %vm601_vm1, %v429_v61  ;;  %v147_v60 = vld [vmem:[%s14287_s0 + $0x428] sm:$0xff] }
 0x109   :  { %7794 = vmatprep.mubr.msk.f32.mxu0 %vm601_vm1, %v142_v62  ;;  %8226 = vmatprep.mubr.msk.f32.mxu1 %vm601_vm1, %v430_v63  ;;  %v435_v61 = vld [vmem:[%s14287_s0 + $0xd28] sm:$0xff]  ;;  %v148_v62 = vld [vmem:[%s14287_s0 + $0x430] sm:$0xff] }
 0x10a   :  { %v436_v63 = vld [vmem:[%s14287_s0 + $0xd30] sm:$0xff] }
 0x10b   :  { %v9650_v20 = vpop.f32.mrb[22].mxu0  ;;  %v9652_v21 = vpop.f32.mrb[22].mxu1 }
 0x10c   :  { %v9654_v22 = vpop.f32.mrb[23].mxu0  ;;  %7795 = vmatmul.mubr.msk.f32.gmra.mrb[128].mxu0 %vm601_vm1, %v143_v12  ;;  %v9657_v23 = vpop.f32.mrb[23].mxu1  ;;  %8227 = vmatmul.mubr.msk.f32.gmra.mrb[128].mxu1 %vm601_vm1, %v431_v13 }
 0x10d   :  { %7797 = vmatprep.mubr.msk.f32.mxu0 %vm601_vm1, %v144_v14  ;;  %8229 = vmatprep.mubr.msk.f32.mxu1 %vm601_vm1, %v432_v15 }
 0x10f   :  { %v9674_v44 = vpop.f32.mrb[24].mxu0  ;;  %v9676_v45 = vpop.f32.mrb[24].mxu1 }
 0x110   :  { %v9678_v46 = vpop.f32.mrb[25].mxu0  ;;  %7798 = vmatmul.mubr.msk.f32.gmra.mrb[130].mxu0 %vm601_vm1, %v145_v28  ;;  %v9681_v47 = vpop.f32.mrb[25].mxu1  ;;  %8230 = vmatmul.mubr.msk.f32.gmra.mrb[130].mxu1 %vm601_vm1, %v433_v29  ;;  %v149_v28 = vld [vmem:[%s14287_s0 + $0x438] sm:$0xff] }
 0x111   :  { %14505 = vst [vmem:[#allocation2_spill] sm:$0xff] %v9681_v47  ;;  %7800 = vmatprep.mubr.msk.f32.mxu0 %vm601_vm1, %v146_v30  ;;  %8232 = vmatprep.mubr.msk.f32.mxu1 %vm601_vm1, %v434_v31  ;;  %v437_v29 = vld [vmem:[%s14287_s0 + $0xd38] sm:$0xff]  ;;  %v150_v30 = vld [vmem:[%s14287_s0 + $0x440] sm:$0xff] }
 0x112   :  { %v438_v31 = vld [vmem:[%s14287_s0 + $0xd40] sm:$0xff] }
 0x113   :  { %v9698_v12 = vpop.f32.mrb[26].mxu0  ;;  %v9700_v13 = vpop.f32.mrb[26].mxu1 }
 0x114   :  { %14506 = vst [vmem:[#allocation3_spill] sm:$0xff] %v9698_v12  ;;  %14507 = vst [vmem:[#allocation4_spill] sm:$0xff] %v9700_v13  ;;  %v9702_v14 = vpop.f32.mrb[27].mxu0  ;;  %7801 = vmatmul.mubr.msk.f32.gmra.mrb[132].mxu0 %vm601_vm1, %v147_v60  ;;  %v9705_v15 = vpop.f32.mrb[27].mxu1  ;;  %8233 = vmatmul.mubr.msk.f32.gmra.mrb[132].mxu1 %vm601_vm1, %v435_v61 }
 0x115   :  { %14508 = vst [vmem:[#allocation5_spill] sm:$0xff] %v9702_v14  ;;  %14509 = vst [vmem:[#allocation6_spill] sm:$0xff] %v9705_v15  ;;  %7803 = vmatprep.mubr.msk.f32.mxu0 %vm601_vm1, %v148_v62  ;;  %8235 = vmatprep.mubr.msk.f32.mxu1 %vm601_vm1, %v436_v63  ;;  %v151_v15 = vld [vmem:[%s14287_s0 + $0x448] sm:$0xff] }
 0x117   :  { %v9722_v60 = vpop.f32.mrb[28].mxu0  ;;  %v9724_v61 = vpop.f32.mrb[28].mxu1 }
 0x118   :  { %14510 = vst [vmem:[#allocation7_spill] sm:$0xff] %v9722_v60  ;;  %14511 = vst [vmem:[#allocation8_spill] sm:$0xff] %v9724_v61  ;;  %v9726_v62 = vpop.f32.mrb[29].mxu0  ;;  %7804 = vmatmul.mubr.msk.f32.gmra.mrb[134].mxu0 %vm601_vm1, %v149_v28  ;;  %v9729_v63 = vpop.f32.mrb[29].mxu1  ;;  %8236 = vmatmul.mubr.msk.f32.gmra.mrb[134].mxu1 %vm601_vm1, %v437_v29  ;;  %v439_v61 = vld [vmem:[%s14287_s0 + $0xd48] sm:$0xff]  ;;  %v152_v28 = vld [vmem:[%s14287_s0 + $0x450] sm:$0xff] }
 0x119   :  { %14512 = vst [vmem:[#allocation9_spill] sm:$0xff] %v9726_v62  ;;  %14513 = vst [vmem:[#allocation10_spill] sm:$0xff] %v9729_v63  ;;  %7806 = vmatprep.mubr.msk.f32.mxu0 %vm601_vm1, %v150_v30  ;;  %8238 = vmatprep.mubr.msk.f32.mxu1 %vm601_vm1, %v438_v31  ;;  %v440_v29 = vld [vmem:[%s14287_s0 + $0xd50] sm:$0xff]  ;;  %v153_v60 = vld [vmem:[%s14287_s0 + $0x458] sm:$0xff] }
 0x11b   :  { %v9746_v63 = vpop.f32.mrb[30].mxu0  ;;  %v9748_v30 = vpop.f32.mrb[30].mxu1 }
 0x11c   :  { %14514 = vst [vmem:[#allocation11_spill] sm:$0xff] %v9746_v63  ;;  %14515 = vst [vmem:[#allocation12_spill] sm:$0xff] %v9748_v30  ;;  %v9750_v31 = vpop.f32.mrb[31].mxu0  ;;  %7807 = vmatmul.mubr.msk.f32.gmra.mrb[136].mxu0 %vm601_vm1, %v151_v15  ;;  %v9753_v62 = vpop.f32.mrb[31].mxu1  ;;  %8239 = vmatmul.mubr.msk.f32.gmra.mrb[136].mxu1 %vm601_vm1, %v439_v61  ;;  %v441_v30 = vld [vmem:[%s14287_s0 + $0xd58] sm:$0xff]  ;;  %v154_v15 = vld [vmem:[%s14287_s0 + $0x460] sm:$0xff] }
 0x11d   :  { %14516 = vst [vmem:[#allocation13_spill] sm:$0xff] %v9750_v31  ;;  %14517 = vst [vmem:[#allocation14_spill] sm:$0xff] %v9753_v62  ;;  %7809 = vmatprep.mubr.msk.f32.mxu0 %vm601_vm1, %v152_v28  ;;  %8241 = vmatprep.mubr.msk.f32.mxu1 %vm601_vm1, %v440_v29  ;;  %v442_v61 = vld [vmem:[%s14287_s0 + $0xd60] sm:$0xff]  ;;  %v155_v63 = vld [vmem:[%s14287_s0 + $0x468] sm:$0xff] }
 0x11f   :  { %v9770_v62 = vpop.f32.mrb[32].mxu0  ;;  %v9772_v28 = vpop.f32.mrb[32].mxu1 }
 0x120   :  { %14518 = vst [vmem:[#allocation15_spill] sm:$0xff] %v9770_v62  ;;  %14519 = vst [vmem:[#allocation16_spill] sm:$0xff] %v9772_v28  ;;  %v9774_v29 = vpop.f32.mrb[33].mxu0  ;;  %7810 = vmatmul.mubr.msk.f32.gmra.mrb[138].mxu0 %vm601_vm1, %v153_v60  ;;  %v9777_v31 = vpop.f32.mrb[33].mxu1  ;;  %8242 = vmatmul.mubr.msk.f32.gmra.mrb[138].mxu1 %vm601_vm1, %v441_v30  ;;  %v443_v28 = vld [vmem:[%s14287_s0 + $0xd68] sm:$0xff]  ;;  %v156_v60 = vld [vmem:[%s14287_s0 + $0x470] sm:$0xff] }
 0x121   :  { %14520 = vst [vmem:[#allocation17_spill] sm:$0xff] %v9774_v29  ;;  %14521 = vst [vmem:[#allocation18_spill] sm:$0xff] %v9777_v31  ;;  %7812 = vmatprep.mubr.msk.f32.mxu0 %vm601_vm1, %v154_v15  ;;  %8244 = vmatprep.mubr.msk.f32.mxu1 %vm601_vm1, %v442_v61  ;;  %v444_v30 = vld [vmem:[%s14287_s0 + $0xd70] sm:$0xff]  ;;  %v157_v62 = vld [vmem:[%s14287_s0 + $0x478] sm:$0xff] }
 0x123   :  { %v9794_v31 = vpop.f32.mrb[34].mxu0  ;;  %v9796_v15 = vpop.f32.mrb[34].mxu1 }
 0x124   :  { %14522 = vst [vmem:[#allocation19_spill] sm:$0xff] %v9794_v31  ;;  %14523 = vst [vmem:[#allocation20_spill] sm:$0xff] %v9796_v15  ;;  %v9798_v61 = vpop.f32.mrb[35].mxu0  ;;  %7813 = vmatmul.mubr.msk.f32.gmra.mrb[140].mxu0 %vm601_vm1, %v155_v63  ;;  %v9801_v29 = vpop.f32.mrb[35].mxu1  ;;  %8245 = vmatmul.mubr.msk.f32.gmra.mrb[140].mxu1 %vm601_vm1, %v443_v28  ;;  %v445_v15 = vld [vmem:[%s14287_s0 + $0xd78] sm:$0xff]  ;;  %v158_v63 = vld [vmem:[%s14287_s0 + $0x480] sm:$0xff] }
 0x125   :  { %14524 = vst [vmem:[#allocation21_spill] sm:$0xff] %v9798_v61  ;;  %14525 = vst [vmem:[#allocation22_spill] sm:$0xff] %v9801_v29  ;;  %7815 = vmatprep.mubr.msk.f32.mxu0 %vm601_vm1, %v156_v60  ;;  %8247 = vmatprep.mubr.msk.f32.mxu1 %vm601_vm1, %v444_v30  ;;  %v446_v28 = vld [vmem:[%s14287_s0 + $0xd80] sm:$0xff]  ;;  %v159_v31 = vld [vmem:[%s14287_s0 + $0x488] sm:$0xff] }
 0x127   :  { %v9818_v29 = vpop.f32.mrb[36].mxu0  ;;  %v9820_v60 = vpop.f32.mrb[36].mxu1 }
 0x128   :  { %14526 = vst [vmem:[#allocation23_spill] sm:$0xff] %v9818_v29  ;;  %14527 = vst [vmem:[#allocation24_spill] sm:$0xff] %v9820_v60  ;;  %v9822_v30 = vpop.f32.mrb[37].mxu0  ;;  %7816 = vmatmul.mubr.msk.f32.gmra.mrb[142].mxu0 %vm601_vm1, %v157_v62  ;;  %v9825_v61 = vpop.f32.mrb[37].mxu1  ;;  %8248 = vmatmul.mubr.msk.f32.gmra.mrb[142].mxu1 %vm601_vm1, %v445_v15  ;;  %v447_v60 = vld [vmem:[%s14287_s0 + $0xd88] sm:$0xff]  ;;  %v160_v62 = vld [vmem:[%s14287_s0 + $0x490] sm:$0xff] }
 0x129   :  { %14528 = vst [vmem:[#allocation25_spill] sm:$0xff] %v9822_v30  ;;  %14529 = vst [vmem:[#allocation26_spill] sm:$0xff] %v9825_v61  ;;  %7818 = vmatprep.mubr.msk.f32.mxu0 %vm601_vm1, %v158_v63  ;;  %8250 = vmatprep.mubr.msk.f32.mxu1 %vm601_vm1, %v446_v28  ;;  %v448_v15 = vld [vmem:[%s14287_s0 + $0xd90] sm:$0xff]  ;;  %v161_v29 = vld [vmem:[%s14287_s0 + $0x498] sm:$0xff] }
 0x12b   :  { %v9842_v61 = vpop.f32.mrb[38].mxu0  ;;  %v9844_v63 = vpop.f32.mrb[38].mxu1 }
 0x12c   :  { %14530 = vst [vmem:[#allocation27_spill] sm:$0xff] %v9842_v61  ;;  %14531 = vst [vmem:[#allocation28_spill] sm:$0xff] %v9844_v63  ;;  %v9846_v28 = vpop.f32.mrb[39].mxu0  ;;  %7819 = vmatmul.mubr.msk.f32.gmra.mrb[144].mxu0 %vm601_vm1, %v159_v31  ;;  %v9849_v30 = vpop.f32.mrb[39].mxu1  ;;  %8251 = vmatmul.mubr.msk.f32.gmra.mrb[144].mxu1 %vm601_vm1, %v447_v60  ;;  %v449_v63 = vld [vmem:[%s14287_s0 + $0xd98] sm:$0xff]  ;;  %v162_v31 = vld [vmem:[%s14287_s0 + $0x4a0] sm:$0xff] }
 0x12d   :  { %14532 = vst [vmem:[#allocation29_spill] sm:$0xff] %v9846_v28  ;;  %14533 = vst [vmem:[#allocation30_spill] sm:$0xff] %v9849_v30  ;;  %7821 = vmatprep.mubr.msk.f32.mxu0 %vm601_vm1, %v160_v62  ;;  %8253 = vmatprep.mubr.msk.f32.mxu1 %vm601_vm1, %v448_v15  ;;  %v450_v60 = vld [vmem:[%s14287_s0 + $0xda0] sm:$0xff]  ;;  %v163_v61 = vld [vmem:[%s14287_s0 + $0x4a8] sm:$0xff] }
 0x12f   :  { %v9866_v30 = vpop.f32.mrb[40].mxu0  ;;  %v9868_v62 = vpop.f32.mrb[40].mxu1 }
 0x130   :  { %14534 = vst [vmem:[#allocation31_spill] sm:$0xff] %v9866_v30  ;;  %14535 = vst [vmem:[#allocation32_spill] sm:$0xff] %v9868_v62  ;;  %v9870_v15 = vpop.f32.mrb[41].mxu0  ;;  %7822 = vmatmul.mubr.msk.f32.gmra.mrb[146].mxu0 %vm601_vm1, %v161_v29  ;;  %v9873_v28 = vpop.f32.mrb[41].mxu1  ;;  %8254 = vmatmul.mubr.msk.f32.gmra.mrb[146].mxu1 %vm601_vm1, %v449_v63  ;;  %v451_v62 = vld [vmem:[%s14287_s0 + $0xda8] sm:$0xff]  ;;  %v164_v29 = vld [vmem:[%s14287_s0 + $0x4b0] sm:$0xff] }
 0x131   :  { %14536 = vst [vmem:[#allocation33_spill] sm:$0xff] %v9870_v15  ;;  %14537 = vst [vmem:[#allocation34_spill] sm:$0xff] %v9873_v28  ;;  %7824 = vmatprep.mubr.msk.f32.mxu0 %vm601_vm1, %v162_v31  ;;  %8256 = vmatprep.mubr.msk.f32.mxu1 %vm601_vm1, %v450_v60  ;;  %v452_v63 = vld [vmem:[%s14287_s0 + $0xdb0] sm:$0xff]  ;;  %v165_v30 = vld [vmem:[%s14287_s0 + $0x4b8] sm:$0xff] }
 0x133   :  { %v9890_v28 = vpop.f32.mrb[42].mxu0  ;;  %v9892_v31 = vpop.f32.mrb[42].mxu1 }
 0x134   :  { %14538 = vst [vmem:[#allocation35_spill] sm:$0xff] %v9890_v28  ;;  %14539 = vst [vmem:[#allocation36_spill] sm:$0xff] %v9892_v31  ;;  %v9894_v60 = vpop.f32.mrb[43].mxu0  ;;  %7825 = vmatmul.mubr.msk.f32.gmra.mrb[148].mxu0 %vm601_vm1, %v163_v61  ;;  %v9897_v15 = vpop.f32.mrb[43].mxu1  ;;  %8257 = vmatmul.mubr.msk.f32.gmra.mrb[148].mxu1 %vm601_vm1, %v451_v62  ;;  %v453_v31 = vld [vmem:[%s14287_s0 + $0xdb8] sm:$0xff]  ;;  %v166_v61 = vld [vmem:[%s14287_s0 + $0x4c0] sm:$0xff] }
 0x135   :  { %14540 = vst [vmem:[#allocation37_spill] sm:$0xff] %v9894_v60  ;;  %14541 = vst [vmem:[#allocation38_spill] sm:$0xff] %v9897_v15  ;;  %7827 = vmatprep.mubr.msk.f32.mxu0 %vm601_vm1, %v164_v29  ;;  %8259 = vmatprep.mubr.msk.f32.mxu1 %vm601_vm1, %v452_v63  ;;  %v454_v62 = vld [vmem:[%s14287_s0 + $0xdc0] sm:$0xff]  ;;  %v167_v28 = vld [vmem:[%s14287_s0 + $0x4c8] sm:$0xff] }
 0x137   :  { %v9914_v15 = vpop.f32.mrb[44].mxu0  ;;  %v9916_v29 = vpop.f32.mrb[44].mxu1 }
 0x138   :  { %14542 = vst [vmem:[#allocation39_spill] sm:$0xff] %v9914_v15  ;;  %14543 = vst [vmem:[#allocation40_spill] sm:$0xff] %v9916_v29  ;;  %v9918_v63 = vpop.f32.mrb[45].mxu0  ;;  %7828 = vmatmul.mubr.msk.f32.gmra.mrb[150].mxu0 %vm601_vm1, %v165_v30  ;;  %v9921_v60 = vpop.f32.mrb[45].mxu1  ;;  %8260 = vmatmul.mubr.msk.f32.gmra.mrb[150].mxu1 %vm601_vm1, %v453_v31  ;;  %v455_v29 = vld [vmem:[%s14287_s0 + $0xdc8] sm:$0xff]  ;;  %v168_v30 = vld [vmem:[%s14287_s0 + $0x4d0] sm:$0xff] }
 0x139   :  { %14544 = vst [vmem:[#allocation41_spill] sm:$0xff] %v9918_v63  ;;  %14545 = vst [vmem:[#allocation42_spill] sm:$0xff] %v9921_v60  ;;  %7830 = vmatprep.mubr.msk.f32.mxu0 %vm601_vm1, %v166_v61  ;;  %8262 = vmatprep.mubr.msk.f32.mxu1 %vm601_vm1, %v454_v62  ;;  %v456_v31 = vld [vmem:[%s14287_s0 + $0xdd0] sm:$0xff]  ;;  %v169_v15 = vld [vmem:[%s14287_s0 + $0x4d8] sm:$0xff] }
 0x13b   :  { %v9938_v60 = vpop.f32.mrb[46].mxu0  ;;  %v9940_v61 = vpop.f32.mrb[46].mxu1 }
 0x13c   :  { %14546 = vst [vmem:[#allocation43_spill] sm:$0xff] %v9938_v60  ;;  %14547 = vst [vmem:[#allocation44_spill] sm:$0xff] %v9940_v61  ;;  %v9942_v62 = vpop.f32.mrb[47].mxu0  ;;  %7831 = vmatmul.mubr.msk.f32.gmra.mrb[152].mxu0 %vm601_vm1, %v167_v28  ;;  %v9945_v63 = vpop.f32.mrb[47].mxu1  ;;  %8263 = vmatmul.mubr.msk.f32.gmra.mrb[152].mxu1 %vm601_vm1, %v455_v29  ;;  %v457_v61 = vld [vmem:[%s14287_s0 + $0xdd8] sm:$0xff]  ;;  %v170_v28 = vld [vmem:[%s14287_s0 + $0x4e0] sm:$0xff] }
 0x13d   :  { %14548 = vst [vmem:[#allocation45_spill] sm:$0xff] %v9942_v62  ;;  %14549 = vst [vmem:[#allocation46_spill] sm:$0xff] %v9945_v63  ;;  %7833 = vmatprep.mubr.msk.f32.mxu0 %vm601_vm1, %v168_v30  ;;  %8265 = vmatprep.mubr.msk.f32.mxu1 %vm601_vm1, %v456_v31  ;;  %v458_v29 = vld [vmem:[%s14287_s0 + $0xde0] sm:$0xff]  ;;  %v171_v60 = vld [vmem:[%s14287_s0 + $0x4e8] sm:$0xff] }
 0x13f   :  { %v9962_v63 = vpop.f32.mrb[48].mxu0  ;;  %v9964_v30 = vpop.f32.mrb[48].mxu1 }
 0x140   :  { %14550 = vst [vmem:[#allocation47_spill] sm:$0xff] %v9962_v63  ;;  %14551 = vst [vmem:[#allocation48_spill] sm:$0xff] %v9964_v30  ;;  %v9966_v31 = vpop.f32.mrb[49].mxu0  ;;  %7834 = vmatmul.mubr.msk.f32.gmra.mrb[154].mxu0 %vm601_vm1, %v169_v15  ;;  %v9969_v62 = vpop.f32.mrb[49].mxu1  ;;  %8266 = vmatmul.mubr.msk.f32.gmra.mrb[154].mxu1 %vm601_vm1, %v457_v61  ;;  %v459_v30 = vld [vmem:[%s14287_s0 + $0xde8] sm:$0xff]  ;;  %v172_v15 = vld [vmem:[%s14287_s0 + $0x4f0] sm:$0xff] }
 0x141   :  { %14552 = vst [vmem:[#allocation49_spill] sm:$0xff] %v9966_v31  ;;  %14553 = vst [vmem:[#allocation50_spill] sm:$0xff] %v9969_v62  ;;  %7836 = vmatprep.mubr.msk.f32.mxu0 %vm601_vm1, %v170_v28  ;;  %8268 = vmatprep.mubr.msk.f32.mxu1 %vm601_vm1, %v458_v29  ;;  %v460_v61 = vld [vmem:[%s14287_s0 + $0xdf0] sm:$0xff]  ;;  %v173_v63 = vld [vmem:[%s14287_s0 + $0x4f8] sm:$0xff] }
 0x143   :  { %v9986_v62 = vpop.f32.mrb[50].mxu0  ;;  %v9988_v28 = vpop.f32.mrb[50].mxu1 }
 0x144   :  { %14554 = vst [vmem:[#allocation51_spill] sm:$0xff] %v9986_v62  ;;  %14555 = vst [vmem:[#allocation52_spill] sm:$0xff] %v9988_v28  ;;  %v9990_v29 = vpop.f32.mrb[51].mxu0  ;;  %7837 = vmatmul.mubr.msk.f32.gmra.mrb[156].mxu0 %vm601_vm1, %v171_v60  ;;  %v9993_v31 = vpop.f32.mrb[51].mxu1  ;;  %8269 = vmatmul.mubr.msk.f32.gmra.mrb[156].mxu1 %vm601_vm1, %v459_v30  ;;  %v461_v28 = vld [vmem:[%s14287_s0 + $0xdf8] sm:$0xff]  ;;  %v174_v60 = vld [vmem:[%s14287_s0 + $0x500] sm:$0xff] }
 0x145   :  { %14556 = vst [vmem:[#allocation53_spill] sm:$0xff] %v9990_v29  ;;  %14557 = vst [vmem:[#allocation54_spill] sm:$0xff] %v9993_v31  ;;  %7839 = vmatprep.mubr.msk.f32.mxu0 %vm601_vm1, %v172_v15  ;;  %8271 = vmatprep.mubr.msk.f32.mxu1 %vm601_vm1, %v460_v61  ;;  %v462_v30 = vld [vmem:[%s14287_s0 + $0xe00] sm:$0xff]  ;;  %v175_v62 = vld [vmem:[%s14287_s0 + $0x508] sm:$0xff] }
 0x147   :  { %v10010_v31 = vpop.f32.mrb[52].mxu0  ;;  %v10012_v15 = vpop.f32.mrb[52].mxu1 }
 0x148   :  { %14558 = vst [vmem:[#allocation55_spill] sm:$0xff] %v10010_v31  ;;  %14559 = vst [vmem:[#allocation56_spill] sm:$0xff] %v10012_v15  ;;  %v10014_v61 = vpop.f32.mrb[53].mxu0  ;;  %7840 = vmatmul.mubr.msk.f32.gmra.mrb[158].mxu0 %vm601_vm1, %v173_v63  ;;  %v10017_v29 = vpop.f32.mrb[53].mxu1  ;;  %8272 = vmatmul.mubr.msk.f32.gmra.mrb[158].mxu1 %vm601_vm1, %v461_v28  ;;  %v463_v15 = vld [vmem:[%s14287_s0 + $0xe08] sm:$0xff]  ;;  %v176_v63 = vld [vmem:[%s14287_s0 + $0x510] sm:$0xff] }
 0x149   :  { %14560 = vst [vmem:[#allocation57_spill] sm:$0xff] %v10014_v61  ;;  %14561 = vst [vmem:[#allocation58_spill] sm:$0xff] %v10017_v29  ;;  %7842 = vmatprep.mubr.msk.f32.mxu0 %vm601_vm1, %v174_v60  ;;  %8274 = vmatprep.mubr.msk.f32.mxu1 %vm601_vm1, %v462_v30  ;;  %v464_v28 = vld [vmem:[%s14287_s0 + $0xe10] sm:$0xff]  ;;  %v177_v31 = vld [vmem:[%s14287_s0 + $0x518] sm:$0xff] }
 0x14b   :  { %v10034_v29 = vpop.f32.mrb[54].mxu0  ;;  %v10036_v60 = vpop.f32.mrb[54].mxu1 }
 0x14c   :  { %14562 = vst [vmem:[#allocation59_spill] sm:$0xff] %v10034_v29  ;;  %14563 = vst [vmem:[#allocation60_spill] sm:$0xff] %v10036_v60  ;;  %v10038_v30 = vpop.f32.mrb[55].mxu0  ;;  %7843 = vmatmul.mubr.msk.f32.gmra.mrb[160].mxu0 %vm601_vm1, %v175_v62  ;;  %v10041_v61 = vpop.f32.mrb[55].mxu1  ;;  %8275 = vmatmul.mubr.msk.f32.gmra.mrb[160].mxu1 %vm601_vm1, %v463_v15  ;;  %v465_v60 = vld [vmem:[%s14287_s0 + $0xe18] sm:$0xff]  ;;  %v178_v62 = vld [vmem:[%s14287_s0 + $0x520] sm:$0xff] }
 0x14d   :  { %14564 = vst [vmem:[#allocation61_spill] sm:$0xff] %v10038_v30  ;;  %14565 = vst [vmem:[#allocation62_spill] sm:$0xff] %v10041_v61  ;;  %7845 = vmatprep.mubr.msk.f32.mxu0 %vm601_vm1, %v176_v63  ;;  %8277 = vmatprep.mubr.msk.f32.mxu1 %vm601_vm1, %v464_v28  ;;  %v466_v15 = vld [vmem:[%s14287_s0 + $0xe20] sm:$0xff]  ;;  %v179_v29 = vld [vmem:[%s14287_s0 + $0x528] sm:$0xff] }
 0x14f   :  { %v10058_v61 = vpop.f32.mrb[56].mxu0  ;;  %v10060_v63 = vpop.f32.mrb[56].mxu1 }
 0x150   :  { %14566 = vst [vmem:[#allocation63_spill] sm:$0xff] %v10058_v61  ;;  %14567 = vst [vmem:[#allocation64_spill] sm:$0xff] %v10060_v63  ;;  %v10062_v28 = vpop.f32.mrb[57].mxu0  ;;  %7846 = vmatmul.mubr.msk.f32.gmra.mrb[162].mxu0 %vm601_vm1, %v177_v31  ;;  %v10065_v30 = vpop.f32.mrb[57].mxu1  ;;  %8278 = vmatmul.mubr.msk.f32.gmra.mrb[162].mxu1 %vm601_vm1, %v465_v60  ;;  %v467_v63 = vld [vmem:[%s14287_s0 + $0xe28] sm:$0xff]  ;;  %v180_v31 = vld [vmem:[%s14287_s0 + $0x530] sm:$0xff] }
 0x151   :  { %14568 = vst [vmem:[#allocation65_spill] sm:$0xff] %v10062_v28  ;;  %14569 = vst [vmem:[#allocation66_spill] sm:$0xff] %v10065_v30  ;;  %7848 = vmatprep.mubr.msk.f32.mxu0 %vm601_vm1, %v178_v62  ;;  %8280 = vmatprep.mubr.msk.f32.mxu1 %vm601_vm1, %v466_v15  ;;  %v468_v60 = vld [vmem:[%s14287_s0 + $0xe30] sm:$0xff]  ;;  %v181_v61 = vld [vmem:[%s14287_s0 + $0x538] sm:$0xff] }
 0x153   :  { %v10082_v30 = vpop.f32.mrb[58].mxu0  ;;  %v10084_v62 = vpop.f32.mrb[58].mxu1 }
 0x154   :  { %14570 = vst [vmem:[#allocation67_spill] sm:$0xff] %v10082_v30  ;;  %14571 = vst [vmem:[#allocation68_spill] sm:$0xff] %v10084_v62  ;;  %v10086_v15 = vpop.f32.mrb[59].mxu0  ;;  %7849 = vmatmul.mubr.msk.f32.gmra.mrb[164].mxu0 %vm601_vm1, %v179_v29  ;;  %v10089_v28 = vpop.f32.mrb[59].mxu1  ;;  %8281 = vmatmul.mubr.msk.f32.gmra.mrb[164].mxu1 %vm601_vm1, %v467_v63  ;;  %v469_v62 = vld [vmem:[%s14287_s0 + $0xe38] sm:$0xff]  ;;  %v182_v29 = vld [vmem:[%s14287_s0 + $0x540] sm:$0xff] }
 0x155   :  { %14572 = vst [vmem:[#allocation69_spill] sm:$0xff] %v10086_v15  ;;  %14573 = vst [vmem:[#allocation70_spill] sm:$0xff] %v10089_v28  ;;  %7851 = vmatprep.mubr.msk.f32.mxu0 %vm601_vm1, %v180_v31  ;;  %8283 = vmatprep.mubr.msk.f32.mxu1 %vm601_vm1, %v468_v60  ;;  %v470_v63 = vld [vmem:[%s14287_s0 + $0xe40] sm:$0xff]  ;;  %v183_v30 = vld [vmem:[%s14287_s0 + $0x548] sm:$0xff] }
 0x157   :  { %v10106_v28 = vpop.f32.mrb[60].mxu0  ;;  %v10108_v31 = vpop.f32.mrb[60].mxu1 }
 0x158   :  { %14574 = vst [vmem:[#allocation71_spill] sm:$0xff] %v10106_v28  ;;  %14575 = vst [vmem:[#allocation72_spill] sm:$0xff] %v10108_v31  ;;  %v10110_v60 = vpop.f32.mrb[61].mxu0  ;;  %7852 = vmatmul.mubr.msk.f32.gmra.mrb[166].mxu0 %vm601_vm1, %v181_v61  ;;  %v10113_v15 = vpop.f32.mrb[61].mxu1  ;;  %8284 = vmatmul.mubr.msk.f32.gmra.mrb[166].mxu1 %vm601_vm1, %v469_v62  ;;  %v471_v31 = vld [vmem:[%s14287_s0 + $0xe48] sm:$0xff]  ;;  %v184_v61 = vld [vmem:[%s14287_s0 + $0x550] sm:$0xff] }
 0x159   :  { %14576 = vst [vmem:[#allocation73_spill] sm:$0xff] %v10110_v60  ;;  %14577 = vst [vmem:[#allocation74_spill] sm:$0xff] %v10113_v15  ;;  %7854 = vmatprep.mubr.msk.f32.mxu0 %vm601_vm1, %v182_v29  ;;  %8286 = vmatprep.mubr.msk.f32.mxu1 %vm601_vm1, %v470_v63  ;;  %v472_v62 = vld [vmem:[%s14287_s0 + $0xe50] sm:$0xff]  ;;  %v185_v28 = vld [vmem:[%s14287_s0 + $0x558] sm:$0xff] }
 0x15b   :  { %v10130_v15 = vpop.f32.mrb[62].mxu0  ;;  %v10132_v29 = vpop.f32.mrb[62].mxu1 }
 0x15c   :  { %14578 = vst [vmem:[#allocation75_spill] sm:$0xff] %v10130_v15  ;;  %14579 = vst [vmem:[#allocation76_spill] sm:$0xff] %v10132_v29  ;;  %v10134_v63 = vpop.f32.mrb[63].mxu0  ;;  %7855 = vmatmul.mubr.msk.f32.gmra.mrb[168].mxu0 %vm601_vm1, %v183_v30  ;;  %v10137_v60 = vpop.f32.mrb[63].mxu1  ;;  %8287 = vmatmul.mubr.msk.f32.gmra.mrb[168].mxu1 %vm601_vm1, %v471_v31  ;;  %v473_v29 = vld [vmem:[%s14287_s0 + $0xe58] sm:$0xff]  ;;  %v186_v30 = vld [vmem:[%s14287_s0 + $0x560] sm:$0xff] }
 0x15d   :  { %14580 = vst [vmem:[#allocation77_spill] sm:$0xff] %v10134_v63  ;;  %14581 = vst [vmem:[#allocation78_spill] sm:$0xff] %v10137_v60  ;;  %7857 = vmatprep.mubr.msk.f32.mxu0 %vm601_vm1, %v184_v61  ;;  %8289 = vmatprep.mubr.msk.f32.mxu1 %vm601_vm1, %v472_v62  ;;  %v474_v31 = vld [vmem:[%s14287_s0 + $0xe60] sm:$0xff]  ;;  %v187_v15 = vld [vmem:[%s14287_s0 + $0x568] sm:$0xff] }
 0x15f   :  { %v10154_v60 = vpop.f32.mrb[64].mxu0  ;;  %v10156_v61 = vpop.f32.mrb[64].mxu1 }
 0x160   :  { %14582 = vst [vmem:[#allocation79_spill] sm:$0xff] %v10154_v60  ;;  %14583 = vst [vmem:[#allocation80_spill] sm:$0xff] %v10156_v61  ;;  %v10158_v62 = vpop.f32.mrb[65].mxu0  ;;  %7858 = vmatmul.mubr.msk.f32.gmra.mrb[170].mxu0 %vm601_vm1, %v185_v28  ;;  %v10161_v63 = vpop.f32.mrb[65].mxu1  ;;  %8290 = vmatmul.mubr.msk.f32.gmra.mrb[170].mxu1 %vm601_vm1, %v473_v29  ;;  %v475_v61 = vld [vmem:[%s14287_s0 + $0xe68] sm:$0xff]  ;;  %v188_v28 = vld [vmem:[%s14287_s0 + $0x570] sm:$0xff] }
 0x161   :  { %14584 = vst [vmem:[#allocation81_spill] sm:$0xff] %v10158_v62  ;;  %14585 = vst [vmem:[#allocation82_spill] sm:$0xff] %v10161_v63  ;;  %7860 = vmatprep.mubr.msk.f32.mxu0 %vm601_vm1, %v186_v30  ;;  %8292 = vmatprep.mubr.msk.f32.mxu1 %vm601_vm1, %v474_v31  ;;  %v476_v29 = vld [vmem:[%s14287_s0 + $0xe70] sm:$0xff]  ;;  %v189_v60 = vld [vmem:[%s14287_s0 + $0x578] sm:$0xff] }
 0x163   :  { %v10178_v63 = vpop.f32.mrb[66].mxu0  ;;  %v10180_v30 = vpop.f32.mrb[66].mxu1 }
 0x164   :  { %14586 = vst [vmem:[#allocation83_spill] sm:$0xff] %v10178_v63  ;;  %14587 = vst [vmem:[#allocation84_spill] sm:$0xff] %v10180_v30  ;;  %v10182_v31 = vpop.f32.mrb[67].mxu0  ;;  %7861 = vmatmul.mubr.msk.f32.gmra.mrb[172].mxu0 %vm601_vm1, %v187_v15  ;;  %v10185_v62 = vpop.f32.mrb[67].mxu1  ;;  %8293 = vmatmul.mubr.msk.f32.gmra.mrb[172].mxu1 %vm601_vm1, %v475_v61  ;;  %v477_v30 = vld [vmem:[%s14287_s0 + $0xe78] sm:$0xff]  ;;  %v190_v15 = vld [vmem:[%s14287_s0 + $0x580] sm:$0xff] }
 0x165   :  { %14588 = vst [vmem:[#allocation85_spill] sm:$0xff] %v10182_v31  ;;  %14589 = vst [vmem:[#allocation86_spill] sm:$0xff] %v10185_v62  ;;  %7863 = vmatprep.mubr.msk.f32.mxu0 %vm601_vm1, %v188_v28  ;;  %8295 = vmatprep.mubr.msk.f32.mxu1 %vm601_vm1, %v476_v29  ;;  %v478_v61 = vld [vmem:[%s14287_s0 + $0xe80] sm:$0xff]  ;;  %v191_v63 = vld [vmem:[%s14287_s0 + $0x588] sm:$0xff] }
 0x167   :  { %v10202_v62 = vpop.f32.mrb[68].mxu0  ;;  %v10204_v28 = vpop.f32.mrb[68].mxu1 }
 0x168   :  { %14590 = vst [vmem:[#allocation87_spill] sm:$0xff] %v10202_v62  ;;  %14591 = vst [vmem:[#allocation88_spill] sm:$0xff] %v10204_v28  ;;  %v10206_v29 = vpop.f32.mrb[69].mxu0  ;;  %7864 = vmatmul.mubr.msk.f32.gmra.mrb[174].mxu0 %vm601_vm1, %v189_v60  ;;  %v10209_v31 = vpop.f32.mrb[69].mxu1  ;;  %8296 = vmatmul.mubr.msk.f32.gmra.mrb[174].mxu1 %vm601_vm1, %v477_v30  ;;  %v479_v28 = vld [vmem:[%s14287_s0 + $0xe88] sm:$0xff]  ;;  %v192_v60 = vld [vmem:[%s14287_s0 + $0x590] sm:$0xff] }
 0x169   :  { %14592 = vst [vmem:[#allocation89_spill] sm:$0xff] %v10206_v29  ;;  %14593 = vst [vmem:[#allocation90_spill] sm:$0xff] %v10209_v31  ;;  %7866 = vmatprep.mubr.msk.f32.mxu0 %vm601_vm1, %v190_v15  ;;  %8298 = vmatprep.mubr.msk.f32.mxu1 %vm601_vm1, %v478_v61  ;;  %v480_v30 = vld [vmem:[%s14287_s0 + $0xe90] sm:$0xff]  ;;  %v193_v62 = vld [vmem:[%s14287_s0 + $0x598] sm:$0xff] }
 0x16b   :  { %v10226_v31 = vpop.f32.mrb[70].mxu0  ;;  %v10228_v15 = vpop.f32.mrb[70].mxu1 }
 0x16c   :  { %14594 = vst [vmem:[#allocation91_spill] sm:$0xff] %v10226_v31  ;;  %14595 = vst [vmem:[#allocation92_spill] sm:$0xff] %v10228_v15  ;;  %v10230_v61 = vpop.f32.mrb[71].mxu0  ;;  %7867 = vmatmul.mubr.msk.f32.gmra.mrb[176].mxu0 %vm601_vm1, %v191_v63  ;;  %v10233_v29 = vpop.f32.mrb[71].mxu1  ;;  %8299 = vmatmul.mubr.msk.f32.gmra.mrb[176].mxu1 %vm601_vm1, %v479_v28  ;;  %v481_v15 = vld [vmem:[%s14287_s0 + $0xe98] sm:$0xff]  ;;  %v194_v63 = vld [vmem:[%s14287_s0 + $0x5a0] sm:$0xff] }
 0x16d   :  { %14596 = vst [vmem:[#allocation93_spill] sm:$0xff] %v10230_v61  ;;  %14597 = vst [vmem:[#allocation94_spill] sm:$0xff] %v10233_v29  ;;  %7869 = vmatprep.mubr.msk.f32.mxu0 %vm601_vm1, %v192_v60  ;;  %8301 = vmatprep.mubr.msk.f32.mxu1 %vm601_vm1, %v480_v30  ;;  %v482_v28 = vld [vmem:[%s14287_s0 + $0xea0] sm:$0xff]  ;;  %v195_v31 = vld [vmem:[%s14287_s0 + $0x5a8] sm:$0xff] }
 0x16f   :  { %v10250_v29 = vpop.f32.mrb[72].mxu0  ;;  %v10252_v60 = vpop.f32.mrb[72].mxu1 }
 0x170   :  { %14598 = vst [vmem:[#allocation95_spill] sm:$0xff] %v10250_v29  ;;  %14599 = vst [vmem:[#allocation96_spill] sm:$0xff] %v10252_v60  ;;  %v10254_v30 = vpop.f32.mrb[73].mxu0  ;;  %7870 = vmatmul.mubr.msk.f32.gmra.mrb[178].mxu0 %vm601_vm1, %v193_v62  ;;  %v10257_v61 = vpop.f32.mrb[73].mxu1  ;;  %8302 = vmatmul.mubr.msk.f32.gmra.mrb[178].mxu1 %vm601_vm1, %v481_v15  ;;  %v483_v60 = vld [vmem:[%s14287_s0 + $0xea8] sm:$0xff]  ;;  %v196_v62 = vld [vmem:[%s14287_s0 + $0x5b0] sm:$0xff] }
 0x171   :  { %14600 = vst [vmem:[#allocation97_spill] sm:$0xff] %v10254_v30  ;;  %14601 = vst [vmem:[#allocation98_spill] sm:$0xff] %v10257_v61  ;;  %7872 = vmatprep.mubr.msk.f32.mxu0 %vm601_vm1, %v194_v63  ;;  %8304 = vmatprep.mubr.msk.f32.mxu1 %vm601_vm1, %v482_v28  ;;  %v484_v15 = vld [vmem:[%s14287_s0 + $0xeb0] sm:$0xff]  ;;  %v197_v29 = vld [vmem:[%s14287_s0 + $0x5b8] sm:$0xff] }
 0x173   :  { %v10274_v61 = vpop.f32.mrb[74].mxu0  ;;  %v10276_v63 = vpop.f32.mrb[74].mxu1 }
 0x174   :  { %14602 = vst [vmem:[#allocation99_spill] sm:$0xff] %v10274_v61  ;;  %14603 = vst [vmem:[#allocation100_spill] sm:$0xff] %v10276_v63  ;;  %v10278_v28 = vpop.f32.mrb[75].mxu0  ;;  %7873 = vmatmul.mubr.msk.f32.gmra.mrb[180].mxu0 %vm601_vm1, %v195_v31  ;;  %v10281_v30 = vpop.f32.mrb[75].mxu1  ;;  %8305 = vmatmul.mubr.msk.f32.gmra.mrb[180].mxu1 %vm601_vm1, %v483_v60  ;;  %v485_v63 = vld [vmem:[%s14287_s0 + $0xeb8] sm:$0xff]  ;;  %v198_v31 = vld [vmem:[%s14287_s0 + $0x5c0] sm:$0xff] }
 0x175   :  { %14604 = vst [vmem:[#allocation101_spill] sm:$0xff] %v10278_v28  ;;  %14605 = vst [vmem:[#allocation102_spill] sm:$0xff] %v10281_v30  ;;  %7875 = vmatprep.mubr.msk.f32.mxu0 %vm601_vm1, %v196_v62  ;;  %8307 = vmatprep.mubr.msk.f32.mxu1 %vm601_vm1, %v484_v15  ;;  %v486_v60 = vld [vmem:[%s14287_s0 + $0xec0] sm:$0xff]  ;;  %v199_v61 = vld [vmem:[%s14287_s0 + $0x5c8] sm:$0xff] }
 0x177   :  { %v10298_v30 = vpop.f32.mrb[76].mxu0  ;;  %v10300_v62 = vpop.f32.mrb[76].mxu1 }
 0x178   :  { %14606 = vst [vmem:[#allocation103_spill] sm:$0xff] %v10298_v30  ;;  %14607 = vst [vmem:[#allocation104_spill] sm:$0xff] %v10300_v62  ;;  %v10302_v15 = vpop.f32.mrb[77].mxu0  ;;  %7876 = vmatmul.mubr.msk.f32.gmra.mrb[182].mxu0 %vm601_vm1, %v197_v29  ;;  %v10305_v28 = vpop.f32.mrb[77].mxu1  ;;  %8308 = vmatmul.mubr.msk.f32.gmra.mrb[182].mxu1 %vm601_vm1, %v485_v63  ;;  %v487_v62 = vld [vmem:[%s14287_s0 + $0xec8] sm:$0xff]  ;;  %v200_v29 = vld [vmem:[%s14287_s0 + $0x5d0] sm:$0xff] }
 0x179   :  { %14608 = vst [vmem:[#allocation105_spill] sm:$0xff] %v10302_v15  ;;  %14609 = vst [vmem:[#allocation106_spill] sm:$0xff] %v10305_v28  ;;  %7878 = vmatprep.mubr.msk.f32.mxu0 %vm601_vm1, %v198_v31  ;;  %8310 = vmatprep.mubr.msk.f32.mxu1 %vm601_vm1, %v486_v60  ;;  %v488_v63 = vld [vmem:[%s14287_s0 + $0xed0] sm:$0xff]  ;;  %v201_v30 = vld [vmem:[%s14287_s0 + $0x5d8] sm:$0xff] }
 0x17b   :  { %v10322_v28 = vpop.f32.mrb[78].mxu0  ;;  %v10324_v31 = vpop.f32.mrb[78].mxu1 }
 0x17c   :  { %14610 = vst [vmem:[#allocation107_spill] sm:$0xff] %v10322_v28  ;;  %14611 = vst [vmem:[#allocation108_spill] sm:$0xff] %v10324_v31  ;;  %v10326_v60 = vpop.f32.mrb[79].mxu0  ;;  %7879 = vmatmul.mubr.msk.f32.gmra.mrb[184].mxu0 %vm601_vm1, %v199_v61  ;;  %v10329_v15 = vpop.f32.mrb[79].mxu1  ;;  %8311 = vmatmul.mubr.msk.f32.gmra.mrb[184].mxu1 %vm601_vm1, %v487_v62  ;;  %v489_v31 = vld [vmem:[%s14287_s0 + $0xed8] sm:$0xff]  ;;  %v202_v61 = vld [vmem:[%s14287_s0 + $0x5e0] sm:$0xff] }
 0x17d   :  { %14612 = vst [vmem:[#allocation109_spill] sm:$0xff] %v10326_v60  ;;  %14613 = vst [vmem:[#allocation110_spill] sm:$0xff] %v10329_v15  ;;  %7881 = vmatprep.mubr.msk.f32.mxu0 %vm601_vm1, %v200_v29  ;;  %8313 = vmatprep.mubr.msk.f32.mxu1 %vm601_vm1, %v488_v63  ;;  %v490_v62 = vld [vmem:[%s14287_s0 + $0xee0] sm:$0xff]  ;;  %v203_v28 = vld [vmem:[%s14287_s0 + $0x5e8] sm:$0xff] }
 0x17f   :  { %v10346_v15 = vpop.f32.mrb[80].mxu0  ;;  %v10348_v29 = vpop.f32.mrb[80].mxu1 }
 0x180   :  { %14614 = vst [vmem:[#allocation111_spill] sm:$0xff] %v10346_v15  ;;  %14615 = vst [vmem:[#allocation112_spill] sm:$0xff] %v10348_v29  ;;  %v10350_v63 = vpop.f32.mrb[81].mxu0  ;;  %7882 = vmatmul.mubr.msk.f32.gmra.mrb[186].mxu0 %vm601_vm1, %v201_v30  ;;  %v10353_v60 = vpop.f32.mrb[81].mxu1  ;;  %8314 = vmatmul.mubr.msk.f32.gmra.mrb[186].mxu1 %vm601_vm1, %v489_v31  ;;  %v491_v29 = vld [vmem:[%s14287_s0 + $0xee8] sm:$0xff]  ;;  %v204_v30 = vld [vmem:[%s14287_s0 + $0x5f0] sm:$0xff] }
 0x181   :  { %14616 = vst [vmem:[#allocation113_spill] sm:$0xff] %v10350_v63  ;;  %14617 = vst [vmem:[#allocation114_spill] sm:$0xff] %v10353_v60  ;;  %7884 = vmatprep.mubr.msk.f32.mxu0 %vm601_vm1, %v202_v61  ;;  %8316 = vmatprep.mubr.msk.f32.mxu1 %vm601_vm1, %v490_v62  ;;  %v492_v31 = vld [vmem:[%s14287_s0 + $0xef0] sm:$0xff]  ;;  %v205_v15 = vld [vmem:[%s14287_s0 + $0x5f8] sm:$0xff] }
 0x183   :  { %v10370_v60 = vpop.f32.mrb[82].mxu0  ;;  %v10372_v61 = vpop.f32.mrb[82].mxu1 }
 0x184   :  { %14618 = vst [vmem:[#allocation115_spill] sm:$0xff] %v10370_v60  ;;  %14619 = vst [vmem:[#allocation116_spill] sm:$0xff] %v10372_v61  ;;  %v10374_v62 = vpop.f32.mrb[83].mxu0  ;;  %7885 = vmatmul.mubr.msk.f32.gmra.mrb[188].mxu0 %vm601_vm1, %v203_v28  ;;  %v10377_v63 = vpop.f32.mrb[83].mxu1  ;;  %8317 = vmatmul.mubr.msk.f32.gmra.mrb[188].mxu1 %vm601_vm1, %v491_v29  ;;  %v493_v61 = vld [vmem:[%s14287_s0 + $0xef8] sm:$0xff]  ;;  %v206_v28 = vld [vmem:[%s14287_s0 + $0x600] sm:$0xff] }
 0x185   :  { %14620 = vst [vmem:[#allocation117_spill] sm:$0xff] %v10374_v62  ;;  %14621 = vst [vmem:[#allocation118_spill] sm:$0xff] %v10377_v63  ;;  %7887 = vmatprep.mubr.msk.f32.mxu0 %vm601_vm1, %v204_v30  ;;  %8319 = vmatprep.mubr.msk.f32.mxu1 %vm601_vm1, %v492_v31  ;;  %v494_v29 = vld [vmem:[%s14287_s0 + $0xf00] sm:$0xff]  ;;  %v207_v60 = vld [vmem:[%s14287_s0 + $0x608] sm:$0xff] }
 0x187   :  { %v10394_v63 = vpop.f32.mrb[84].mxu0  ;;  %v10396_v30 = vpop.f32.mrb[84].mxu1 }
 0x188   :  { %14622 = vst [vmem:[#allocation119_spill] sm:$0xff] %v10394_v63  ;;  %14623 = vst [vmem:[#allocation120_spill] sm:$0xff] %v10396_v30  ;;  %v10398_v31 = vpop.f32.mrb[85].mxu0  ;;  %7888 = vmatmul.mubr.msk.f32.gmra.mrb[190].mxu0 %vm601_vm1, %v205_v15  ;;  %v10401_v62 = vpop.f32.mrb[85].mxu1  ;;  %8320 = vmatmul.mubr.msk.f32.gmra.mrb[190].mxu1 %vm601_vm1, %v493_v61  ;;  %v495_v30 = vld [vmem:[%s14287_s0 + $0xf08] sm:$0xff]  ;;  %v208_v15 = vld [vmem:[%s14287_s0 + $0x610] sm:$0xff] }
 0x189   :  { %14624 = vst [vmem:[#allocation121_spill] sm:$0xff] %v10398_v31  ;;  %14625 = vst [vmem:[#allocation122_spill] sm:$0xff] %v10401_v62  ;;  %7890 = vmatprep.mubr.msk.f32.mxu0 %vm601_vm1, %v206_v28  ;;  %8322 = vmatprep.mubr.msk.f32.mxu1 %vm601_vm1, %v494_v29  ;;  %v496_v61 = vld [vmem:[%s14287_s0 + $0xf10] sm:$0xff]  ;;  %v209_v63 = vld [vmem:[%s14287_s0 + $0x618] sm:$0xff] }
 0x18b   :  { %v10418_v62 = vpop.f32.mrb[86].mxu0  ;;  %v10420_v28 = vpop.f32.mrb[86].mxu1 }
 0x18c   :  { %14626 = vst [vmem:[#allocation123_spill] sm:$0xff] %v10418_v62  ;;  %14627 = vst [vmem:[#allocation124_spill] sm:$0xff] %v10420_v28  ;;  %v10422_v29 = vpop.f32.mrb[87].mxu0  ;;  %7891 = vmatmul.mubr.msk.f32.gmra.mrb[192].mxu0 %vm601_vm1, %v207_v60  ;;  %v10425_v31 = vpop.f32.mrb[87].mxu1  ;;  %8323 = vmatmul.mubr.msk.f32.gmra.mrb[192].mxu1 %vm601_vm1, %v495_v30  ;;  %v497_v28 = vld [vmem:[%s14287_s0 + $0xf18] sm:$0xff]  ;;  %v210_v60 = vld [vmem:[%s14287_s0 + $0x620] sm:$0xff] }
 0x18d   :  { %14628 = vst [vmem:[#allocation125_spill] sm:$0xff] %v10422_v29  ;;  %14629 = vst [vmem:[#allocation126_spill] sm:$0xff] %v10425_v31  ;;  %7893 = vmatprep.mubr.msk.f32.mxu0 %vm601_vm1, %v208_v15  ;;  %8325 = vmatprep.mubr.msk.f32.mxu1 %vm601_vm1, %v496_v61  ;;  %v498_v30 = vld [vmem:[%s14287_s0 + $0xf20] sm:$0xff] }
 0x18e   :  { %v10455_v62 = vld [vmem:[%s14288_s2] ss:$0 sm:$0xff] }
 0x18f   :  { %v10442_v31 = vpop.f32.mrb[88].mxu0  ;;  %v10444_v15 = vpop.f32.mrb[88].mxu1  ;;  %v10535_v12 = vadd.f32 %v9434_v48, %v10455_v62  ;;  %v10551_v48 = vadd.f32 %v10455_v62, %v9438_v50 }
 0x190   :  { %14630 = vst [vmem:[#allocation127_spill] sm:$0xff] %v10442_v31  ;;  %14631 = vst [vmem:[#allocation128_spill] sm:$0xff] %v10444_v15  ;;  %v10446_v61 = vpop.f32.mrb[89].mxu0  ;;  %7894 = vmatmul.mubr.msk.f32.gmra.mrb[194].mxu0 %vm601_vm1, %v209_v63  ;;  %v10449_v29 = vpop.f32.mrb[89].mxu1  ;;  %8326 = vmatmul.mubr.msk.f32.gmra.mrb[194].mxu1 %vm601_vm1, %v497_v28  ;;  %v211_v15 = vld [vmem:[%s14287_s0 + $0x628] sm:$0xff]  ;;  %v212_v28 = vld [vmem:[%s14287_s0 + $0x630] sm:$0xff]  ;;  %v10481_v31 = vadd.f32 %v9388_v33, %v10455_v62 }
 0x191   :  { %14632 = vst [vmem:[#allocation129_spill] sm:$0xff] %v10446_v61  ;;  %14633 = vst [vmem:[#allocation130_spill] sm:$0xff] %v10449_v29  ;;  %7896 = vmatprep.mubr.msk.f32.mxu0 %vm601_vm1, %v210_v60  ;;  %8328 = vmatprep.mubr.msk.f32.mxu1 %vm601_vm1, %v498_v30  ;;  %v499_v63 = vld [vmem:[%s14287_s0 + $0xf28] sm:$0xff]  ;;  %v500_v29 = vld [vmem:[%s14287_s0 + $0xf30] sm:$0xff]  ;;  %v10477_v30 = vadd.f32 %v9386_v32, %v10455_v62  ;;  %v10495_v32 = vadd.f32 %v10455_v62, %v9393_v35 }
 0x192   :  { %v213_v33 = vld [vmem:[%s14287_s0 + $0x638] sm:$0xff]  ;;  %v10511_v35 = vadd.f32 %v9412_v41, %v10455_v62  ;;  %14642 = vst [vmem:[#allocation139_spill] sm:$0xff] %v10535_v12  ;;  %14644 = vst [vmem:[#allocation141_spill] sm:$0xff] %v10551_v48  ;;  %v10727_v48 = vadd.f32 %v9578_v36, %v10455_v62  ;;  %v10743_v36 = vadd.f32 %v10455_v62, %v9582_v38  ;;  %v14925_v12 = vld [vmem:[#allocation103_spill] sm:$0xff] }
 0x193   :  { %v10471_v61 = vpop.f32.mrb[90].mxu0  ;;  %v10473_v60 = vpop.f32.mrb[90].mxu1  ;;  %14639 = vst [vmem:[#allocation136_spill] sm:$0xff] %v10495_v32  ;;  %v506_v32 = vld [vmem:[%s14287_s0 + $0xf60] sm:$0xff] }
 0x194   :  { %14634 = vst [vmem:[#allocation131_spill] sm:$0xff] %v10471_v61  ;;  %14635 = vst [vmem:[#allocation132_spill] sm:$0xff] %v10473_v60  ;;  %v10483_v14 = vpop.f32.mrb[91].mxu0  ;;  %7897 = vmatmul.mubr.msk.f32.gmra.mrb[196].mxu0 %vm601_vm1, %v211_v15  ;;  %v10486_v13 = vpop.f32.mrb[91].mxu1  ;;  %8329 = vmatmul.mubr.msk.f32.gmra.mrb[196].mxu1 %vm601_vm1, %v499_v63  ;;  %v10491_v61 = vadd.f32 %v10455_v62, %v9390_v34  ;;  %v501_v15 = vld [vmem:[%s14287_s0 + $0xf38] sm:$0xff]  ;;  %v10507_v34 = vadd.f32 %v9410_v40, %v10455_v62  ;;  %v502_v63 = vld [vmem:[%s14287_s0 + $0xf40] sm:$0xff] }
 0x195   :  { %14636 = vst [vmem:[#allocation133_spill] sm:$0xff] %v10483_v14  ;;  %14637 = vst [vmem:[#allocation134_spill] sm:$0xff] %v10486_v13  ;;  %7899 = vmatprep.mubr.msk.f32.mxu0 %vm601_vm1, %v212_v28  ;;  %8331 = vmatprep.mubr.msk.f32.mxu1 %vm601_vm1, %v500_v29  ;;  %v214_v29 = vld [vmem:[%s14287_s0 + $0x640] sm:$0xff]  ;;  %v10521_v28 = vadd.f32 %v10455_v62, %v9414_v42  ;;  %v10525_v40 = vadd.f32 %v10455_v62, %v9417_v43  ;;  %v504_v14 = vld [vmem:[%s14287_s0 + $0xf50] sm:$0xff] }
 0x196   :  { %14638 = vst [vmem:[#allocation135_spill] sm:$0xff] %v10491_v61  ;;  %14640 = vst [vmem:[#allocation137_spill] sm:$0xff] %v10507_v34  ;;  %v10539_v42 = vadd.f32 %v9436_v49, %v10455_v62  ;;  %v10555_v49 = vadd.f32 %v10455_v62, %v9441_v51  ;;  %v10569_v51 = vadd.f32 %v9458_v56, %v10455_v62 }
 0x197   :  { %14641 = vst [vmem:[#allocation138_spill] sm:$0xff] %v10511_v35  ;;  %v10527_v13 = vpop.f32.mrb[92].mxu0  ;;  %v10529_v41 = vpop.f32.mrb[92].mxu1  ;;  %v10585_v56 = vadd.f32 %v10455_v62, %v9462_v58  ;;  %v10599_v60 = vadd.f32 %v9482_v0, %v10455_v62  ;;  %v10603_v58 = vadd.f32 %v9484_v1, %v10455_v62  ;;  %v10615_v0 = vadd.f32 %v10455_v62, %v9486_v2 }
 0x198   :  { %14643 = vst [vmem:[#allocation140_spill] sm:$0xff] %v10539_v42  ;;  %v10541_v47 = vpop.f32.mrb[93].mxu0  ;;  %7900 = vmatmul.mubr.msk.f32.gmra.mrb[198].mxu0 %vm601_vm1, %v213_v33  ;;  %v10544_v43 = vpop.f32.mrb[93].mxu1  ;;  %8332 = vmatmul.mubr.msk.f32.gmra.mrb[198].mxu1 %vm601_vm1, %v501_v15  ;;  %14645 = vst [vmem:[#allocation142_spill] sm:$0xff] %v10555_v49  ;;  %v215_v33 = vld [vmem:[%s14287_s0 + $0x648] sm:$0xff]  ;;  %v10619_v1 = vadd.f32 %v10455_v62, %v9489_v3  ;;  %v10633_v3 = vadd.f32 %v9506_v8, %v10455_v62  ;;  %v508_v49 = vld [vmem:[%s14287_s0 + $0xf70] sm:$0xff] }
 0x199   :  { %7902 = vmatprep.mubr.msk.f32.mxu0 %vm601_vm1, %v214_v29  ;;  %8334 = vmatprep.mubr.msk.f32.mxu1 %vm601_vm1, %v502_v63  ;;  %v503_v15 = vld [vmem:[%s14287_s0 + $0xf48] sm:$0xff]  ;;  %14646 = vst [vmem:[#allocation143_spill] sm:$0xff] %v10569_v51  ;;  %v10573_v29 = vadd.f32 %v9460_v57, %v10455_v62  ;;  %v216_v63 = vld [vmem:[%s14287_s0 + $0x650] sm:$0xff]  ;;  %14648 = vst [vmem:[#allocation145_spill] sm:$0xff] %v10585_v56  ;;  %v10589_v57 = vadd.f32 %v10455_v62, %v9465_v59 }
 0x19a   :  { %14650 = vst [vmem:[#allocation147_spill] sm:$0xff] %v10599_v60  ;;  %14651 = vst [vmem:[#allocation148_spill] sm:$0xff] %v10603_v58  ;;  %v10649_v8 = vadd.f32 %v10455_v62, %v9510_v10  ;;  %v10663_v61 = vadd.f32 %v9530_v16, %v10455_v62  ;;  %v10667_v10 = vadd.f32 %v9532_v17, %v10455_v62  ;;  %v14745_v58 = vld [vmem:[#allocation31_spill] sm:$0xff] }
 0x19b   :  { %14647 = vst [vmem:[#allocation144_spill] sm:$0xff] %v10573_v29  ;;  %14649 = vst [vmem:[#allocation146_spill] sm:$0xff] %v10589_v57  ;;  %v10591_v35 = vpop.f32.mrb[94].mxu0  ;;  %v10593_v34 = vpop.f32.mrb[94].mxu1  ;;  %v10679_v16 = vadd.f32 %v10455_v62, %v9534_v18  ;;  %v10683_v17 = vadd.f32 %v10455_v62, %v9537_v19  ;;  %v10697_v19 = vadd.f32 %v9554_v24, %v10455_v62  ;;  %v14755_v56 = vld [vmem:[#allocation35_spill] sm:$0xff] }
 0x19c   :  { %v10605_v50 = vpop.f32.mrb[95].mxu0  ;;  %7903 = vmatmul.mubr.msk.f32.gmra.mrb[200].mxu0 %vm601_vm1, %v215_v33  ;;  %v10608_v59 = vpop.f32.mrb[95].mxu1  ;;  %8335 = vmatmul.mubr.msk.f32.gmra.mrb[200].mxu1 %vm601_vm1, %v503_v15  ;;  %14652 = vst [vmem:[#allocation149_spill] sm:$0xff] %v10615_v0  ;;  %14653 = vst [vmem:[#allocation150_spill] sm:$0xff] %v10619_v1  ;;  %v217_v33 = vld [vmem:[%s14287_s0 + $0x658] sm:$0xff]  ;;  %v10713_v24 = vadd.f32 %v10455_v62, %v9558_v26  ;;  %v10731_v26 = vadd.f32 %v9580_v37, %v10455_v62  ;;  %v510_v1 = vld [vmem:[%s14287_s0 + $0xf80] sm:$0xff] }
 0x19d   :  { %7905 = vmatprep.mubr.msk.f32.mxu0 %vm601_vm1, %v216_v63  ;;  %8337 = vmatprep.mubr.msk.f32.mxu1 %vm601_vm1, %v504_v14  ;;  %v505_v15 = vld [vmem:[%s14287_s0 + $0xf58] sm:$0xff]  ;;  %14654 = vst [vmem:[#allocation151_spill] sm:$0xff] %v10633_v3  ;;  %v10637_v63 = vadd.f32 %v9508_v9, %v10455_v62  ;;  %v218_v14 = vld [vmem:[%s14287_s0 + $0x660] sm:$0xff]  ;;  %14656 = vst [vmem:[#allocation153_spill] sm:$0xff] %v10649_v8  ;;  %v10653_v9 = vadd.f32 %v10455_v62, %v9513_v11 }
 0x19e   :  { %14658 = vst [vmem:[#allocation155_spill] sm:$0xff] %v10663_v61  ;;  %14659 = vst [vmem:[#allocation156_spill] sm:$0xff] %v10667_v10  ;;  %v10747_v37 = vadd.f32 %v10455_v62, %v9585_v39  ;;  %v10761_v39 = vadd.f32 %v9602_v52, %v10455_v62  ;;  %v10777_v52 = vadd.f32 %v10455_v62, %v9606_v54  ;;  %v14727_v10 = vld [vmem:[#allocation23_spill] sm:$0xff] }
 0x19f   :  { %14655 = vst [vmem:[#allocation152_spill] sm:$0xff] %v10637_v63  ;;  %14657 = vst [vmem:[#allocation154_spill] sm:$0xff] %v10653_v9  ;;  %v10655_v29 = vpop.f32.mrb[96].mxu0  ;;  %v10657_v51 = vpop.f32.mrb[96].mxu1  ;;  %v10791_v0 = vadd.f32 %v9626_v4, %v10455_v62  ;;  %v10795_v54 = vadd.f32 %v9628_v5, %v10455_v62  ;;  %v10807_v4 = vadd.f32 %v10455_v62, %v9630_v6  ;;  %v14735_v8 = vld [vmem:[#allocation27_spill] sm:$0xff] }
 0x1a0   :  { %v10669_v2 = vpop.f32.mrb[97].mxu0  ;;  %7906 = vmatmul.mubr.msk.f32.gmra.mrb[202].mxu0 %vm601_vm1, %v217_v33  ;;  %v10672_v11 = vpop.f32.mrb[97].mxu1  ;;  %8338 = vmatmul.mubr.msk.f32.gmra.mrb[202].mxu1 %vm601_vm1, %v505_v15  ;;  %14660 = vst [vmem:[#allocation157_spill] sm:$0xff] %v10679_v16  ;;  %14661 = vst [vmem:[#allocation158_spill] sm:$0xff] %v10683_v17  ;;  %v219_v33 = vld [vmem:[%s14287_s0 + $0x668] sm:$0xff]  ;;  %v10811_v5 = vadd.f32 %v10455_v62, %v9633_v7  ;;  %v10825_v7 = vadd.f32 %v9650_v20, %v10455_v62  ;;  %v512_v17 = vld [vmem:[%s14287_s0 + $0xf90] sm:$0xff] }
 0x1a1   :  { %7908 = vmatprep.mubr.msk.f32.mxu0 %vm601_vm1, %v218_v14  ;;  %8340 = vmatprep.mubr.msk.f32.mxu1 %vm601_vm1, %v506_v32  ;;  %v507_v15 = vld [vmem:[%s14287_s0 + $0xf68] sm:$0xff]  ;;  %14662 = vst [vmem:[#allocation159_spill] sm:$0xff] %v10697_v19  ;;  %v10701_v14 = vadd.f32 %v9556_v25, %v10455_v62  ;;  %v220_v32 = vld [vmem:[%s14287_s0 + $0x670] sm:$0xff]  ;;  %14664 = vst [vmem:[#allocation161_spill] sm:$0xff] %v10713_v24  ;;  %v10717_v25 = vadd.f32 %v10455_v62, %v9561_v27 }
 0x1a2   :  { %14666 = vst [vmem:[#allocation163_spill] sm:$0xff] %v10727_v48  ;;  %14667 = vst [vmem:[#allocation164_spill] sm:$0xff] %v10731_v26  ;;  %v10841_v20 = vadd.f32 %v10455_v62, %v9654_v22  ;;  %v10855_v16 = vadd.f32 %v9674_v44, %v10455_v62  ;;  %v10859_v22 = vadd.f32 %v9676_v45, %v10455_v62  ;;  %v14711_v26 = vld [vmem:[#allocation15_spill] sm:$0xff] }
 0x1a3   :  { %14663 = vst [vmem:[#allocation160_spill] sm:$0xff] %v10701_v14  ;;  %14665 = vst [vmem:[#allocation162_spill] sm:$0xff] %v10717_v25  ;;  %v10719_v63 = vpop.f32.mrb[98].mxu0  ;;  %v10721_v3 = vpop.f32.mrb[98].mxu1  ;;  %v10871_v44 = vadd.f32 %v10455_v62, %v9678_v46  ;;  %v14697_v46 = vld [vmem:[#allocation8_spill] sm:$0xff]  ;;  %v14719_v24 = vld [vmem:[#allocation19_spill] sm:$0xff] }
 0x1a4   :  { %v10733_v18 = vpop.f32.mrb[99].mxu0  ;;  %7909 = vmatmul.mubr.msk.f32.gmra.mrb[204].mxu0 %vm601_vm1, %v219_v33  ;;  %v10736_v27 = vpop.f32.mrb[99].mxu1  ;;  %8341 = vmatmul.mubr.msk.f32.gmra.mrb[204].mxu1 %vm601_vm1, %v507_v15  ;;  %14668 = vst [vmem:[#allocation165_spill] sm:$0xff] %v10743_v36  ;;  %14669 = vst [vmem:[#allocation166_spill] sm:$0xff] %v10747_v37  ;;  %v221_v33 = vld [vmem:[%s14287_s0 + $0x678] sm:$0xff]  ;;  %v14687_v37 = vld [vmem:[#allocation3_spill] sm:$0xff] }
 0x1a5   :  { %7911 = vmatprep.mubr.msk.f32.mxu0 %vm601_vm1, %v220_v32  ;;  %8343 = vmatprep.mubr.msk.f32.mxu1 %vm601_vm1, %v508_v49  ;;  %v509_v15 = vld [vmem:[%s14287_s0 + $0xf78] sm:$0xff]  ;;  %14670 = vst [vmem:[#allocation167_spill] sm:$0xff] %v10761_v39  ;;  %v10765_v32 = vadd.f32 %v9604_v53, %v10455_v62  ;;  %v222_v49 = vld [vmem:[%s14287_s0 + $0x680] sm:$0xff]  ;;  %14672 = vst [vmem:[#allocation169_spill] sm:$0xff] %v10777_v52  ;;  %v10781_v53 = vadd.f32 %v10455_v62, %v9609_v55 }
 0x1a6   :  { %14674 = vst [vmem:[#allocation171_spill] sm:$0xff] %v10791_v0  ;;  %14675 = vst [vmem:[#allocation172_spill] sm:$0xff] %v10795_v54  ;;  %v14685_v54 = vld [vmem:[#allocation2_spill] sm:$0xff]  ;;  %v14695_v36 = vld [vmem:[#allocation7_spill] sm:$0xff] }
 0x1a7   :  { %14671 = vst [vmem:[#allocation168_spill] sm:$0xff] %v10765_v32  ;;  %14673 = vst [vmem:[#allocation170_spill] sm:$0xff] %v10781_v53  ;;  %v10783_v14 = vpop.f32.mrb[100].mxu0  ;;  %v10785_v19 = vpop.f32.mrb[100].mxu1  ;;  %v10875_v45 = vadd.f32 %v10455_v62, %v14685_v54  ;;  %v10889_v54 = vadd.f32 %v14687_v37, %v10455_v62  ;;  %v14703_v52 = vld [vmem:[#allocation11_spill] sm:$0xff] }
 0x1a8   :  { %v10797_v38 = vpop.f32.mrb[101].mxu0  ;;  %7912 = vmatmul.mubr.msk.f32.gmra.mrb[206].mxu0 %vm601_vm1, %v221_v33  ;;  %v10800_v55 = vpop.f32.mrb[101].mxu1  ;;  %8344 = vmatmul.mubr.msk.f32.gmra.mrb[206].mxu1 %vm601_vm1, %v509_v15  ;;  %14676 = vst [vmem:[#allocation173_spill] sm:$0xff] %v10807_v4  ;;  %14677 = vst [vmem:[#allocation174_spill] sm:$0xff] %v10811_v5  ;;  %v223_v33 = vld [vmem:[%s14287_s0 + $0x688] sm:$0xff]  ;;  %v514_v4 = vld [vmem:[%s14287_s0 + $0xfa0] sm:$0xff] }
 0x1a9   :  { %7914 = vmatprep.mubr.msk.f32.mxu0 %vm601_vm1, %v222_v49  ;;  %8346 = vmatprep.mubr.msk.f32.mxu1 %vm601_vm1, %v510_v1  ;;  %v511_v15 = vld [vmem:[%s14287_s0 + $0xf88] sm:$0xff]  ;;  %14678 = vst [vmem:[#allocation175_spill] sm:$0xff] %v10825_v7  ;;  %v10829_v49 = vadd.f32 %v9652_v21, %v10455_v62  ;;  %v224_v1 = vld [vmem:[%s14287_s0 + $0x690] sm:$0xff]  ;;  %14680 = vst [vmem:[#allocation177_spill] sm:$0xff] %v10841_v20  ;;  %v10845_v21 = vadd.f32 %v10455_v62, %v9657_v23 }
 0x1aa   :  { %14682 = vst [vmem:[#allocation179_spill] sm:$0xff] %v10855_v16  ;;  %14683 = vst [vmem:[#allocation180_spill] sm:$0xff] %v10859_v22  ;;  %v14693_v7 = vld [vmem:[#allocation6_spill] sm:$0xff]  ;;  %v10919_v20 = vadd.f32 %v14695_v36, %v10455_v62  ;;  %v14699_v22 = vld [vmem:[#allocation9_spill] sm:$0xff] }
 0x1ab   :  { %14679 = vst [vmem:[#allocation176_spill] sm:$0xff] %v10829_v49  ;;  %14681 = vst [vmem:[#allocation178_spill] sm:$0xff] %v10845_v21  ;;  %v10847_v32 = vpop.f32.mrb[102].mxu0  ;;  %v10849_v39 = vpop.f32.mrb[102].mxu1  ;;  %v14691_v49 = vld [vmem:[#allocation5_spill] sm:$0xff]  ;;  %v10935_v36 = vadd.f32 %v10455_v62, %v14699_v22  ;;  %v14701_v16 = vld [vmem:[#allocation10_spill] sm:$0xff] }
 0x1ac   :  { %v10861_v6 = vpop.f32.mrb[103].mxu0  ;;  %7915 = vmatmul.mubr.msk.f32.gmra.mrb[208].mxu0 %vm601_vm1, %v223_v33  ;;  %v10864_v23 = vpop.f32.mrb[103].mxu1  ;;  %8347 = vmatmul.mubr.msk.f32.gmra.mrb[208].mxu1 %vm601_vm1, %v511_v15  ;;  %14684 = vst [vmem:[#allocation181_spill] sm:$0xff] %v10871_v44  ;;  %14686 = vst [vmem:[#allocation2_spill] sm:$0xff] %v10875_v45  ;;  %v225_v33 = vld [vmem:[%s14287_s0 + $0x698] sm:$0xff]  ;;  %v10905_v37 = vadd.f32 %v10455_v62, %v14691_v49  ;;  %v10923_v49 = vadd.f32 %v14697_v46, %v10455_v62  ;;  %v516_v44 = vld [vmem:[%s14287_s0 + $0xfb0] sm:$0xff] }
 0x1ad   :  { %7917 = vmatprep.mubr.msk.f32.mxu0 %vm601_vm1, %v224_v1  ;;  %8349 = vmatprep.mubr.msk.f32.mxu1 %vm601_vm1, %v512_v17  ;;  %v513_v15 = vld [vmem:[%s14287_s0 + $0xf98] sm:$0xff]  ;;  %14688 = vst [vmem:[#allocation3_spill] sm:$0xff] %v10889_v54  ;;  %v14689_v1 = vld [vmem:[#allocation4_spill] sm:$0xff]  ;;  %v226_v17 = vld [vmem:[%s14287_s0 + $0x6a0] sm:$0xff]  ;;  %v10939_v46 = vadd.f32 %v10455_v62, %v14701_v16  ;;  %v10953_v16 = vadd.f32 %v14703_v52, %v10455_v62 }
 0x1ae   :  { %v10893_v5 = vadd.f32 %v14689_v1, %v10455_v62  ;;  %14692 = vst [vmem:[#allocation5_spill] sm:$0xff] %v10905_v37  ;;  %v10909_v1 = vadd.f32 %v10455_v62, %v14693_v7  ;;  %14696 = vst [vmem:[#allocation7_spill] sm:$0xff] %v10919_v20  ;;  %v14709_v54 = vld [vmem:[#allocation14_spill] sm:$0xff]  ;;  %v10983_v37 = vadd.f32 %v14711_v26, %v10455_v62  ;;  %v14713_v22 = vld [vmem:[#allocation16_spill] sm:$0xff] }
 0x1af   :  { %v10911_v0 = vpop.f32.mrb[104].mxu0  ;;  %v10913_v53 = vpop.f32.mrb[104].mxu1  ;;  %14698 = vst [vmem:[#allocation8_spill] sm:$0xff] %v10923_v49  ;;  %14700 = vst [vmem:[#allocation9_spill] sm:$0xff] %v10935_v36  ;;  %v14715_v49 = vld [vmem:[#allocation17_spill] sm:$0xff]  ;;  %v14717_v20 = vld [vmem:[#allocation18_spill] sm:$0xff] }
 0x1b0   :  { %14690 = vst [vmem:[#allocation4_spill] sm:$0xff] %v10893_v5  ;;  %14694 = vst [vmem:[#allocation6_spill] sm:$0xff] %v10909_v1  ;;  %v10925_v21 = vpop.f32.mrb[105].mxu0  ;;  %7918 = vmatmul.mubr.msk.f32.gmra.mrb[210].mxu0 %vm601_vm1, %v225_v33  ;;  %v10928_v7 = vpop.f32.mrb[105].mxu1  ;;  %8350 = vmatmul.mubr.msk.f32.gmra.mrb[210].mxu1 %vm601_vm1, %v513_v15  ;;  %v227_v33 = vld [vmem:[%s14287_s0 + $0x6a8] sm:$0xff]  ;;  %v14707_v5 = vld [vmem:[#allocation13_spill] sm:$0xff]  ;;  %v10999_v26 = vadd.f32 %v10455_v62, %v14715_v49 }
 0x1b1   :  { %14702 = vst [vmem:[#allocation10_spill] sm:$0xff] %v10939_v46  ;;  %7920 = vmatprep.mubr.msk.f32.mxu0 %vm601_vm1, %v226_v17  ;;  %8352 = vmatprep.mubr.msk.f32.mxu1 %vm601_vm1, %v514_v4  ;;  %v515_v15 = vld [vmem:[%s14287_s0 + $0xfa8] sm:$0xff]  ;;  %14704 = vst [vmem:[#allocation11_spill] sm:$0xff] %v10953_v16  ;;  %v14705_v17 = vld [vmem:[#allocation12_spill] sm:$0xff]  ;;  %v10969_v52 = vadd.f32 %v10455_v62, %v14707_v5  ;;  %v10987_v5 = vadd.f32 %v14713_v22, %v10455_v62 }
 0x1b2   :  { %v10957_v45 = vadd.f32 %v14705_v17, %v10455_v62  ;;  %v228_v4 = vld [vmem:[%s14287_s0 + $0x6b0] sm:$0xff]  ;;  %v10973_v17 = vadd.f32 %v10455_v62, %v14709_v54  ;;  %14712 = vst [vmem:[#allocation15_spill] sm:$0xff] %v10983_v37  ;;  %14716 = vst [vmem:[#allocation17_spill] sm:$0xff] %v10999_v26  ;;  %v11003_v22 = vadd.f32 %v10455_v62, %v14717_v20  ;;  %v518_v36 = vld [vmem:[%s14287_s0 + $0xfc0] sm:$0xff] }
 0x1b3   :  { %14708 = vst [vmem:[#allocation13_spill] sm:$0xff] %v10969_v52  ;;  %v10975_v48 = vpop.f32.mrb[106].mxu0  ;;  %v10977_v25 = vpop.f32.mrb[106].mxu1  ;;  %14714 = vst [vmem:[#allocation16_spill] sm:$0xff] %v10987_v5  ;;  %v11017_v20 = vadd.f32 %v14719_v24, %v10455_v62  ;;  %v14725_v16 = vld [vmem:[#allocation22_spill] sm:$0xff]  ;;  %v11047_v52 = vadd.f32 %v14727_v10, %v10455_v62  ;;  %v14729_v49 = vld [vmem:[#allocation24_spill] sm:$0xff] }
 0x1b4   :  { %14706 = vst [vmem:[#allocation12_spill] sm:$0xff] %v10957_v45  ;;  %14710 = vst [vmem:[#allocation14_spill] sm:$0xff] %v10973_v17  ;;  %v10989_v1 = vpop.f32.mrb[107].mxu0  ;;  %7921 = vmatmul.mubr.msk.f32.gmra.mrb[212].mxu0 %vm601_vm1, %v227_v33  ;;  %v10992_v54 = vpop.f32.mrb[107].mxu1  ;;  %8353 = vmatmul.mubr.msk.f32.gmra.mrb[212].mxu1 %vm601_vm1, %v515_v15  ;;  %v229_v33 = vld [vmem:[%s14287_s0 + $0x6b8] sm:$0xff]  ;;  %v14733_v37 = vld [vmem:[#allocation26_spill] sm:$0xff] }
 0x1b5   :  { %14718 = vst [vmem:[#allocation18_spill] sm:$0xff] %v11003_v22  ;;  %7923 = vmatprep.mubr.msk.f32.mxu0 %vm601_vm1, %v228_v4  ;;  %8355 = vmatprep.mubr.msk.f32.mxu1 %vm601_vm1, %v516_v44  ;;  %v517_v15 = vld [vmem:[%s14287_s0 + $0xfb8] sm:$0xff]  ;;  %14720 = vst [vmem:[#allocation19_spill] sm:$0xff] %v11017_v20  ;;  %v14721_v4 = vld [vmem:[#allocation20_spill] sm:$0xff] }
 0x1b6   :  { %v11021_v46 = vadd.f32 %v14721_v4, %v10455_v62  ;;  %v230_v44 = vld [vmem:[%s14287_s0 + $0x6c0] sm:$0xff]  ;;  %v14723_v45 = vld [vmem:[#allocation21_spill] sm:$0xff]  ;;  %v11037_v4 = vadd.f32 %v10455_v62, %v14725_v16  ;;  %14728 = vst [vmem:[#allocation23_spill] sm:$0xff] %v11047_v52  ;;  %v520_v26 = vld [vmem:[%s14287_s0 + $0xfd0] sm:$0xff] }
 0x1b7   :  { %v11033_v24 = vadd.f32 %v10455_v62, %v14723_v45  ;;  %v11039_v61 = vpop.f32.mrb[108].mxu0  ;;  %v11041_v9 = vpop.f32.mrb[108].mxu1  ;;  %v11051_v45 = vadd.f32 %v14729_v49, %v10455_v62  ;;  %v14731_v5 = vld [vmem:[#allocation25_spill] sm:$0xff]  ;;  %v11067_v49 = vadd.f32 %v10455_v62, %v14733_v37  ;;  %v11081_v37 = vadd.f32 %v14735_v8, %v10455_v62  ;;  %v14741_v20 = vld [vmem:[#allocation30_spill] sm:$0xff]  ;;  %v14765_v42 = vld [vmem:[#allocation39_spill] sm:$0xff] }
 0x1b8   :  { %14722 = vst [vmem:[#allocation20_spill] sm:$0xff] %v11021_v46  ;;  %14726 = vst [vmem:[#allocation22_spill] sm:$0xff] %v11037_v4  ;;  %v11053_v17 = vpop.f32.mrb[109].mxu0  ;;  %7924 = vmatmul.mubr.msk.f32.gmra.mrb[214].mxu0 %vm601_vm1, %v229_v33  ;;  %v11056_v16 = vpop.f32.mrb[109].mxu1  ;;  %8356 = vmatmul.mubr.msk.f32.gmra.mrb[214].mxu1 %vm601_vm1, %v517_v15  ;;  %v11063_v10 = vadd.f32 %v10455_v62, %v14731_v5  ;;  %v231_v33 = vld [vmem:[%s14287_s0 + $0x6c8] sm:$0xff]  ;;  %v14739_v46 = vld [vmem:[#allocation29_spill] sm:$0xff] }
 0x1b9   :  { %14724 = vst [vmem:[#allocation21_spill] sm:$0xff] %v11033_v24  ;;  %14730 = vst [vmem:[#allocation24_spill] sm:$0xff] %v11051_v45  ;;  %7926 = vmatprep.mubr.msk.f32.mxu0 %vm601_vm1, %v230_v44  ;;  %8358 = vmatprep.mubr.msk.f32.mxu1 %vm601_vm1, %v518_v36  ;;  %v519_v15 = vld [vmem:[%s14287_s0 + $0xfc8] sm:$0xff]  ;;  %v14737_v44 = vld [vmem:[#allocation28_spill] sm:$0xff]  ;;  %v11097_v8 = vadd.f32 %v10455_v62, %v14739_v46  ;;  %v11111_v24 = vadd.f32 %v14745_v58, %v10455_v62 }
 0x1ba   :  { %14732 = vst [vmem:[#allocation25_spill] sm:$0xff] %v11063_v10  ;;  %14734 = vst [vmem:[#allocation26_spill] sm:$0xff] %v11067_v49  ;;  %v11085_v22 = vadd.f32 %v14737_v44, %v10455_v62  ;;  %v232_v36 = vld [vmem:[%s14287_s0 + $0x6d0] sm:$0xff]  ;;  %v11101_v44 = vadd.f32 %v10455_v62, %v14741_v20  ;;  %v14751_v45 = vld [vmem:[#allocation33_spill] sm:$0xff] }
 0x1bb   :  { %14736 = vst [vmem:[#allocation27_spill] sm:$0xff] %v11081_v37  ;;  %14740 = vst [vmem:[#allocation29_spill] sm:$0xff] %v11097_v8  ;;  %v11103_v60 = vpop.f32.mrb[110].mxu0  ;;  %v11105_v57 = vpop.f32.mrb[110].mxu1  ;;  %v14747_v5 = vld [vmem:[#allocation32_spill] sm:$0xff]  ;;  %v11127_v58 = vadd.f32 %v10455_v62, %v14751_v45  ;;  %v14753_v52 = vld [vmem:[#allocation34_spill] sm:$0xff]  ;;  %v11175_v8 = vadd.f32 %v14765_v42, %v10455_v62 }
 0x1bc   :  { %14738 = vst [vmem:[#allocation28_spill] sm:$0xff] %v11085_v22  ;;  %14742 = vst [vmem:[#allocation30_spill] sm:$0xff] %v11101_v44  ;;  %v11115_v46 = vadd.f32 %v14747_v5, %v10455_v62  ;;  %v11117_v4 = vpop.f32.mrb[111].mxu0  ;;  %7927 = vmatmul.mubr.msk.f32.gmra.mrb[216].mxu0 %vm601_vm1, %v231_v33  ;;  %v11120_v20 = vpop.f32.mrb[111].mxu1  ;;  %8359 = vmatmul.mubr.msk.f32.gmra.mrb[216].mxu1 %vm601_vm1, %v519_v15  ;;  %v11131_v5 = vadd.f32 %v10455_v62, %v14753_v52  ;;  %v233_v33 = vld [vmem:[%s14287_s0 + $0x6d8] sm:$0xff]  ;;  %v522_v10 = vld [vmem:[%s14287_s0 + $0xfe0] sm:$0xff] }
 0x1bd   :  { %14743 = vst [vmem:[#allocation182_spill] sm:$0xff] %v11103_v60  ;;  %14744 = vst [vmem:[#allocation183_spill] sm:$0xff] %v11105_v57  ;;  %7929 = vmatprep.mubr.msk.f32.mxu0 %vm601_vm1, %v232_v36  ;;  %8361 = vmatprep.mubr.msk.f32.mxu1 %vm601_vm1, %v520_v26  ;;  %v521_v15 = vld [vmem:[%s14287_s0 + $0xfd8] sm:$0xff]  ;;  %v11145_v52 = vadd.f32 %v14755_v56, %v10455_v62  ;;  %v14757_v36 = vld [vmem:[#allocation36_spill] sm:$0xff] }
 0x1be   :  { %14746 = vst [vmem:[#allocation31_spill] sm:$0xff] %v11111_v24  ;;  %14748 = vst [vmem:[#allocation32_spill] sm:$0xff] %v11115_v46  ;;  %v11149_v49 = vadd.f32 %v14757_v36, %v10455_v62  ;;  %v234_v26 = vld [vmem:[%s14287_s0 + $0x6e0] sm:$0xff]  ;;  %v14759_v22 = vld [vmem:[#allocation37_spill] sm:$0xff] }
 0x1bf   :  { %14749 = vst [vmem:[#allocation184_spill] sm:$0xff] %v11117_v4  ;;  %14750 = vst [vmem:[#allocation185_spill] sm:$0xff] %v11120_v20  ;;  %v11161_v56 = vadd.f32 %v10455_v62, %v14759_v22  ;;  %v14761_v37 = vld [vmem:[#allocation38_spill] sm:$0xff]  ;;  %v11167_v20 = vpop.f32.mrb[112].mxu0  ;;  %v11169_v4 = vpop.f32.mrb[112].mxu1  ;;  %v14767_v45 = vld [vmem:[#allocation40_spill] sm:$0xff] }
 0x1c0   :  { %14752 = vst [vmem:[#allocation33_spill] sm:$0xff] %v11127_v58  ;;  %14754 = vst [vmem:[#allocation34_spill] sm:$0xff] %v11131_v5  ;;  %v11165_v36 = vadd.f32 %v10455_v62, %v14761_v37  ;;  %v11179_v22 = vadd.f32 %v14767_v45, %v10455_v62  ;;  %v11181_v44 = vpop.f32.mrb[113].mxu0  ;;  %7930 = vmatmul.mubr.msk.f32.gmra.mrb[218].mxu0 %vm601_vm1, %v233_v33  ;;  %v11184_v37 = vpop.f32.mrb[113].mxu1  ;;  %8362 = vmatmul.mubr.msk.f32.gmra.mrb[218].mxu1 %vm601_vm1, %v521_v15  ;;  %v14771_v46 = vld [vmem:[#allocation41_spill] sm:$0xff]  ;;  %v14773_v24 = vld [vmem:[#allocation42_spill] sm:$0xff] }
 0x1c1   :  { %14756 = vst [vmem:[#allocation35_spill] sm:$0xff] %v11145_v52  ;;  %14758 = vst [vmem:[#allocation36_spill] sm:$0xff] %v11149_v49  ;;  %v11191_v42 = vadd.f32 %v10455_v62, %v14771_v46  ;;  %v11195_v45 = vadd.f32 %v10455_v62, %v14773_v24  ;;  %7932 = vmatprep.mubr.msk.f32.mxu0 %vm601_vm1, %v234_v26  ;;  %8364 = vmatprep.mubr.msk.f32.mxu1 %vm601_vm1, %v522_v10  ;;  %v235_v33 = vld [vmem:[%s14287_s0 + $0x6e8] sm:$0xff]  ;;  %v14777_v26 = vld [vmem:[#allocation44_spill] sm:$0xff] }
 0x1c2   :  { %14760 = vst [vmem:[#allocation37_spill] sm:$0xff] %v11161_v56  ;;  %14762 = vst [vmem:[#allocation38_spill] sm:$0xff] %v11165_v36  ;;  %v523_v15 = vld [vmem:[%s14287_s0 + $0xfe8] sm:$0xff]  ;;  %v11213_v5 = vadd.f32 %v14777_v26, %v10455_v62  ;;  %v236_v10 = vld [vmem:[%s14287_s0 + $0x6f0] sm:$0xff] }
 0x1c3   :  { %14763 = vst [vmem:[#allocation186_spill] sm:$0xff] %v11167_v20  ;;  %14764 = vst [vmem:[#allocation187_spill] sm:$0xff] %v11169_v4  ;;  %v14775_v57 = vld [vmem:[#allocation43_spill] sm:$0xff]  ;;  %v524_v58 = vld [vmem:[%s14287_s0 + $0xff0] sm:$0xff] }
 0x1c4   :  { %14766 = vst [vmem:[#allocation39_spill] sm:$0xff] %v11175_v8  ;;  %14768 = vst [vmem:[#allocation40_spill] sm:$0xff] %v11179_v22  ;;  %v11209_v24 = vadd.f32 %v14775_v57, %v10455_v62  ;;  %v14779_v49 = vld [vmem:[#allocation45_spill] sm:$0xff]  ;;  %v14781_v52 = vld [vmem:[#allocation46_spill] sm:$0xff]  ;;  %7933 = vmatmul.mubr.msk.f32.gmra.mrb[220].mxu0 %vm601_vm1, %v235_v33  ;;  %8365 = vmatmul.mubr.msk.f32.gmra.mrb[220].mxu1 %vm601_vm1, %v523_v15 }
 0x1c5   :  { %14769 = vst [vmem:[#allocation188_spill] sm:$0xff] %v11181_v44  ;;  %14770 = vst [vmem:[#allocation189_spill] sm:$0xff] %v11184_v37  ;;  %v11225_v57 = vadd.f32 %v10455_v62, %v14779_v49  ;;  %v11229_v26 = vadd.f32 %v10455_v62, %v14781_v52  ;;  %v11231_v37 = vpop.f32.mrb[114].mxu0  ;;  %v11233_v44 = vpop.f32.mrb[114].mxu1  ;;  %v14785_v60 = vld [vmem:[#allocation47_spill] sm:$0xff]  ;;  %v14787_v46 = vld [vmem:[#allocation48_spill] sm:$0xff]  ;;  %7935 = vmatprep.mubr.msk.f32.mxu0 %vm601_vm1, %v236_v10  ;;  %8367 = vmatprep.mubr.msk.f32.mxu1 %vm601_vm1, %v524_v58 }
 0x1c6   :  { %14772 = vst [vmem:[#allocation41_spill] sm:$0xff] %v11191_v42  ;;  %14774 = vst [vmem:[#allocation42_spill] sm:$0xff] %v11195_v45  ;;  %v11239_v56 = vadd.f32 %v14785_v60, %v10455_v62  ;;  %v11243_v49 = vadd.f32 %v14787_v46, %v10455_v62  ;;  %v11245_v36 = vpop.f32.mrb[115].mxu0  ;;  %v11248_v52 = vpop.f32.mrb[115].mxu1  ;;  %v14791_v22 = vld [vmem:[#allocation49_spill] sm:$0xff]  ;;  %v14793_v8 = vld [vmem:[#allocation50_spill] sm:$0xff] }
 0x1c7   :  { %14776 = vst [vmem:[#allocation43_spill] sm:$0xff] %v11209_v24  ;;  %14778 = vst [vmem:[#allocation44_spill] sm:$0xff] %v11213_v5  ;;  %v11255_v60 = vadd.f32 %v10455_v62, %v14791_v22  ;;  %v11259_v46 = vadd.f32 %v10455_v62, %v14793_v8  ;;  %v237_v33 = vld [vmem:[%s14287_s0 + $0x6f8] sm:$0xff]  ;;  %v14795_v4 = vld [vmem:[#allocation51_spill] sm:$0xff] }
 0x1c8   :  { %14780 = vst [vmem:[#allocation45_spill] sm:$0xff] %v11225_v57  ;;  %14782 = vst [vmem:[#allocation46_spill] sm:$0xff] %v11229_v26  ;;  %v525_v15 = vld [vmem:[%s14287_s0 + $0xff8] sm:$0xff]  ;;  %v11273_v8 = vadd.f32 %v14795_v4, %v10455_v62  ;;  %v14797_v10 = vld [vmem:[#allocation52_spill] sm:$0xff]  ;;  %7936 = vmatmul.mubr.msk.f32.gmra.mrb[222].mxu0 %vm601_vm1, %v237_v33 }
 0x1c9   :  { %14783 = vst [vmem:[#allocation190_spill] sm:$0xff] %v11231_v37  ;;  %14784 = vst [vmem:[#allocation191_spill] sm:$0xff] %v11233_v44  ;;  %v11277_v45 = vadd.f32 %v14797_v10, %v10455_v62  ;;  %v238_v58 = vld [vmem:[%s14287_s0 + $0x700] sm:$0xff]  ;;  %v14799_v5 = vld [vmem:[#allocation53_spill] sm:$0xff]  ;;  %8368 = vmatmul.mubr.msk.f32.gmra.mrb[222].mxu1 %vm601_vm1, %v525_v15 }
 0x1ca   :  { %14786 = vst [vmem:[#allocation47_spill] sm:$0xff] %v11239_v56  ;;  %14788 = vst [vmem:[#allocation48_spill] sm:$0xff] %v11243_v49  ;;  %v526_v42 = vld [vmem:[%s14287_s0 + $0x1000] sm:$0xff]  ;;  %v11289_v4 = vadd.f32 %v10455_v62, %v14799_v5  ;;  %v14805_v20 = vld [vmem:[#allocation55_spill] sm:$0xff]  ;;  %7938 = vmatprep.mubr.msk.f32.mxu0 %vm601_vm1, %v238_v58 }
 0x1cb   :  { %14789 = vst [vmem:[#allocation192_spill] sm:$0xff] %v11245_v36  ;;  %14790 = vst [vmem:[#allocation193_spill] sm:$0xff] %v11248_v52  ;;  %v14801_v24 = vld [vmem:[#allocation54_spill] sm:$0xff]  ;;  %v11295_v52 = vpop.f32.mrb[116].mxu0  ;;  %v11297_v36 = vpop.f32.mrb[116].mxu1  ;;  %v11303_v57 = vadd.f32 %v14805_v20, %v10455_v62  ;;  %v14807_v22 = vld [vmem:[#allocation56_spill] sm:$0xff]  ;;  %8370 = vmatprep.mubr.msk.f32.mxu1 %vm601_vm1, %v526_v42 }
 0x1cc   :  { %14792 = vst [vmem:[#allocation49_spill] sm:$0xff] %v11255_v60  ;;  %14794 = vst [vmem:[#allocation50_spill] sm:$0xff] %v11259_v46  ;;  %v11293_v10 = vadd.f32 %v10455_v62, %v14801_v24  ;;  %v11307_v5 = vadd.f32 %v14807_v22, %v10455_v62  ;;  %v11309_v26 = vpop.f32.mrb[117].mxu0  ;;  %v11312_v24 = vpop.f32.mrb[117].mxu1  ;;  %v14811_v49 = vld [vmem:[#allocation57_spill] sm:$0xff]  ;;  %v14813_v56 = vld [vmem:[#allocation58_spill] sm:$0xff] }
 0x1cd   :  { %14796 = vst [vmem:[#allocation51_spill] sm:$0xff] %v11273_v8  ;;  %14798 = vst [vmem:[#allocation52_spill] sm:$0xff] %v11277_v45  ;;  %v11319_v20 = vadd.f32 %v10455_v62, %v14811_v49  ;;  %v11323_v22 = vadd.f32 %v10455_v62, %v14813_v56  ;;  %v239_v33 = vld [vmem:[%s14287_s0 + $0x708] sm:$0xff]  ;;  %v14817_v58 = vld [vmem:[#allocation60_spill] sm:$0xff] }
 0x1ce   :  { %14800 = vst [vmem:[#allocation53_spill] sm:$0xff] %v11289_v4  ;;  %14802 = vst [vmem:[#allocation54_spill] sm:$0xff] %v11293_v10  ;;  %v527_v15 = vld [vmem:[%s14287_s0 + $0x1008] sm:$0xff]  ;;  %v11341_v46 = vadd.f32 %v14817_v58, %v10455_v62  ;;  %v240_v42 = vld [vmem:[%s14287_s0 + $0x710] sm:$0xff]  ;;  %7939 = vmatmul.mubr.msk.f32.gmra.mrb[224].mxu0 %vm601_vm1, %v239_v33 }
 0x1cf   :  { %14803 = vst [vmem:[#allocation194_spill] sm:$0xff] %v11295_v52  ;;  %14804 = vst [vmem:[#allocation195_spill] sm:$0xff] %v11297_v36  ;;  %v14815_v44 = vld [vmem:[#allocation59_spill] sm:$0xff]  ;;  %v528_v60 = vld [vmem:[%s14287_s0 + $0x1010] sm:$0xff]  ;;  %8371 = vmatmul.mubr.msk.f32.gmra.mrb[224].mxu1 %vm601_vm1, %v527_v15  ;;  %7941 = vmatprep.mubr.msk.f32.mxu0 %vm601_vm1, %v240_v42 }
 0x1d0   :  { %14806 = vst [vmem:[#allocation55_spill] sm:$0xff] %v11303_v57  ;;  %14808 = vst [vmem:[#allocation56_spill] sm:$0xff] %v11307_v5  ;;  %v11337_v56 = vadd.f32 %v14815_v44, %v10455_v62  ;;  %v14819_v45 = vld [vmem:[#allocation61_spill] sm:$0xff]  ;;  %v14821_v8 = vld [vmem:[#allocation62_spill] sm:$0xff]  ;;  %8373 = vmatprep.mubr.msk.f32.mxu1 %vm601_vm1, %v528_v60 }
 0x1d1   :  { %14809 = vst [vmem:[#allocation196_spill] sm:$0xff] %v11309_v26  ;;  %14810 = vst [vmem:[#allocation197_spill] sm:$0xff] %v11312_v24  ;;  %v11353_v44 = vadd.f32 %v10455_v62, %v14819_v45  ;;  %v11357_v58 = vadd.f32 %v10455_v62, %v14821_v8  ;;  %v11359_v24 = vpop.f32.mrb[118].mxu0  ;;  %v11361_v26 = vpop.f32.mrb[118].mxu1  ;;  %v14825_v37 = vld [vmem:[#allocation63_spill] sm:$0xff]  ;;  %v14827_v49 = vld [vmem:[#allocation64_spill] sm:$0xff] }
 0x1d2   :  { %14812 = vst [vmem:[#allocation57_spill] sm:$0xff] %v11319_v20  ;;  %14814 = vst [vmem:[#allocation58_spill] sm:$0xff] %v11323_v22  ;;  %v11367_v4 = vadd.f32 %v14825_v37, %v10455_v62  ;;  %v11371_v45 = vadd.f32 %v14827_v49, %v10455_v62  ;;  %v11373_v10 = vpop.f32.mrb[119].mxu0  ;;  %v11376_v8 = vpop.f32.mrb[119].mxu1  ;;  %v14831_v5 = vld [vmem:[#allocation65_spill] sm:$0xff]  ;;  %v14833_v57 = vld [vmem:[#allocation66_spill] sm:$0xff] }
 0x1d3   :  { %14816 = vst [vmem:[#allocation59_spill] sm:$0xff] %v11337_v56  ;;  %14818 = vst [vmem:[#allocation60_spill] sm:$0xff] %v11341_v46  ;;  %v11383_v37 = vadd.f32 %v10455_v62, %v14831_v5  ;;  %v11387_v49 = vadd.f32 %v10455_v62, %v14833_v57  ;;  %v241_v33 = vld [vmem:[%s14287_s0 + $0x718] sm:$0xff]  ;;  %v14835_v36 = vld [vmem:[#allocation67_spill] sm:$0xff] }
 0x1d4   :  { %14820 = vst [vmem:[#allocation61_spill] sm:$0xff] %v11353_v44  ;;  %14822 = vst [vmem:[#allocation62_spill] sm:$0xff] %v11357_v58  ;;  %v529_v15 = vld [vmem:[%s14287_s0 + $0x1018] sm:$0xff]  ;;  %v11401_v57 = vadd.f32 %v14835_v36, %v10455_v62  ;;  %v14837_v42 = vld [vmem:[#allocation68_spill] sm:$0xff]  ;;  %7942 = vmatmul.mubr.msk.f32.gmra.mrb[226].mxu0 %vm601_vm1, %v241_v33 }
 0x1d5   :  { %14823 = vst [vmem:[#allocation198_spill] sm:$0xff] %v11359_v24  ;;  %14824 = vst [vmem:[#allocation199_spill] sm:$0xff] %v11361_v26  ;;  %v11405_v22 = vadd.f32 %v14837_v42, %v10455_v62  ;;  %v242_v60 = vld [vmem:[%s14287_s0 + $0x720] sm:$0xff]  ;;  %v14839_v46 = vld [vmem:[#allocation69_spill] sm:$0xff]  ;;  %8374 = vmatmul.mubr.msk.f32.gmra.mrb[226].mxu1 %vm601_vm1, %v529_v15 }
 0x1d6   :  { %14826 = vst [vmem:[#allocation63_spill] sm:$0xff] %v11367_v4  ;;  %14828 = vst [vmem:[#allocation64_spill] sm:$0xff] %v11371_v45  ;;  %v530_v20 = vld [vmem:[%s14287_s0 + $0x1020] sm:$0xff]  ;;  %v11417_v36 = vadd.f32 %v10455_v62, %v14839_v46  ;;  %v14845_v52 = vld [vmem:[#allocation71_spill] sm:$0xff]  ;;  %7944 = vmatprep.mubr.msk.f32.mxu0 %vm601_vm1, %v242_v60 }
 0x1d7   :  { %14829 = vst [vmem:[#allocation200_spill] sm:$0xff] %v11373_v10  ;;  %14830 = vst [vmem:[#allocation201_spill] sm:$0xff] %v11376_v8  ;;  %v14841_v56 = vld [vmem:[#allocation70_spill] sm:$0xff]  ;;  %v11423_v8 = vpop.f32.mrb[120].mxu0  ;;  %v11425_v10 = vpop.f32.mrb[120].mxu1  ;;  %v11431_v44 = vadd.f32 %v14845_v52, %v10455_v62  ;;  %v14847_v5 = vld [vmem:[#allocation72_spill] sm:$0xff]  ;;  %8376 = vmatprep.mubr.msk.f32.mxu1 %vm601_vm1, %v530_v20 }
 0x1d8   :  { %14832 = vst [vmem:[#allocation65_spill] sm:$0xff] %v11383_v37  ;;  %14834 = vst [vmem:[#allocation66_spill] sm:$0xff] %v11387_v49  ;;  %v11421_v42 = vadd.f32 %v10455_v62, %v14841_v56  ;;  %v11435_v46 = vadd.f32 %v14847_v5, %v10455_v62  ;;  %v11437_v58 = vpop.f32.mrb[121].mxu0  ;;  %v11440_v56 = vpop.f32.mrb[121].mxu1  ;;  %v14851_v45 = vld [vmem:[#allocation73_spill] sm:$0xff]  ;;  %v14853_v4 = vld [vmem:[#allocation74_spill] sm:$0xff] }
 0x1d9   :  { %14836 = vst [vmem:[#allocation67_spill] sm:$0xff] %v11401_v57  ;;  %14838 = vst [vmem:[#allocation68_spill] sm:$0xff] %v11405_v22  ;;  %v11447_v52 = vadd.f32 %v10455_v62, %v14851_v45  ;;  %v11451_v5 = vadd.f32 %v10455_v62, %v14853_v4  ;;  %v243_v33 = vld [vmem:[%s14287_s0 + $0x728] sm:$0xff]  ;;  %v14857_v60 = vld [vmem:[#allocation76_spill] sm:$0xff] }
 0x1da   :  { %14840 = vst [vmem:[#allocation69_spill] sm:$0xff] %v11417_v36  ;;  %14842 = vst [vmem:[#allocation70_spill] sm:$0xff] %v11421_v42  ;;  %v531_v15 = vld [vmem:[%s14287_s0 + $0x1028] sm:$0xff]  ;;  %v11469_v49 = vadd.f32 %v14857_v60, %v10455_v62  ;;  %v244_v20 = vld [vmem:[%s14287_s0 + $0x730] sm:$0xff]  ;;  %7945 = vmatmul.mubr.msk.f32.gmra.mrb[228].mxu0 %vm601_vm1, %v243_v33 }
 0x1db   :  { %14843 = vst [vmem:[#allocation202_spill] sm:$0xff] %v11423_v8  ;;  %14844 = vst [vmem:[#allocation203_spill] sm:$0xff] %v11425_v10  ;;  %v14855_v26 = vld [vmem:[#allocation75_spill] sm:$0xff]  ;;  %v532_v37 = vld [vmem:[%s14287_s0 + $0x1030] sm:$0xff]  ;;  %8377 = vmatmul.mubr.msk.f32.gmra.mrb[228].mxu1 %vm601_vm1, %v531_v15  ;;  %7947 = vmatprep.mubr.msk.f32.mxu0 %vm601_vm1, %v244_v20 }
 0x1dc   :  { %14846 = vst [vmem:[#allocation71_spill] sm:$0xff] %v11431_v44  ;;  %14848 = vst [vmem:[#allocation72_spill] sm:$0xff] %v11435_v46  ;;  %v11465_v4 = vadd.f32 %v14855_v26, %v10455_v62  ;;  %v14859_v22 = vld [vmem:[#allocation77_spill] sm:$0xff]  ;;  %v14861_v57 = vld [vmem:[#allocation78_spill] sm:$0xff]  ;;  %8379 = vmatprep.mubr.msk.f32.mxu1 %vm601_vm1, %v532_v37 }
 0x1dd   :  { %14849 = vst [vmem:[#allocation204_spill] sm:$0xff] %v11437_v58  ;;  %14850 = vst [vmem:[#allocation205_spill] sm:$0xff] %v11440_v56  ;;  %v11481_v26 = vadd.f32 %v10455_v62, %v14859_v22  ;;  %v11485_v60 = vadd.f32 %v10455_v62, %v14861_v57  ;;  %v11487_v56 = vpop.f32.mrb[122].mxu0  ;;  %v11489_v58 = vpop.f32.mrb[122].mxu1  ;;  %v14865_v24 = vld [vmem:[#allocation79_spill] sm:$0xff]  ;;  %v14867_v45 = vld [vmem:[#allocation80_spill] sm:$0xff] }
 0x1de   :  { %14852 = vst [vmem:[#allocation73_spill] sm:$0xff] %v11447_v52  ;;  %14854 = vst [vmem:[#allocation74_spill] sm:$0xff] %v11451_v5  ;;  %v11495_v36 = vadd.f32 %v14865_v24, %v10455_v62  ;;  %v11499_v22 = vadd.f32 %v14867_v45, %v10455_v62  ;;  %v11501_v42 = vpop.f32.mrb[123].mxu0  ;;  %v11504_v57 = vpop.f32.mrb[123].mxu1  ;;  %v14871_v46 = vld [vmem:[#allocation81_spill] sm:$0xff]  ;;  %v14873_v44 = vld [vmem:[#allocation82_spill] sm:$0xff] }
 0x1df   :  { %14856 = vst [vmem:[#allocation75_spill] sm:$0xff] %v11465_v4  ;;  %14858 = vst [vmem:[#allocation76_spill] sm:$0xff] %v11469_v49  ;;  %v11511_v24 = vadd.f32 %v10455_v62, %v14871_v46  ;;  %v11515_v45 = vadd.f32 %v10455_v62, %v14873_v44  ;;  %v245_v33 = vld [vmem:[%s14287_s0 + $0x738] sm:$0xff]  ;;  %v14875_v10 = vld [vmem:[#allocation83_spill] sm:$0xff]  ;;  %v11551_v52 = vpop.f32.mrb[124].mxu0 }
 0x1e0   :  { %14860 = vst [vmem:[#allocation77_spill] sm:$0xff] %v11481_v26  ;;  %14862 = vst [vmem:[#allocation78_spill] sm:$0xff] %v11485_v60  ;;  %v533_v15 = vld [vmem:[%s14287_s0 + $0x1038] sm:$0xff]  ;;  %v11529_v44 = vadd.f32 %v14875_v10, %v10455_v62  ;;  %v14877_v20 = vld [vmem:[#allocation84_spill] sm:$0xff]  ;;  %v11565_v60 = vpop.f32.mrb[125].mxu0  ;;  %7948 = vmatmul.mubr.msk.f32.gmra.mrb[230].mxu0 %vm601_vm1, %v245_v33 }
 0x1e1   :  { %14863 = vst [vmem:[#allocation206_spill] sm:$0xff] %v11487_v56  ;;  %14864 = vst [vmem:[#allocation207_spill] sm:$0xff] %v11489_v58  ;;  %v246_v37 = vld [vmem:[%s14287_s0 + $0x740] sm:$0xff]  ;;  %v14879_v49 = vld [vmem:[#allocation85_spill] sm:$0xff]  ;;  %8380 = vmatmul.mubr.msk.f32.gmra.mrb[230].mxu1 %vm601_vm1, %v533_v15 }
 0x1e2   :  { %14866 = vst [vmem:[#allocation79_spill] sm:$0xff] %v11495_v36  ;;  %14868 = vst [vmem:[#allocation80_spill] sm:$0xff] %v11499_v22  ;;  %v534_v5 = vld [vmem:[%s14287_s0 + $0x1040] sm:$0xff]  ;;  %v11545_v10 = vadd.f32 %v10455_v62, %v14879_v49  ;;  %v14885_v8 = vld [vmem:[#allocation87_spill] sm:$0xff]  ;;  %7950 = vmatprep.mubr.msk.f32.mxu0 %vm601_vm1, %v246_v37 }
 0x1e3   :  { %14869 = vst [vmem:[#allocation208_spill] sm:$0xff] %v11501_v42  ;;  %14870 = vst [vmem:[#allocation209_spill] sm:$0xff] %v11504_v57  ;;  %v11533_v57 = vadd.f32 %v14877_v20, %v10455_v62  ;;  %v14881_v4 = vld [vmem:[#allocation86_spill] sm:$0xff]  ;;  %v11553_v42 = vpop.f32.mrb[124].mxu1  ;;  %v11559_v26 = vadd.f32 %v14885_v8, %v10455_v62  ;;  %v14887_v46 = vld [vmem:[#allocation88_spill] sm:$0xff]  ;;  %8382 = vmatprep.mubr.msk.f32.mxu1 %vm601_vm1, %v534_v5 }
 0x1e4   :  { %14872 = vst [vmem:[#allocation81_spill] sm:$0xff] %v11511_v24  ;;  %14874 = vst [vmem:[#allocation82_spill] sm:$0xff] %v11515_v45  ;;  %v11549_v20 = vadd.f32 %v10455_v62, %v14881_v4  ;;  %v11563_v49 = vadd.f32 %v14887_v46, %v10455_v62  ;;  %v11568_v4 = vpop.f32.mrb[125].mxu1  ;;  %v247_v33 = vld [vmem:[%s14287_s0 + $0x748] sm:$0xff]  ;;  %v14897_v37 = vld [vmem:[#allocation92_spill] sm:$0xff]  ;;  %v11615_v45 = vpop.f32.mrb[126].mxu0 }
 0x1e5   :  { %14876 = vst [vmem:[#allocation83_spill] sm:$0xff] %v11529_v44  ;;  %14878 = vst [vmem:[#allocation84_spill] sm:$0xff] %v11533_v57  ;;  %v535_v15 = vld [vmem:[%s14287_s0 + $0x1048] sm:$0xff]  ;;  %v248_v5 = vld [vmem:[%s14287_s0 + $0x750] sm:$0xff]  ;;  %v11617_v24 = vpop.f32.mrb[126].mxu1  ;;  %7951 = vmatmul.mubr.msk.f32.gmra.mrb[232].mxu0 %vm601_vm1, %v247_v33 }
 0x1e6   :  { %14880 = vst [vmem:[#allocation85_spill] sm:$0xff] %v11545_v10  ;;  %14882 = vst [vmem:[#allocation86_spill] sm:$0xff] %v11549_v20  ;;  %v14895_v58 = vld [vmem:[#allocation91_spill] sm:$0xff]  ;;  %v14899_v57 = vld [vmem:[#allocation93_spill] sm:$0xff]  ;;  %v11629_v20 = vpop.f32.mrb[127].mxu0  ;;  %8383 = vmatmul.mubr.msk.f32.gmra.mrb[232].mxu1 %vm601_vm1, %v535_v15  ;;  %7953 = vmatprep.mubr.msk.f32.mxu0 %vm601_vm1, %v248_v5 }
 0x1e7   :  { %14883 = vst [vmem:[#allocation210_spill] sm:$0xff] %v11551_v52  ;;  %14884 = vst [vmem:[#allocation211_spill] sm:$0xff] %v11553_v42  ;;  %v14891_v42 = vld [vmem:[#allocation89_spill] sm:$0xff]  ;;  %v14893_v52 = vld [vmem:[#allocation90_spill] sm:$0xff] }
 0x1e8   :  { %14886 = vst [vmem:[#allocation87_spill] sm:$0xff] %v11559_v26  ;;  %14888 = vst [vmem:[#allocation88_spill] sm:$0xff] %v11563_v49  ;;  %v11575_v8 = vadd.f32 %v10455_v62, %v14891_v42  ;;  %v11579_v46 = vadd.f32 %v10455_v62, %v14893_v52  ;;  %v11593_v52 = vadd.f32 %v14895_v58, %v10455_v62  ;;  %v14901_v44 = vld [vmem:[#allocation94_spill] sm:$0xff]  ;;  %v14905_v56 = vld [vmem:[#allocation95_spill] sm:$0xff] }
 0x1e9   :  { %14889 = vst [vmem:[#allocation212_spill] sm:$0xff] %v11565_v60  ;;  %14890 = vst [vmem:[#allocation213_spill] sm:$0xff] %v11568_v4  ;;  %v11597_v4 = vadd.f32 %v14897_v37, %v10455_v62  ;;  %v536_v60 = vld [vmem:[%s14287_s0 + $0x1050] sm:$0xff]  ;;  %v11609_v58 = vadd.f32 %v10455_v62, %v14899_v57  ;;  %v11613_v37 = vadd.f32 %v10455_v62, %v14901_v44  ;;  %v11632_v44 = vpop.f32.mrb[127].mxu1  ;;  %v249_v15 = vld [vmem:[%s14287_s0 + $0x758] sm:$0xff] }
 0x1ea   :  { %14892 = vst [vmem:[#allocation89_spill] sm:$0xff] %v11575_v8  ;;  %14894 = vst [vmem:[#allocation90_spill] sm:$0xff] %v11579_v46  ;;  %v11623_v10 = vadd.f32 %v14905_v56, %v10455_v62  ;;  %v14907_v42 = vld [vmem:[#allocation96_spill] sm:$0xff]  ;;  %v11640_v56 = vld [vmem:[%s14288_s2] ss:$0 sm:$0xff]  ;;  %8385 = vmatprep.mubr.msk.f32.mxu1 %vm601_vm1, %v536_v60  ;;  %v11684_v46 = vpop.f32.mrb[128].mxu0  ;;  %7954 = vmatmul.mubr.msk.f32.gmra.mrb[234].mxu0 %vm601_vm1, %v249_v15 }
 0x1eb   :  { %14896 = vst [vmem:[#allocation91_spill] sm:$0xff] %v11593_v52  ;;  %14898 = vst [vmem:[#allocation92_spill] sm:$0xff] %v11597_v4  ;;  %v11627_v57 = vadd.f32 %v14907_v42, %v10455_v62  ;;  %v14913_v42 = vld [vmem:[#allocation98_spill] sm:$0xff]  ;;  %v537_v36 = vld [vmem:[%s14287_s0 + $0x1058] sm:$0xff]  ;;  %v11686_v8 = vpop.f32.mrb[128].mxu1  ;;  %v11692_v22 = vadd.f32 %v11640_v56, %v14925_v12 }
 0x1ec   :  { %14900 = vst [vmem:[#allocation93_spill] sm:$0xff] %v11609_v58  ;;  %14902 = vst [vmem:[#allocation94_spill] sm:$0xff] %v11613_v37  ;;  %v11648_v33 = vadd.f32 %v11640_v56, %v14913_v42  ;;  %v250_v60 = vld [vmem:[%s14287_s0 + $0x760] sm:$0xff]  ;;  %v14919_v4 = vld [vmem:[#allocation101_spill] sm:$0xff]  ;;  %v11698_v37 = vpop.f32.mrb[129].mxu0  ;;  %8386 = vmatmul.mubr.msk.f32.gmra.mrb[234].mxu1 %vm601_vm1, %v537_v36 }
 0x1ed   :  { %14903 = vst [vmem:[#allocation214_spill] sm:$0xff] %v11615_v45  ;;  %14904 = vst [vmem:[#allocation215_spill] sm:$0xff] %v11617_v24  ;;  %v14911_v24 = vld [vmem:[#allocation97_spill] sm:$0xff]  ;;  %v538_v45 = vld [vmem:[%s14287_s0 + $0x1060] sm:$0xff]  ;;  %7956 = vmatprep.mubr.msk.f32.mxu0 %vm601_vm1, %v250_v60 }
 0x1ee   :  { %14906 = vst [vmem:[#allocation95_spill] sm:$0xff] %v11623_v10  ;;  %14908 = vst [vmem:[#allocation96_spill] sm:$0xff] %v11627_v57  ;;  %v11644_v62 = vadd.f32 %v11640_v56, %v14911_v24  ;;  %v14921_v52 = vld [vmem:[#allocation102_spill] sm:$0xff]  ;;  %v14927_v24 = vld [vmem:[#allocation104_spill] sm:$0xff]  ;;  %8388 = vmatprep.mubr.msk.f32.mxu1 %vm601_vm1, %v538_v45 }
 0x1ef   :  { %14909 = vst [vmem:[#allocation216_spill] sm:$0xff] %v11629_v20  ;;  %14910 = vst [vmem:[#allocation217_spill] sm:$0xff] %v11632_v44  ;;  %v14915_v44 = vld [vmem:[#allocation99_spill] sm:$0xff]  ;;  %v14917_v20 = vld [vmem:[#allocation100_spill] sm:$0xff] }
 0x1f0   :  { %14912 = vst [vmem:[#allocation97_spill] sm:$0xff] %v11644_v62  ;;  %14914 = vst [vmem:[#allocation98_spill] sm:$0xff] %v11648_v33  ;;  %v11662_v42 = vadd.f32 %v11640_v56, %v14915_v44  ;;  %v11666_v5 = vadd.f32 %v11640_v56, %v14917_v20  ;;  %v11678_v44 = vadd.f32 %v11640_v56, %v14919_v4  ;;  %v251_v36 = vld [vmem:[%s14287_s0 + $0x768] sm:$0xff]  ;;  %v252_v45 = vld [vmem:[%s14287_s0 + $0x770] sm:$0xff]  ;;  %v11748_v33 = vpop.f32.mrb[130].mxu0 }
 0x1f1   :  { %v11682_v20 = vadd.f32 %v11640_v56, %v14921_v52  ;;  %14923 = vst [vmem:[#allocation218_spill] sm:$0xff] %v11684_v46  ;;  %14924 = vst [vmem:[#allocation219_spill] sm:$0xff] %v11686_v8  ;;  %v11696_v4 = vadd.f32 %v11640_v56, %v14927_v24  ;;  %v11701_v52 = vpop.f32.mrb[129].mxu1  ;;  %v14931_v8 = vld [vmem:[#allocation105_spill] sm:$0xff]  ;;  %v14933_v46 = vld [vmem:[#allocation106_spill] sm:$0xff]  ;;  %7957 = vmatmul.mubr.msk.f32.gmra.mrb[236].mxu0 %vm601_vm1, %v251_v36 }
 0x1f2   :  { %14916 = vst [vmem:[#allocation99_spill] sm:$0xff] %v11662_v42  ;;  %14918 = vst [vmem:[#allocation100_spill] sm:$0xff] %v11666_v5  ;;  %v11708_v12 = vadd.f32 %v11640_v56, %v14931_v8  ;;  %v11712_v24 = vadd.f32 %v11640_v56, %v14933_v46  ;;  %v539_v15 = vld [vmem:[%s14287_s0 + $0x1068] sm:$0xff]  ;;  %v14939_v5 = vld [vmem:[#allocation109_spill] sm:$0xff]  ;;  %v11750_v62 = vpop.f32.mrb[130].mxu1  ;;  %7959 = vmatprep.mubr.msk.f32.mxu0 %vm601_vm1, %v252_v45 }
 0x1f3   :  { %14920 = vst [vmem:[#allocation101_spill] sm:$0xff] %v11678_v44  ;;  %14922 = vst [vmem:[#allocation102_spill] sm:$0xff] %v11682_v20  ;;  %v14935_v49 = vld [vmem:[#allocation107_spill] sm:$0xff]  ;;  %v14941_v42 = vld [vmem:[#allocation110_spill] sm:$0xff]  ;;  %v11762_v20 = vpop.f32.mrb[131].mxu0  ;;  %8389 = vmatmul.mubr.msk.f32.gmra.mrb[236].mxu1 %vm601_vm1, %v539_v15 }
 0x1f4   :  { %14926 = vst [vmem:[#allocation103_spill] sm:$0xff] %v11692_v22  ;;  %14928 = vst [vmem:[#allocation104_spill] sm:$0xff] %v11696_v4  ;;  %v11726_v46 = vadd.f32 %v11640_v56, %v14935_v49  ;;  %v11742_v49 = vadd.f32 %v11640_v56, %v14939_v5  ;;  %v14945_v58 = vld [vmem:[#allocation111_spill] sm:$0xff]  ;;  %v14947_v8 = vld [vmem:[#allocation112_spill] sm:$0xff] }
 0x1f5   :  { %14929 = vst [vmem:[#allocation220_spill] sm:$0xff] %v11698_v37  ;;  %14930 = vst [vmem:[#allocation221_spill] sm:$0xff] %v11701_v52  ;;  %v14937_v52 = vld [vmem:[#allocation108_spill] sm:$0xff]  ;;  %v11756_v26 = vadd.f32 %v11640_v56, %v14945_v58  ;;  %v11760_v5 = vadd.f32 %v11640_v56, %v14947_v8  ;;  %v253_v36 = vld [vmem:[%s14287_s0 + $0x778] sm:$0xff] }
 0x1f6   :  { %14932 = vst [vmem:[#allocation105_spill] sm:$0xff] %v11708_v12  ;;  %14934 = vst [vmem:[#allocation106_spill] sm:$0xff] %v11712_v24  ;;  %v11730_v60 = vadd.f32 %v11640_v56, %v14937_v52  ;;  %v540_v37 = vld [vmem:[%s14287_s0 + $0x1070] sm:$0xff]  ;;  %v11746_v52 = vadd.f32 %v11640_v56, %v14941_v42  ;;  %v11765_v42 = vpop.f32.mrb[131].mxu1  ;;  %v541_v15 = vld [vmem:[%s14287_s0 + $0x1078] sm:$0xff]  ;;  %v11812_v24 = vpop.f32.mrb[132].mxu0  ;;  %7960 = vmatmul.mubr.msk.f32.gmra.mrb[238].mxu0 %vm601_vm1, %v253_v36 }
 0x1f7   :  { %14936 = vst [vmem:[#allocation107_spill] sm:$0xff] %v11726_v46  ;;  %14940 = vst [vmem:[#allocation109_spill] sm:$0xff] %v11742_v49  ;;  %8391 = vmatprep.mubr.msk.f32.mxu1 %vm601_vm1, %v540_v37  ;;  %v14955_v57 = vld [vmem:[#allocation115_spill] sm:$0xff]  ;;  %v254_v37 = vld [vmem:[%s14287_s0 + $0x780] sm:$0xff]  ;;  %v11814_v12 = vpop.f32.mrb[132].mxu1 }
 0x1f8   :  { %14938 = vst [vmem:[#allocation108_spill] sm:$0xff] %v11730_v60  ;;  %14942 = vst [vmem:[#allocation110_spill] sm:$0xff] %v11746_v52  ;;  %v14959_v60 = vld [vmem:[#allocation117_spill] sm:$0xff]  ;;  %v14960_v46 = vld [vmem:[#allocation118_spill] sm:$0xff]  ;;  %v11826_v52 = vpop.f32.mrb[133].mxu0  ;;  %8392 = vmatmul.mubr.msk.f32.gmra.mrb[238].mxu1 %vm601_vm1, %v541_v15  ;;  %7962 = vmatprep.mubr.msk.f32.mxu0 %vm601_vm1, %v254_v37 }
 0x1f9   :  { %14943 = vst [vmem:[#allocation222_spill] sm:$0xff] %v11748_v33  ;;  %14944 = vst [vmem:[#allocation223_spill] sm:$0xff] %v11750_v62  ;;  %v14951_v62 = vld [vmem:[#allocation113_spill] sm:$0xff]  ;;  %v14953_v33 = vld [vmem:[#allocation114_spill] sm:$0xff] }
 0x1fa   :  { %14946 = vst [vmem:[#allocation111_spill] sm:$0xff] %v11756_v26  ;;  %14948 = vst [vmem:[#allocation112_spill] sm:$0xff] %v11760_v5  ;;  %v11772_v58 = vadd.f32 %v11640_v56, %v14951_v62  ;;  %v11776_v8 = vadd.f32 %v11640_v56, %v14953_v33  ;;  %v11790_v33 = vadd.f32 %v11640_v56, %v14955_v57  ;;  %v14964_v44 = vld [vmem:[#allocation119_spill] sm:$0xff]  ;;  %v14966_v62 = vld [vmem:[#allocation120_spill] sm:$0xff] }
 0x1fb   :  { %14949 = vst [vmem:[#allocation224_spill] sm:$0xff] %v11762_v20  ;;  %14950 = vst [vmem:[#allocation225_spill] sm:$0xff] %v11765_v42  ;;  %v14957_v42 = vld [vmem:[#allocation116_spill] sm:$0xff]  ;;  %v542_v20 = vld [vmem:[%s14287_s0 + $0x1080] sm:$0xff]  ;;  %v11806_v57 = vadd.f32 %v11640_v56, %v14959_v60  ;;  %v11820_v10 = vadd.f32 %v11640_v56, %v14964_v44  ;;  %v11824_v60 = vadd.f32 %v11640_v56, %v14966_v62 }
 0x1fc   :  { %14952 = vst [vmem:[#allocation113_spill] sm:$0xff] %v11772_v58  ;;  %14954 = vst [vmem:[#allocation114_spill] sm:$0xff] %v11776_v8  ;;  %v11794_v45 = vadd.f32 %v11640_v56, %v14957_v42  ;;  %v11810_v42 = vadd.f32 %v11640_v56, %v14960_v46  ;;  %v11829_v46 = vpop.f32.mrb[133].mxu1  ;;  %8394 = vmatprep.mubr.msk.f32.mxu1 %vm601_vm1, %v542_v20  ;;  %v255_v36 = vld [vmem:[%s14287_s0 + $0x788] sm:$0xff]  ;;  %v256_v20 = vld [vmem:[%s14287_s0 + $0x790] sm:$0xff]  ;;  %v11876_v8 = vpop.f32.mrb[134].mxu0  ;;  %v11948_v26 = vadd.f32 %v11640_v56, %v10527_v13 }
 0x1fd   :  { %14956 = vst [vmem:[#allocation115_spill] sm:$0xff] %v11790_v33  ;;  %14962 = vst [vmem:[#allocation118_spill] sm:$0xff] %v11812_v24  ;;  %v14972_v24 = vld [vmem:[#allocation122_spill] sm:$0xff]  ;;  %v543_v15 = vld [vmem:[%s14287_s0 + $0x1088] sm:$0xff]  ;;  %v11878_v58 = vpop.f32.mrb[134].mxu1  ;;  %7963 = vmatmul.mubr.msk.f32.gmra.mrb[240].mxu0 %vm601_vm1, %v255_v36  ;;  %v11964_v13 = vadd.f32 %v11640_v56, %v10541_v47 }
 0x1fe   :  { %14958 = vst [vmem:[#allocation116_spill] sm:$0xff] %v11794_v45  ;;  %14961 = vst [vmem:[#allocation117_spill] sm:$0xff] %v11810_v42  ;;  %v11840_v62 = vadd.f32 %v11640_v56, %v14972_v24  ;;  %v14974_v4 = vld [vmem:[#allocation123_spill] sm:$0xff]  ;;  %v14978_v45 = vld [vmem:[#allocation125_spill] sm:$0xff]  ;;  %v11890_v42 = vpop.f32.mrb[135].mxu0  ;;  %8395 = vmatmul.mubr.msk.f32.gmra.mrb[240].mxu1 %vm601_vm1, %v543_v15  ;;  %7965 = vmatprep.mubr.msk.f32.mxu0 %vm601_vm1, %v256_v20 }
 0x1ff   :  { %14963 = vst [vmem:[#allocation226_spill] sm:$0xff] %v11814_v12  ;;  %14965 = vst [vmem:[#allocation119_spill] sm:$0xff] %v11820_v10  ;;  %v14970_v12 = vld [vmem:[#allocation121_spill] sm:$0xff]  ;;  %v11854_v24 = vadd.f32 %v11640_v56, %v14974_v4  ;;  %v11870_v4 = vadd.f32 %v11640_v56, %v14978_v45  ;;  %v14979_v33 = vld [vmem:[#allocation126_spill] sm:$0xff]  ;;  %v12012_v10 = vadd.f32 %v11640_v56, %v10655_v29 }
 0x200   :  { %14967 = vst [vmem:[#allocation120_spill] sm:$0xff] %v11824_v60  ;;  %14968 = vst [vmem:[#allocation227_spill] sm:$0xff] %v11826_v52  ;;  %v11836_v44 = vadd.f32 %v11640_v56, %v14970_v12  ;;  %v544_v52 = vld [vmem:[%s14287_s0 + $0x1090] sm:$0xff]  ;;  %v14982_v49 = vld [vmem:[#allocation127_spill] sm:$0xff]  ;;  %v12028_v29 = vadd.f32 %v11640_v56, %v10669_v2 }
 0x201   :  { %14969 = vst [vmem:[#allocation228_spill] sm:$0xff] %v11829_v46  ;;  %14973 = vst [vmem:[#allocation122_spill] sm:$0xff] %v11840_v62  ;;  %v14976_v46 = vld [vmem:[#allocation124_spill] sm:$0xff]  ;;  %v11884_v22 = vadd.f32 %v11640_v56, %v14982_v49  ;;  %8397 = vmatprep.mubr.msk.f32.mxu1 %vm601_vm1, %v544_v52  ;;  %v257_v36 = vld [vmem:[%s14287_s0 + $0x798] sm:$0xff]  ;;  %v11940_v62 = vpop.f32.mrb[136].mxu0 }
 0x202   :  { %14971 = vst [vmem:[#allocation121_spill] sm:$0xff] %v11836_v44  ;;  %14975 = vst [vmem:[#allocation123_spill] sm:$0xff] %v11854_v24  ;;  %v11858_v37 = vadd.f32 %v11640_v56, %v14976_v46  ;;  %v11874_v46 = vadd.f32 %v11640_v56, %v14979_v33  ;;  %v14983_v12 = vld [vmem:[#allocation128_spill] sm:$0xff]  ;;  %v11893_v33 = vpop.f32.mrb[135].mxu1  ;;  %v545_v15 = vld [vmem:[%s14287_s0 + $0x1098] sm:$0xff]  ;;  %7966 = vmatmul.mubr.msk.f32.gmra.mrb[242].mxu0 %vm601_vm1, %v257_v36 }
 0x203   :  { %14980 = vst [vmem:[#allocation125_spill] sm:$0xff] %v11876_v8  ;;  %14981 = vst [vmem:[#allocation126_spill] sm:$0xff] %v11878_v58  ;;  %v11888_v45 = vadd.f32 %v11640_v56, %v14983_v12  ;;  %v14986_v58 = vld [vmem:[#allocation129_spill] sm:$0xff]  ;;  %v14987_v8 = vld [vmem:[#allocation130_spill] sm:$0xff]  ;;  %v11942_v44 = vpop.f32.mrb[136].mxu1  ;;  %8398 = vmatmul.mubr.msk.f32.gmra.mrb[242].mxu1 %vm601_vm1, %v545_v15 }
 0x204   :  { %14977 = vst [vmem:[#allocation124_spill] sm:$0xff] %v11858_v37  ;;  %14984 = vst [vmem:[#allocation127_spill] sm:$0xff] %v11890_v42  ;;  %v11900_v49 = vadd.f32 %v11640_v56, %v14986_v58  ;;  %v11904_v12 = vadd.f32 %v11640_v56, %v14987_v8  ;;  %v14988_v5 = vld [vmem:[#allocation131_spill] sm:$0xff]  ;;  %v258_v52 = vld [vmem:[%s14287_s0 + $0x7a0] sm:$0xff]  ;;  %v11954_v58 = vpop.f32.mrb[137].mxu0 }
 0x205   :  { %14985 = vst [vmem:[#allocation128_spill] sm:$0xff] %v11893_v33  ;;  %v11918_v8 = vadd.f32 %v11640_v56, %v14988_v5  ;;  %v14989_v33 = vld [vmem:[#allocation132_spill] sm:$0xff]  ;;  %v546_v42 = vld [vmem:[%s14287_s0 + $0x10a0] sm:$0xff]  ;;  %v14990_v37 = vld [vmem:[#allocation133_spill] sm:$0xff]  ;;  %7968 = vmatprep.mubr.msk.f32.mxu0 %vm601_vm1, %v258_v52  ;;  %v11986_v52 = vadd.f32 %v11640_v56, %v10593_v34  ;;  %v12002_v34 = vadd.f32 %v11640_v56, %v10608_v59 }
 0x206   :  { %v11922_v20 = vadd.f32 %v11640_v56, %v14989_v33  ;;  %v11934_v5 = vadd.f32 %v11640_v56, %v14990_v37  ;;  %v14991_v24 = vld [vmem:[#allocation134_spill] sm:$0xff]  ;;  %14992 = vst [vmem:[#allocation129_spill] sm:$0xff] %v11940_v62  ;;  %14993 = vst [vmem:[#allocation130_spill] sm:$0xff] %v11942_v44  ;;  %v11952_v37 = vadd.f32 %v11640_v56, %v10529_v41  ;;  %8400 = vmatprep.mubr.msk.f32.mxu1 %vm601_vm1, %v546_v42  ;;  %v259_v36 = vld [vmem:[%s14287_s0 + $0x7a8] sm:$0xff] }
 0x207   :  { %v11938_v33 = vadd.f32 %v11640_v56, %v14991_v24  ;;  %14994 = vst [vmem:[#allocation131_spill] sm:$0xff] %v11954_v58  ;;  %v11957_v24 = vpop.f32.mrb[137].mxu1  ;;  %v11968_v41 = vadd.f32 %v11640_v56, %v10544_v43  ;;  %v547_v15 = vld [vmem:[%s14287_s0 + $0x10a8] sm:$0xff]  ;;  %v11982_v43 = vadd.f32 %v11640_v56, %v10591_v35  ;;  %v260_v42 = vld [vmem:[%s14287_s0 + $0x7b0] sm:$0xff]  ;;  %v11998_v35 = vadd.f32 %v11640_v56, %v10605_v50  ;;  %v550_v44 = vld [vmem:[%s14287_s0 + $0x10c0] sm:$0xff] }
 0x208   :  { %14995 = vst [vmem:[#allocation132_spill] sm:$0xff] %v11957_v24  ;;  %v548_v60 = vld [vmem:[%s14287_s0 + $0x10b0] sm:$0xff]  ;;  %v12004_v24 = vpop.f32.mrb[138].mxu0  ;;  %v12006_v58 = vpop.f32.mrb[138].mxu1  ;;  %v12016_v50 = vadd.f32 %v11640_v56, %v10657_v51  ;;  %7969 = vmatmul.mubr.msk.f32.gmra.mrb[244].mxu0 %vm601_vm1, %v259_v36  ;;  %8401 = vmatmul.mubr.msk.f32.gmra.mrb[244].mxu1 %vm601_vm1, %v547_v15  ;;  %v12032_v51 = vadd.f32 %v11640_v56, %v10672_v11  ;;  %v261_v36 = vld [vmem:[%s14287_s0 + $0x7b8] sm:$0xff] }
 0x209   :  { %14996 = vst [vmem:[#allocation133_spill] sm:$0xff] %v12004_v24  ;;  %14997 = vst [vmem:[#allocation134_spill] sm:$0xff] %v12006_v58  ;;  %v12018_v47 = vpop.f32.mrb[139].mxu0  ;;  %v12021_v59 = vpop.f32.mrb[139].mxu1  ;;  %7971 = vmatprep.mubr.msk.f32.mxu0 %vm601_vm1, %v260_v42  ;;  %8403 = vmatprep.mubr.msk.f32.mxu1 %vm601_vm1, %v548_v60  ;;  %v549_v15 = vld [vmem:[%s14287_s0 + $0x10b8] sm:$0xff]  ;;  %v12046_v11 = vadd.f32 %v11640_v56, %v10719_v63  ;;  %v12050_v42 = vadd.f32 %v11640_v56, %v10721_v3  ;;  %v262_v60 = vld [vmem:[%s14287_s0 + $0x7c0] sm:$0xff] }
 0x20a   :  { %14998 = vst [vmem:[#allocation229_spill] sm:$0xff] %v12018_v47  ;;  %14999 = vst [vmem:[#allocation230_spill] sm:$0xff] %v12021_v59  ;;  %v12062_v63 = vadd.f32 %v11640_v56, %v10733_v18  ;;  %v12066_v3 = vadd.f32 %v11640_v56, %v10736_v27  ;;  %v12068_v59 = vpop.f32.mrb[140].mxu0  ;;  %v12070_v47 = vpop.f32.mrb[140].mxu1  ;;  %v12076_v62 = vadd.f32 %v11640_v56, %v10783_v14  ;;  %v552_v58 = vld [vmem:[%s14287_s0 + $0x10d0] sm:$0xff] }
 0x20b   :  { %15000 = vst [vmem:[#allocation231_spill] sm:$0xff] %v12068_v59  ;;  %15001 = vst [vmem:[#allocation232_spill] sm:$0xff] %v12070_v47  ;;  %v12080_v18 = vadd.f32 %v11640_v56, %v10785_v19  ;;  %v12082_v2 = vpop.f32.mrb[141].mxu0  ;;  %v12085_v27 = vpop.f32.mrb[141].mxu1  ;;  %v12092_v14 = vadd.f32 %v11640_v56, %v10797_v38  ;;  %v12096_v19 = vadd.f32 %v11640_v56, %v10800_v55  ;;  %v554_v47 = vld [vmem:[%s14287_s0 + $0x10e0] sm:$0xff] }
 0x20c   :  { %15002 = vst [vmem:[#allocation233_spill] sm:$0xff] %v12082_v2  ;;  %7972 = vmatmul.mubr.msk.f32.gmra.mrb[246].mxu0 %vm601_vm1, %v261_v36  ;;  %15003 = vst [vmem:[#allocation234_spill] sm:$0xff] %v12085_v27  ;;  %8404 = vmatmul.mubr.msk.f32.gmra.mrb[246].mxu1 %vm601_vm1, %v549_v15  ;;  %v263_v36 = vld [vmem:[%s14287_s0 + $0x7c8] sm:$0xff]  ;;  %v12110_v55 = vadd.f32 %v11640_v56, %v10847_v32  ;;  %v12126_v32 = vadd.f32 %v11640_v56, %v10861_v6  ;;  %v12132_v27 = vpop.f32.mrb[142].mxu0  ;;  %v12134_v2 = vpop.f32.mrb[142].mxu1 }
 0x20d   :  { %7974 = vmatprep.mubr.msk.f32.mxu0 %vm601_vm1, %v262_v60  ;;  %8406 = vmatprep.mubr.msk.f32.mxu1 %vm601_vm1, %v550_v44  ;;  %v551_v15 = vld [vmem:[%s14287_s0 + $0x10c8] sm:$0xff]  ;;  %v12114_v60 = vadd.f32 %v11640_v56, %v10849_v39  ;;  %v264_v44 = vld [vmem:[%s14287_s0 + $0x7d0] sm:$0xff]  ;;  %v12130_v39 = vadd.f32 %v11640_v56, %v10864_v23  ;;  %15008 = vst [vmem:[#allocation239_spill] sm:$0xff] %v12132_v27  ;;  %15009 = vst [vmem:[#allocation240_spill] sm:$0xff] %v12134_v2  ;;  %v12146_v38 = vpop.f32.mrb[143].mxu0  ;;  %v12149_v23 = vpop.f32.mrb[143].mxu1 }
 0x20e   :  { %15004 = vst [vmem:[#allocation235_spill] sm:$0xff] %v12110_v55  ;;  %15006 = vst [vmem:[#allocation237_spill] sm:$0xff] %v12126_v32  ;;  %v12140_v24 = vadd.f32 %v11640_v56, %v10911_v0  ;;  %v12144_v6 = vadd.f32 %v11640_v56, %v10913_v53  ;;  %v12156_v0 = vadd.f32 %v11640_v56, %v10925_v21 }
 0x20f   :  { %15005 = vst [vmem:[#allocation236_spill] sm:$0xff] %v12114_v60  ;;  %15007 = vst [vmem:[#allocation238_spill] sm:$0xff] %v12130_v39  ;;  %v12160_v53 = vadd.f32 %v11640_v56, %v10928_v7  ;;  %v12174_v7 = vadd.f32 %v11640_v56, %v10975_v48  ;;  %v12190_v48 = vadd.f32 %v11640_v56, %v10989_v1 }
 0x210   :  { %15010 = vst [vmem:[#allocation241_spill] sm:$0xff] %v12140_v24  ;;  %15011 = vst [vmem:[#allocation242_spill] sm:$0xff] %v12144_v6  ;;  %7975 = vmatmul.mubr.msk.f32.gmra.mrb[248].mxu0 %vm601_vm1, %v263_v36  ;;  %8407 = vmatmul.mubr.msk.f32.gmra.mrb[248].mxu1 %vm601_vm1, %v551_v15  ;;  %v265_v36 = vld [vmem:[%s14287_s0 + $0x7d8] sm:$0xff] }
 0x211   :  { %15012 = vst [vmem:[#allocation243_spill] sm:$0xff] %v12146_v38  ;;  %15013 = vst [vmem:[#allocation244_spill] sm:$0xff] %v12149_v23  ;;  %7977 = vmatprep.mubr.msk.f32.mxu0 %vm601_vm1, %v264_v44  ;;  %8409 = vmatprep.mubr.msk.f32.mxu1 %vm601_vm1, %v552_v58  ;;  %v553_v15 = vld [vmem:[%s14287_s0 + $0x10d8] sm:$0xff]  ;;  %v12178_v44 = vadd.f32 %v11640_v56, %v10977_v25  ;;  %v266_v58 = vld [vmem:[%s14287_s0 + $0x7e0] sm:$0xff]  ;;  %v12194_v25 = vadd.f32 %v11640_v56, %v10992_v54  ;;  %v7820_v23 = vpop.f32.mrb[144].mxu0  ;;  %v8252_v38 = vpop.f32.mrb[144].mxu1 }
 0x212   :  { %15014 = vst [vmem:[#allocation245_spill] sm:$0xff] %v12156_v0  ;;  %15015 = vst [vmem:[#allocation246_spill] sm:$0xff] %v12160_v53  ;;  %v3126_v60 = vadd.f32 %v11640_v56, %v7820_v23  ;;  %v4566_v21 = vadd.f32 %v11640_v56, %v8252_v38  ;;  %v3120_v32 = vpop.f32.mrb[145].mxu0  ;;  %v4560_v59 = vpop.f32.mrb[145].mxu1  ;;  %v267_v38 = vld [vmem:[%s14287_s0 + $0x7e8] sm:$0xff] }
 0x213   :  { %15016 = vst [vmem:[#allocation247_spill] sm:$0xff] %v12174_v7  ;;  %15017 = vst [vmem:[#allocation248_spill] sm:$0xff] %v12178_v44  ;;  %v3121_v39 = vadd.f32 %v11640_v56, %v3120_v32  ;;  %v4561_v2 = vadd.f32 %v11640_v56, %v4560_v59  ;;  %v555_v23 = vld [vmem:[%s14287_s0 + $0x10e8] sm:$0xff]  ;;  %v268_v59 = vld [vmem:[%s14287_s0 + $0x7f0] sm:$0xff]  ;;  %v7823_v0 = vpop.f32.mrb[146].mxu0 }
 0x214   :  { %15018 = vst [vmem:[#allocation249_spill] sm:$0xff] %v12190_v48  ;;  %15019 = vst [vmem:[#allocation250_spill] sm:$0xff] %v12194_v25  ;;  %7978 = vmatmul.mubr.msk.f32.gmra.mrb[250].mxu0 %vm601_vm1, %v265_v36  ;;  %8410 = vmatmul.mubr.msk.f32.gmra.mrb[250].mxu1 %vm601_vm1, %v553_v15  ;;  %v5424_v54 = vmax.f32 %v3126_v60, 0.0  ;;  %v5712_v32 = vmax.f32 %v4566_v21, 0.0  ;;  %v8255_v36 = vpop.f32.mrb[146].mxu1  ;;  %v15020_v15 = vmax.f32 %v10477_v30, 0.0  ;;  %v3136_v7 = vadd.f32 %v11640_v56, %v7823_v0 }
 0x215   :  { %7980 = vmatprep.mubr.msk.f32.mxu0 %vm601_vm1, %v266_v58  ;;  %8412 = vmatprep.mubr.msk.f32.mxu1 %vm601_vm1, %v554_v47  ;;  %v556_v47 = vld [vmem:[%s14287_s0 + $0x10f0] sm:$0xff]  ;;  %v5423_v27 = vmax.f32 %v3121_v39, 0.0  ;;  %v5711_v53 = vmax.f32 %v4561_v2, 0.0  ;;  %v15021_v21 = vmax.f32 %v10481_v31, 0.0  ;;  %v4576_v6 = vadd.f32 %v11640_v56, %v8255_v36  ;;  %v3130_v24 = vpop.f32.mrb[147].mxu0  ;;  %v4570_v58 = vpop.f32.mrb[147].mxu1 }
 0x216   :  { %v5856_v60 = vmax.f32 %v15020_v15, %v5424_v54  ;;  %v15022_v48 = vld [vmem:[#allocation135_spill] sm:$0xff]  ;;  %v15024_v2 = vld [vmem:[#allocation136_spill] sm:$0xff]  ;;  %v3131_v30 = vadd.f32 %v11640_v56, %v3130_v24  ;;  %v4571_v54 = vadd.f32 %v11640_v56, %v4570_v58  ;;  %v269_v31 = vld [vmem:[%s14287_s0 + $0x7f8] sm:$0xff]  ;;  %v12243_v0 = vadd.f32 %v11640_v56, %v11039_v61  ;;  %v7826_v61 = vpop.f32.mrb[148].mxu0  ;;  %v8258_v36 = vpop.f32.mrb[148].mxu1 }
 0x217   :  { %v6000_v44 = vmax.f32 %v15021_v21, %v5712_v32  ;;  %v15023_v1 = vmax.f32 %v15022_v48, 0.0  ;;  %v15025_v25 = vmax.f32 %v15024_v2, 0.0  ;;  %v5426_v48 = vmax.f32 %v3136_v7, 0.0  ;;  %v557_v24 = vld [vmem:[%s14287_s0 + $0x10f8] sm:$0xff]  ;;  %v558_v7 = vld [vmem:[%s14287_s0 + $0x1100] sm:$0xff]  ;;  %v4580_v21 = vpop.f32.mrb[149].mxu1 }
 0x218   :  { %7981 = vmatmul.mubr.msk.f32.gmra.mrb[252].mxu0 %vm601_vm1, %v267_v38  ;;  %8413 = vmatmul.mubr.msk.f32.gmra.mrb[252].mxu1 %vm601_vm1, %v555_v23  ;;  %v5713_v23 = vmax.f32 %v4571_v54, 0.0  ;;  %v15028_v15 = vld [vmem:[#allocation138_spill] sm:$0xff]  ;;  %v4586_v58 = vadd.f32 %v11640_v56, %v8258_v36 }
 0x219   :  { %v5855_v39 = vmax.f32 %v15023_v1, %v5423_v27  ;;  %v5999_v55 = vmax.f32 %v15025_v25, %v5711_v53  ;;  %v6144_v38 = vmax.f32 %v5856_v60, %v6000_v44  ;;  %v5714_v27 = vmax.f32 %v4576_v6, 0.0  ;;  %7983 = vmatprep.mubr.msk.f32.mxu0 %vm601_vm1, %v268_v59  ;;  %8415 = vmatprep.mubr.msk.f32.mxu1 %vm601_vm1, %v556_v47  ;;  %v270_v6 = vld [vmem:[%s14287_s0 + $0x800] sm:$0xff]  ;;  %v3140_v60 = vpop.f32.mrb[149].mxu0 }
 0x21a   :  { %v12252_v53 = vadd.f32 %v11640_v56, %v11041_v9  ;;  %v5425_v1 = vmax.f32 %v3131_v30, 0.0  ;;  %v15026_v9 = vld [vmem:[#allocation137_spill] sm:$0xff]  ;;  %v15029_v32 = vmax.f32 %v15028_v15, 0.0  ;;  %v3146_v47 = vadd.f32 %v11640_v56, %v7826_v61  ;;  %v15034_v15 = vld [vmem:[#allocation140_spill] sm:$0xff] }
 0x21b   :  { %v6143_v25 = vmax.f32 %v5855_v39, %v5999_v55  ;;  %6289 = vst.msk [vmem:[%s14289_s3 + $0x8] sm:$0xff] %vm6287_vm4, %v6144_v38  ;;  %v15027_v44 = vmax.f32 %v15026_v9, 0.0  ;;  %v15030_v39 = vmax.f32 %v10521_v28, 0.0  ;;  %v15031_v30 = vmax.f32 %v10525_v40, 0.0  ;;  %v559_v40 = vld [vmem:[%s14287_s0 + $0x1108] sm:$0xff]  ;;  %v8261_v9 = vpop.f32.mrb[150].mxu1 }
 0x21c   :  { %v6002_v59 = vmax.f32 %v15029_v32, %v5714_v27  ;;  %7984 = vmatmul.mubr.msk.f32.gmra.mrb[254].mxu0 %vm601_vm1, %v269_v31  ;;  %v3141_v38 = vadd.f32 %v11640_v56, %v3140_v60  ;;  %8416 = vmatmul.mubr.msk.f32.gmra.mrb[254].mxu1 %vm601_vm1, %v557_v24  ;;  %v271_v31 = vld [vmem:[%s14287_s0 + $0x808] sm:$0xff]  ;;  %v12287_v27 = vadd.f32 %v11640_v56, %v11053_v17  ;;  %v5428_v28 = vmax.f32 %v3146_v47, 0.0  ;;  %v7829_v17 = vpop.f32.mrb[150].mxu0 }
 0x21d   :  { %v5858_v55 = vmax.f32 %v15027_v44, %v5426_v48  ;;  %6288 = vst.msk [vmem:[%s14289_s3] sm:$0xff] %vm6287_vm4, %v6143_v25  ;;  %v5857_v2 = vmax.f32 %v15030_v39, %v5425_v1  ;;  %v6001_v54 = vmax.f32 %v15031_v30, %v5713_v23  ;;  %v4581_v48 = vadd.f32 %v11640_v56, %v4580_v21  ;;  %v272_v44 = vld [vmem:[%s14287_s0 + $0x810] sm:$0xff]  ;;  %v3150_v60 = vpop.f32.mrb[151].mxu0  ;;  %v4590_v21 = vpop.f32.mrb[151].mxu1  ;;  %v15036_v39 = vld [vmem:[#allocation141_spill] sm:$0xff] }
 0x21e   :  { %v5716_v1 = vmax.f32 %v4586_v58, 0.0  ;;  %7986 = vmatprep.mubr.msk.f32.mxu0 %vm601_vm1, %v270_v6  ;;  %8418 = vmatprep.mubr.msk.f32.mxu1 %vm601_vm1, %v558_v7  ;;  %v12296_v24 = vadd.f32 %v11640_v56, %v11056_v16  ;;  %v5427_v61 = vmax.f32 %v3141_v38, 0.0  ;;  %v560_v6 = vld [vmem:[%s14287_s0 + $0x1110] sm:$0xff]  ;;  %v15032_v16 = vld [vmem:[#allocation139_spill] sm:$0xff]  ;;  %v15035_v32 = vmax.f32 %v15034_v15, 0.0 }
 0x21f   :  { %v6146_v25 = vmax.f32 %v5858_v55, %v6002_v59  ;;  %v6145_v23 = vmax.f32 %v5857_v2, %v6001_v54  ;;  %v5715_v36 = vmax.f32 %v4581_v48, 0.0  ;;  %v15033_v7 = vmax.f32 %v15032_v16, 0.0  ;;  %v15038_v54 = vld [vmem:[#allocation142_spill] sm:$0xff] }
 0x220   :  { %v6004_v59 = vmax.f32 %v15035_v32, %v5716_v1  ;;  %v3156_v47 = vadd.f32 %v11640_v56, %v7829_v17  ;;  %v4596_v58 = vadd.f32 %v11640_v56, %v8261_v9  ;;  %7987 = vmatmul.mubr.msk.f32.gmra.mrb[0].mxu0 %vm601_vm1, %v271_v31  ;;  %v15037_v2 = vmax.f32 %v15036_v39, 0.0  ;;  %8419 = vmatmul.mubr.msk.f32.gmra.mrb[0].mxu1 %vm601_vm1, %v559_v40  ;;  %v273_v31 = vld [vmem:[%s14287_s0 + $0x818] sm:$0xff]  ;;  %v274_v40 = vld [vmem:[%s14287_s0 + $0x820] sm:$0xff]  ;;  %v8264_v32 = vpop.f32.mrb[152].mxu1 }
 0x221   :  { %6291 = vst.msk [vmem:[%s14289_s3 + $0x18] sm:$0xff] %vm6287_vm4, %v6146_v25  ;;  %v5860_v55 = vmax.f32 %v15033_v7, %v5428_v28  ;;  %6290 = vst.msk [vmem:[%s14289_s3 + $0x10] sm:$0xff] %vm6287_vm4, %v6145_v23  ;;  %v15039_v38 = vmax.f32 %v15038_v54, 0.0  ;;  %v3151_v25 = vadd.f32 %v11640_v56, %v3150_v60  ;;  %v4591_v28 = vadd.f32 %v11640_v56, %v4590_v21  ;;  %v4600_v54 = vpop.f32.mrb[153].mxu1 }
 0x222   :  { %v5859_v30 = vmax.f32 %v15037_v2, %v5427_v61  ;;  %v5430_v23 = vmax.f32 %v3156_v47, 0.0  ;;  %v5718_v9 = vmax.f32 %v4596_v58, 0.0  ;;  %7989 = vmatprep.mubr.msk.f32.mxu0 %vm601_vm1, %v272_v44  ;;  %8421 = vmatprep.mubr.msk.f32.mxu1 %vm601_vm1, %v560_v6  ;;  %v561_v61 = vld [vmem:[%s14287_s0 + $0x1118] sm:$0xff]  ;;  %v562_v44 = vld [vmem:[%s14287_s0 + $0x1120] sm:$0xff]  ;;  %v15040_v6 = vld [vmem:[#allocation143_spill] sm:$0xff]  ;;  %v4606_v2 = vadd.f32 %v11640_v56, %v8264_v32 }
 0x223   :  { %v6003_v48 = vmax.f32 %v15039_v38, %v5715_v36  ;;  %v6148_v17 = vmax.f32 %v5860_v55, %v6004_v59  ;;  %v5429_v7 = vmax.f32 %v3151_v25, 0.0  ;;  %v5717_v15 = vmax.f32 %v4591_v28, 0.0  ;;  %v7832_v55 = vpop.f32.mrb[152].mxu0  ;;  %v15042_v58 = vld [vmem:[#allocation144_spill] sm:$0xff]  ;;  %v15044_v38 = vld [vmem:[#allocation145_spill] sm:$0xff]  ;;  %v15046_v28 = vld [vmem:[#allocation146_spill] sm:$0xff] }
 0x224   :  { %v15041_v59 = vmax.f32 %v15040_v6, 0.0  ;;  %v15043_v60 = vmax.f32 %v15042_v58, 0.0  ;;  %v3166_v39 = vadd.f32 %v11640_v56, %v7832_v55  ;;  %7990 = vmatmul.mubr.msk.f32.gmra.mrb[2].mxu0 %vm601_vm1, %v273_v31  ;;  %v4601_v55 = vadd.f32 %v11640_v56, %v4600_v54  ;;  %8422 = vmatmul.mubr.msk.f32.gmra.mrb[2].mxu1 %vm601_vm1, %v561_v61  ;;  %v275_v31 = vld [vmem:[%s14287_s0 + $0x828] sm:$0xff]  ;;  %v276_v61 = vld [vmem:[%s14287_s0 + $0x830] sm:$0xff] }
 0x225   :  { %v6147_v16 = vmax.f32 %v5859_v30, %v6003_v48  ;;  %6293 = vst.msk [vmem:[%s14289_s3 + $0x28] sm:$0xff] %vm6287_vm4, %v6148_v17  ;;  %v3160_v30 = vpop.f32.mrb[153].mxu0  ;;  %v15045_v48 = vmax.f32 %v15044_v38, 0.0  ;;  %v15047_v17 = vmax.f32 %v15046_v28, 0.0  ;;  %7992 = vmatprep.mubr.msk.f32.mxu0 %vm601_vm1, %v274_v40  ;;  %8424 = vmatprep.mubr.msk.f32.mxu1 %vm601_vm1, %v562_v44  ;;  %v564_v40 = vld [vmem:[%s14287_s0 + $0x1130] sm:$0xff]  ;;  %v15048_v44 = vld [vmem:[#allocation147_spill] sm:$0xff] }
 0x226   :  { %v5862_v47 = vmax.f32 %v15041_v59, %v5430_v23  ;;  %v6006_v21 = vmax.f32 %v15043_v60, %v5718_v9  ;;  %v3161_v9 = vadd.f32 %v11640_v56, %v3160_v30  ;;  %v5720_v59 = vmax.f32 %v4606_v2, 0.0  ;;  %v15050_v54 = vld [vmem:[#allocation148_spill] sm:$0xff] }
 0x227   :  { %6292 = vst.msk [vmem:[%s14289_s3 + $0x20] sm:$0xff] %vm6287_vm4, %v6147_v16  ;;  %v5861_v25 = vmax.f32 %v15045_v48, %v5429_v7  ;;  %v6005_v23 = vmax.f32 %v15047_v17, %v5717_v15  ;;  %v5432_v16 = vmax.f32 %v3166_v39, 0.0  ;;  %v563_v7 = vld [vmem:[%s14287_s0 + $0x1128] sm:$0xff]  ;;  %v5719_v30 = vmax.f32 %v4601_v55, 0.0 }
 0x228   :  { %v6150_v6 = vmax.f32 %v5862_v47, %v6006_v21  ;;  %v5431_v60 = vmax.f32 %v3161_v9, 0.0  ;;  %v7835_v47 = vpop.f32.mrb[154].mxu0  ;;  %v8267_v21 = vpop.f32.mrb[154].mxu1  ;;  %v15049_v39 = vmax.f32 %v15048_v44, 0.0  ;;  %v15051_v38 = vmax.f32 %v15050_v54, 0.0  ;;  %7993 = vmatmul.mubr.msk.f32.gmra.mrb[4].mxu0 %vm601_vm1, %v275_v31  ;;  %v15052_v9 = vld [vmem:[#allocation149_spill] sm:$0xff]  ;;  %8425 = vmatmul.mubr.msk.f32.gmra.mrb[4].mxu1 %vm601_vm1, %v563_v7 }
 0x229   :  { %v6149_v58 = vmax.f32 %v5861_v25, %v6005_v23  ;;  %v3176_v25 = vadd.f32 %v11640_v56, %v7835_v47  ;;  %v4616_v28 = vadd.f32 %v11640_v56, %v8267_v21  ;;  %v3170_v17 = vpop.f32.mrb[155].mxu0  ;;  %v4610_v23 = vpop.f32.mrb[155].mxu1  ;;  %v15053_v55 = vmax.f32 %v15052_v9, 0.0  ;;  %v277_v31 = vld [vmem:[%s14287_s0 + $0x838] sm:$0xff]  ;;  %v15056_v21 = vld [vmem:[#allocation182_spill] sm:$0xff]  ;;  %7995 = vmatprep.mubr.msk.f32.mxu0 %vm601_vm1, %v276_v61  ;;  %8427 = vmatprep.mubr.msk.f32.mxu1 %vm601_vm1, %v564_v40  ;;  %v15058_v7 = vld [vmem:[#allocation183_spill] sm:$0xff] }
 0x22a   :  { %6295 = vst.msk [vmem:[%s14289_s3 + $0x38] sm:$0xff] %vm6287_vm4, %v6150_v6  ;;  %v5864_v2 = vmax.f32 %v15049_v39, %v5432_v16  ;;  %v6008_v48 = vmax.f32 %v15051_v38, %v5720_v59  ;;  %v15054_v16 = vld [vmem:[#allocation150_spill] sm:$0xff]  ;;  %v3171_v59 = vadd.f32 %v11640_v56, %v3170_v17  ;;  %v4611_v47 = vadd.f32 %v11640_v56, %v4610_v23  ;;  %v15060_v40 = vld [vmem:[#allocation151_spill] sm:$0xff] }
 0x22b   :  { %6294 = vst.msk [vmem:[%s14289_s3 + $0x30] sm:$0xff] %vm6287_vm4, %v6149_v58  ;;  %v5863_v6 = vmax.f32 %v15053_v55, %v5431_v60  ;;  %v15055_v44 = vmax.f32 %v15054_v16, 0.0  ;;  %v12407_v54 = vadd.f32 %v11640_v56, %v15056_v21  ;;  %v5434_v38 = vmax.f32 %v3176_v25, 0.0  ;;  %v7838_v16 = vpop.f32.mrb[156].mxu0  ;;  %v566_v61 = vld [vmem:[%s14287_s0 + $0x1140] sm:$0xff] }
 0x22c   :  { %v6152_v58 = vmax.f32 %v5864_v2, %v6008_v48  ;;  %v5722_v60 = vmax.f32 %v4616_v28, 0.0  ;;  %v12416_v17 = vadd.f32 %v11640_v56, %v15058_v7  ;;  %v5433_v9 = vmax.f32 %v3171_v59, 0.0  ;;  %v278_v2 = vld [vmem:[%s14287_s0 + $0x840] sm:$0xff]  ;;  %v15062_v28 = vld [vmem:[#allocation152_spill] sm:$0xff]  ;;  %v3180_v21 = vpop.f32.mrb[157].mxu0  ;;  %7996 = vmatmul.mubr.msk.f32.gmra.mrb[6].mxu0 %vm601_vm1, %v277_v31  ;;  %v279_v31 = vld [vmem:[%s14287_s0 + $0x848] sm:$0xff] }
 0x22d   :  { %v6007_v39 = vmax.f32 %v15055_v44, %v5719_v30  ;;  %15057 = vst [vmem:[#allocation135_spill] sm:$0xff] %v12407_v54  ;;  %v565_v30 = vld [vmem:[%s14287_s0 + $0x1138] sm:$0xff]  ;;  %v5721_v55 = vmax.f32 %v4611_v47, 0.0  ;;  %v8270_v44 = vpop.f32.mrb[156].mxu1  ;;  %v15061_v48 = vmax.f32 %v15060_v40, 0.0  ;;  %v3186_v59 = vadd.f32 %v11640_v56, %v7838_v16  ;;  %7998 = vmatprep.mubr.msk.f32.mxu0 %vm601_vm1, %v278_v2  ;;  %v568_v2 = vld [vmem:[%s14287_s0 + $0x1150] sm:$0xff] }
 0x22e   :  { %15059 = vst [vmem:[#allocation136_spill] sm:$0xff] %v12416_v17  ;;  %6297 = vst.msk [vmem:[%s14289_s3 + $0x48] sm:$0xff] %vm6287_vm4, %v6152_v58  ;;  %v4626_v47 = vadd.f32 %v11640_v56, %v8270_v44  ;;  %v4620_v7 = vpop.f32.mrb[157].mxu1  ;;  %v15064_v58 = vld [vmem:[#allocation153_spill] sm:$0xff]  ;;  %8428 = vmatmul.mubr.msk.f32.gmra.mrb[6].mxu1 %vm601_vm1, %v565_v30  ;;  %v15068_v44 = vld [vmem:[#allocation184_spill] sm:$0xff] }
 0x22f   :  { %v6151_v23 = vmax.f32 %v5863_v6, %v6007_v39  ;;  %v5866_v25 = vmax.f32 %v15061_v48, %v5434_v38  ;;  %v15063_v6 = vmax.f32 %v15062_v28, 0.0  ;;  %v15065_v15 = vmax.f32 %v15064_v58, 0.0  ;;  %v15066_v38 = vld [vmem:[#allocation154_spill] sm:$0xff]  ;;  %8430 = vmatprep.mubr.msk.f32.mxu1 %vm601_vm1, %v566_v61  ;;  %v15070_v30 = vld [vmem:[#allocation185_spill] sm:$0xff]  ;;  %v15072_v61 = vld [vmem:[#allocation155_spill] sm:$0xff] }
 0x230   :  { %v15067_v48 = vmax.f32 %v15066_v38, 0.0  ;;  %v4621_v16 = vadd.f32 %v11640_v56, %v4620_v7  ;;  %v5436_v58 = vmax.f32 %v3186_v59, 0.0  ;;  %7999 = vmatmul.mubr.msk.f32.gmra.mrb[8].mxu0 %vm601_vm1, %v279_v31  ;;  %v281_v31 = vld [vmem:[%s14287_s0 + $0x858] sm:$0xff] }
 0x231   :  { %v6010_v39 = vmax.f32 %v15063_v6, %v5722_v60  ;;  %6296 = vst.msk [vmem:[%s14289_s3 + $0x40] sm:$0xff] %vm6287_vm4, %v6151_v23  ;;  %v5865_v40 = vmax.f32 %v15065_v15, %v5433_v9  ;;  %v3181_v60 = vadd.f32 %v11640_v56, %v3180_v21  ;;  %v12451_v6 = vadd.f32 %v11640_v56, %v15068_v44  ;;  %v567_v9 = vld [vmem:[%s14287_s0 + $0x1148] sm:$0xff]  ;;  %v8273_v44 = vpop.f32.mrb[158].mxu1 }
 0x232   :  { %v6009_v28 = vmax.f32 %v15067_v48, %v5721_v55  ;;  %v5724_v15 = vmax.f32 %v4626_v47, 0.0  ;;  %v12460_v55 = vadd.f32 %v11640_v56, %v15070_v30  ;;  %v5723_v38 = vmax.f32 %v4621_v16, 0.0  ;;  %v7841_v48 = vpop.f32.mrb[158].mxu0  ;;  %v15074_v47 = vld [vmem:[#allocation156_spill] sm:$0xff]  ;;  %v4630_v32 = vpop.f32.mrb[159].mxu1  ;;  %8431 = vmatmul.mubr.msk.f32.gmra.mrb[8].mxu1 %vm601_vm1, %v567_v9 }
 0x233   :  { %15069 = vst [vmem:[#allocation137_spill] sm:$0xff] %v12451_v6  ;;  %v6154_v23 = vmax.f32 %v5866_v25, %v6010_v39  ;;  %v5435_v7 = vmax.f32 %v3181_v60, 0.0  ;;  %v280_v25 = vld [vmem:[%s14287_s0 + $0x850] sm:$0xff]  ;;  %v15073_v39 = vmax.f32 %v15072_v61, 0.0  ;;  %v3196_v60 = vadd.f32 %v11640_v56, %v7841_v48  ;;  %v3190_v30 = vpop.f32.mrb[159].mxu0  ;;  %8433 = vmatprep.mubr.msk.f32.mxu1 %vm601_vm1, %v568_v2  ;;  %v15080_v2 = vld [vmem:[#allocation159_spill] sm:$0xff] }
 0x234   :  { %15071 = vst [vmem:[#allocation138_spill] sm:$0xff] %v12460_v55  ;;  %v6153_v21 = vmax.f32 %v5865_v40, %v6009_v28  ;;  %v15075_v40 = vmax.f32 %v15074_v47, 0.0  ;;  %v4636_v16 = vadd.f32 %v11640_v56, %v8273_v44  ;;  %v4631_v48 = vadd.f32 %v11640_v56, %v4630_v32  ;;  %8001 = vmatprep.mubr.msk.f32.mxu0 %vm601_vm1, %v280_v25  ;;  %v282_v32 = vld [vmem:[%s14287_s0 + $0x860] sm:$0xff] }
 0x235   :  { %6299 = vst.msk [vmem:[%s14289_s3 + $0x58] sm:$0xff] %vm6287_vm4, %v6154_v23  ;;  %v5868_v59 = vmax.f32 %v15073_v39, %v5436_v58  ;;  %v15076_v23 = vld [vmem:[#allocation157_spill] sm:$0xff]  ;;  %v15078_v58 = vld [vmem:[#allocation158_spill] sm:$0xff]  ;;  %8002 = vmatmul.mubr.msk.f32.gmra.mrb[10].mxu0 %vm601_vm1, %v281_v31  ;;  %v283_v31 = vld [vmem:[%s14287_s0 + $0x868] sm:$0xff] }
 0x236   :  { %v6012_v28 = vmax.f32 %v15075_v40, %v5724_v15  ;;  %6298 = vst.msk [vmem:[%s14289_s3 + $0x50] sm:$0xff] %vm6287_vm4, %v6153_v21  ;;  %v15077_v36 = vmax.f32 %v15076_v23, 0.0  ;;  %v15079_v39 = vmax.f32 %v15078_v58, 0.0  ;;  %v3191_v15 = vadd.f32 %v11640_v56, %v3190_v30  ;;  %v570_v25 = vld [vmem:[%s14287_s0 + $0x1160] sm:$0xff]  ;;  %v15082_v23 = vld [vmem:[#allocation160_spill] sm:$0xff]  ;;  %8004 = vmatprep.mubr.msk.f32.mxu0 %vm601_vm1, %v282_v32 }
 0x237   :  { %v5438_v21 = vmax.f32 %v3196_v60, 0.0  ;;  %v5726_v1 = vmax.f32 %v4636_v16, 0.0  ;;  %v5725_v30 = vmax.f32 %v4631_v48, 0.0  ;;  %v15081_v60 = vmax.f32 %v15080_v2, 0.0  ;;  %v572_v32 = vld [vmem:[%s14287_s0 + $0x1170] sm:$0xff] }
 0x238   :  { %v5867_v61 = vmax.f32 %v15077_v36, %v5435_v7  ;;  %v6011_v47 = vmax.f32 %v15079_v39, %v5723_v38  ;;  %v6156_v40 = vmax.f32 %v5868_v59, %v6012_v28  ;;  %v569_v36 = vld [vmem:[%s14287_s0 + $0x1158] sm:$0xff]  ;;  %v5437_v38 = vmax.f32 %v3191_v15, 0.0  ;;  %v7844_v59 = vpop.f32.mrb[160].mxu0  ;;  %v8276_v28 = vpop.f32.mrb[160].mxu1 }
 0x239   :  { %v5870_v16 = vmax.f32 %v15081_v60, %v5438_v21  ;;  %v15083_v58 = vmax.f32 %v15082_v23, 0.0  ;;  %v3200_v15 = vpop.f32.mrb[161].mxu0  ;;  %v4640_v48 = vpop.f32.mrb[161].mxu1  ;;  %v15086_v21 = vld [vmem:[#allocation162_spill] sm:$0xff]  ;;  %8434 = vmatmul.mubr.msk.f32.gmra.mrb[10].mxu1 %vm601_vm1, %v569_v36  ;;  %8005 = vmatmul.mubr.msk.f32.gmra.mrb[12].mxu0 %vm601_vm1, %v283_v31  ;;  %v285_v31 = vld [vmem:[%s14287_s0 + $0x878] sm:$0xff] }
 0x23a   :  { %v6155_v7 = vmax.f32 %v5867_v61, %v6011_v47  ;;  %6301 = vst.msk [vmem:[%s14289_s3 + $0x68] sm:$0xff] %vm6287_vm4, %v6156_v40  ;;  %v3206_v61 = vadd.f32 %v11640_v56, %v7844_v59  ;;  %v4646_v47 = vadd.f32 %v11640_v56, %v8276_v28  ;;  %v15084_v40 = vld [vmem:[#allocation161_spill] sm:$0xff]  ;;  %v15087_v60 = vmax.f32 %v15086_v21, 0.0  ;;  %8436 = vmatprep.mubr.msk.f32.mxu1 %vm601_vm1, %v570_v25  ;;  %v15088_v25 = vld [vmem:[#allocation163_spill] sm:$0xff] }
 0x23b   :  { %v6014_v39 = vmax.f32 %v15083_v58, %v5726_v1  ;;  %v15085_v9 = vmax.f32 %v15084_v40, 0.0  ;;  %v3201_v1 = vadd.f32 %v11640_v56, %v3200_v15  ;;  %v4641_v59 = vadd.f32 %v11640_v56, %v4640_v48  ;;  %v284_v56 = vld [vmem:[%s14287_s0 + $0x870] sm:$0xff] }
 0x23c   :  { %6300 = vst.msk [vmem:[%s14289_s3 + $0x60] sm:$0xff] %vm6287_vm4, %v6155_v7  ;;  %v6013_v23 = vmax.f32 %v15087_v60, %v5725_v30  ;;  %v5440_v7 = vmax.f32 %v3206_v61, 0.0  ;;  %v5728_v44 = vmax.f32 %v4646_v47, 0.0  ;;  %v15089_v61 = vmax.f32 %v15088_v25, 0.0  ;;  %v15090_v48 = vld [vmem:[#allocation164_spill] sm:$0xff]  ;;  %v15094_v25 = vld [vmem:[#allocation166_spill] sm:$0xff]  ;;  %8007 = vmatprep.mubr.msk.f32.mxu0 %vm601_vm1, %v284_v56 }
 0x23d   :  { %v5869_v2 = vmax.f32 %v15085_v9, %v5437_v38  ;;  %v6158_v58 = vmax.f32 %v5870_v16, %v6014_v39  ;;  %v571_v9 = vld [vmem:[%s14287_s0 + $0x1168] sm:$0xff]  ;;  %v5439_v30 = vmax.f32 %v3201_v1, 0.0  ;;  %v5727_v15 = vmax.f32 %v4641_v59, 0.0  ;;  %v7847_v16 = vpop.f32.mrb[162].mxu0  ;;  %v8279_v39 = vpop.f32.mrb[162].mxu1  ;;  %v574_v56 = vld [vmem:[%s14287_s0 + $0x1180] sm:$0xff]  ;;  %8008 = vmatmul.mubr.msk.f32.gmra.mrb[14].mxu0 %vm601_vm1, %v285_v31 }
 0x23e   :  { %v5872_v47 = vmax.f32 %v15089_v61, %v5440_v7  ;;  %v15091_v40 = vmax.f32 %v15090_v48, 0.0  ;;  %v3210_v1 = vpop.f32.mrb[163].mxu0  ;;  %v4650_v59 = vpop.f32.mrb[163].mxu1  ;;  %v15095_v61 = vmax.f32 %v15094_v25, 0.0  ;;  %8437 = vmatmul.mubr.msk.f32.gmra.mrb[12].mxu1 %vm601_vm1, %v571_v9  ;;  %v15098_v9 = vld [vmem:[#allocation187_spill] sm:$0xff] }
 0x23f   :  { %v6157_v38 = vmax.f32 %v5869_v2, %v6013_v23  ;;  %6303 = vst.msk [vmem:[%s14289_s3 + $0x78] sm:$0xff] %vm6287_vm4, %v6158_v58  ;;  %v12555_v2 = vld [vmem:[%s14288_s2] ss:$0 sm:$0xff]  ;;  %v15092_v58 = vld [vmem:[#allocation165_spill] sm:$0xff]  ;;  %8439 = vmatprep.mubr.msk.f32.mxu1 %vm601_vm1, %v572_v32  ;;  %v15100_v32 = vld [vmem:[#allocation167_spill] sm:$0xff] }
 0x240   :  { %v6016_v21 = vmax.f32 %v15091_v40, %v5728_v44  ;;  %v3216_v60 = vadd.f32 %v12555_v2, %v7847_v16  ;;  %v4656_v23 = vadd.f32 %v12555_v2, %v8279_v39  ;;  %v15093_v44 = vmax.f32 %v15092_v58, 0.0  ;;  %v15096_v39 = vld [vmem:[#allocation186_spill] sm:$0xff]  ;;  %v287_v31 = vld [vmem:[%s14287_s0 + $0x888] sm:$0xff] }
 0x241   :  { %6302 = vst.msk [vmem:[%s14289_s3 + $0x70] sm:$0xff] %vm6287_vm4, %v6157_v38  ;;  %v6015_v48 = vmax.f32 %v15095_v61, %v5727_v15  ;;  %v3211_v40 = vadd.f32 %v12555_v2, %v3210_v1  ;;  %v4651_v16 = vadd.f32 %v12555_v2, %v4650_v59  ;;  %v12576_v36 = vadd.f32 %v12555_v2, %v15096_v39  ;;  %v573_v15 = vld [vmem:[%s14287_s0 + $0x1178] sm:$0xff]  ;;  %v7850_v61 = vpop.f32.mrb[164].mxu0  ;;  %v8282_v39 = vpop.f32.mrb[164].mxu1 }
 0x242   :  { %v5871_v7 = vmax.f32 %v15093_v44, %v5439_v30  ;;  %v6160_v38 = vmax.f32 %v5872_v47, %v6016_v21  ;;  %v5442_v58 = vmax.f32 %v3216_v60, 0.0  ;;  %v5730_v30 = vmax.f32 %v4656_v23, 0.0  ;;  %v286_v47 = vld [vmem:[%s14287_s0 + $0x880] sm:$0xff]  ;;  %v15102_v23 = vld [vmem:[#allocation168_spill] sm:$0xff]  ;;  %v4660_v28 = vpop.f32.mrb[165].mxu1  ;;  %8440 = vmatmul.mubr.msk.f32.gmra.mrb[14].mxu1 %vm601_vm1, %v573_v15  ;;  %v15110_v15 = vld [vmem:[#allocation189_spill] sm:$0xff] }
 0x243   :  { %15097 = vst [vmem:[#allocation139_spill] sm:$0xff] %v12576_v36  ;;  %v12585_v1 = vadd.f32 %v12555_v2, %v15098_v9  ;;  %v5441_v44 = vmax.f32 %v3211_v40, 0.0  ;;  %v5729_v25 = vmax.f32 %v4651_v16, 0.0  ;;  %v15101_v21 = vmax.f32 %v15100_v32, 0.0  ;;  %v3220_v9 = vpop.f32.mrb[165].mxu0  ;;  %8010 = vmatprep.mubr.msk.f32.mxu0 %vm601_vm1, %v286_v47  ;;  %8442 = vmatprep.mubr.msk.f32.mxu1 %vm601_vm1, %v574_v56  ;;  %v576_v47 = vld [vmem:[%s14287_s0 + $0x1190] sm:$0xff] }
 0x244   :  { %v6159_v59 = vmax.f32 %v5871_v7, %v6015_v48  ;;  %6305 = vst.msk [vmem:[%s14289_s3 + $0x88] sm:$0xff] %vm6287_vm4, %v6160_v38  ;;  %v15103_v7 = vmax.f32 %v15102_v23, 0.0  ;;  %v3226_v40 = vadd.f32 %v12555_v2, %v7850_v61  ;;  %v4666_v16 = vadd.f32 %v12555_v2, %v8282_v39  ;;  %v15104_v38 = vld [vmem:[#allocation169_spill] sm:$0xff]  ;;  %v15108_v39 = vld [vmem:[#allocation188_spill] sm:$0xff]  ;;  %v15112_v56 = vld [vmem:[#allocation171_spill] sm:$0xff]  ;;  %8011 = vmatmul.mubr.msk.f32.gmra.mrb[16].mxu0 %vm601_vm1, %v287_v31 }
 0x245   :  { %15099 = vst [vmem:[#allocation140_spill] sm:$0xff] %v12585_v1  ;;  %v5874_v60 = vmax.f32 %v15101_v21, %v5442_v58  ;;  %v15105_v55 = vmax.f32 %v15104_v38, 0.0  ;;  %v15106_v58 = vld [vmem:[#allocation170_spill] sm:$0xff]  ;;  %v4661_v61 = vadd.f32 %v12555_v2, %v4660_v28  ;;  %v575_v28 = vld [vmem:[%s14287_s0 + $0x1188] sm:$0xff]  ;;  %v289_v31 = vld [vmem:[%s14287_s0 + $0x898] sm:$0xff] }
 0x246   :  { %v6018_v48 = vmax.f32 %v15103_v7, %v5730_v30  ;;  %6304 = vst.msk [vmem:[%s14289_s3 + $0x80] sm:$0xff] %vm6287_vm4, %v6159_v59  ;;  %v15107_v21 = vmax.f32 %v15106_v58, 0.0  ;;  %v3221_v30 = vadd.f32 %v12555_v2, %v3220_v9  ;;  %v12620_v7 = vadd.f32 %v12555_v2, %v15108_v39  ;;  %v8285_v39 = vpop.f32.mrb[166].mxu1  ;;  %8443 = vmatmul.mubr.msk.f32.gmra.mrb[16].mxu1 %vm601_vm1, %v575_v28 }
 0x247   :  { %v5873_v32 = vmax.f32 %v15105_v55, %v5441_v44  ;;  %v5444_v38 = vmax.f32 %v3226_v40, 0.0  ;;  %v5732_v55 = vmax.f32 %v4666_v16, 0.0  ;;  %v12629_v44 = vadd.f32 %v12555_v2, %v15110_v15  ;;  %v15114_v16 = vld [vmem:[#allocation172_spill] sm:$0xff]  ;;  %v4670_v6 = vpop.f32.mrb[167].mxu1  ;;  %8445 = vmatprep.mubr.msk.f32.mxu1 %vm601_vm1, %v576_v47  ;;  %v15120_v47 = vld [vmem:[#allocation175_spill] sm:$0xff] }
 0x248   :  { %v6017_v23 = vmax.f32 %v15107_v21, %v5729_v25  ;;  %15109 = vst [vmem:[#allocation141_spill] sm:$0xff] %v12620_v7  ;;  %v6162_v59 = vmax.f32 %v5874_v60, %v6018_v48  ;;  %v5443_v9 = vmax.f32 %v3221_v30, 0.0  ;;  %v5731_v58 = vmax.f32 %v4661_v61, 0.0  ;;  %v7853_v21 = vpop.f32.mrb[166].mxu0  ;;  %v288_v60 = vld [vmem:[%s14287_s0 + $0x890] sm:$0xff] }
 0x249   :  { %15111 = vst [vmem:[#allocation142_spill] sm:$0xff] %v12629_v44  ;;  %v15113_v48 = vmax.f32 %v15112_v56, 0.0  ;;  %v3236_v30 = vadd.f32 %v12555_v2, %v7853_v21  ;;  %v4676_v61 = vadd.f32 %v12555_v2, %v8285_v39  ;;  %v3230_v15 = vpop.f32.mrb[167].mxu0  ;;  %v4671_v21 = vadd.f32 %v12555_v2, %v4670_v6  ;;  %8013 = vmatprep.mubr.msk.f32.mxu0 %vm601_vm1, %v288_v60  ;;  %v290_v6 = vld [vmem:[%s14287_s0 + $0x8a0] sm:$0xff] }
 0x24a   :  { %v6161_v25 = vmax.f32 %v5873_v32, %v6017_v23  ;;  %6307 = vst.msk [vmem:[%s14289_s3 + $0x98] sm:$0xff] %vm6287_vm4, %v6162_v59  ;;  %v15115_v32 = vmax.f32 %v15114_v16, 0.0  ;;  %v15116_v59 = vld [vmem:[#allocation173_spill] sm:$0xff]  ;;  %v578_v60 = vld [vmem:[%s14287_s0 + $0x11a0] sm:$0xff]  ;;  %8014 = vmatmul.mubr.msk.f32.gmra.mrb[18].mxu0 %vm601_vm1, %v289_v31  ;;  %v291_v31 = vld [vmem:[%s14287_s0 + $0x8a8] sm:$0xff] }
 0x24b   :  { %v5876_v40 = vmax.f32 %v15113_v48, %v5444_v38  ;;  %v15117_v17 = vmax.f32 %v15116_v59, 0.0  ;;  %v15118_v38 = vld [vmem:[#allocation174_spill] sm:$0xff]  ;;  %v5734_v54 = vmax.f32 %v4676_v61, 0.0  ;;  %v15122_v59 = vld [vmem:[#allocation176_spill] sm:$0xff]  ;;  %8016 = vmatprep.mubr.msk.f32.mxu0 %vm601_vm1, %v290_v6 }
 0x24c   :  { %v6020_v23 = vmax.f32 %v15115_v32, %v5732_v55  ;;  %6306 = vst.msk [vmem:[%s14289_s3 + $0x90] sm:$0xff] %vm6287_vm4, %v6161_v25  ;;  %v15119_v48 = vmax.f32 %v15118_v38, 0.0  ;;  %v3231_v55 = vadd.f32 %v12555_v2, %v3230_v15  ;;  %v5446_v25 = vmax.f32 %v3236_v30, 0.0  ;;  %v580_v6 = vld [vmem:[%s14287_s0 + $0x11b0] sm:$0xff] }
 0x24d   :  { %v5875_v56 = vmax.f32 %v15117_v17, %v5443_v9  ;;  %v577_v17 = vld [vmem:[%s14287_s0 + $0x1198] sm:$0xff]  ;;  %v5733_v15 = vmax.f32 %v4671_v21, 0.0  ;;  %v15121_v30 = vmax.f32 %v15120_v47, 0.0  ;;  %v15123_v38 = vmax.f32 %v15122_v59, 0.0 }
 0x24e   :  { %v6019_v16 = vmax.f32 %v15119_v48, %v5731_v58  ;;  %v6164_v32 = vmax.f32 %v5876_v40, %v6020_v23  ;;  %v5445_v58 = vmax.f32 %v3231_v55, 0.0  ;;  %v7856_v40 = vpop.f32.mrb[168].mxu0  ;;  %v8288_v23 = vpop.f32.mrb[168].mxu1  ;;  %8446 = vmatmul.mubr.msk.f32.gmra.mrb[18].mxu1 %vm601_vm1, %v577_v17  ;;  %v292_v17 = vld [vmem:[%s14287_s0 + $0x8b0] sm:$0xff]  ;;  %8017 = vmatmul.mubr.msk.f32.gmra.mrb[20].mxu0 %vm601_vm1, %v291_v31  ;;  %v293_v31 = vld [vmem:[%s14287_s0 + $0x8b8] sm:$0xff] }
 0x24f   :  { %v5878_v61 = vmax.f32 %v15121_v30, %v5446_v25  ;;  %v6022_v48 = vmax.f32 %v15123_v38, %v5734_v54  ;;  %v3240_v55 = vpop.f32.mrb[169].mxu0  ;;  %v4680_v21 = vpop.f32.mrb[169].mxu1  ;;  %v15126_v25 = vld [vmem:[#allocation178_spill] sm:$0xff]  ;;  %8448 = vmatprep.mubr.msk.f32.mxu1 %vm601_vm1, %v578_v60  ;;  %v15128_v60 = vld [vmem:[#allocation179_spill] sm:$0xff]  ;;  %8019 = vmatprep.mubr.msk.f32.mxu0 %vm601_vm1, %v292_v17 }
 0x250   :  { %v6163_v9 = vmax.f32 %v5875_v56, %v6019_v16  ;;  %6309 = vst.msk [vmem:[%s14289_s3 + $0xa8] sm:$0xff] %vm6287_vm4, %v6164_v32  ;;  %v3246_v56 = vadd.f32 %v12555_v2, %v7856_v40  ;;  %v4686_v16 = vadd.f32 %v12555_v2, %v8288_v23  ;;  %v15124_v32 = vld [vmem:[#allocation177_spill] sm:$0xff]  ;;  %v15127_v30 = vmax.f32 %v15126_v25, 0.0  ;;  %v582_v17 = vld [vmem:[%s14287_s0 + $0x11c0] sm:$0xff] }
 0x251   :  { %v15125_v28 = vmax.f32 %v15124_v32, 0.0  ;;  %v3241_v54 = vadd.f32 %v12555_v2, %v3240_v55  ;;  %v4681_v40 = vadd.f32 %v12555_v2, %v4680_v21  ;;  %v6166_v38 = vmax.f32 %v5878_v61, %v6022_v48  ;;  %v7859_v61 = vpop.f32.mrb[170].mxu0  ;;  %v8291_v48 = vpop.f32.mrb[170].mxu1  ;;  %v15130_v32 = vld [vmem:[#allocation180_spill] sm:$0xff] }
 0x252   :  { %6308 = vst.msk [vmem:[%s14289_s3 + $0xa0] sm:$0xff] %vm6287_vm4, %v6163_v9  ;;  %v6021_v59 = vmax.f32 %v15127_v30, %v5733_v15  ;;  %v5448_v9 = vmax.f32 %v3246_v56, 0.0  ;;  %v5736_v39 = vmax.f32 %v4686_v16, 0.0  ;;  %v15129_v56 = vmax.f32 %v15128_v60, 0.0  ;;  %8020 = vmatmul.mubr.msk.f32.gmra.mrb[22].mxu0 %vm601_vm1, %v293_v31  ;;  %v295_v31 = vld [vmem:[%s14287_s0 + $0x8c8] sm:$0xff] }
 0x253   :  { %v5877_v47 = vmax.f32 %v15125_v28, %v5445_v58  ;;  %v579_v28 = vld [vmem:[%s14287_s0 + $0x11a8] sm:$0xff]  ;;  %v5447_v55 = vmax.f32 %v3241_v54, 0.0  ;;  %v5735_v21 = vmax.f32 %v4681_v40, 0.0  ;;  %6311 = vst.msk [vmem:[%s14289_s3 + $0xb8] sm:$0xff] %vm6287_vm4, %v6166_v38  ;;  %v15131_v25 = vmax.f32 %v15130_v32, 0.0  ;;  %v3250_v54 = vpop.f32.mrb[171].mxu0 }
 0x254   :  { %v5880_v16 = vmax.f32 %v15129_v56, %v5448_v9  ;;  %v4690_v40 = vpop.f32.mrb[171].mxu1  ;;  %v15132_v38 = vld [vmem:[#allocation181_spill] sm:$0xff]  ;;  %v15134_v9 = vld [vmem:[#allocation2_spill] sm:$0xff]  ;;  %8449 = vmatmul.mubr.msk.f32.gmra.mrb[20].mxu1 %vm601_vm1, %v579_v28  ;;  %v15138_v28 = vld [vmem:[#allocation191_spill] sm:$0xff] }
 0x255   :  { %v6165_v15 = vmax.f32 %v5877_v47, %v6021_v59  ;;  %v6024_v30 = vmax.f32 %v15131_v25, %v5736_v39  ;;  %v3256_v47 = vadd.f32 %v12555_v2, %v7859_v61  ;;  %v4696_v59 = vadd.f32 %v12555_v2, %v8291_v48  ;;  %v15136_v48 = vld [vmem:[#allocation190_spill] sm:$0xff]  ;;  %8451 = vmatprep.mubr.msk.f32.mxu1 %vm601_vm1, %v580_v6  ;;  %v15140_v6 = vld [vmem:[#allocation3_spill] sm:$0xff] }
 0x256   :  { %v15133_v58 = vmax.f32 %v15132_v38, 0.0  ;;  %v15135_v56 = vmax.f32 %v15134_v9, 0.0  ;;  %v3251_v39 = vadd.f32 %v12555_v2, %v3250_v54  ;;  %v4691_v61 = vadd.f32 %v12555_v2, %v4690_v40 }
 0x257   :  { %6310 = vst.msk [vmem:[%s14289_s3 + $0xb0] sm:$0xff] %vm6287_vm4, %v6165_v15  ;;  %v12740_v25 = vadd.f32 %v12555_v2, %v15136_v48  ;;  %v6168_v15 = vmax.f32 %v5880_v16, %v6024_v30  ;;  %v5450_v38 = vmax.f32 %v3256_v47, 0.0  ;;  %v8294_v48 = vpop.f32.mrb[172].mxu1  ;;  %v294_v16 = vld [vmem:[%s14287_s0 + $0x8c0] sm:$0xff]  ;;  %v15141_v30 = vmax.f32 %v15140_v6, 0.0 }
 0x258   :  { %v5879_v60 = vmax.f32 %v15133_v58, %v5447_v55  ;;  %v6023_v32 = vmax.f32 %v15135_v56, %v5735_v21  ;;  %v5738_v58 = vmax.f32 %v4696_v59, 0.0  ;;  %v581_v55 = vld [vmem:[%s14287_s0 + $0x11b8] sm:$0xff]  ;;  %v12749_v21 = vadd.f32 %v12555_v2, %v15138_v28  ;;  %v7862_v56 = vpop.f32.mrb[172].mxu0  ;;  %v15142_v59 = vld [vmem:[#allocation4_spill] sm:$0xff]  ;;  %v4700_v23 = vpop.f32.mrb[173].mxu1  ;;  %8022 = vmatprep.mubr.msk.f32.mxu0 %vm601_vm1, %v294_v16 }
 0x259   :  { %15137 = vst [vmem:[#allocation143_spill] sm:$0xff] %v12740_v25  ;;  %v5449_v40 = vmax.f32 %v3251_v39, 0.0  ;;  %v5737_v9 = vmax.f32 %v4691_v61, 0.0  ;;  %6313 = vst.msk [vmem:[%s14289_s3 + $0xc8] sm:$0xff] %vm6287_vm4, %v6168_v15  ;;  %v5882_v47 = vmax.f32 %v15141_v30, %v5450_v38  ;;  %v3266_v39 = vadd.f32 %v12555_v2, %v7862_v56  ;;  %v3260_v28 = vpop.f32.mrb[173].mxu0  ;;  %v15144_v15 = vld [vmem:[#allocation5_spill] sm:$0xff]  ;;  %8452 = vmatmul.mubr.msk.f32.gmra.mrb[22].mxu1 %vm601_vm1, %v581_v55 }
 0x25a   :  { %15139 = vst [vmem:[#allocation144_spill] sm:$0xff] %v12749_v21  ;;  %v6167_v54 = vmax.f32 %v5879_v60, %v6023_v32  ;;  %v15143_v60 = vmax.f32 %v15142_v59, 0.0  ;;  %v4706_v61 = vadd.f32 %v12555_v2, %v8294_v48  ;;  %v15145_v44 = vmax.f32 %v15144_v15, 0.0  ;;  %v15146_v38 = vld [vmem:[#allocation6_spill] sm:$0xff]  ;;  %v15148_v48 = vld [vmem:[#allocation192_spill] sm:$0xff]  ;;  %8454 = vmatprep.mubr.msk.f32.mxu1 %vm601_vm1, %v582_v17  ;;  %v15150_v55 = vld [vmem:[#allocation193_spill] sm:$0xff]  ;;  %8023 = vmatmul.mubr.msk.f32.gmra.mrb[24].mxu0 %vm601_vm1, %v295_v31 }
 0x25b   :  { %v15147_v30 = vmax.f32 %v15146_v38, 0.0  ;;  %v4701_v56 = vadd.f32 %v12555_v2, %v4700_v23  ;;  %v5452_v15 = vmax.f32 %v3266_v39, 0.0  ;;  %v583_v23 = vld [vmem:[%s14287_s0 + $0x11c8] sm:$0xff]  ;;  %v584_v16 = vld [vmem:[%s14287_s0 + $0x11d0] sm:$0xff]  ;;  %v297_v31 = vld [vmem:[%s14287_s0 + $0x8d8] sm:$0xff] }
 0x25c   :  { %v6026_v32 = vmax.f32 %v15143_v60, %v5738_v58  ;;  %6312 = vst.msk [vmem:[%s14289_s3 + $0xc0] sm:$0xff] %vm6287_vm4, %v6167_v54  ;;  %v5881_v6 = vmax.f32 %v15145_v44, %v5449_v40  ;;  %v3261_v58 = vadd.f32 %v12555_v2, %v3260_v28  ;;  %v12784_v60 = vadd.f32 %v12555_v2, %v15148_v48  ;;  %v8297_v48 = vpop.f32.mrb[174].mxu1  ;;  %v15152_v17 = vld [vmem:[#allocation7_spill] sm:$0xff] }
 0x25d   :  { %v6025_v59 = vmax.f32 %v15147_v30, %v5737_v9  ;;  %v5740_v44 = vmax.f32 %v4706_v61, 0.0  ;;  %v12793_v40 = vadd.f32 %v12555_v2, %v15150_v55  ;;  %v5739_v38 = vmax.f32 %v4701_v56, 0.0  ;;  %v7865_v30 = vpop.f32.mrb[174].mxu0  ;;  %v15154_v61 = vld [vmem:[#allocation8_spill] sm:$0xff]  ;;  %v4710_v7 = vpop.f32.mrb[175].mxu1  ;;  %8455 = vmatmul.mubr.msk.f32.gmra.mrb[24].mxu1 %vm601_vm1, %v583_v23 }
 0x25e   :  { %15149 = vst [vmem:[#allocation145_spill] sm:$0xff] %v12784_v60  ;;  %v6170_v54 = vmax.f32 %v5882_v47, %v6026_v32  ;;  %v5451_v28 = vmax.f32 %v3261_v58, 0.0  ;;  %v296_v47 = vld [vmem:[%s14287_s0 + $0x8d0] sm:$0xff]  ;;  %v15153_v32 = vmax.f32 %v15152_v17, 0.0  ;;  %v3276_v58 = vadd.f32 %v12555_v2, %v7865_v30  ;;  %v3270_v55 = vpop.f32.mrb[175].mxu0  ;;  %8457 = vmatprep.mubr.msk.f32.mxu1 %vm601_vm1, %v584_v16  ;;  %v15160_v16 = vld [vmem:[#allocation11_spill] sm:$0xff] }
 0x25f   :  { %15151 = vst [vmem:[#allocation146_spill] sm:$0xff] %v12793_v40  ;;  %v6169_v9 = vmax.f32 %v5881_v6, %v6025_v59  ;;  %v15155_v6 = vmax.f32 %v15154_v61, 0.0  ;;  %v4716_v56 = vadd.f32 %v12555_v2, %v8297_v48  ;;  %v4711_v30 = vadd.f32 %v12555_v2, %v4710_v7  ;;  %8025 = vmatprep.mubr.msk.f32.mxu0 %vm601_vm1, %v296_v47  ;;  %v298_v7 = vld [vmem:[%s14287_s0 + $0x8e0] sm:$0xff] }
 0x260   :  { %6315 = vst.msk [vmem:[%s14289_s3 + $0xd8] sm:$0xff] %vm6287_vm4, %v6170_v54  ;;  %v5884_v39 = vmax.f32 %v15153_v32, %v5452_v15  ;;  %v15156_v54 = vld [vmem:[#allocation9_spill] sm:$0xff]  ;;  %v15158_v15 = vld [vmem:[#allocation10_spill] sm:$0xff]  ;;  %8026 = vmatmul.mubr.msk.f32.gmra.mrb[26].mxu0 %vm601_vm1, %v297_v31  ;;  %v299_v31 = vld [vmem:[%s14287_s0 + $0x8e8] sm:$0xff] }
 0x261   :  { %v6028_v59 = vmax.f32 %v15155_v6, %v5740_v44  ;;  %6314 = vst.msk [vmem:[%s14289_s3 + $0xd0] sm:$0xff] %vm6287_vm4, %v6169_v9  ;;  %v15157_v1 = vmax.f32 %v15156_v54, 0.0  ;;  %v15159_v32 = vmax.f32 %v15158_v15, 0.0  ;;  %v3271_v44 = vadd.f32 %v12555_v2, %v3270_v55  ;;  %v586_v47 = vld [vmem:[%s14287_s0 + $0x11e0] sm:$0xff]  ;;  %v15162_v54 = vld [vmem:[#allocation12_spill] sm:$0xff]  ;;  %8028 = vmatprep.mubr.msk.f32.mxu0 %vm601_vm1, %v298_v7  ;;  %v15168_v7 = vld [vmem:[#allocation15_spill] sm:$0xff] }
 0x262   :  { %v5454_v9 = vmax.f32 %v3276_v58, 0.0  ;;  %v5742_v36 = vmax.f32 %v4716_v56, 0.0  ;;  %v5741_v55 = vmax.f32 %v4711_v30, 0.0  ;;  %v15161_v58 = vmax.f32 %v15160_v16, 0.0 }
 0x263   :  { %v5883_v17 = vmax.f32 %v15157_v1, %v5451_v28  ;;  %v6027_v61 = vmax.f32 %v15159_v32, %v5739_v38  ;;  %v6172_v6 = vmax.f32 %v5884_v39, %v6028_v59  ;;  %v585_v1 = vld [vmem:[%s14287_s0 + $0x11d8] sm:$0xff]  ;;  %v5453_v38 = vmax.f32 %v3271_v44, 0.0  ;;  %v7868_v39 = vpop.f32.mrb[176].mxu0  ;;  %v8300_v59 = vpop.f32.mrb[176].mxu1 }
 0x264   :  { %v5886_v56 = vmax.f32 %v15161_v58, %v5454_v9  ;;  %v15163_v15 = vmax.f32 %v15162_v54, 0.0  ;;  %v3280_v44 = vpop.f32.mrb[177].mxu0  ;;  %v4720_v30 = vpop.f32.mrb[177].mxu1  ;;  %v15166_v9 = vld [vmem:[#allocation14_spill] sm:$0xff]  ;;  %8458 = vmatmul.mubr.msk.f32.gmra.mrb[26].mxu1 %vm601_vm1, %v585_v1  ;;  %8029 = vmatmul.mubr.msk.f32.gmra.mrb[28].mxu0 %vm601_vm1, %v299_v31  ;;  %v301_v31 = vld [vmem:[%s14287_s0 + $0x8f8] sm:$0xff] }
 0x265   :  { %v6171_v28 = vmax.f32 %v5883_v17, %v6027_v61  ;;  %6317 = vst.msk [vmem:[%s14289_s3 + $0xe8] sm:$0xff] %vm6287_vm4, %v6172_v6  ;;  %v3286_v17 = vadd.f32 %v12555_v2, %v7868_v39  ;;  %v4726_v61 = vadd.f32 %v12555_v2, %v8300_v59  ;;  %v15164_v6 = vld [vmem:[#allocation13_spill] sm:$0xff]  ;;  %v15167_v58 = vmax.f32 %v15166_v9, 0.0  ;;  %8460 = vmatprep.mubr.msk.f32.mxu1 %vm601_vm1, %v586_v47 }
 0x266   :  { %v6030_v32 = vmax.f32 %v15163_v15, %v5742_v36  ;;  %v15165_v23 = vmax.f32 %v15164_v6, 0.0  ;;  %v3281_v36 = vadd.f32 %v12555_v2, %v3280_v44  ;;  %v4721_v39 = vadd.f32 %v12555_v2, %v4720_v30  ;;  %v7871_v44 = vpop.f32.mrb[178].mxu0  ;;  %v8303_v30 = vpop.f32.mrb[178].mxu1  ;;  %v300_v6 = vld [vmem:[%s14287_s0 + $0x8f0] sm:$0xff] }
 0x267   :  { %6316 = vst.msk [vmem:[%s14289_s3 + $0xe0] sm:$0xff] %vm6287_vm4, %v6171_v28  ;;  %v6029_v54 = vmax.f32 %v15167_v58, %v5741_v55  ;;  %v5456_v28 = vmax.f32 %v3286_v17, 0.0  ;;  %v5744_v48 = vmax.f32 %v4726_v61, 0.0  ;;  %v15169_v47 = vmax.f32 %v15168_v7, 0.0  ;;  %v15170_v17 = vld [vmem:[#allocation16_spill] sm:$0xff]  ;;  %8031 = vmatprep.mubr.msk.f32.mxu0 %vm601_vm1, %v300_v6  ;;  %v15178_v6 = vld [vmem:[#allocation19_spill] sm:$0xff] }
 0x268   :  { %v5885_v16 = vmax.f32 %v15165_v23, %v5453_v38  ;;  %v6174_v15 = vmax.f32 %v5886_v56, %v6030_v32  ;;  %v587_v23 = vld [vmem:[%s14287_s0 + $0x11e8] sm:$0xff]  ;;  %v5455_v55 = vmax.f32 %v3281_v36, 0.0  ;;  %v5743_v1 = vmax.f32 %v4721_v39, 0.0  ;;  %v588_v56 = vld [vmem:[%s14287_s0 + $0x11f0] sm:$0xff]  ;;  %v4730_v36 = vpop.f32.mrb[179].mxu1  ;;  %v15172_v39 = vld [vmem:[#allocation17_spill] sm:$0xff]  ;;  %8032 = vmatmul.mubr.msk.f32.gmra.mrb[30].mxu0 %vm601_vm1, %v301_v31 }
 0x269   :  { %v5888_v32 = vmax.f32 %v15169_v47, %v5456_v28  ;;  %v15171_v61 = vmax.f32 %v15170_v17, 0.0  ;;  %v3296_v9 = vadd.f32 %v12555_v2, %v7871_v44  ;;  %v4736_v58 = vadd.f32 %v12555_v2, %v8303_v30  ;;  %v15174_v28 = vld [vmem:[#allocation18_spill] sm:$0xff]  ;;  %8461 = vmatmul.mubr.msk.f32.gmra.mrb[28].mxu1 %vm601_vm1, %v587_v23 }
 0x26a   :  { %v6173_v38 = vmax.f32 %v5885_v16, %v6029_v54  ;;  %6319 = vst.msk [vmem:[%s14289_s3 + $0xf8] sm:$0xff] %vm6287_vm4, %v6174_v15  ;;  %v3290_v54 = vpop.f32.mrb[179].mxu0  ;;  %v15173_v15 = vmax.f32 %v15172_v39, 0.0  ;;  %v15175_v47 = vmax.f32 %v15174_v28, 0.0  ;;  %v4731_v44 = vadd.f32 %v12555_v2, %v4730_v36  ;;  %8463 = vmatprep.mubr.msk.f32.mxu1 %vm601_vm1, %v588_v56  ;;  %v8306_v28 = vpop.f32.mrb[180].mxu1 }
 0x26b   :  { %v6032_v16 = vmax.f32 %v15171_v61, %v5744_v48  ;;  %v3291_v48 = vadd.f32 %v12555_v2, %v3290_v54  ;;  %v5746_v59 = vmax.f32 %v4736_v58, 0.0  ;;  %v15179_v56 = vmax.f32 %v15178_v6, 0.0 }
 0x26c   :  { %6318 = vst.msk [vmem:[%s14289_s3 + $0xf0] sm:$0xff] %vm6287_vm4, %v6173_v38  ;;  %v5887_v7 = vmax.f32 %v15173_v15, %v5455_v55  ;;  %v6031_v17 = vmax.f32 %v15175_v47, %v5743_v1  ;;  %v5458_v38 = vmax.f32 %v3296_v9, 0.0  ;;  %v589_v55 = vld [vmem:[%s14287_s0 + $0x11f8] sm:$0xff]  ;;  %v15176_v1 = vld [vmem:[#allocation194_spill] sm:$0xff]  ;;  %v5745_v39 = vmax.f32 %v4731_v44, 0.0  ;;  %v7874_v15 = vpop.f32.mrb[180].mxu0 }
 0x26d   :  { %v6176_v61 = vmax.f32 %v5888_v32, %v6032_v16  ;;  %v12909_v23 = vadd.f32 %v12555_v2, %v15176_v1  ;;  %v5457_v36 = vmax.f32 %v3291_v48, 0.0  ;;  %v15180_v16 = vld [vmem:[#allocation20_spill] sm:$0xff]  ;;  %v3306_v47 = vadd.f32 %v12555_v2, %v7874_v15  ;;  %v15182_v48 = vld [vmem:[#allocation21_spill] sm:$0xff]  ;;  %8464 = vmatmul.mubr.msk.f32.gmra.mrb[30].mxu1 %vm601_vm1, %v589_v55  ;;  %v15190_v55 = vld [vmem:[#allocation23_spill] sm:$0xff] }
 0x26e   :  { %v6175_v54 = vmax.f32 %v5887_v7, %v6031_v17  ;;  %v5890_v32 = vmax.f32 %v15179_v56, %v5458_v38  ;;  %v15181_v9 = vmax.f32 %v15180_v16, 0.0  ;;  %v4746_v1 = vadd.f32 %v12555_v2, %v8306_v28  ;;  %v3300_v7 = vpop.f32.mrb[181].mxu0  ;;  %v4740_v17 = vpop.f32.mrb[181].mxu1  ;;  %v15184_v38 = vld [vmem:[#allocation22_spill] sm:$0xff]  ;;  %v15186_v28 = vld [vmem:[#allocation195_spill] sm:$0xff] }
 0x26f   :  { %15177 = vst [vmem:[#allocation147_spill] sm:$0xff] %v12909_v23  ;;  %6321 = vst.msk [vmem:[%s14289_s3 + $0x108] sm:$0xff] %vm6287_vm4, %v6176_v61  ;;  %v15183_v44 = vmax.f32 %v15182_v48, 0.0  ;;  %v15185_v6 = vmax.f32 %v15184_v38, 0.0  ;;  %v4741_v15 = vadd.f32 %v12555_v2, %v4740_v17  ;;  %v12935_v31 = vadd.f32 %v12555_v2, %v15186_v28  ;;  %v7877_v38 = vpop.f32.mrb[182].mxu0 }
 0x270   :  { %v6034_v58 = vmax.f32 %v15181_v9, %v5746_v59  ;;  %6320 = vst.msk [vmem:[%s14289_s3 + $0x100] sm:$0xff] %vm6287_vm4, %v6175_v54  ;;  %v3301_v59 = vadd.f32 %v12555_v2, %v3300_v7  ;;  %v5460_v9 = vmax.f32 %v3306_v47, 0.0  ;;  %v5748_v30 = vmax.f32 %v4746_v1, 0.0  ;;  %v15188_v54 = vld [vmem:[#allocation196_spill] sm:$0xff]  ;;  %v8309_v7 = vpop.f32.mrb[182].mxu1 }
 0x271   :  { %v5889_v61 = vmax.f32 %v15183_v44, %v5457_v36  ;;  %v6033_v56 = vmax.f32 %v15185_v6, %v5745_v39  ;;  %15187 = vst [vmem:[#allocation148_spill] sm:$0xff] %v12935_v31  ;;  %v12939_v48 = vadd.f32 %v12555_v2, %v15188_v54  ;;  %v5747_v39 = vmax.f32 %v4741_v15, 0.0  ;;  %v15196_v54 = vld [vmem:[#allocation26_spill] sm:$0xff] }
 0x272   :  { %v6178_v16 = vmax.f32 %v5890_v32, %v6034_v58  ;;  %v5459_v44 = vmax.f32 %v3301_v59, 0.0  ;;  %v15191_v17 = vmax.f32 %v15190_v55, 0.0  ;;  %v15192_v32 = vld [vmem:[#allocation24_spill] sm:$0xff]  ;;  %v3316_v1 = vadd.f32 %v12555_v2, %v7877_v38  ;;  %v15194_v59 = vld [vmem:[#allocation25_spill] sm:$0xff] }
 0x273   :  { %15189 = vst [vmem:[#allocation149_spill] sm:$0xff] %v12939_v48  ;;  %v6177_v36 = vmax.f32 %v5889_v61, %v6033_v56  ;;  %v15193_v58 = vmax.f32 %v15192_v32, 0.0  ;;  %v4756_v28 = vadd.f32 %v12555_v2, %v8309_v7  ;;  %v3310_v61 = vpop.f32.mrb[183].mxu0  ;;  %v4750_v56 = vpop.f32.mrb[183].mxu1  ;;  %v15195_v15 = vmax.f32 %v15194_v59, 0.0  ;;  %v15198_v38 = vld [vmem:[#allocation197_spill] sm:$0xff] }
 0x274   :  { %6323 = vst.msk [vmem:[%s14289_s3 + $0x118] sm:$0xff] %vm6287_vm4, %v6178_v16  ;;  %v5892_v6 = vmax.f32 %v15191_v17, %v5460_v9  ;;  %v15197_v55 = vmax.f32 %v15196_v54, 0.0  ;;  %v3311_v17 = vadd.f32 %v12555_v2, %v3310_v61  ;;  %v12963_v7 = vadd.f32 %v12555_v2, %v15198_v38  ;;  %v15202_v54 = vld [vmem:[#allocation28_spill] sm:$0xff]  ;;  %v15206_v38 = vld [vmem:[#allocation30_spill] sm:$0xff] }
 0x275   :  { %v6036_v47 = vmax.f32 %v15193_v58, %v5748_v30  ;;  %6322 = vst.msk [vmem:[%s14289_s3 + $0x110] sm:$0xff] %vm6287_vm4, %v6177_v36  ;;  %v5891_v16 = vmax.f32 %v15195_v15, %v5459_v44  ;;  %v4751_v30 = vadd.f32 %v12555_v2, %v4750_v56  ;;  %v5462_v58 = vmax.f32 %v3316_v1, 0.0  ;;  %v7880_v44 = vpop.f32.mrb[184].mxu0  ;;  %v8312_v15 = vpop.f32.mrb[184].mxu1 }
 0x276   :  { %v6035_v9 = vmax.f32 %v15197_v55, %v5747_v39  ;;  %15199 = vst [vmem:[#allocation150_spill] sm:$0xff] %v12963_v7  ;;  %v5750_v40 = vmax.f32 %v4756_v28, 0.0  ;;  %v5461_v21 = vmax.f32 %v3311_v17, 0.0  ;;  %v15200_v39 = vld [vmem:[#allocation27_spill] sm:$0xff]  ;;  %v15203_v55 = vmax.f32 %v15202_v54, 0.0  ;;  %v3320_v28 = vpop.f32.mrb[185].mxu0 }
 0x277   :  { %v6180_v32 = vmax.f32 %v5892_v6, %v6036_v47  ;;  %v5749_v59 = vmax.f32 %v4751_v30, 0.0  ;;  %v15201_v61 = vmax.f32 %v15200_v39, 0.0  ;;  %v3326_v47 = vadd.f32 %v12555_v2, %v7880_v44  ;;  %v7883_v25 = vpop.f32.mrb[186].mxu0 }
 0x278   :  { %v6179_v36 = vmax.f32 %v5891_v16, %v6035_v9  ;;  %v6038_v6 = vmax.f32 %v15203_v55, %v5750_v40  ;;  %v4766_v1 = vadd.f32 %v12555_v2, %v8312_v15  ;;  %v4760_v16 = vpop.f32.mrb[185].mxu1  ;;  %v15204_v9 = vld [vmem:[#allocation29_spill] sm:$0xff]  ;;  %v3321_v39 = vadd.f32 %v12555_v2, %v3320_v28 }
 0x279   :  { %6325 = vst.msk [vmem:[%s14289_s3 + $0x128] sm:$0xff] %vm6287_vm4, %v6180_v32  ;;  %v5894_v56 = vmax.f32 %v15201_v61, %v5462_v58  ;;  %v15205_v17 = vmax.f32 %v15204_v9, 0.0  ;;  %v15207_v32 = vmax.f32 %v15206_v38, 0.0  ;;  %v4761_v40 = vadd.f32 %v12555_v2, %v4760_v16  ;;  %v8315_v9 = vpop.f32.mrb[186].mxu1  ;;  %v15210_v16 = vld [vmem:[#allocation32_spill] sm:$0xff]  ;;  %v15212_v38 = vld [vmem:[#allocation33_spill] sm:$0xff] }
 0x27a   :  { %6324 = vst.msk [vmem:[%s14289_s3 + $0x120] sm:$0xff] %vm6287_vm4, %v6179_v36  ;;  %v5464_v61 = vmax.f32 %v3326_v47, 0.0  ;;  %v5752_v54 = vmax.f32 %v4766_v1, 0.0  ;;  %v5463_v23 = vmax.f32 %v3321_v39, 0.0  ;;  %v4776_v47 = vadd.f32 %v12555_v2, %v8315_v9  ;;  %v3330_v1 = vpop.f32.mrb[187].mxu0  ;;  %v15214_v39 = vld [vmem:[#allocation34_spill] sm:$0xff] }
 0x27b   :  { %v5893_v30 = vmax.f32 %v15205_v17, %v5461_v21  ;;  %v6037_v58 = vmax.f32 %v15207_v32, %v5749_v59  ;;  %v6182_v15 = vmax.f32 %v5894_v56, %v6038_v6  ;;  %v5751_v36 = vmax.f32 %v4761_v40, 0.0  ;;  %v15208_v21 = vld [vmem:[#allocation31_spill] sm:$0xff] }
 0x27c   :  { %v15209_v59 = vmax.f32 %v15208_v21, 0.0  ;;  %v15211_v17 = vmax.f32 %v15210_v16, 0.0  ;;  %v3336_v6 = vadd.f32 %v12555_v2, %v7883_v25  ;;  %v15213_v32 = vmax.f32 %v15212_v38, 0.0  ;;  %v15216_v16 = vld [vmem:[#allocation198_spill] sm:$0xff]  ;;  %v15228_v25 = vld [vmem:[#allocation200_spill] sm:$0xff] }
 0x27d   :  { %v6181_v60 = vmax.f32 %v5893_v30, %v6037_v58  ;;  %6327 = vst.msk [vmem:[%s14289_s3 + $0x138] sm:$0xff] %vm6287_vm4, %v6182_v15  ;;  %v4770_v30 = vpop.f32.mrb[187].mxu1  ;;  %v15215_v40 = vmax.f32 %v15214_v39, 0.0 }
 0x27e   :  { %v5896_v28 = vmax.f32 %v15209_v59, %v5464_v61  ;;  %v6040_v56 = vmax.f32 %v15211_v17, %v5752_v54  ;;  %v5895_v58 = vmax.f32 %v15213_v32, %v5463_v23  ;;  %v3331_v61 = vadd.f32 %v12555_v2, %v3330_v1  ;;  %v7886_v23 = vpop.f32.mrb[188].mxu0  ;;  %v8318_v32 = vpop.f32.mrb[188].mxu1 }
 0x27f   :  { %6326 = vst.msk [vmem:[%s14289_s3 + $0x130] sm:$0xff] %vm6287_vm4, %v6181_v60  ;;  %v6039_v15 = vmax.f32 %v15215_v40, %v5751_v36  ;;  %v4771_v54 = vadd.f32 %v12555_v2, %v4770_v30  ;;  %v5466_v21 = vmax.f32 %v3336_v6, 0.0  ;;  %v5754_v59 = vmax.f32 %v4776_v47, 0.0  ;;  %v15218_v36 = vld [vmem:[#allocation35_spill] sm:$0xff]  ;;  %v4780_v40 = vpop.f32.mrb[189].mxu1 }
 0x280   :  { %v6184_v9 = vmax.f32 %v5896_v28, %v6040_v56  ;;  %v13011_v17 = vadd.f32 %v12555_v2, %v15216_v16  ;;  %v5465_v55 = vmax.f32 %v3331_v61, 0.0  ;;  %v15219_v1 = vmax.f32 %v15218_v36, 0.0  ;;  %v15220_v28 = vld [vmem:[#allocation36_spill] sm:$0xff] }
 0x281   :  { %v6183_v60 = vmax.f32 %v5895_v58, %v6039_v15  ;;  %v5753_v38 = vmax.f32 %v4771_v54, 0.0  ;;  %v15221_v56 = vmax.f32 %v15220_v28, 0.0  ;;  %v3346_v47 = vadd.f32 %v12555_v2, %v7886_v23  ;;  %v3340_v58 = vpop.f32.mrb[189].mxu0  ;;  %v15222_v15 = vld [vmem:[#allocation37_spill] sm:$0xff]  ;;  %v15226_v23 = vld [vmem:[#allocation199_spill] sm:$0xff] }
 0x282   :  { %15217 = vst [vmem:[#allocation182_spill] sm:$0xff] %v13011_v17  ;;  %6329 = vst.msk [vmem:[%s14289_s3 + $0x148] sm:$0xff] %vm6287_vm4, %v6184_v9  ;;  %v5898_v30 = vmax.f32 %v15219_v1, %v5466_v21  ;;  %v4786_v39 = vadd.f32 %v12555_v2, %v8318_v32  ;;  %v15223_v61 = vmax.f32 %v15222_v15, 0.0  ;;  %v15224_v9 = vld [vmem:[#allocation38_spill] sm:$0xff]  ;;  %v3341_v36 = vadd.f32 %v12555_v2, %v3340_v58  ;;  %v15230_v58 = vld [vmem:[#allocation39_spill] sm:$0xff] }
 0x283   :  { %v6042_v6 = vmax.f32 %v15221_v56, %v5754_v59  ;;  %6328 = vst.msk [vmem:[%s14289_s3 + $0x140] sm:$0xff] %vm6287_vm4, %v6183_v60  ;;  %v15225_v16 = vmax.f32 %v15224_v9, 0.0  ;;  %v4781_v59 = vadd.f32 %v12555_v2, %v4780_v40  ;;  %v13035_v32 = vadd.f32 %v12555_v2, %v15226_v23  ;;  %v7889_v9 = vpop.f32.mrb[190].mxu0 }
 0x284   :  { %v5897_v54 = vmax.f32 %v15223_v61, %v5465_v55  ;;  %v5468_v28 = vmax.f32 %v3346_v47, 0.0  ;;  %v5756_v56 = vmax.f32 %v4786_v39, 0.0  ;;  %v13039_v60 = vadd.f32 %v12555_v2, %v15228_v25 }
 0x285   :  { %v6041_v21 = vmax.f32 %v15225_v16, %v5753_v38  ;;  %15227 = vst [vmem:[#allocation183_spill] sm:$0xff] %v13035_v32  ;;  %v6186_v1 = vmax.f32 %v5898_v30, %v6042_v6  ;;  %v5467_v55 = vmax.f32 %v3341_v36, 0.0  ;;  %v5755_v61 = vmax.f32 %v4781_v59, 0.0  ;;  %v8321_v38 = vpop.f32.mrb[190].mxu1  ;;  %v15232_v30 = vld [vmem:[#allocation40_spill] sm:$0xff]  ;;  %v15234_v36 = vld [vmem:[#allocation41_spill] sm:$0xff] }
 0x286   :  { %15229 = vst [vmem:[#allocation151_spill] sm:$0xff] %v13039_v60  ;;  %v15231_v40 = vmax.f32 %v15230_v58, 0.0  ;;  %v15233_v6 = vmax.f32 %v15232_v30, 0.0  ;;  %v3356_v39 = vadd.f32 %v12555_v2, %v7889_v9  ;;  %v4796_v25 = vadd.f32 %v12555_v2, %v8321_v38  ;;  %v15238_v9 = vld [vmem:[#allocation201_spill] sm:$0xff] }
 0x287   :  { %v6185_v15 = vmax.f32 %v5897_v54, %v6041_v21  ;;  %6331 = vst.msk [vmem:[%s14289_s3 + $0x158] sm:$0xff] %vm6287_vm4, %v6186_v1  ;;  %v3350_v54 = vpop.f32.mrb[191].mxu0  ;;  %v4790_v21 = vpop.f32.mrb[191].mxu1  ;;  %v15235_v59 = vmax.f32 %v15234_v36, 0.0  ;;  %v15236_v1 = vld [vmem:[#allocation42_spill] sm:$0xff]  ;;  %v13063_v38 = vadd.f32 %v12555_v2, %v15238_v9 }
 0x288   :  { %v5900_v16 = vmax.f32 %v15231_v40, %v5468_v28  ;;  %v6044_v47 = vmax.f32 %v15233_v6, %v5756_v56  ;;  %v15237_v58 = vmax.f32 %v15236_v1, 0.0  ;;  %v3351_v40 = vadd.f32 %v12555_v2, %v3350_v54  ;;  %v15242_v1 = vld [vmem:[#allocation44_spill] sm:$0xff]  ;;  %v15246_v9 = vld [vmem:[#allocation46_spill] sm:$0xff] }
 0x289   :  { %6330 = vst.msk [vmem:[%s14289_s3 + $0x150] sm:$0xff] %vm6287_vm4, %v6185_v15  ;;  %v5899_v23 = vmax.f32 %v15235_v59, %v5467_v55  ;;  %v4791_v56 = vadd.f32 %v12555_v2, %v4790_v21  ;;  %15239 = vst [vmem:[#allocation152_spill] sm:$0xff] %v13063_v38  ;;  %v5470_v6 = vmax.f32 %v3356_v39, 0.0  ;;  %v5758_v44 = vmax.f32 %v4796_v25, 0.0  ;;  %v7892_v55 = vpop.f32.mrb[192].mxu0  ;;  %v8324_v59 = vpop.f32.mrb[192].mxu1 }
 0x28a   :  { %v6043_v28 = vmax.f32 %v15237_v58, %v5755_v61  ;;  %v6188_v30 = vmax.f32 %v5900_v16, %v6044_v47  ;;  %v5469_v48 = vmax.f32 %v3351_v40, 0.0  ;;  %v15240_v61 = vld [vmem:[#allocation43_spill] sm:$0xff]  ;;  %v15243_v58 = vmax.f32 %v15242_v1, 0.0  ;;  %v3360_v25 = vpop.f32.mrb[193].mxu0 }
 0x28b   :  { %v5757_v36 = vmax.f32 %v4791_v56, 0.0  ;;  %v15241_v54 = vmax.f32 %v15240_v61, 0.0  ;;  %v3366_v47 = vadd.f32 %v12555_v2, %v7892_v55  ;;  %v4806_v39 = vadd.f32 %v12555_v2, %v8324_v59  ;;  %v7895_v31 = vpop.f32.mrb[194].mxu0 }
 0x28c   :  { %v6187_v15 = vmax.f32 %v5899_v23, %v6043_v28  ;;  %6333 = vst.msk [vmem:[%s14289_s3 + $0x168] sm:$0xff] %vm6287_vm4, %v6188_v30  ;;  %v6046_v16 = vmax.f32 %v15243_v58, %v5758_v44  ;;  %v4800_v23 = vpop.f32.mrb[193].mxu1  ;;  %v15244_v28 = vld [vmem:[#allocation45_spill] sm:$0xff]  ;;  %v15247_v30 = vmax.f32 %v15246_v9, 0.0  ;;  %v3361_v61 = vadd.f32 %v12555_v2, %v3360_v25 }
 0x28d   :  { %v5902_v21 = vmax.f32 %v15241_v54, %v5470_v6  ;;  %v15245_v40 = vmax.f32 %v15244_v28, 0.0  ;;  %v4801_v44 = vadd.f32 %v12555_v2, %v4800_v23  ;;  %v5472_v54 = vmax.f32 %v3366_v47, 0.0  ;;  %v8327_v28 = vpop.f32.mrb[194].mxu1  ;;  %v15250_v23 = vld [vmem:[#allocation48_spill] sm:$0xff]  ;;  %v15252_v9 = vld [vmem:[#allocation49_spill] sm:$0xff] }
 0x28e   :  { %6332 = vst.msk [vmem:[%s14289_s3 + $0x160] sm:$0xff] %vm6287_vm4, %v6187_v15  ;;  %v6045_v6 = vmax.f32 %v15247_v30, %v5757_v36  ;;  %v5760_v1 = vmax.f32 %v4806_v39, 0.0  ;;  %v5471_v17 = vmax.f32 %v3361_v61, 0.0  ;;  %v4816_v47 = vadd.f32 %v12555_v2, %v8327_v28  ;;  %v3370_v39 = vpop.f32.mrb[195].mxu0  ;;  %v15254_v61 = vld [vmem:[#allocation50_spill] sm:$0xff] }
 0x28f   :  { %v5901_v56 = vmax.f32 %v15245_v40, %v5469_v48  ;;  %v6190_v59 = vmax.f32 %v5902_v21, %v6046_v16  ;;  %v5759_v15 = vmax.f32 %v4801_v44, 0.0  ;;  %v15248_v48 = vld [vmem:[#allocation47_spill] sm:$0xff]  ;;  %v15251_v40 = vmax.f32 %v15250_v23, 0.0  ;;  %v15256_v23 = vld [vmem:[#allocation202_spill] sm:$0xff] }
 0x290   :  { %v15249_v36 = vmax.f32 %v15248_v48, 0.0  ;;  %v3376_v16 = vadd.f32 %v12555_v2, %v7895_v31  ;;  %v15253_v30 = vmax.f32 %v15252_v9, 0.0  ;;  %v15255_v44 = vmax.f32 %v15254_v61, 0.0  ;;  %v15268_v31 = vld [vmem:[#allocation204_spill] sm:$0xff] }
 0x291   :  { %v6189_v7 = vmax.f32 %v5901_v56, %v6045_v6  ;;  %6335 = vst.msk [vmem:[%s14289_s3 + $0x178] sm:$0xff] %vm6287_vm4, %v6190_v59  ;;  %v6048_v21 = vmax.f32 %v15251_v40, %v5760_v1  ;;  %v4810_v56 = vpop.f32.mrb[195].mxu1  ;;  %v13111_v40 = vadd.f32 %v12555_v2, %v15256_v23 }
 0x292   :  { %v5904_v25 = vmax.f32 %v15249_v36, %v5472_v54  ;;  %v5903_v6 = vmax.f32 %v15253_v30, %v5471_v17  ;;  %v6047_v59 = vmax.f32 %v15255_v44, %v5759_v15  ;;  %v3371_v54 = vadd.f32 %v12555_v2, %v3370_v39  ;;  %v7898_v17 = vpop.f32.mrb[196].mxu0  ;;  %v8330_v30 = vpop.f32.mrb[196].mxu1  ;;  %v15258_v15 = vld [vmem:[#allocation51_spill] sm:$0xff] }
 0x293   :  { %6334 = vst.msk [vmem:[%s14289_s3 + $0x170] sm:$0xff] %vm6287_vm4, %v6189_v7  ;;  %v4811_v1 = vadd.f32 %v12555_v2, %v4810_v56  ;;  %v5474_v48 = vmax.f32 %v3376_v16, 0.0  ;;  %v5762_v36 = vmax.f32 %v4816_v47, 0.0  ;;  %15257 = vst [vmem:[#allocation153_spill] sm:$0xff] %v13111_v40  ;;  %v15259_v39 = vmax.f32 %v15258_v15, 0.0  ;;  %v4820_v44 = vpop.f32.mrb[197].mxu1 }
 0x294   :  { %v6192_v28 = vmax.f32 %v5904_v25, %v6048_v21  ;;  %v6191_v7 = vmax.f32 %v5903_v6, %v6047_v59  ;;  %v5473_v58 = vmax.f32 %v3371_v54, 0.0  ;;  %v15260_v25 = vld [vmem:[#allocation52_spill] sm:$0xff]  ;;  %v3386_v47 = vadd.f32 %v12555_v2, %v7898_v17  ;;  %v3380_v6 = vpop.f32.mrb[197].mxu0  ;;  %v15262_v59 = vld [vmem:[#allocation53_spill] sm:$0xff]  ;;  %v15266_v17 = vld [vmem:[#allocation203_spill] sm:$0xff] }
 0x295   :  { %v5761_v9 = vmax.f32 %v4811_v1, 0.0  ;;  %v5906_v56 = vmax.f32 %v15259_v39, %v5474_v48  ;;  %v15261_v21 = vmax.f32 %v15260_v25, 0.0  ;;  %v4826_v61 = vadd.f32 %v12555_v2, %v8330_v30 }
 0x296   :  { %6337 = vst.msk [vmem:[%s14289_s3 + $0x188] sm:$0xff] %vm6287_vm4, %v6192_v28  ;;  %6336 = vst.msk [vmem:[%s14289_s3 + $0x180] sm:$0xff] %vm6287_vm4, %v6191_v7  ;;  %v15263_v54 = vmax.f32 %v15262_v59, 0.0  ;;  %v15264_v28 = vld [vmem:[#allocation54_spill] sm:$0xff]  ;;  %v3381_v15 = vadd.f32 %v12555_v2, %v3380_v6  ;;  %v13135_v30 = vadd.f32 %v12555_v2, %v15266_v17  ;;  %v5476_v25 = vmax.f32 %v3386_v47, 0.0  ;;  %v15270_v6 = vld [vmem:[#allocation55_spill] sm:$0xff] }
 0x297   :  { %v6050_v16 = vmax.f32 %v15261_v21, %v5762_v36  ;;  %v15265_v23 = vmax.f32 %v15264_v28, 0.0  ;;  %v4821_v36 = vadd.f32 %v12555_v2, %v4820_v44  ;;  %v5764_v21 = vmax.f32 %v4826_v61, 0.0  ;;  %v7901_v28 = vpop.f32.mrb[198].mxu0 }
 0x298   :  { %v5905_v1 = vmax.f32 %v15263_v54, %v5473_v58  ;;  %15267 = vst [vmem:[#allocation154_spill] sm:$0xff] %v13135_v30  ;;  %v13139_v7 = vadd.f32 %v12555_v2, %v15268_v31  ;;  %v5475_v58 = vmax.f32 %v3381_v15, 0.0  ;;  %v15271_v44 = vmax.f32 %v15270_v6, 0.0  ;;  %v15274_v15 = vld [vmem:[#allocation57_spill] sm:$0xff] }
 0x299   :  { %v6049_v48 = vmax.f32 %v15265_v23, %v5761_v9  ;;  %v6194_v39 = vmax.f32 %v5906_v56, %v6050_v16  ;;  %v5763_v54 = vmax.f32 %v4821_v36, 0.0  ;;  %v8333_v9 = vpop.f32.mrb[198].mxu1  ;;  %v15272_v56 = vld [vmem:[#allocation56_spill] sm:$0xff]  ;;  %v3396_v61 = vadd.f32 %v12555_v2, %v7901_v28  ;;  %v15278_v28 = vld [vmem:[#allocation205_spill] sm:$0xff] }
 0x29a   :  { %15269 = vst [vmem:[#allocation184_spill] sm:$0xff] %v13139_v7  ;;  %v5908_v23 = vmax.f32 %v15271_v44, %v5476_v25  ;;  %v15273_v16 = vmax.f32 %v15272_v56, 0.0  ;;  %v4836_v31 = vadd.f32 %v12555_v2, %v8333_v9  ;;  %v15275_v36 = vmax.f32 %v15274_v15, 0.0 }
 0x29b   :  { %v6193_v59 = vmax.f32 %v5905_v1, %v6049_v48  ;;  %6339 = vst.msk [vmem:[%s14289_s3 + $0x198] sm:$0xff] %vm6287_vm4, %v6194_v39  ;;  %v3390_v1 = vpop.f32.mrb[199].mxu0  ;;  %v4830_v48 = vpop.f32.mrb[199].mxu1  ;;  %v15276_v39 = vld [vmem:[#allocation58_spill] sm:$0xff]  ;;  %v13163_v9 = vadd.f32 %v12555_v2, %v15278_v28 }
 0x29c   :  { %v6052_v47 = vmax.f32 %v15273_v16, %v5764_v21  ;;  %v5907_v17 = vmax.f32 %v15275_v36, %v5475_v58  ;;  %v15277_v6 = vmax.f32 %v15276_v39, 0.0  ;;  %v3391_v44 = vadd.f32 %v12555_v2, %v3390_v1  ;;  %v7904_v58 = vpop.f32.mrb[200].mxu0  ;;  %v8336_v36 = vpop.f32.mrb[200].mxu1  ;;  %v15282_v39 = vld [vmem:[#allocation60_spill] sm:$0xff]  ;;  %v15286_v28 = vld [vmem:[#allocation62_spill] sm:$0xff] }
 0x29d   :  { %6338 = vst.msk [vmem:[%s14289_s3 + $0x190] sm:$0xff] %vm6287_vm4, %v6193_v59  ;;  %v4831_v21 = vadd.f32 %v12555_v2, %v4830_v48  ;;  %15279 = vst [vmem:[#allocation185_spill] sm:$0xff] %v13163_v9  ;;  %v5478_v16 = vmax.f32 %v3396_v61, 0.0  ;;  %v5766_v55 = vmax.f32 %v4836_v31, 0.0  ;;  %v4846_v61 = vadd.f32 %v12555_v2, %v8336_v36  ;;  %v3400_v31 = vpop.f32.mrb[201].mxu0 }
 0x29e   :  { %v6051_v25 = vmax.f32 %v15277_v6, %v5763_v54  ;;  %v6196_v56 = vmax.f32 %v5908_v23, %v6052_v47  ;;  %v5477_v60 = vmax.f32 %v3391_v44, 0.0  ;;  %v15280_v54 = vld [vmem:[#allocation59_spill] sm:$0xff]  ;;  %v15283_v6 = vmax.f32 %v15282_v39, 0.0  ;;  %v7907_v32 = vpop.f32.mrb[202].mxu0 }
 0x29f   :  { %v5765_v15 = vmax.f32 %v4831_v21, 0.0  ;;  %v15281_v1 = vmax.f32 %v15280_v54, 0.0  ;;  %v3406_v47 = vadd.f32 %v12555_v2, %v7904_v58  ;;  %v3401_v54 = vadd.f32 %v12555_v2, %v3400_v31 }
 0x2a0   :  { %v6195_v59 = vmax.f32 %v5907_v17, %v6051_v25  ;;  %6341 = vst.msk [vmem:[%s14289_s3 + $0x1a8] sm:$0xff] %vm6287_vm4, %v6196_v56  ;;  %v6054_v23 = vmax.f32 %v15283_v6, %v5766_v55  ;;  %v4840_v17 = vpop.f32.mrb[201].mxu1  ;;  %v15284_v25 = vld [vmem:[#allocation61_spill] sm:$0xff]  ;;  %v15287_v56 = vmax.f32 %v15286_v28, 0.0  ;;  %v5768_v39 = vmax.f32 %v4846_v61, 0.0 }
 0x2a1   :  { %v5910_v48 = vmax.f32 %v15281_v1, %v5478_v16  ;;  %v15285_v44 = vmax.f32 %v15284_v25, 0.0  ;;  %v4841_v55 = vadd.f32 %v12555_v2, %v4840_v17  ;;  %v5480_v1 = vmax.f32 %v3406_v47, 0.0  ;;  %v8339_v25 = vpop.f32.mrb[202].mxu1  ;;  %v15290_v17 = vld [vmem:[#allocation64_spill] sm:$0xff]  ;;  %v13200_v47 = vld [vmem:[%s14288_s2] ss:$0 sm:$0xff] }
 0x2a2   :  { %6340 = vst.msk [vmem:[%s14289_s3 + $0x1a0] sm:$0xff] %vm6287_vm4, %v6195_v59  ;;  %v6053_v16 = vmax.f32 %v15287_v56, %v5765_v15  ;;  %v5479_v40 = vmax.f32 %v3401_v54, 0.0  ;;  %v4856_v61 = vadd.f32 %v13200_v47, %v8339_v25  ;;  %v4850_v28 = vpop.f32.mrb[203].mxu1  ;;  %v15292_v56 = vld [vmem:[#allocation65_spill] sm:$0xff] }
 0x2a3   :  { %v5909_v21 = vmax.f32 %v15285_v44, %v5477_v60  ;;  %v6198_v36 = vmax.f32 %v5910_v48, %v6054_v23  ;;  %v5767_v59 = vmax.f32 %v4841_v55, 0.0  ;;  %v15288_v60 = vld [vmem:[#allocation63_spill] sm:$0xff]  ;;  %v15291_v44 = vmax.f32 %v15290_v17, 0.0  ;;  %v15294_v55 = vld [vmem:[#allocation66_spill] sm:$0xff] }
 0x2a4   :  { %v15289_v15 = vmax.f32 %v15288_v60, 0.0  ;;  %v3416_v23 = vadd.f32 %v12555_v2, %v7907_v32  ;;  %v15296_v17 = vld [vmem:[#allocation206_spill] sm:$0xff] }
 0x2a5   :  { %v6197_v38 = vmax.f32 %v5909_v21, %v6053_v16  ;;  %6343 = vst.msk [vmem:[%s14289_s3 + $0x1b8] sm:$0xff] %vm6287_vm4, %v6198_v36  ;;  %v6056_v48 = vmax.f32 %v15291_v44, %v5768_v39  ;;  %v3410_v21 = vpop.f32.mrb[203].mxu0  ;;  %v15293_v16 = vmax.f32 %v15292_v56, 0.0  ;;  %v15295_v36 = vmax.f32 %v15294_v55, 0.0  ;;  %v15308_v39 = vld [vmem:[#allocation208_spill] sm:$0xff] }
 0x2a6   :  { %v5912_v31 = vmax.f32 %v15289_v15, %v5480_v1  ;;  %v3411_v32 = vadd.f32 %v13200_v47, %v3410_v21  ;;  %v4851_v1 = vadd.f32 %v13200_v47, %v4850_v28  ;;  %v5482_v60 = vmax.f32 %v3416_v23, 0.0 }
 0x2a7   :  { %6342 = vst.msk [vmem:[%s14289_s3 + $0x1b0] sm:$0xff] %vm6287_vm4, %v6197_v38  ;;  %v5911_v54 = vmax.f32 %v15293_v16, %v5479_v40  ;;  %v6055_v2 = vmax.f32 %v15295_v36, %v5767_v59  ;;  %v5770_v15 = vmax.f32 %v4856_v61, 0.0  ;;  %v13216_v44 = vadd.f32 %v13200_v47, %v15296_v17  ;;  %v7910_v40 = vpop.f32.mrb[204].mxu0  ;;  %v8342_v16 = vpop.f32.mrb[204].mxu1  ;;  %v15298_v59 = vld [vmem:[#allocation67_spill] sm:$0xff] }
 0x2a8   :  { %v6200_v25 = vmax.f32 %v5912_v31, %v6056_v48  ;;  %v5481_v6 = vmax.f32 %v3411_v32, 0.0  ;;  %v5769_v56 = vmax.f32 %v4851_v1, 0.0  ;;  %v15299_v21 = vmax.f32 %v15298_v59, 0.0  ;;  %v15300_v31 = vld [vmem:[#allocation68_spill] sm:$0xff]  ;;  %v4860_v36 = vpop.f32.mrb[205].mxu1 }
 0x2a9   :  { %15297 = vst [vmem:[#allocation155_spill] sm:$0xff] %v13216_v44  ;;  %v6199_v38 = vmax.f32 %v5911_v54, %v6055_v2  ;;  %v15301_v48 = vmax.f32 %v15300_v31, 0.0  ;;  %v3426_v61 = vadd.f32 %v13200_v47, %v7910_v40  ;;  %v4866_v55 = vadd.f32 %v13200_v47, %v8342_v16  ;;  %v3420_v54 = vpop.f32.mrb[205].mxu0  ;;  %v15302_v2 = vld [vmem:[#allocation69_spill] sm:$0xff]  ;;  %v15306_v40 = vld [vmem:[#allocation207_spill] sm:$0xff] }
 0x2aa   :  { %6345 = vst.msk [vmem:[%s14289_s3 + $0x1c8] sm:$0xff] %vm6287_vm4, %v6200_v25  ;;  %v5914_v28 = vmax.f32 %v15299_v21, %v5482_v60  ;;  %v15303_v32 = vmax.f32 %v15302_v2, 0.0  ;;  %v15304_v25 = vld [vmem:[#allocation70_spill] sm:$0xff]  ;;  %v3421_v59 = vadd.f32 %v13200_v47, %v3420_v54  ;;  %v13240_v16 = vadd.f32 %v13200_v47, %v15306_v40  ;;  %v15310_v54 = vld [vmem:[#allocation71_spill] sm:$0xff] }
 0x2ab   :  { %v6058_v23 = vmax.f32 %v15301_v48, %v5770_v15  ;;  %6344 = vst.msk [vmem:[%s14289_s3 + $0x1c0] sm:$0xff] %vm6287_vm4, %v6199_v38  ;;  %v15305_v17 = vmax.f32 %v15304_v25, 0.0  ;;  %v4861_v15 = vadd.f32 %v13200_v47, %v4860_v36  ;;  %v5484_v31 = vmax.f32 %v3426_v61, 0.0  ;;  %v7913_v25 = vpop.f32.mrb[206].mxu0 }
 0x2ac   :  { %v5913_v1 = vmax.f32 %v15303_v32, %v5481_v6  ;;  %15307 = vst [vmem:[#allocation156_spill] sm:$0xff] %v13240_v16  ;;  %v5772_v48 = vmax.f32 %v4866_v55, 0.0  ;;  %v13244_v38 = vadd.f32 %v13200_v47, %v15308_v39  ;;  %v5483_v6 = vmax.f32 %v3421_v59, 0.0  ;;  %v15314_v59 = vld [vmem:[#allocation73_spill] sm:$0xff] }
 0x2ad   :  { %v6057_v60 = vmax.f32 %v15305_v17, %v5769_v56  ;;  %v6202_v21 = vmax.f32 %v5914_v28, %v6058_v23  ;;  %v5771_v32 = vmax.f32 %v4861_v15, 0.0  ;;  %v8345_v56 = vpop.f32.mrb[206].mxu1  ;;  %v15311_v36 = vmax.f32 %v15310_v54, 0.0  ;;  %v15312_v28 = vld [vmem:[#allocation72_spill] sm:$0xff] }
 0x2ae   :  { %15309 = vst [vmem:[#allocation157_spill] sm:$0xff] %v13244_v38  ;;  %v15313_v23 = vmax.f32 %v15312_v28, 0.0  ;;  %v3436_v55 = vadd.f32 %v13200_v47, %v7913_v25  ;;  %v4876_v39 = vadd.f32 %v13200_v47, %v8345_v56  ;;  %v15315_v15 = vmax.f32 %v15314_v59, 0.0  ;;  %v15318_v25 = vld [vmem:[#allocation209_spill] sm:$0xff] }
 0x2af   :  { %v6201_v2 = vmax.f32 %v5913_v1, %v6057_v60  ;;  %6347 = vst.msk [vmem:[%s14289_s3 + $0x1d8] sm:$0xff] %vm6287_vm4, %v6202_v21  ;;  %v5916_v17 = vmax.f32 %v15311_v36, %v5484_v31  ;;  %v3430_v1 = vpop.f32.mrb[207].mxu0  ;;  %v4870_v60 = vpop.f32.mrb[207].mxu1  ;;  %v15316_v21 = vld [vmem:[#allocation74_spill] sm:$0xff]  ;;  %v13268_v56 = vadd.f32 %v13200_v47, %v15318_v25 }
 0x2b0   :  { %v6060_v61 = vmax.f32 %v15313_v23, %v5772_v48  ;;  %v5915_v40 = vmax.f32 %v15315_v15, %v5483_v6  ;;  %v15317_v54 = vmax.f32 %v15316_v21, 0.0  ;;  %v3431_v36 = vadd.f32 %v13200_v47, %v3430_v1  ;;  %v7916_v6 = vpop.f32.mrb[208].mxu0  ;;  %v8348_v15 = vpop.f32.mrb[208].mxu1  ;;  %v15322_v21 = vld [vmem:[#allocation76_spill] sm:$0xff]  ;;  %v15326_v25 = vld [vmem:[#allocation78_spill] sm:$0xff] }
 0x2b1   :  { %6346 = vst.msk [vmem:[%s14289_s3 + $0x1d0] sm:$0xff] %vm6287_vm4, %v6201_v2  ;;  %v4871_v48 = vadd.f32 %v13200_v47, %v4870_v60  ;;  %15319 = vst [vmem:[#allocation158_spill] sm:$0xff] %v13268_v56  ;;  %v5486_v23 = vmax.f32 %v3436_v55, 0.0  ;;  %v5774_v58 = vmax.f32 %v4876_v39, 0.0  ;;  %v4886_v55 = vadd.f32 %v13200_v47, %v8348_v15  ;;  %v3440_v39 = vpop.f32.mrb[209].mxu0 }
 0x2b2   :  { %v6059_v31 = vmax.f32 %v15317_v54, %v5771_v32  ;;  %v6204_v28 = vmax.f32 %v5916_v17, %v6060_v61  ;;  %v5485_v7 = vmax.f32 %v3431_v36, 0.0  ;;  %v15320_v32 = vld [vmem:[#allocation75_spill] sm:$0xff]  ;;  %v15323_v54 = vmax.f32 %v15322_v21, 0.0  ;;  %v7919_v30 = vpop.f32.mrb[210].mxu0 }
 0x2b3   :  { %v5773_v59 = vmax.f32 %v4871_v48, 0.0  ;;  %v15321_v1 = vmax.f32 %v15320_v32, 0.0  ;;  %v3446_v61 = vadd.f32 %v13200_v47, %v7916_v6  ;;  %v3441_v32 = vadd.f32 %v13200_v47, %v3440_v39 }
 0x2b4   :  { %v6203_v2 = vmax.f32 %v5915_v40, %v6059_v31  ;;  %6349 = vst.msk [vmem:[%s14289_s3 + $0x1e8] sm:$0xff] %vm6287_vm4, %v6204_v28  ;;  %v6062_v17 = vmax.f32 %v15323_v54, %v5774_v58  ;;  %v4880_v40 = vpop.f32.mrb[209].mxu1  ;;  %v15324_v31 = vld [vmem:[#allocation77_spill] sm:$0xff]  ;;  %v15327_v28 = vmax.f32 %v15326_v25, 0.0  ;;  %v5776_v21 = vmax.f32 %v4886_v55, 0.0  ;;  %v3450_v55 = vpop.f32.mrb[211].mxu0 }
 0x2b5   :  { %v5918_v60 = vmax.f32 %v15321_v1, %v5486_v23  ;;  %v15325_v36 = vmax.f32 %v15324_v31, 0.0  ;;  %v4881_v58 = vadd.f32 %v13200_v47, %v4880_v40  ;;  %v5488_v1 = vmax.f32 %v3446_v61, 0.0  ;;  %v8351_v31 = vpop.f32.mrb[210].mxu1  ;;  %v15330_v40 = vld [vmem:[#allocation80_spill] sm:$0xff]  ;;  %v15332_v25 = vld [vmem:[#allocation81_spill] sm:$0xff] }
 0x2b6   :  { %6348 = vst.msk [vmem:[%s14289_s3 + $0x1e0] sm:$0xff] %vm6287_vm4, %v6203_v2  ;;  %v6061_v23 = vmax.f32 %v15327_v28, %v5773_v59  ;;  %v5487_v44 = vmax.f32 %v3441_v32, 0.0  ;;  %v4896_v61 = vadd.f32 %v13200_v47, %v8351_v31  ;;  %v15333_v28 = vmax.f32 %v15332_v25, 0.0  ;;  %v15334_v32 = vld [vmem:[#allocation82_spill] sm:$0xff] }
 0x2b7   :  { %v5917_v48 = vmax.f32 %v15325_v36, %v5485_v7  ;;  %v6206_v15 = vmax.f32 %v5918_v60, %v6062_v17  ;;  %v5775_v2 = vmax.f32 %v4881_v58, 0.0  ;;  %v15328_v7 = vld [vmem:[#allocation79_spill] sm:$0xff]  ;;  %v15331_v36 = vmax.f32 %v15330_v40, 0.0  ;;  %v15336_v40 = vld [vmem:[#allocation210_spill] sm:$0xff] }
 0x2b8   :  { %v15329_v59 = vmax.f32 %v15328_v7, 0.0  ;;  %v3456_v17 = vadd.f32 %v13200_v47, %v7919_v30  ;;  %v15335_v58 = vmax.f32 %v15334_v32, 0.0  ;;  %v15348_v30 = vld [vmem:[#allocation212_spill] sm:$0xff] }
 0x2b9   :  { %v6205_v9 = vmax.f32 %v5917_v48, %v6061_v23  ;;  %6351 = vst.msk [vmem:[%s14289_s3 + $0x1f8] sm:$0xff] %vm6287_vm4, %v6206_v15  ;;  %v6064_v60 = vmax.f32 %v15331_v36, %v5776_v21  ;;  %v4890_v48 = vpop.f32.mrb[211].mxu1  ;;  %v5919_v23 = vmax.f32 %v15333_v28, %v5487_v44  ;;  %v13316_v36 = vadd.f32 %v13200_v47, %v15336_v40  ;;  %v7922_v44 = vpop.f32.mrb[212].mxu0 }
 0x2ba   :  { %v5920_v39 = vmax.f32 %v15329_v59, %v5488_v1  ;;  %v6063_v15 = vmax.f32 %v15335_v58, %v5775_v2  ;;  %v3451_v1 = vadd.f32 %v13200_v47, %v3450_v55  ;;  %v4891_v21 = vadd.f32 %v13200_v47, %v4890_v48  ;;  %v8354_v28 = vpop.f32.mrb[212].mxu1  ;;  %v15338_v2 = vld [vmem:[#allocation83_spill] sm:$0xff] }
 0x2bb   :  { %6350 = vst.msk [vmem:[%s14289_s3 + $0x1f0] sm:$0xff] %vm6287_vm4, %v6205_v9  ;;  %v5490_v7 = vmax.f32 %v3456_v17, 0.0  ;;  %v5778_v59 = vmax.f32 %v4896_v61, 0.0  ;;  %15337 = vst [vmem:[#allocation159_spill] sm:$0xff] %v13316_v36  ;;  %v15339_v55 = vmax.f32 %v15338_v2, 0.0  ;;  %v3466_v61 = vadd.f32 %v13200_v47, %v7922_v44  ;;  %v4900_v58 = vpop.f32.mrb[213].mxu1 }
 0x2bc   :  { %v6208_v31 = vmax.f32 %v5920_v39, %v6064_v60  ;;  %v6207_v9 = vmax.f32 %v5919_v23, %v6063_v15  ;;  %v5489_v54 = vmax.f32 %v3451_v1, 0.0  ;;  %v5777_v25 = vmax.f32 %v4891_v21, 0.0  ;;  %v15340_v39 = vld [vmem:[#allocation84_spill] sm:$0xff]  ;;  %v3460_v23 = vpop.f32.mrb[213].mxu0  ;;  %v15342_v15 = vld [vmem:[#allocation85_spill] sm:$0xff]  ;;  %v15346_v44 = vld [vmem:[#allocation211_spill] sm:$0xff] }
 0x2bd   :  { %v5922_v48 = vmax.f32 %v15339_v55, %v5490_v7  ;;  %v15341_v60 = vmax.f32 %v15340_v39, 0.0  ;;  %v4906_v32 = vadd.f32 %v13200_v47, %v8354_v28  ;;  %v15343_v1 = vmax.f32 %v15342_v15, 0.0 }
 0x2be   :  { %6353 = vst.msk [vmem:[%s14289_s3 + $0x208] sm:$0xff] %vm6287_vm4, %v6208_v31  ;;  %6352 = vst.msk [vmem:[%s14289_s3 + $0x200] sm:$0xff] %vm6287_vm4, %v6207_v9  ;;  %v15344_v31 = vld [vmem:[#allocation86_spill] sm:$0xff]  ;;  %v3461_v2 = vadd.f32 %v13200_v47, %v3460_v23  ;;  %v13340_v28 = vadd.f32 %v13200_v47, %v15346_v44  ;;  %v5492_v39 = vmax.f32 %v3466_v61, 0.0  ;;  %v13344_v9 = vadd.f32 %v13200_v47, %v15348_v30  ;;  %v15350_v23 = vld [vmem:[#allocation87_spill] sm:$0xff] }
 0x2bf   :  { %v6066_v17 = vmax.f32 %v15341_v60, %v5778_v59  ;;  %v5921_v21 = vmax.f32 %v15343_v1, %v5489_v54  ;;  %v15345_v40 = vmax.f32 %v15344_v31, 0.0  ;;  %v4901_v59 = vadd.f32 %v13200_v47, %v4900_v58  ;;  %v7925_v31 = vpop.f32.mrb[214].mxu0 }
 0x2c0   :  { %15347 = vst [vmem:[#allocation160_spill] sm:$0xff] %v13340_v28  ;;  %v5780_v60 = vmax.f32 %v4906_v32, 0.0  ;;  %15349 = vst [vmem:[#allocation161_spill] sm:$0xff] %v13344_v9  ;;  %v5491_v54 = vmax.f32 %v3461_v2, 0.0  ;;  %v15351_v58 = vmax.f32 %v15350_v23, 0.0  ;;  %v3476_v32 = vadd.f32 %v13200_v47, %v7925_v31  ;;  %v15354_v2 = vld [vmem:[#allocation89_spill] sm:$0xff] }
 0x2c1   :  { %v6065_v7 = vmax.f32 %v15345_v40, %v5777_v25  ;;  %v6210_v55 = vmax.f32 %v5922_v48, %v6066_v17  ;;  %v5779_v1 = vmax.f32 %v4901_v59, 0.0  ;;  %v8357_v25 = vpop.f32.mrb[214].mxu1  ;;  %v15352_v48 = vld [vmem:[#allocation88_spill] sm:$0xff]  ;;  %v15355_v59 = vmax.f32 %v15354_v2, 0.0  ;;  %v15358_v31 = vld [vmem:[#allocation213_spill] sm:$0xff] }
 0x2c2   :  { %v5924_v40 = vmax.f32 %v15351_v58, %v5492_v39  ;;  %v15353_v17 = vmax.f32 %v15352_v48, 0.0  ;;  %v4916_v30 = vadd.f32 %v13200_v47, %v8357_v25  ;;  %v13368_v25 = vadd.f32 %v13200_v47, %v15358_v31  ;;  %v15366_v31 = vld [vmem:[#allocation94_spill] sm:$0xff] }
 0x2c3   :  { %v6209_v15 = vmax.f32 %v5921_v21, %v6065_v7  ;;  %6355 = vst.msk [vmem:[%s14289_s3 + $0x218] sm:$0xff] %vm6287_vm4, %v6210_v55  ;;  %v3470_v21 = vpop.f32.mrb[215].mxu0  ;;  %v4910_v7 = vpop.f32.mrb[215].mxu1  ;;  %v5923_v44 = vmax.f32 %v15355_v59, %v5491_v54  ;;  %v15356_v55 = vld [vmem:[#allocation90_spill] sm:$0xff] }
 0x2c4   :  { %v6068_v61 = vmax.f32 %v15353_v17, %v5780_v60  ;;  %v15357_v23 = vmax.f32 %v15356_v55, 0.0  ;;  %v3471_v58 = vadd.f32 %v13200_v47, %v3470_v21  ;;  %v4911_v60 = vadd.f32 %v13200_v47, %v4910_v7  ;;  %15359 = vst [vmem:[#allocation162_spill] sm:$0xff] %v13368_v25  ;;  %v7928_v54 = vpop.f32.mrb[216].mxu0  ;;  %v8360_v59 = vpop.f32.mrb[216].mxu1  ;;  %v15362_v55 = vld [vmem:[#allocation92_spill] sm:$0xff] }
 0x2c5   :  { %6354 = vst.msk [vmem:[%s14289_s3 + $0x210] sm:$0xff] %vm6287_vm4, %v6209_v15  ;;  %v5494_v17 = vmax.f32 %v3476_v32, 0.0  ;;  %v5782_v6 = vmax.f32 %v4916_v30, 0.0  ;;  %v4926_v32 = vadd.f32 %v13200_v47, %v8360_v59  ;;  %v3480_v30 = vpop.f32.mrb[217].mxu0 }
 0x2c6   :  { %v6067_v39 = vmax.f32 %v15357_v23, %v5779_v1  ;;  %v6212_v48 = vmax.f32 %v5924_v40, %v6068_v61  ;;  %v5493_v38 = vmax.f32 %v3471_v58, 0.0  ;;  %v5781_v2 = vmax.f32 %v4911_v60, 0.0  ;;  %v15360_v1 = vld [vmem:[#allocation91_spill] sm:$0xff]  ;;  %v7931_v16 = vpop.f32.mrb[218].mxu0 }
 0x2c7   :  { %v15361_v21 = vmax.f32 %v15360_v1, 0.0  ;;  %v15363_v23 = vmax.f32 %v15362_v55, 0.0  ;;  %v3486_v61 = vadd.f32 %v13200_v47, %v7928_v54  ;;  %v3481_v1 = vadd.f32 %v13200_v47, %v3480_v30 }
 0x2c8   :  { %v6211_v15 = vmax.f32 %v5923_v44, %v6067_v39  ;;  %6357 = vst.msk [vmem:[%s14289_s3 + $0x228] sm:$0xff] %vm6287_vm4, %v6212_v48  ;;  %v4920_v44 = vpop.f32.mrb[217].mxu1  ;;  %v15364_v39 = vld [vmem:[#allocation93_spill] sm:$0xff]  ;;  %v15367_v48 = vmax.f32 %v15366_v31, 0.0  ;;  %v5784_v55 = vmax.f32 %v4926_v32, 0.0  ;;  %v3490_v32 = vpop.f32.mrb[219].mxu0 }
 0x2c9   :  { %v5926_v7 = vmax.f32 %v15361_v21, %v5494_v17  ;;  %v6070_v40 = vmax.f32 %v15363_v23, %v5782_v6  ;;  %v15365_v58 = vmax.f32 %v15364_v39, 0.0  ;;  %v4921_v6 = vadd.f32 %v13200_v47, %v4920_v44  ;;  %v8363_v39 = vpop.f32.mrb[218].mxu1  ;;  %v15370_v44 = vld [vmem:[#allocation96_spill] sm:$0xff]  ;;  %v15372_v31 = vld [vmem:[#allocation97_spill] sm:$0xff] }
 0x2ca   :  { %6356 = vst.msk [vmem:[%s14289_s3 + $0x220] sm:$0xff] %vm6287_vm4, %v6211_v15  ;;  %v6069_v17 = vmax.f32 %v15367_v48, %v5781_v2  ;;  %v5496_v21 = vmax.f32 %v3486_v61, 0.0  ;;  %v5495_v36 = vmax.f32 %v3481_v1, 0.0  ;;  %v4936_v61 = vadd.f32 %v13200_v47, %v8363_v39  ;;  %v15374_v1 = vld [vmem:[#allocation98_spill] sm:$0xff] }
 0x2cb   :  { %v5925_v60 = vmax.f32 %v15365_v58, %v5493_v38  ;;  %v6214_v59 = vmax.f32 %v5926_v7, %v6070_v40  ;;  %v5783_v15 = vmax.f32 %v4921_v6, 0.0  ;;  %v15368_v38 = vld [vmem:[#allocation95_spill] sm:$0xff]  ;;  %v15371_v58 = vmax.f32 %v15370_v44, 0.0  ;;  %v15376_v44 = vld [vmem:[#allocation214_spill] sm:$0xff] }
 0x2cc   :  { %v15369_v2 = vmax.f32 %v15368_v38, 0.0  ;;  %v3496_v40 = vadd.f32 %v13200_v47, %v7931_v16  ;;  %v15373_v48 = vmax.f32 %v15372_v31, 0.0  ;;  %v15375_v6 = vmax.f32 %v15374_v1, 0.0  ;;  %v15387_v16 = vld [vmem:[#allocation216_spill] sm:$0xff] }
 0x2cd   :  { %v6213_v56 = vmax.f32 %v5925_v60, %v6069_v17  ;;  %6359 = vst.msk [vmem:[%s14289_s3 + $0x238] sm:$0xff] %vm6287_vm4, %v6214_v59  ;;  %v6072_v7 = vmax.f32 %v15371_v58, %v5784_v55  ;;  %v4930_v60 = vpop.f32.mrb[219].mxu1  ;;  %v13416_v58 = vadd.f32 %v13200_v47, %v15376_v44 }
 0x2ce   :  { %v5928_v30 = vmax.f32 %v15369_v2, %v5496_v21  ;;  %v5927_v17 = vmax.f32 %v15373_v48, %v5495_v36  ;;  %v6071_v59 = vmax.f32 %v15375_v6, %v5783_v15  ;;  %v3491_v21 = vadd.f32 %v13200_v47, %v3490_v32  ;;  %v7934_v36 = vpop.f32.mrb[220].mxu0  ;;  %v8366_v48 = vpop.f32.mrb[220].mxu1  ;;  %v15378_v15 = vld [vmem:[#allocation99_spill] sm:$0xff] }
 0x2cf   :  { %6358 = vst.msk [vmem:[%s14289_s3 + $0x230] sm:$0xff] %vm6287_vm4, %v6213_v56  ;;  %v4931_v55 = vadd.f32 %v13200_v47, %v4930_v60  ;;  %v5498_v38 = vmax.f32 %v3496_v40, 0.0  ;;  %v5786_v2 = vmax.f32 %v4936_v61, 0.0  ;;  %15377 = vst [vmem:[#allocation163_spill] sm:$0xff] %v13416_v58  ;;  %v15379_v32 = vmax.f32 %v15378_v15, 0.0  ;;  %v4940_v6 = vpop.f32.mrb[221].mxu1 }
 0x2d0   :  { %v6216_v39 = vmax.f32 %v5928_v30, %v6072_v7  ;;  %v6215_v56 = vmax.f32 %v5927_v17, %v6071_v59  ;;  %v5497_v23 = vmax.f32 %v3491_v21, 0.0  ;;  %v15380_v30 = vld [vmem:[#allocation100_spill] sm:$0xff]  ;;  %v3506_v61 = vadd.f32 %v13200_v47, %v7934_v36  ;;  %v3500_v17 = vpop.f32.mrb[221].mxu0  ;;  %v15382_v59 = vld [vmem:[#allocation101_spill] sm:$0xff]  ;;  %v15386_v36 = vld [vmem:[#allocation215_spill] sm:$0xff] }
 0x2d1   :  { %v5785_v31 = vmax.f32 %v4931_v55, 0.0  ;;  %v5930_v60 = vmax.f32 %v15379_v32, %v5498_v38  ;;  %v15381_v7 = vmax.f32 %v15380_v30, 0.0  ;;  %v4946_v1 = vadd.f32 %v13200_v47, %v8366_v48 }
 0x2d2   :  { %6361 = vst.msk [vmem:[%s14289_s3 + $0x248] sm:$0xff] %vm6287_vm4, %v6216_v39  ;;  %6360 = vst.msk [vmem:[%s14289_s3 + $0x240] sm:$0xff] %vm6287_vm4, %v6215_v56  ;;  %v15383_v21 = vmax.f32 %v15382_v59, 0.0  ;;  %v15384_v39 = vld [vmem:[#allocation102_spill] sm:$0xff]  ;;  %v3501_v15 = vadd.f32 %v13200_v47, %v3500_v17  ;;  %v13440_v48 = vadd.f32 %v13200_v47, %v15386_v36  ;;  %v5500_v30 = vmax.f32 %v3506_v61, 0.0  ;;  %v15388_v17 = vld [vmem:[#allocation103_spill] sm:$0xff] }
 0x2d3   :  { %v6074_v40 = vmax.f32 %v15381_v7, %v5786_v2  ;;  %v15385_v44 = vmax.f32 %v15384_v39, 0.0  ;;  %v4941_v2 = vadd.f32 %v13200_v47, %v4940_v6  ;;  %v5788_v7 = vmax.f32 %v4946_v1, 0.0  ;;  %v7937_v39 = vpop.f32.mrb[222].mxu0 }
 0x2d4   :  { %v5929_v55 = vmax.f32 %v15383_v21, %v5497_v23  ;;  %v13444_v56 = vadd.f32 %v13200_v47, %v15387_v16  ;;  %v5499_v23 = vmax.f32 %v3501_v15, 0.0  ;;  %v15389_v6 = vmax.f32 %v15388_v17, 0.0  ;;  %v15392_v15 = vld [vmem:[#allocation105_spill] sm:$0xff] }
 0x2d5   :  { %v6073_v38 = vmax.f32 %v15385_v44, %v5785_v31  ;;  %v6218_v32 = vmax.f32 %v5930_v60, %v6074_v40  ;;  %v5787_v21 = vmax.f32 %v4941_v2, 0.0  ;;  %v8369_v31 = vpop.f32.mrb[222].mxu1  ;;  %v15390_v60 = vld [vmem:[#allocation104_spill] sm:$0xff]  ;;  %v3516_v1 = vadd.f32 %v13200_v47, %v7937_v39  ;;  %v15396_v39 = vld [vmem:[#allocation217_spill] sm:$0xff] }
 0x2d6   :  { %v5932_v44 = vmax.f32 %v15389_v6, %v5500_v30  ;;  %v15391_v40 = vmax.f32 %v15390_v60, 0.0  ;;  %v4956_v16 = vadd.f32 %v13200_v47, %v8369_v31  ;;  %v15393_v2 = vmax.f32 %v15392_v15, 0.0 }
 0x2d7   :  { %v6217_v59 = vmax.f32 %v5929_v55, %v6073_v38  ;;  %6363 = vst.msk [vmem:[%s14289_s3 + $0x258] sm:$0xff] %vm6287_vm4, %v6218_v32  ;;  %v3510_v55 = vpop.f32.mrb[223].mxu0  ;;  %v4950_v38 = vpop.f32.mrb[223].mxu1  ;;  %v15394_v32 = vld [vmem:[#allocation106_spill] sm:$0xff]  ;;  %v13468_v31 = vadd.f32 %v13200_v47, %v15396_v39 }
 0x2d8   :  { %v6076_v61 = vmax.f32 %v15391_v40, %v5788_v7  ;;  %v5931_v36 = vmax.f32 %v15393_v2, %v5499_v23  ;;  %v15395_v17 = vmax.f32 %v15394_v32, 0.0  ;;  %v3511_v6 = vadd.f32 %v13200_v47, %v3510_v55  ;;  %v7940_v23 = vpop.f32.mrb[224].mxu0  ;;  %v8372_v2 = vpop.f32.mrb[224].mxu1  ;;  %v15400_v32 = vld [vmem:[#allocation108_spill] sm:$0xff]  ;;  %v15404_v39 = vld [vmem:[#allocation110_spill] sm:$0xff] }
 0x2d9   :  { %6362 = vst.msk [vmem:[%s14289_s3 + $0x250] sm:$0xff] %vm6287_vm4, %v6217_v59  ;;  %v4951_v7 = vadd.f32 %v13200_v47, %v4950_v38  ;;  %15397 = vst [vmem:[#allocation164_spill] sm:$0xff] %v13468_v31  ;;  %v5502_v40 = vmax.f32 %v3516_v1, 0.0  ;;  %v5790_v54 = vmax.f32 %v4956_v16, 0.0  ;;  %v4966_v1 = vadd.f32 %v13200_v47, %v8372_v2  ;;  %v3520_v16 = vpop.f32.mrb[225].mxu0 }
 0x2da   :  { %v6075_v30 = vmax.f32 %v15395_v17, %v5787_v21  ;;  %v6220_v60 = vmax.f32 %v5932_v44, %v6076_v61  ;;  %v5501_v9 = vmax.f32 %v3511_v6, 0.0  ;;  %v15398_v21 = vld [vmem:[#allocation107_spill] sm:$0xff]  ;;  %v15401_v17 = vmax.f32 %v15400_v32, 0.0  ;;  %v7943_v28 = vpop.f32.mrb[226].mxu0 }
 0x2db   :  { %v5789_v15 = vmax.f32 %v4951_v7, 0.0  ;;  %v15399_v55 = vmax.f32 %v15398_v21, 0.0  ;;  %v3526_v61 = vadd.f32 %v13200_v47, %v7940_v23  ;;  %v3521_v21 = vadd.f32 %v13200_v47, %v3520_v16 }
 0x2dc   :  { %v6219_v59 = vmax.f32 %v5931_v36, %v6075_v30  ;;  %6365 = vst.msk [vmem:[%s14289_s3 + $0x268] sm:$0xff] %vm6287_vm4, %v6220_v60  ;;  %v6078_v44 = vmax.f32 %v15401_v17, %v5790_v54  ;;  %v4960_v36 = vpop.f32.mrb[225].mxu1  ;;  %v15402_v30 = vld [vmem:[#allocation109_spill] sm:$0xff]  ;;  %v15405_v60 = vmax.f32 %v15404_v39, 0.0  ;;  %v5792_v32 = vmax.f32 %v4966_v1, 0.0  ;;  %v3530_v1 = vpop.f32.mrb[227].mxu0 }
 0x2dd   :  { %v5934_v38 = vmax.f32 %v15399_v55, %v5502_v40  ;;  %v15403_v6 = vmax.f32 %v15402_v30, 0.0  ;;  %v4961_v54 = vadd.f32 %v13200_v47, %v4960_v36  ;;  %v5504_v55 = vmax.f32 %v3526_v61, 0.0  ;;  %v8375_v30 = vpop.f32.mrb[226].mxu1  ;;  %v15408_v36 = vld [vmem:[#allocation112_spill] sm:$0xff]  ;;  %v15410_v39 = vld [vmem:[#allocation113_spill] sm:$0xff] }
 0x2de   :  { %6364 = vst.msk [vmem:[%s14289_s3 + $0x260] sm:$0xff] %vm6287_vm4, %v6219_v59  ;;  %v6077_v40 = vmax.f32 %v15405_v60, %v5789_v15  ;;  %v5503_v58 = vmax.f32 %v3521_v21, 0.0  ;;  %v4976_v61 = vadd.f32 %v13200_v47, %v8375_v30  ;;  %v15411_v60 = vmax.f32 %v15410_v39, 0.0  ;;  %v15412_v21 = vld [vmem:[#allocation114_spill] sm:$0xff] }
 0x2df   :  { %v5933_v7 = vmax.f32 %v15403_v6, %v5501_v9  ;;  %v6222_v2 = vmax.f32 %v5934_v38, %v6078_v44  ;;  %v5791_v59 = vmax.f32 %v4961_v54, 0.0  ;;  %v15406_v9 = vld [vmem:[#allocation111_spill] sm:$0xff]  ;;  %v15409_v6 = vmax.f32 %v15408_v36, 0.0  ;;  %v15414_v36 = vld [vmem:[#allocation218_spill] sm:$0xff] }
 0x2e0   :  { %v15407_v15 = vmax.f32 %v15406_v9, 0.0  ;;  %v3536_v44 = vadd.f32 %v13200_v47, %v7943_v28  ;;  %v15413_v54 = vmax.f32 %v15412_v21, 0.0 }
 0x2e1   :  { %v6221_v25 = vmax.f32 %v5933_v7, %v6077_v40  ;;  %6367 = vst.msk [vmem:[%s14289_s3 + $0x278] sm:$0xff] %vm6287_vm4, %v6222_v2  ;;  %v6080_v38 = vmax.f32 %v15409_v6, %v5792_v32  ;;  %v4970_v7 = vpop.f32.mrb[227].mxu1  ;;  %v5935_v40 = vmax.f32 %v15411_v60, %v5503_v58  ;;  %v13516_v6 = vadd.f32 %v13200_v47, %v15414_v36  ;;  %v7946_v58 = vpop.f32.mrb[228].mxu0 }
 0x2e2   :  { %v5936_v16 = vmax.f32 %v15407_v15, %v5504_v55  ;;  %v6079_v2 = vmax.f32 %v15413_v54, %v5791_v59  ;;  %v3531_v55 = vadd.f32 %v13200_v47, %v3530_v1  ;;  %v4971_v32 = vadd.f32 %v13200_v47, %v4970_v7  ;;  %v8378_v60 = vpop.f32.mrb[228].mxu1  ;;  %v15415_v59 = vld [vmem:[#allocation115_spill] sm:$0xff] }
 0x2e3   :  { %6366 = vst.msk [vmem:[%s14289_s3 + $0x270] sm:$0xff] %vm6287_vm4, %v6221_v25  ;;  %v5506_v9 = vmax.f32 %v3536_v44, 0.0  ;;  %v5794_v15 = vmax.f32 %v4976_v61, 0.0  ;;  %v15416_v1 = vmax.f32 %v15415_v59, 0.0  ;;  %v3546_v61 = vadd.f32 %v13200_v47, %v7946_v58  ;;  %v4980_v54 = vpop.f32.mrb[229].mxu1  ;;  %v15422_v58 = vld [vmem:[#allocation219_spill] sm:$0xff] }
 0x2e4   :  { %v6224_v30 = vmax.f32 %v5936_v16, %v6080_v38  ;;  %v6223_v25 = vmax.f32 %v5935_v40, %v6079_v2  ;;  %v5505_v17 = vmax.f32 %v3531_v55, 0.0  ;;  %v5793_v39 = vmax.f32 %v4971_v32, 0.0  ;;  %v15417_v16 = vld [vmem:[#allocation116_spill] sm:$0xff]  ;;  %v3540_v40 = vpop.f32.mrb[229].mxu0  ;;  %v15420_v32 = vld [vmem:[#allocation117_spill] sm:$0xff] }
 0x2e5   :  { %v5938_v7 = vmax.f32 %v15416_v1, %v5506_v9  ;;  %v15418_v38 = vmax.f32 %v15417_v16, 0.0  ;;  %v4986_v21 = vadd.f32 %v13200_v47, %v8378_v60  ;;  %v15419_v2 = vmax.f32 %v11806_v57, 0.0 }
 0x2e6   :  { %6369 = vst.msk [vmem:[%s14289_s3 + $0x288] sm:$0xff] %vm6287_vm4, %v6224_v30  ;;  %6368 = vst.msk [vmem:[%s14289_s3 + $0x280] sm:$0xff] %vm6287_vm4, %v6223_v25  ;;  %v15421_v30 = vmax.f32 %v15420_v32, 0.0  ;;  %v3541_v36 = vadd.f32 %v13200_v47, %v3540_v40  ;;  %v13540_v60 = vadd.f32 %v13200_v47, %v15422_v58  ;;  %v5508_v1 = vmax.f32 %v3546_v61, 0.0  ;;  %v7949_v32 = vpop.f32.mrb[230].mxu0  ;;  %v15424_v40 = vld [vmem:[#allocation119_spill] sm:$0xff] }
 0x2e7   :  { %v6082_v44 = vmax.f32 %v15418_v38, %v5794_v15  ;;  %v5937_v55 = vmax.f32 %v15419_v2, %v5505_v17  ;;  %v4981_v15 = vadd.f32 %v13200_v47, %v4980_v54  ;;  %v5796_v16 = vmax.f32 %v4986_v21, 0.0  ;;  %v15423_v38 = vld [vmem:[#allocation220_spill] sm:$0xff] }
 0x2e8   :  { %v6081_v9 = vmax.f32 %v15421_v30, %v5793_v39  ;;  %v13544_v25 = vadd.f32 %v13200_v47, %v15423_v38  ;;  %v5507_v17 = vmax.f32 %v3541_v36, 0.0  ;;  %v8381_v39 = vpop.f32.mrb[230].mxu1  ;;  %v15425_v54 = vmax.f32 %v15424_v40, 0.0  ;;  %v15428_v36 = vld [vmem:[#allocation121_spill] sm:$0xff]  ;;  %v15430_v38 = vld [vmem:[#allocation122_spill] sm:$0xff] }
 0x2e9   :  { %v6226_v59 = vmax.f32 %v5938_v7, %v6082_v44  ;;  %v5795_v2 = vmax.f32 %v4981_v15, 0.0  ;;  %v15426_v7 = vld [vmem:[#allocation120_spill] sm:$0xff]  ;;  %v3556_v21 = vadd.f32 %v13200_v47, %v7949_v32  ;;  %v4996_v58 = vadd.f32 %v13200_v47, %v8381_v39  ;;  %v15432_v32 = vld [vmem:[#allocation221_spill] sm:$0xff] }
 0x2ea   :  { %v6225_v57 = vmax.f32 %v5937_v55, %v6081_v9  ;;  %v5940_v30 = vmax.f32 %v15425_v54, %v5508_v1  ;;  %v15427_v44 = vmax.f32 %v15426_v7, 0.0  ;;  %v3550_v55 = vpop.f32.mrb[231].mxu0  ;;  %v4990_v9 = vpop.f32.mrb[231].mxu1  ;;  %v15429_v15 = vmax.f32 %v15428_v36, 0.0 }
 0x2eb   :  { %6371 = vst.msk [vmem:[%s14289_s3 + $0x298] sm:$0xff] %vm6287_vm4, %v6226_v59  ;;  %v15431_v40 = vmax.f32 %v15430_v38, 0.0  ;;  %v3551_v54 = vadd.f32 %v13200_v47, %v3550_v55  ;;  %v13568_v39 = vadd.f32 %v13200_v47, %v15432_v32  ;;  %v5798_v28 = vmax.f32 %v4996_v58, 0.0  ;;  %v15435_v38 = vld [vmem:[#allocation124_spill] sm:$0xff] }
 0x2ec   :  { %v6084_v61 = vmax.f32 %v15427_v44, %v5796_v16  ;;  %6370 = vst.msk [vmem:[%s14289_s3 + $0x290] sm:$0xff] %vm6287_vm4, %v6225_v57  ;;  %v5939_v59 = vmax.f32 %v15429_v15, %v5507_v17  ;;  %v4991_v16 = vadd.f32 %v13200_v47, %v4990_v9  ;;  %v5510_v44 = vmax.f32 %v3556_v21, 0.0  ;;  %v7952_v17 = vpop.f32.mrb[232].mxu0  ;;  %v8384_v15 = vpop.f32.mrb[232].mxu1 }
 0x2ed   :  { %v6083_v1 = vmax.f32 %v15431_v40, %v5795_v2  ;;  %v5509_v31 = vmax.f32 %v3551_v54, 0.0  ;;  %v15433_v2 = vld [vmem:[#allocation123_spill] sm:$0xff]  ;;  %v15436_v40 = vmax.f32 %v15435_v38, 0.0  ;;  %v5006_v21 = vadd.f32 %v13200_v47, %v8384_v15  ;;  %v3560_v58 = vpop.f32.mrb[233].mxu0 }
 0x2ee   :  { %v6228_v7 = vmax.f32 %v5940_v30, %v6084_v61  ;;  %v5797_v36 = vmax.f32 %v4991_v16, 0.0  ;;  %v15434_v55 = vmax.f32 %v15433_v2, 0.0  ;;  %v3566_v61 = vadd.f32 %v13200_v47, %v7952_v17  ;;  %v7955_v23 = vpop.f32.mrb[234].mxu0 }
 0x2ef   :  { %v6227_v57 = vmax.f32 %v5939_v59, %v6083_v1  ;;  %v6086_v30 = vmax.f32 %v15436_v40, %v5798_v28  ;;  %v5000_v59 = vpop.f32.mrb[233].mxu1  ;;  %v15437_v1 = vmax.f32 %v11870_v4, 0.0  ;;  %v15438_v16 = vmax.f32 %v11874_v46, 0.0 }
 0x2f0   :  { %6373 = vst.msk [vmem:[%s14289_s3 + $0x2a8] sm:$0xff] %vm6287_vm4, %v6228_v7  ;;  %v5942_v9 = vmax.f32 %v15434_v55, %v5510_v44  ;;  %v3561_v7 = vadd.f32 %v13200_v47, %v3560_v58  ;;  %v5001_v28 = vadd.f32 %v13200_v47, %v5000_v59  ;;  %v5696_v44 = vmax.f32 %v13540_v60, 0.0  ;;  %v8387_v4 = vpop.f32.mrb[234].mxu1 }
 0x2f1   :  { %6372 = vst.msk [vmem:[%s14289_s3 + $0x2a0] sm:$0xff] %vm6287_vm4, %v6227_v57  ;;  %v5941_v54 = vmax.f32 %v15437_v1, %v5509_v31  ;;  %v6085_v32 = vmax.f32 %v15438_v16, %v5797_v36  ;;  %v5512_v15 = vmax.f32 %v3566_v61, 0.0  ;;  %v5800_v2 = vmax.f32 %v5006_v21, 0.0  ;;  %v3570_v21 = vpop.f32.mrb[235].mxu0  ;;  %v5010_v58 = vpop.f32.mrb[235].mxu1 }
 0x2f2   :  { %v6230_v17 = vmax.f32 %v5942_v9, %v6086_v30  ;;  %v5407_v55 = vmax.f32 %v13544_v25, 0.0  ;;  %v5511_v40 = vmax.f32 %v3561_v7, 0.0  ;;  %v5799_v57 = vmax.f32 %v5001_v28, 0.0 }
 0x2f3   :  { %v6229_v38 = vmax.f32 %v5941_v54, %v6085_v32  ;;  %v15439_v46 = vmax.f32 %v11884_v22, 0.0  ;;  %v15440_v36 = vmax.f32 %v11888_v45, 0.0  ;;  %v3576_v30 = vadd.f32 %v13200_v47, %v7955_v23 }
 0x2f4   :  { %6375 = vst.msk [vmem:[%s14289_s3 + $0x2b8] sm:$0xff] %vm6287_vm4, %v6230_v17  ;;  %v5016_v61 = vadd.f32 %v13200_v47, %v8387_v4  ;;  %v15441_v59 = vmax.f32 %v11900_v49, 0.0  ;;  %v15442_v22 = vmax.f32 %v11904_v12, 0.0  ;;  %v3571_v45 = vadd.f32 %v13200_v47, %v3570_v21  ;;  %v15443_v17 = vld [vmem:[#allocation222_spill] sm:$0xff]  ;;  %v8390_v4 = vpop.f32.mrb[236].mxu1 }
 0x2f5   :  { %v5944_v31 = vmax.f32 %v15439_v46, %v5512_v15  ;;  %v6088_v9 = vmax.f32 %v15440_v36, %v5800_v2  ;;  %6374 = vst.msk [vmem:[%s14289_s3 + $0x2b0] sm:$0xff] %vm6287_vm4, %v6229_v38  ;;  %v5011_v16 = vadd.f32 %v13200_v47, %v5010_v58  ;;  %v5695_v23 = vmax.f32 %v13568_v39, 0.0 }
 0x2f6   :  { %v5943_v1 = vmax.f32 %v15441_v59, %v5511_v40  ;;  %v6087_v54 = vmax.f32 %v15442_v22, %v5799_v57  ;;  %v5514_v7 = vmax.f32 %v3576_v30, 0.0  ;;  %v5802_v28 = vmax.f32 %v5016_v61, 0.0  ;;  %v7958_v40 = vpop.f32.mrb[236].mxu0  ;;  %v5020_v61 = vpop.f32.mrb[237].mxu1  ;;  %v15448_v22 = vld [vmem:[#allocation223_spill] sm:$0xff] }
 0x2f7   :  { %v6232_v32 = vmax.f32 %v5944_v31, %v6088_v9  ;;  %v13616_v15 = vadd.f32 %v13200_v47, %v15443_v17  ;;  %v5513_v38 = vmax.f32 %v3571_v45, 0.0  ;;  %v5801_v49 = vmax.f32 %v5011_v16, 0.0  ;;  %v3580_v30 = vpop.f32.mrb[237].mxu0 }
 0x2f8   :  { %v6231_v2 = vmax.f32 %v5943_v1, %v6087_v54  ;;  %v15444_v12 = vmax.f32 %v11918_v8, 0.0  ;;  %v15445_v46 = vmax.f32 %v11922_v20, 0.0  ;;  %v3586_v36 = vadd.f32 %v13200_v47, %v7958_v40 }
 0x2f9   :  { %6377 = vst.msk [vmem:[%s14289_s3 + $0x2c8] sm:$0xff] %vm6287_vm4, %v6232_v32  ;;  %v5026_v9 = vadd.f32 %v13200_v47, %v8390_v4  ;;  %v15446_v21 = vmax.f32 %v11934_v5, 0.0  ;;  %v15447_v8 = vmax.f32 %v11938_v33, 0.0  ;;  %v3581_v20 = vadd.f32 %v13200_v47, %v3580_v30  ;;  %v7961_v33 = vpop.f32.mrb[238].mxu0 }
 0x2fa   :  { %v5946_v57 = vmax.f32 %v15444_v12, %v5514_v7  ;;  %v6090_v31 = vmax.f32 %v15445_v46, %v5802_v28  ;;  %6376 = vst.msk [vmem:[%s14289_s3 + $0x2c0] sm:$0xff] %vm6287_vm4, %v6231_v2  ;;  %v5021_v1 = vadd.f32 %v13200_v47, %v5020_v61  ;;  %v13640_v54 = vadd.f32 %v13200_v47, %v15448_v22  ;;  %v15449_v7 = vld [vmem:[#allocation224_spill] sm:$0xff] }
 0x2fb   :  { %v5945_v58 = vmax.f32 %v15446_v21, %v5513_v38  ;;  %v6089_v59 = vmax.f32 %v15447_v8, %v5801_v49  ;;  %v5516_v16 = vmax.f32 %v3586_v36, 0.0  ;;  %v5804_v32 = vmax.f32 %v5026_v9, 0.0  ;;  %v8393_v38 = vpop.f32.mrb[238].mxu1 }
 0x2fc   :  { %v6234_v45 = vmax.f32 %v5946_v57, %v6090_v31  ;;  %v13644_v28 = vadd.f32 %v13200_v47, %v15449_v7  ;;  %v5515_v17 = vmax.f32 %v3581_v20, 0.0  ;;  %v5803_v2 = vmax.f32 %v5021_v1, 0.0  ;;  %v3590_v31 = vpop.f32.mrb[239].mxu0  ;;  %v5030_v36 = vpop.f32.mrb[239].mxu1 }
 0x2fd   :  { %v6233_v5 = vmax.f32 %v5945_v58, %v6089_v59  ;;  %v15450_v49 = vmax.f32 %v11948_v26, 0.0  ;;  %v15451_v4 = vmax.f32 %v11952_v37, 0.0  ;;  %v3596_v57 = vadd.f32 %v13200_v47, %v7961_v33  ;;  %v15454_v58 = vld [vmem:[#allocation225_spill] sm:$0xff]  ;;  %v8396_v7 = vpop.f32.mrb[240].mxu1 }
 0x2fe   :  { %6379 = vst.msk [vmem:[%s14289_s3 + $0x2d8] sm:$0xff] %vm6287_vm4, %v6234_v45  ;;  %v5036_v46 = vadd.f32 %v13200_v47, %v8393_v38  ;;  %v15452_v9 = vmax.f32 %v11964_v13, 0.0  ;;  %v15453_v26 = vmax.f32 %v11968_v41, 0.0  ;;  %v3591_v37 = vadd.f32 %v13200_v47, %v3590_v31 }
 0x2ff   :  { %v5948_v40 = vmax.f32 %v15450_v49, %v5516_v16  ;;  %v6092_v12 = vmax.f32 %v15451_v4, %v5804_v32  ;;  %6378 = vst.msk [vmem:[%s14289_s3 + $0x2d0] sm:$0xff] %vm6287_vm4, %v6233_v5  ;;  %v5031_v21 = vadd.f32 %v13200_v47, %v5030_v36  ;;  %v13668_v8 = vadd.f32 %v13200_v47, %v15454_v58  ;;  %v7964_v32 = vpop.f32.mrb[240].mxu0 }
 0x300   :  { %v5947_v30 = vmax.f32 %v15452_v9, %v5515_v17  ;;  %v6091_v61 = vmax.f32 %v15453_v26, %v5803_v2  ;;  %v5518_v20 = vmax.f32 %v3596_v57, 0.0  ;;  %v5806_v1 = vmax.f32 %v5036_v46, 0.0  ;;  %v3600_v49 = vpop.f32.mrb[241].mxu0 }
 0x301   :  { %v6236_v59 = vmax.f32 %v5948_v40, %v6092_v12  ;;  %v5410_v22 = vmax.f32 %v13616_v15, 0.0  ;;  %v5517_v16 = vmax.f32 %v3591_v37, 0.0  ;;  %v5805_v13 = vmax.f32 %v5031_v21, 0.0  ;;  %v5040_v40 = vpop.f32.mrb[241].mxu1  ;;  %v7967_v58 = vpop.f32.mrb[242].mxu0 }
 0x302   :  { %v6235_v45 = vmax.f32 %v5947_v30, %v6091_v61  ;;  %v15455_v41 = vmax.f32 %v11982_v43, 0.0  ;;  %v15456_v17 = vmax.f32 %v11986_v52, 0.0  ;;  %v3606_v33 = vadd.f32 %v13200_v47, %v7964_v32 }
 0x303   :  { %6381 = vst.msk [vmem:[%s14289_s3 + $0x2e8] sm:$0xff] %vm6287_vm4, %v6236_v59  ;;  %v5046_v38 = vadd.f32 %v13200_v47, %v8396_v7  ;;  %v15457_v4 = vmax.f32 %v11998_v35, 0.0  ;;  %v15458_v43 = vmax.f32 %v12002_v34, 0.0  ;;  %v3601_v52 = vadd.f32 %v13200_v47, %v3600_v49  ;;  %v8399_v35 = vpop.f32.mrb[242].mxu1 }
 0x304   :  { %v5950_v5 = vmax.f32 %v15455_v41, %v5518_v20  ;;  %v6094_v2 = vmax.f32 %v15456_v17, %v5806_v1  ;;  %6380 = vst.msk [vmem:[%s14289_s3 + $0x2e0] sm:$0xff] %vm6287_vm4, %v6235_v45  ;;  %v5041_v46 = vadd.f32 %v13200_v47, %v5040_v40  ;;  %v5698_v31 = vmax.f32 %v13640_v54, 0.0  ;;  %v5050_v32 = vpop.f32.mrb[243].mxu1  ;;  %v15463_v40 = vld [vmem:[#allocation118_spill] sm:$0xff] }
 0x305   :  { %v5949_v12 = vmax.f32 %v15457_v4, %v5517_v16  ;;  %v6093_v57 = vmax.f32 %v15458_v43, %v5805_v13  ;;  %v5520_v9 = vmax.f32 %v3606_v33, 0.0  ;;  %v5808_v30 = vmax.f32 %v5046_v38, 0.0  ;;  %v3610_v13 = vpop.f32.mrb[243].mxu0 }
 0x306   :  { %v6238_v36 = vmax.f32 %v5950_v5, %v6094_v2  ;;  %v5409_v26 = vmax.f32 %v13644_v28, 0.0  ;;  %v5519_v37 = vmax.f32 %v3601_v52, 0.0  ;;  %v5807_v21 = vmax.f32 %v5041_v46, 0.0  ;;  %v8402_v52 = vpop.f32.mrb[244].mxu1 }
 0x307   :  { %v6237_v61 = vmax.f32 %v5949_v12, %v6093_v57  ;;  %v15459_v34 = vmax.f32 %v12012_v10, 0.0  ;;  %v15460_v20 = vmax.f32 %v12016_v50, 0.0  ;;  %v3616_v45 = vadd.f32 %v13200_v47, %v7967_v58  ;;  %v7970_v57 = vpop.f32.mrb[244].mxu0 }
 0x308   :  { %6383 = vst.msk [vmem:[%s14289_s3 + $0x2f8] sm:$0xff] %vm6287_vm4, %v6238_v36  ;;  %v5056_v16 = vadd.f32 %v13200_v47, %v8399_v35  ;;  %v15461_v7 = vmax.f32 %v12028_v29, 0.0  ;;  %v15462_v10 = vmax.f32 %v12032_v51, 0.0  ;;  %v3611_v50 = vadd.f32 %v13200_v47, %v3610_v13 }
 0x309   :  { %v5952_v59 = vmax.f32 %v15459_v34, %v5520_v9  ;;  %v6096_v1 = vmax.f32 %v15460_v20, %v5808_v30  ;;  %6382 = vst.msk [vmem:[%s14289_s3 + $0x2f0] sm:$0xff] %vm6287_vm4, %v6237_v61  ;;  %v5051_v17 = vadd.f32 %v13200_v47, %v5050_v32  ;;  %v5697_v2 = vmax.f32 %v13668_v8, 0.0  ;;  %v15468_v20 = vld [vmem:[#allocation226_spill] sm:$0xff]  ;;  %v15469_v32 = vld [vmem:[#allocation227_spill] sm:$0xff] }
 0x30a   :  { %v5951_v41 = vmax.f32 %v15461_v7, %v5519_v37  ;;  %v6095_v5 = vmax.f32 %v15462_v10, %v5807_v21  ;;  %v5522_v38 = vmax.f32 %v3616_v45, 0.0  ;;  %v5810_v49 = vmax.f32 %v5056_v16, 0.0  ;;  %v3620_v37 = vpop.f32.mrb[245].mxu0  ;;  %v5060_v21 = vpop.f32.mrb[245].mxu1 }
 0x30b   :  { %v6240_v33 = vmax.f32 %v5952_v59, %v6096_v1  ;;  %v13716_v4 = vadd.f32 %v13200_v47, %v15463_v40  ;;  %v5521_v43 = vmax.f32 %v3611_v50, 0.0  ;;  %v5809_v29 = vmax.f32 %v5051_v17, 0.0 }
 0x30c   :  { %v6239_v12 = vmax.f32 %v5951_v41, %v6095_v5  ;;  %v15464_v51 = vmax.f32 %v12046_v11, 0.0  ;;  %v15465_v36 = vmax.f32 %v12050_v42, 0.0  ;;  %v3626_v30 = vadd.f32 %v13200_v47, %v7970_v57  ;;  %v8405_v5 = vpop.f32.mrb[246].mxu1 }
 0x30d   :  { %6385 = vst.msk [vmem:[%s14289_s3 + $0x308] sm:$0xff] %vm6287_vm4, %v6240_v33  ;;  %v5066_v61 = vadd.f32 %v13200_v47, %v8402_v52  ;;  %v15466_v58 = vmax.f32 %v12062_v63, 0.0  ;;  %v15467_v11 = vmax.f32 %v12066_v3, 0.0  ;;  %v3621_v42 = vadd.f32 %v13200_v47, %v3620_v37  ;;  %v7973_v3 = vpop.f32.mrb[246].mxu0 }
 0x30e   :  { %v5954_v46 = vmax.f32 %v15464_v51, %v5522_v38  ;;  %v6098_v9 = vmax.f32 %v15465_v36, %v5810_v49  ;;  %6384 = vst.msk [vmem:[%s14289_s3 + $0x300] sm:$0xff] %vm6287_vm4, %v6239_v12  ;;  %v5061_v59 = vadd.f32 %v13200_v47, %v5060_v21  ;;  %v13740_v1 = vadd.f32 %v13200_v47, %v15468_v20  ;;  %v3630_v12 = vpop.f32.mrb[247].mxu0 }
 0x30f   :  { %v5953_v35 = vmax.f32 %v15466_v58, %v5521_v43  ;;  %v6097_v34 = vmax.f32 %v15467_v11, %v5809_v29  ;;  %v5524_v16 = vmax.f32 %v3626_v30, 0.0  ;;  %v5812_v13 = vmax.f32 %v5066_v61, 0.0  ;;  %v5070_v43 = vpop.f32.mrb[247].mxu1 }
 0x310   :  { %v6242_v45 = vmax.f32 %v5954_v46, %v6098_v9  ;;  %v13744_v7 = vadd.f32 %v13200_v47, %v15469_v32  ;;  %v5523_v41 = vmax.f32 %v3621_v42, 0.0  ;;  %v5811_v10 = vmax.f32 %v5061_v59, 0.0  ;;  %v15474_v46 = vld [vmem:[#allocation228_spill] sm:$0xff]  ;;  %v8408_v11 = vpop.f32.mrb[248].mxu1 }
 0x311   :  { %v6241_v63 = vmax.f32 %v5953_v35, %v6097_v34  ;;  %v15470_v50 = vmax.f32 %v12076_v62, 0.0  ;;  %v15471_v33 = vmax.f32 %v12080_v18, 0.0  ;;  %v3636_v49 = vadd.f32 %v13200_v47, %v7973_v3  ;;  %v7976_v35 = vpop.f32.mrb[248].mxu0  ;;  %v15477_v59 = vld [vmem:[#allocation236_spill] sm:$0xff] }
 0x312   :  { %6387 = vst.msk [vmem:[%s14289_s3 + $0x318] sm:$0xff] %vm6287_vm4, %v6242_v45  ;;  %v5076_v40 = vadd.f32 %v13200_v47, %v8405_v5  ;;  %v15472_v29 = vmax.f32 %v12092_v14, 0.0  ;;  %v15473_v62 = vmax.f32 %v12096_v19, 0.0  ;;  %v3631_v18 = vadd.f32 %v13200_v47, %v3630_v12  ;;  %v15475_v19 = vld [vmem:[#allocation235_spill] sm:$0xff]  ;;  %v3640_v32 = vpop.f32.mrb[249].mxu0  ;;  %v15481_v5 = vld [vmem:[#allocation238_spill] sm:$0xff] }
 0x313   :  { %v5956_v17 = vmax.f32 %v15470_v50, %v5524_v16  ;;  %v6100_v38 = vmax.f32 %v15471_v33, %v5812_v13  ;;  %6386 = vst.msk [vmem:[%s14289_s3 + $0x310] sm:$0xff] %vm6287_vm4, %v6241_v63  ;;  %v5071_v51 = vadd.f32 %v13200_v47, %v5070_v43  ;;  %v13768_v36 = vadd.f32 %v13200_v47, %v15474_v46  ;;  %v5080_v63 = vpop.f32.mrb[249].mxu1  ;;  %v13792_v33 = vld [vmem:[%s14288_s2] ss:$0 sm:$0xff]  ;;  %v15483_v46 = vld [vmem:[#allocation241_spill] sm:$0xff] }
 0x314   :  { %v5955_v57 = vmax.f32 %v15472_v29, %v5523_v41  ;;  %v6099_v52 = vmax.f32 %v15473_v62, %v5811_v10  ;;  %v5526_v30 = vmax.f32 %v3636_v49, 0.0  ;;  %v5814_v61 = vmax.f32 %v5076_v40, 0.0  ;;  %v15479_v41 = vld [vmem:[#allocation237_spill] sm:$0xff] }
 0x315   :  { %v6244_v9 = vmax.f32 %v5956_v17, %v6100_v38  ;;  %v5412_v37 = vmax.f32 %v13716_v4, 0.0  ;;  %v5525_v58 = vmax.f32 %v3631_v18, 0.0  ;;  %v5813_v14 = vmax.f32 %v5071_v51, 0.0  ;;  %v7979_v18 = vpop.f32.mrb[250].mxu0  ;;  %v8411_v51 = vpop.f32.mrb[250].mxu1 }
 0x316   :  { %v6243_v21 = vmax.f32 %v5955_v57, %v6099_v52  ;;  %v15476_v34 = vmax.f32 %v15475_v19, 0.0  ;;  %v15478_v20 = vmax.f32 %v15477_v59, 0.0  ;;  %v3646_v16 = vadd.f32 %v13200_v47, %v7976_v35  ;;  %v5090_v19 = vpop.f32.mrb[251].mxu1 }
 0x317   :  { %6389 = vst.msk [vmem:[%s14289_s3 + $0x328] sm:$0xff] %vm6287_vm4, %v6244_v9  ;;  %v5086_v13 = vadd.f32 %v13200_v47, %v8408_v11  ;;  %v15480_v10 = vmax.f32 %v15479_v41, 0.0  ;;  %v15482_v50 = vmax.f32 %v15481_v5, 0.0  ;;  %v3641_v47 = vadd.f32 %v13792_v33, %v3640_v32  ;;  %v3650_v11 = vpop.f32.mrb[251].mxu0  ;;  %v15491_v5 = vld [vmem:[#allocation125_spill] sm:$0xff] }
 0x318   :  { %v5958_v42 = vmax.f32 %v15476_v34, %v5526_v30  ;;  %v6102_v45 = vmax.f32 %v15478_v20, %v5814_v61  ;;  %6388 = vst.msk [vmem:[%s14289_s3 + $0x320] sm:$0xff] %vm6287_vm4, %v6243_v21  ;;  %v5081_v38 = vadd.f32 %v13792_v33, %v5080_v63  ;;  %v5700_v49 = vmax.f32 %v13740_v1, 0.0  ;;  %v15485_v61 = vld [vmem:[#allocation242_spill] sm:$0xff]  ;;  %v15487_v34 = vld [vmem:[#allocation245_spill] sm:$0xff] }
 0x319   :  { %v5957_v3 = vmax.f32 %v15480_v10, %v5525_v58  ;;  %v6101_v17 = vmax.f32 %v15482_v50, %v5813_v14  ;;  %v5528_v12 = vmax.f32 %v3646_v16, 0.0  ;;  %v5816_v43 = vmax.f32 %v5086_v13, 0.0  ;;  %v15489_v20 = vld [vmem:[#allocation246_spill] sm:$0xff] }
 0x31a   :  { %v6246_v40 = vmax.f32 %v5958_v42, %v6102_v45  ;;  %v5411_v29 = vmax.f32 %v13744_v7, 0.0  ;;  %v5527_v62 = vmax.f32 %v3641_v47, 0.0  ;;  %v5815_v52 = vmax.f32 %v5081_v38, 0.0 }
 0x31b   :  { %v6245_v57 = vmax.f32 %v5957_v3, %v6101_v17  ;;  %v15484_v9 = vmax.f32 %v15483_v46, 0.0  ;;  %v15486_v21 = vmax.f32 %v15485_v61, 0.0  ;;  %v3656_v14 = vadd.f32 %v13792_v33, %v7979_v18  ;;  %v15495_v18 = vld [vmem:[#allocation248_spill] sm:$0xff] }
 0x31c   :  { %6391 = vst.msk [vmem:[%s14289_s3 + $0x338] sm:$0xff] %vm6287_vm4, %v6246_v40  ;;  %v5096_v35 = vadd.f32 %v13792_v33, %v8411_v51  ;;  %v15488_v42 = vmax.f32 %v15487_v34, 0.0  ;;  %v15490_v45 = vmax.f32 %v15489_v20, 0.0  ;;  %v3651_v13 = vadd.f32 %v13792_v33, %v3650_v11  ;;  %v7982_v40 = vpop.f32.mrb[252].mxu0  ;;  %v15501_v20 = vld [vmem:[#allocation127_spill] sm:$0xff] }
 0x31d   :  { %v5960_v30 = vmax.f32 %v15484_v9, %v5528_v12  ;;  %v6104_v58 = vmax.f32 %v15486_v21, %v5816_v43  ;;  %6390 = vst.msk [vmem:[%s14289_s3 + $0x330] sm:$0xff] %vm6287_vm4, %v6245_v57  ;;  %v5091_v32 = vadd.f32 %v13792_v33, %v5090_v19  ;;  %v5699_v63 = vmax.f32 %v13768_v36, 0.0  ;;  %v15492_v12 = vld [vmem:[#allocation126_spill] sm:$0xff]  ;;  %v15493_v57 = vld [vmem:[#allocation247_spill] sm:$0xff]  ;;  %v3660_v61 = vpop.f32.mrb[253].mxu0  ;;  %v15497_v21 = vld [vmem:[#allocation249_spill] sm:$0xff] }
 0x31e   :  { %v5959_v59 = vmax.f32 %v15488_v42, %v5527_v62  ;;  %v6103_v16 = vmax.f32 %v15490_v45, %v5815_v52  ;;  %v5530_v10 = vmax.f32 %v3656_v14, 0.0  ;;  %v5818_v3 = vmax.f32 %v5096_v35, 0.0  ;;  %v15499_v35 = vld [vmem:[#allocation250_spill] sm:$0xff] }
 0x31f   :  { %v6248_v41 = vmax.f32 %v5960_v30, %v6104_v58  ;;  %v13821_v50 = vadd.f32 %v13792_v33, %v15491_v5  ;;  %v5529_v47 = vmax.f32 %v3651_v13, 0.0  ;;  %v5817_v38 = vmax.f32 %v5091_v32, 0.0  ;;  %v8414_v30 = vpop.f32.mrb[252].mxu1 }
 0x320   :  { %v6247_v17 = vmax.f32 %v5959_v59, %v6103_v16  ;;  %v13825_v43 = vadd.f32 %v13792_v33, %v15492_v12  ;;  %v15494_v62 = vmax.f32 %v15493_v57, 0.0  ;;  %v15496_v51 = vmax.f32 %v15495_v18, 0.0  ;;  %v5100_v59 = vpop.f32.mrb[253].mxu1 }
 0x321   :  { %6393 = vst.msk [vmem:[%s14289_s3 + $0x348] sm:$0xff] %vm6287_vm4, %v6248_v41  ;;  %v3666_v9 = vadd.f32 %v13792_v33, %v7982_v40  ;;  %v15498_v58 = vmax.f32 %v15497_v21, 0.0  ;;  %v15500_v11 = vmax.f32 %v15499_v35, 0.0  ;;  %v5106_v34 = vadd.f32 %v13792_v33, %v8414_v30  ;;  %v15502_v41 = vld [vmem:[#allocation128_spill] sm:$0xff] }
 0x322   :  { %v5962_v52 = vmax.f32 %v15494_v62, %v5530_v10  ;;  %v6106_v46 = vmax.f32 %v15496_v51, %v5818_v3  ;;  %6392 = vst.msk [vmem:[%s14289_s3 + $0x340] sm:$0xff] %vm6287_vm4, %v6247_v17  ;;  %v3661_v42 = vadd.f32 %v13792_v33, %v3660_v61  ;;  %v13848_v45 = vadd.f32 %v13792_v33, %v15501_v20 }
 0x323   :  { %v5961_v14 = vmax.f32 %v15498_v58, %v5529_v47  ;;  %v6105_v19 = vmax.f32 %v15500_v11, %v5817_v38  ;;  %v5532_v13 = vmax.f32 %v3666_v9, 0.0  ;;  %v5101_v32 = vadd.f32 %v13792_v33, %v5100_v59  ;;  %v7985_v47 = vpop.f32.mrb[254].mxu0 }
 0x324   :  { %v6250_v16 = vmax.f32 %v5962_v52, %v6106_v46  ;;  %v13853_v10 = vadd.f32 %v13792_v33, %v15502_v41  ;;  %v5820_v5 = vmax.f32 %v5106_v34, 0.0  ;;  %v5531_v17 = vmax.f32 %v3661_v42, 0.0  ;;  %v8417_v52 = vpop.f32.mrb[254].mxu1  ;;  %v3670_v18 = vpop.f32.mrb[255].mxu0 }
 0x325   :  { %v6249_v3 = vmax.f32 %v5961_v14, %v6105_v19  ;;  %v15503_v40 = vmax.f32 %v12243_v0, 0.0  ;;  %v5819_v57 = vmax.f32 %v5101_v32, 0.0  ;;  %v3676_v62 = vadd.f32 %v13792_v33, %v7985_v47  ;;  %v5110_v21 = vpop.f32.mrb[255].mxu1 }
 0x326   :  { %6395 = vst.msk [vmem:[%s14289_s3 + $0x358] sm:$0xff] %vm6287_vm4, %v6250_v16  ;;  %v15504_v51 = vmax.f32 %v12252_v53, 0.0  ;;  %v15505_v9 = vmax.f32 %v12287_v27, 0.0  ;;  %v5116_v61 = vadd.f32 %v13792_v33, %v8417_v52  ;;  %v3671_v0 = vadd.f32 %v13792_v33, %v3670_v18  ;;  %v7988_v27 = vpop.f32.mrb[0].mxu0  ;;  %v15507_v16 = vld [vmem:[#allocation135_spill] sm:$0xff] }
 0x327   :  { %v5964_v12 = vmax.f32 %v15503_v40, %v5532_v13  ;;  %6394 = vst.msk [vmem:[%s14289_s3 + $0x350] sm:$0xff] %vm6287_vm4, %v6249_v3  ;;  %v15506_v14 = vmax.f32 %v12296_v24, 0.0  ;;  %v5534_v11 = vmax.f32 %v3676_v62, 0.0  ;;  %v5111_v19 = vadd.f32 %v13792_v33, %v5110_v21  ;;  %v15509_v24 = vld [vmem:[#allocation136_spill] sm:$0xff] }
 0x328   :  { %v6108_v46 = vmax.f32 %v15504_v51, %v5820_v5  ;;  %v5963_v30 = vmax.f32 %v15505_v9, %v5531_v17  ;;  %v5822_v42 = vmax.f32 %v5116_v61, 0.0  ;;  %v5533_v59 = vmax.f32 %v3671_v0, 0.0  ;;  %v8420_v5 = vpop.f32.mrb[0].mxu1  ;;  %v3680_v17 = vpop.f32.mrb[1].mxu0  ;;  %v15513_v9 = vld [vmem:[#allocation138_spill] sm:$0xff] }
 0x329   :  { %v6107_v35 = vmax.f32 %v15506_v14, %v5819_v57  ;;  %v15508_v13 = vmax.f32 %v15507_v16, 0.0  ;;  %v5821_v41 = vmax.f32 %v5111_v19, 0.0  ;;  %v3686_v3 = vadd.f32 %v13792_v33, %v7988_v27  ;;  %v5120_v51 = vpop.f32.mrb[1].mxu1  ;;  %v15515_v14 = vld [vmem:[#allocation129_spill] sm:$0xff]  ;;  %v15516_v27 = vld [vmem:[#allocation139_spill] sm:$0xff] }
 0x32a   :  { %v6252_v53 = vmax.f32 %v5964_v12, %v6108_v46  ;;  %v15510_v47 = vmax.f32 %v15509_v24, 0.0  ;;  %v15511_v12 = vld [vmem:[#allocation137_spill] sm:$0xff]  ;;  %v5126_v52 = vadd.f32 %v13792_v33, %v8420_v5  ;;  %v3681_v18 = vadd.f32 %v13792_v33, %v3680_v17  ;;  %v8423_v17 = vpop.f32.mrb[2].mxu1 }
 0x32b   :  { %v6251_v20 = vmax.f32 %v5963_v30, %v6107_v35  ;;  %v5966_v32 = vmax.f32 %v15508_v13, %v5534_v11  ;;  %v15512_v57 = vmax.f32 %v15511_v12, 0.0  ;;  %v15514_v30 = vmax.f32 %v15513_v9, 0.0  ;;  %v15523_v9 = vld [vmem:[#allocation142_spill] sm:$0xff] }
 0x32c   :  { %6397 = vst.msk [vmem:[%s14289_s3 + $0x368] sm:$0xff] %vm6287_vm4, %v6252_v53  ;;  %v6110_v40 = vmax.f32 %v15510_v47, %v5822_v42  ;;  %v5536_v0 = vmax.f32 %v3686_v3, 0.0  ;;  %v5121_v21 = vadd.f32 %v13792_v33, %v5120_v51  ;;  %v13901_v35 = vadd.f32 %v13792_v33, %v15515_v14  ;;  %v7991_v42 = vpop.f32.mrb[2].mxu0  ;;  %v15518_v3 = vld [vmem:[#allocation140_spill] sm:$0xff]  ;;  %v15520_v47 = vld [vmem:[#allocation141_spill] sm:$0xff]  ;;  %v15525_v14 = vld [vmem:[#allocation131_spill] sm:$0xff] }
 0x32d   :  { %v5965_v62 = vmax.f32 %v15512_v57, %v5533_v59  ;;  %6396 = vst.msk [vmem:[%s14289_s3 + $0x360] sm:$0xff] %vm6287_vm4, %v6251_v20  ;;  %v6109_v61 = vmax.f32 %v15514_v30, %v5821_v41  ;;  %v5824_v19 = vmax.f32 %v5126_v52, 0.0  ;;  %v5535_v53 = vmax.f32 %v3681_v18, 0.0  ;;  %v3690_v41 = vpop.f32.mrb[3].mxu0  ;;  %v5130_v52 = vpop.f32.mrb[3].mxu1  ;;  %v15522_v18 = vld [vmem:[#allocation130_spill] sm:$0xff] }
 0x32e   :  { %v6254_v11 = vmax.f32 %v5966_v32, %v6110_v40  ;;  %v15517_v16 = vmax.f32 %v15516_v27, 0.0  ;;  %v5823_v5 = vmax.f32 %v5121_v21, 0.0  ;;  %v3696_v20 = vadd.f32 %v13792_v33, %v7991_v42  ;;  %v7994_v27 = vpop.f32.mrb[4].mxu0 }
 0x32f   :  { %v6253_v59 = vmax.f32 %v5965_v62, %v6109_v61  ;;  %v15519_v24 = vmax.f32 %v15518_v3, 0.0  ;;  %v15521_v40 = vmax.f32 %v15520_v47, 0.0  ;;  %v5136_v57 = vadd.f32 %v13792_v33, %v8423_v17  ;;  %v15526_v17 = vld [vmem:[#allocation143_spill] sm:$0xff]  ;;  %v8426_v47 = vpop.f32.mrb[4].mxu1 }
 0x330   :  { %v5968_v13 = vmax.f32 %v15517_v16, %v5536_v0  ;;  %6399 = vst.msk [vmem:[%s14289_s3 + $0x378] sm:$0xff] %vm6287_vm4, %v6254_v11  ;;  %v3691_v62 = vadd.f32 %v13792_v33, %v3690_v41  ;;  %v13918_v51 = vadd.f32 %v13792_v33, %v15522_v18  ;;  %v15524_v30 = vmax.f32 %v15523_v9, 0.0  ;;  %v5140_v18 = vpop.f32.mrb[5].mxu1  ;;  %v15532_v9 = vld [vmem:[#allocation132_spill] sm:$0xff] }
 0x331   :  { %v6112_v32 = vmax.f32 %v15519_v24, %v5824_v19  ;;  %v5967_v12 = vmax.f32 %v15521_v40, %v5535_v53  ;;  %6398 = vst.msk [vmem:[%s14289_s3 + $0x370] sm:$0xff] %vm6287_vm4, %v6253_v59  ;;  %v5538_v0 = vmax.f32 %v3696_v20, 0.0  ;;  %v5131_v21 = vadd.f32 %v13792_v33, %v5130_v52  ;;  %v15528_v20 = vld [vmem:[#allocation144_spill] sm:$0xff] }
 0x332   :  { %v6111_v61 = vmax.f32 %v15524_v30, %v5823_v5  ;;  %v13929_v11 = vadd.f32 %v13792_v33, %v15525_v14  ;;  %v5826_v53 = vmax.f32 %v5136_v57, 0.0  ;;  %v5537_v42 = vmax.f32 %v3691_v62, 0.0  ;;  %v3700_v5 = vpop.f32.mrb[5].mxu0 }
 0x333   :  { %v6256_v19 = vmax.f32 %v5968_v13, %v6112_v32  ;;  %v15527_v41 = vmax.f32 %v15526_v17, 0.0  ;;  %v5825_v24 = vmax.f32 %v5131_v21, 0.0  ;;  %v3706_v59 = vadd.f32 %v13792_v33, %v7994_v27  ;;  %v15530_v32 = vld [vmem:[#allocation145_spill] sm:$0xff] }
 0x334   :  { %v6255_v16 = vmax.f32 %v5967_v12, %v6111_v61  ;;  %v15529_v40 = vmax.f32 %v15528_v20, 0.0  ;;  %v15531_v57 = vmax.f32 %v15530_v32, 0.0  ;;  %v5146_v12 = vadd.f32 %v13792_v33, %v8426_v47  ;;  %v15533_v61 = vld [vmem:[#allocation146_spill] sm:$0xff] }
 0x335   :  { %v5970_v3 = vmax.f32 %v15527_v41, %v5538_v0  ;;  %6401 = vst.msk [vmem:[%s14289_s3 + $0x388] sm:$0xff] %vm6287_vm4, %v6256_v19  ;;  %v3701_v52 = vadd.f32 %v13792_v33, %v3700_v5  ;;  %v13946_v30 = vadd.f32 %v13792_v33, %v15532_v9  ;;  %v15534_v0 = vmax.f32 %v15533_v61, 0.0  ;;  %v7997_v41 = vpop.f32.mrb[6].mxu0  ;;  %v15535_v5 = vld [vmem:[#allocation147_spill] sm:$0xff] }
 0x336   :  { %v6114_v13 = vmax.f32 %v15529_v40, %v5826_v53  ;;  %v5969_v62 = vmax.f32 %v15531_v57, %v5537_v42  ;;  %6400 = vst.msk [vmem:[%s14289_s3 + $0x380] sm:$0xff] %vm6287_vm4, %v6255_v16  ;;  %v5540_v14 = vmax.f32 %v3706_v59, 0.0  ;;  %v5141_v19 = vadd.f32 %v13792_v33, %v5140_v18  ;;  %v8429_v16 = vpop.f32.mrb[6].mxu1  ;;  %v3710_v9 = vpop.f32.mrb[7].mxu0 }
 0x337   :  { %v6113_v21 = vmax.f32 %v15534_v0, %v5825_v24  ;;  %v5828_v27 = vmax.f32 %v5146_v12, 0.0  ;;  %v5539_v17 = vmax.f32 %v3701_v52, 0.0  ;;  %v15536_v20 = vmax.f32 %v15535_v5, 0.0  ;;  %v15537_v24 = vld [vmem:[#allocation148_spill] sm:$0xff]  ;;  %v5150_v61 = vpop.f32.mrb[7].mxu1 }
 0x338   :  { %v6258_v42 = vmax.f32 %v5970_v3, %v6114_v13  ;;  %v5827_v32 = vmax.f32 %v5141_v19, 0.0  ;;  %v3716_v57 = vadd.f32 %v13792_v33, %v7997_v41  ;;  %v15538_v59 = vmax.f32 %v15537_v24, 0.0  ;;  %v15539_v13 = vld [vmem:[#allocation149_spill] sm:$0xff]  ;;  %v15543_v24 = vld [vmem:[#allocation182_spill] sm:$0xff] }
 0x339   :  { %v6257_v47 = vmax.f32 %v5969_v62, %v6113_v21  ;;  %v5972_v40 = vmax.f32 %v15536_v20, %v5540_v14  ;;  %v15540_v12 = vmax.f32 %v15539_v13, 0.0  ;;  %v5156_v62 = vadd.f32 %v13792_v33, %v8429_v16  ;;  %v15541_v21 = vld [vmem:[#allocation150_spill] sm:$0xff]  ;;  %v8000_v16 = vpop.f32.mrb[8].mxu0 }
 0x33a   :  { %6403 = vst.msk [vmem:[%s14289_s3 + $0x398] sm:$0xff] %vm6287_vm4, %v6258_v42  ;;  %v6116_v3 = vmax.f32 %v15538_v59, %v5828_v27  ;;  %v3711_v18 = vadd.f32 %v13792_v33, %v3710_v9  ;;  %v15542_v14 = vmax.f32 %v15541_v21, 0.0  ;;  %v5542_v42 = vmax.f32 %v3716_v57, 0.0  ;;  %v3720_v53 = vpop.f32.mrb[9].mxu0 }
 0x33b   :  { %v5971_v52 = vmax.f32 %v15540_v12, %v5539_v17  ;;  %6402 = vst.msk [vmem:[%s14289_s3 + $0x390] sm:$0xff] %vm6287_vm4, %v6257_v47  ;;  %v5151_v27 = vadd.f32 %v13792_v33, %v5150_v61  ;;  %v5830_v5 = vmax.f32 %v5156_v62, 0.0  ;;  %v15544_v59 = vmax.f32 %v15543_v24, 0.0  ;;  %v8432_v47 = vpop.f32.mrb[8].mxu1 }
 0x33c   :  { %v6115_v19 = vmax.f32 %v15542_v14, %v5827_v32  ;;  %v6260_v41 = vmax.f32 %v5972_v40, %v6116_v3  ;;  %v5541_v20 = vmax.f32 %v3711_v18, 0.0  ;;  %v3726_v0 = vadd.f32 %v13792_v33, %v8000_v16  ;;  %v15545_v32 = vld [vmem:[#allocation183_spill] sm:$0xff]  ;;  %v5160_v21 = vpop.f32.mrb[9].mxu1  ;;  %v15551_v16 = vld [vmem:[#allocation133_spill] sm:$0xff] }
 0x33d   :  { %v5974_v13 = vmax.f32 %v15544_v59, %v5542_v42  ;;  %v5829_v12 = vmax.f32 %v5151_v27, 0.0  ;;  %v15546_v57 = vmax.f32 %v15545_v32, 0.0  ;;  %v15547_v3 = vld [vmem:[#allocation151_spill] sm:$0xff]  ;;  %v3721_v61 = vadd.f32 %v13792_v33, %v3720_v53 }
 0x33e   :  { %v6259_v9 = vmax.f32 %v5971_v52, %v6115_v19  ;;  %6405 = vst.msk [vmem:[%s14289_s3 + $0x3a8] sm:$0xff] %vm6287_vm4, %v6260_v41  ;;  %v15548_v62 = vmax.f32 %v15547_v3, 0.0  ;;  %v5166_v52 = vadd.f32 %v13792_v33, %v8432_v47  ;;  %v15549_v19 = vld [vmem:[#allocation152_spill] sm:$0xff]  ;;  %v5544_v41 = vmax.f32 %v3726_v0, 0.0  ;;  %v8003_v47 = vpop.f32.mrb[10].mxu0  ;;  %v15554_v0 = vld [vmem:[#allocation154_spill] sm:$0xff] }
 0x33f   :  { %v6118_v40 = vmax.f32 %v15546_v57, %v5830_v5  ;;  %v15550_v42 = vmax.f32 %v15549_v19, 0.0  ;;  %v5161_v5 = vadd.f32 %v13792_v33, %v5160_v21  ;;  %v5543_v59 = vmax.f32 %v3721_v61, 0.0  ;;  %v15552_v57 = vld [vmem:[#allocation153_spill] sm:$0xff]  ;;  %v8435_v19 = vpop.f32.mrb[10].mxu1 }
 0x340   :  { %v5973_v18 = vmax.f32 %v15548_v62, %v5541_v20  ;;  %6404 = vst.msk [vmem:[%s14289_s3 + $0x3a0] sm:$0xff] %vm6287_vm4, %v6259_v9  ;;  %v14001_v20 = vadd.f32 %v13792_v33, %v15551_v16  ;;  %v5832_v53 = vmax.f32 %v5166_v52, 0.0  ;;  %v15553_v3 = vmax.f32 %v15552_v57, 0.0  ;;  %v15559_v16 = vld [vmem:[#allocation185_spill] sm:$0xff] }
 0x341   :  { %v6117_v27 = vmax.f32 %v15550_v42, %v5829_v12  ;;  %v6262_v24 = vmax.f32 %v5974_v13, %v6118_v40  ;;  %v5831_v14 = vmax.f32 %v5161_v5, 0.0  ;;  %v3736_v9 = vadd.f32 %v13792_v33, %v8003_v47  ;;  %v3730_v12 = vpop.f32.mrb[11].mxu0  ;;  %v15556_v40 = vld [vmem:[#allocation184_spill] sm:$0xff]  ;;  %v15561_v57 = vld [vmem:[#allocation229_spill] sm:$0xff] }
 0x342   :  { %v5976_v62 = vmax.f32 %v15553_v3, %v5544_v41  ;;  %v15555_v21 = vmax.f32 %v15554_v0, 0.0  ;;  %v15557_v52 = vmax.f32 %v15556_v40, 0.0  ;;  %v3731_v42 = vadd.f32 %v13792_v33, %v3730_v12  ;;  %v15558_v41 = vld [vmem:[#allocation134_spill] sm:$0xff] }
 0x343   :  { %v6261_v32 = vmax.f32 %v5973_v18, %v6117_v27  ;;  %6407 = vst.msk [vmem:[%s14289_s3 + $0x3b8] sm:$0xff] %vm6287_vm4, %v6262_v24  ;;  %v5176_v18 = vadd.f32 %v13792_v33, %v8435_v19  ;;  %v5170_v27 = vpop.f32.mrb[11].mxu1  ;;  %v14018_v5 = vadd.f32 %v13792_v33, %v15558_v41  ;;  %v15560_v24 = vmax.f32 %v15559_v16, 0.0 }
 0x344   :  { %v6120_v13 = vmax.f32 %v15555_v21, %v5832_v53  ;;  %v5975_v61 = vmax.f32 %v15557_v52, %v5543_v59  ;;  %v5546_v47 = vmax.f32 %v3736_v9, 0.0  ;;  %v5171_v59 = vadd.f32 %v13792_v33, %v5170_v27  ;;  %v8006_v21 = vpop.f32.mrb[12].mxu0  ;;  %v15562_v52 = vld [vmem:[#allocation155_spill] sm:$0xff]  ;;  %v8438_v16 = vpop.f32.mrb[12].mxu1  ;;  %v15564_v9 = vld [vmem:[#allocation156_spill] sm:$0xff] }
 0x345   :  { %6406 = vst.msk [vmem:[%s14289_s3 + $0x3b0] sm:$0xff] %vm6287_vm4, %v6261_v32  ;;  %v6119_v53 = vmax.f32 %v15560_v24, %v5831_v14  ;;  %v14029_v3 = vadd.f32 %v13792_v33, %v15561_v57  ;;  %v5834_v12 = vmax.f32 %v5176_v18, 0.0  ;;  %v5545_v0 = vmax.f32 %v3731_v42, 0.0  ;;  %v3740_v14 = vpop.f32.mrb[13].mxu0  ;;  %v15569_v57 = vld [vmem:[#allocation158_spill] sm:$0xff] }
 0x346   :  { %v6264_v19 = vmax.f32 %v5976_v62, %v6120_v13  ;;  %v15563_v41 = vmax.f32 %v15562_v52, 0.0  ;;  %v5833_v46 = vmax.f32 %v5171_v59, 0.0  ;;  %v3746_v32 = vadd.f32 %v13792_v33, %v8006_v21  ;;  %v15566_v13 = vld [vmem:[#allocation157_spill] sm:$0xff] }
 0x347   :  { %v6263_v40 = vmax.f32 %v5975_v61, %v6119_v53  ;;  %v15565_v27 = vmax.f32 %v15564_v9, 0.0  ;;  %v15567_v18 = vmax.f32 %v15566_v13, 0.0  ;;  %v5186_v61 = vadd.f32 %v13792_v33, %v8438_v16  ;;  %v5180_v53 = vpop.f32.mrb[13].mxu1  ;;  %v8009_v9 = vpop.f32.mrb[14].mxu0  ;;  %v15571_v13 = vld [vmem:[#allocation159_spill] sm:$0xff] }
 0x348   :  { %v5978_v17 = vmax.f32 %v15563_v41, %v5546_v47  ;;  %6409 = vst.msk [vmem:[%s14289_s3 + $0x3c8] sm:$0xff] %vm6287_vm4, %v6264_v19  ;;  %v3741_v24 = vadd.f32 %v13792_v33, %v3740_v14  ;;  %v15568_v47 = vld [vmem:[#allocation230_spill] sm:$0xff]  ;;  %v15570_v19 = vmax.f32 %v15569_v57, 0.0  ;;  %v5548_v21 = vmax.f32 %v3746_v32, 0.0  ;;  %v3750_v38 = vpop.f32.mrb[15].mxu0 }
 0x349   :  { %v6122_v62 = vmax.f32 %v15565_v27, %v5834_v12  ;;  %v5977_v42 = vmax.f32 %v15567_v18, %v5545_v0  ;;  %v14046_v59 = vadd.f32 %v13792_v33, %v15568_v47  ;;  %6408 = vst.msk [vmem:[%s14289_s3 + $0x3c0] sm:$0xff] %vm6287_vm4, %v6263_v40  ;;  %v5181_v0 = vadd.f32 %v13792_v33, %v5180_v53  ;;  %v8441_v40 = vpop.f32.mrb[14].mxu1 }
 0x34a   :  { %v6121_v12 = vmax.f32 %v15570_v19, %v5833_v46  ;;  %v5836_v16 = vmax.f32 %v5186_v61, 0.0  ;;  %v5547_v14 = vmax.f32 %v3741_v24, 0.0  ;;  %v15572_v18 = vmax.f32 %v15571_v13, 0.0  ;;  %v15573_v46 = vld [vmem:[#allocation160_spill] sm:$0xff]  ;;  %v5190_v57 = vpop.f32.mrb[15].mxu1 }
 0x34b   :  { %v6266_v41 = vmax.f32 %v5978_v17, %v6122_v62  ;;  %v5835_v34 = vmax.f32 %v5181_v0, 0.0  ;;  %v3756_v58 = vadd.f32 %v13792_v33, %v8009_v9  ;;  %v15574_v32 = vmax.f32 %v15573_v46, 0.0  ;;  %v15575_v62 = vld [vmem:[#allocation161_spill] sm:$0xff]  ;;  %v15579_v46 = vld [vmem:[#allocation163_spill] sm:$0xff] }
 0x34c   :  { %v6265_v27 = vmax.f32 %v5977_v42, %v6121_v12  ;;  %v5980_v47 = vmax.f32 %v15572_v18, %v5548_v21  ;;  %v15576_v61 = vmax.f32 %v15575_v62, 0.0  ;;  %v5196_v42 = vadd.f32 %v13792_v33, %v8441_v40  ;;  %v15577_v12 = vld [vmem:[#allocation162_spill] sm:$0xff] }
 0x34d   :  { %6411 = vst.msk [vmem:[%s14289_s3 + $0x3d8] sm:$0xff] %vm6287_vm4, %v6266_v41  ;;  %v6124_v17 = vmax.f32 %v15574_v32, %v5836_v16  ;;  %v3751_v53 = vadd.f32 %v13792_v33, %v3750_v38  ;;  %v15578_v21 = vmax.f32 %v15577_v12, 0.0  ;;  %v5550_v41 = vmax.f32 %v3756_v58, 0.0  ;;  %v8012_v38 = vpop.f32.mrb[16].mxu0  ;;  %v15583_v12 = vld [vmem:[#allocation164_spill] sm:$0xff] }
 0x34e   :  { %v5979_v24 = vmax.f32 %v15576_v61, %v5547_v14  ;;  %6410 = vst.msk [vmem:[%s14289_s3 + $0x3d0] sm:$0xff] %vm6287_vm4, %v6265_v27  ;;  %v5191_v16 = vadd.f32 %v13792_v33, %v5190_v57  ;;  %v5417_v14 = vmax.f32 %v14029_v3, 0.0  ;;  %v5838_v13 = vmax.f32 %v5196_v42, 0.0  ;;  %v8444_v27 = vpop.f32.mrb[16].mxu1  ;;  %v3760_v52 = vpop.f32.mrb[17].mxu0 }
 0x34f   :  { %v6123_v0 = vmax.f32 %v15578_v21, %v5835_v34  ;;  %v6268_v9 = vmax.f32 %v5980_v47, %v6124_v17  ;;  %v5549_v18 = vmax.f32 %v3751_v53, 0.0  ;;  %v15580_v32 = vmax.f32 %v15579_v46, 0.0  ;;  %v5200_v53 = vpop.f32.mrb[17].mxu1 }
 0x350   :  { %v5837_v61 = vmax.f32 %v5191_v16, 0.0  ;;  %v3766_v19 = vadd.f32 %v13792_v33, %v8012_v38  ;;  %v15581_v58 = vmax.f32 %v13440_v48, 0.0  ;;  %v15582_v47 = vmax.f32 %v13444_v56, 0.0  ;;  %v15585_v56 = vld [vmem:[#allocation231_spill] sm:$0xff] }
 0x351   :  { %v6267_v40 = vmax.f32 %v5979_v24, %v6123_v0  ;;  %v5982_v62 = vmax.f32 %v15580_v32, %v5550_v41  ;;  %6413 = vst.msk [vmem:[%s14289_s3 + $0x3e8] sm:$0xff] %vm6287_vm4, %v6268_v9  ;;  %v5206_v24 = vadd.f32 %v13792_v33, %v8444_v27  ;;  %v3761_v42 = vadd.f32 %v13792_v33, %v3760_v52 }
 0x352   :  { %v6126_v34 = vmax.f32 %v15581_v58, %v5838_v13  ;;  %v5981_v17 = vmax.f32 %v15582_v47, %v5549_v18  ;;  %v5705_v57 = vmax.f32 %v14046_v59, 0.0  ;;  %v15584_v21 = vmax.f32 %v15583_v12, 0.0  ;;  %v8015_v18 = vpop.f32.mrb[18].mxu0  ;;  %v8447_v58 = vpop.f32.mrb[18].mxu1 }
 0x353   :  { %6412 = vst.msk [vmem:[%s14289_s3 + $0x3e0] sm:$0xff] %vm6287_vm4, %v6267_v40  ;;  %v5552_v48 = vmax.f32 %v3766_v19, 0.0  ;;  %v5201_v41 = vadd.f32 %v13792_v33, %v5200_v53  ;;  %v14101_v16 = vadd.f32 %v13792_v33, %v15585_v56  ;;  %v5840_v52 = vmax.f32 %v5206_v24, 0.0  ;;  %v5210_v47 = vpop.f32.mrb[19].mxu1 }
 0x354   :  { %v6125_v0 = vmax.f32 %v15584_v21, %v5837_v61  ;;  %v6270_v9 = vmax.f32 %v5982_v62, %v6126_v34  ;;  %v5551_v13 = vmax.f32 %v3761_v42, 0.0  ;;  %v15586_v46 = vmax.f32 %v13516_v6, 0.0  ;;  %v3770_v61 = vpop.f32.mrb[19].mxu0  ;;  %v8450_v39 = vpop.f32.mrb[20].mxu1 }
 0x355   :  { %v5839_v27 = vmax.f32 %v5201_v41, 0.0  ;;  %v3776_v40 = vadd.f32 %v13792_v33, %v8015_v18  ;;  %v6128_v19 = vmax.f32 %v5696_v44, %v5840_v52  ;;  %v5216_v34 = vadd.f32 %v13792_v33, %v8447_v58 }
 0x356   :  { %v6269_v38 = vmax.f32 %v5981_v17, %v6125_v0  ;;  %v5984_v32 = vmax.f32 %v15586_v46, %v5552_v48  ;;  %6415 = vst.msk [vmem:[%s14289_s3 + $0x3f8] sm:$0xff] %vm6287_vm4, %v6270_v9  ;;  %v5983_v62 = vmax.f32 %v5407_v55, %v5551_v13  ;;  %v3771_v6 = vadd.f32 %v13792_v33, %v3770_v61  ;;  %v15587_v17 = vld [vmem:[#allocation232_spill] sm:$0xff]  ;;  %v15588_v55 = vld [vmem:[#allocation233_spill] sm:$0xff]  ;;  %v8018_v0 = vpop.f32.mrb[20].mxu0 }
 0x357   :  { %v14118_v24 = vadd.f32 %v13792_v33, %v15587_v17  ;;  %v6127_v60 = vmax.f32 %v5695_v23, %v5839_v27  ;;  %v5554_v44 = vmax.f32 %v3776_v40, 0.0  ;;  %v5211_v25 = vadd.f32 %v13792_v33, %v5210_v47  ;;  %v3780_v23 = vpop.f32.mrb[21].mxu0 }
 0x358   :  { %6414 = vst.msk [vmem:[%s14289_s3 + $0x3f0] sm:$0xff] %vm6287_vm4, %v6269_v38  ;;  %v14129_v42 = vadd.f32 %v13792_v33, %v15588_v55  ;;  %v6272_v53 = vmax.f32 %v5984_v32, %v6128_v19  ;;  %v5842_v12 = vmax.f32 %v5216_v34, 0.0  ;;  %v5553_v21 = vmax.f32 %v3771_v6, 0.0  ;;  %v15589_v38 = vld [vmem:[#allocation234_spill] sm:$0xff]  ;;  %v8021_v58 = vpop.f32.mrb[22].mxu0 }
 0x359   :  { %v6271_v48 = vmax.f32 %v5983_v62, %v6127_v60  ;;  %v5986_v41 = vmax.f32 %v5410_v22, %v5554_v44  ;;  %v5841_v56 = vmax.f32 %v5211_v25, 0.0  ;;  %v3786_v9 = vadd.f32 %v13792_v33, %v8018_v0  ;;  %v5220_v22 = vpop.f32.mrb[21].mxu1  ;;  %v3790_v47 = vpop.f32.mrb[23].mxu0 }
 0x35a   :  { %6417 = vst.msk [vmem:[%s14289_s3 + $0x408] sm:$0xff] %vm6287_vm4, %v6272_v53  ;;  %v6130_v52 = vmax.f32 %v5698_v31, %v5842_v12  ;;  %v5985_v13 = vmax.f32 %v5409_v26, %v5553_v21  ;;  %v5226_v18 = vadd.f32 %v13792_v33, %v8450_v39  ;;  %v3781_v15 = vadd.f32 %v13792_v33, %v3780_v23  ;;  %v8453_v6 = vpop.f32.mrb[22].mxu1  ;;  %v8024_v53 = vpop.f32.mrb[24].mxu0 }
 0x35b   :  { %v14146_v46 = vadd.f32 %v13792_v33, %v15589_v38  ;;  %6416 = vst.msk [vmem:[%s14289_s3 + $0x400] sm:$0xff] %vm6287_vm4, %v6271_v48  ;;  %v6129_v54 = vmax.f32 %v5697_v2, %v5841_v56  ;;  %v5556_v31 = vmax.f32 %v3786_v9, 0.0  ;;  %v5221_v28 = vadd.f32 %v13792_v33, %v5220_v22  ;;  %v3800_v9 = vpop.f32.mrb[25].mxu0 }
 0x35c   :  { %v5420_v26 = vmax.f32 %v14101_v16, 0.0  ;;  %v6274_v32 = vmax.f32 %v5986_v41, %v6130_v52  ;;  %v5844_v27 = vmax.f32 %v5226_v18, 0.0  ;;  %v5555_v40 = vmax.f32 %v3781_v15, 0.0 }
 0x35d   :  { %v6273_v61 = vmax.f32 %v5985_v13, %v6129_v54  ;;  %v5988_v19 = vmax.f32 %v5412_v37, %v5556_v31  ;;  %v5843_v62 = vmax.f32 %v5221_v28, 0.0  ;;  %v3796_v34 = vadd.f32 %v13792_v33, %v8021_v58  ;;  %v5230_v37 = vpop.f32.mrb[23].mxu1 }
 0x35e   :  { %6419 = vst.msk [vmem:[%s14289_s3 + $0x418] sm:$0xff] %vm6287_vm4, %v6274_v32  ;;  %v6132_v8 = vmax.f32 %v5700_v49, %v5844_v27  ;;  %v5987_v2 = vmax.f32 %v5411_v29, %v5555_v40  ;;  %v5236_v17 = vadd.f32 %v13792_v33, %v8453_v6  ;;  %v3791_v4 = vadd.f32 %v13792_v33, %v3790_v47  ;;  %v8456_v56 = vpop.f32.mrb[24].mxu1  ;;  %v8027_v27 = vpop.f32.mrb[26].mxu0 }
 0x35f   :  { %v5708_v60 = vmax.f32 %v14118_v24, 0.0  ;;  %6418 = vst.msk [vmem:[%s14289_s3 + $0x410] sm:$0xff] %vm6287_vm4, %v6273_v61  ;;  %v6131_v44 = vmax.f32 %v5699_v63, %v5843_v62  ;;  %v5558_v1 = vmax.f32 %v3796_v34, 0.0  ;;  %v5231_v49 = vadd.f32 %v13792_v33, %v5230_v37  ;;  %v5240_v13 = vpop.f32.mrb[25].mxu1  ;;  %v3810_v34 = vpop.f32.mrb[27].mxu0  ;;  %v15598_v37 = vld [vmem:[#allocation240_spill] sm:$0xff] }
 0x360   :  { %v5419_v7 = vmax.f32 %v14129_v42, 0.0  ;;  %v6276_v29 = vmax.f32 %v5988_v19, %v6132_v8  ;;  %v5846_v25 = vmax.f32 %v5236_v17, 0.0  ;;  %v5557_v55 = vmax.f32 %v3791_v4, 0.0 }
 0x361   :  { %v6275_v12 = vmax.f32 %v5987_v2, %v6131_v44  ;;  %v15590_v21 = vmax.f32 %v13821_v50, 0.0  ;;  %v5845_v48 = vmax.f32 %v5231_v49, 0.0  ;;  %v3806_v41 = vadd.f32 %v13792_v33, %v8024_v53 }
 0x362   :  { %6421 = vst.msk [vmem:[%s14289_s3 + $0x428] sm:$0xff] %vm6287_vm4, %v6276_v29  ;;  %v15591_v36 = vmax.f32 %v13825_v43, 0.0  ;;  %v15592_v39 = vmax.f32 %v13848_v45, 0.0  ;;  %v5246_v52 = vadd.f32 %v13792_v33, %v8456_v56  ;;  %v3801_v50 = vadd.f32 %v13792_v33, %v3800_v9  ;;  %v15594_v45 = vld [vmem:[#allocation239_spill] sm:$0xff] }
 0x363   :  { %v5990_v0 = vmax.f32 %v15590_v21, %v5558_v1  ;;  %v5707_v18 = vmax.f32 %v14146_v46, 0.0  ;;  %6420 = vst.msk [vmem:[%s14289_s3 + $0x420] sm:$0xff] %vm6287_vm4, %v6275_v12  ;;  %v15593_v15 = vmax.f32 %v13853_v10, 0.0  ;;  %v5560_v43 = vmax.f32 %v3806_v41, 0.0  ;;  %v8459_v10 = vpop.f32.mrb[26].mxu1  ;;  %v15600_v29 = vld [vmem:[#allocation243_spill] sm:$0xff] }
 0x364   :  { %v6134_v63 = vmax.f32 %v15591_v36, %v5846_v25  ;;  %v5989_v23 = vmax.f32 %v15592_v39, %v5557_v55  ;;  %v5241_v38 = vadd.f32 %v13792_v33, %v5240_v13  ;;  %v14201_v54 = vadd.f32 %v13792_v33, %v15594_v45  ;;  %v5250_v4 = vpop.f32.mrb[27].mxu1  ;;  %v8030_v21 = vpop.f32.mrb[28].mxu0  ;;  %v15603_v13 = vld [vmem:[#allocation244_spill] sm:$0xff] }
 0x365   :  { %v6133_v22 = vmax.f32 %v15593_v15, %v5845_v48  ;;  %v5848_v28 = vmax.f32 %v5246_v52, 0.0  ;;  %v5559_v32 = vmax.f32 %v3801_v50, 0.0  ;;  %v15595_v58 = vmax.f32 %v13901_v35, 0.0  ;;  %v8462_v36 = vpop.f32.mrb[28].mxu1 }
 0x366   :  { %v6278_v31 = vmax.f32 %v5990_v0, %v6134_v63  ;;  %v5847_v19 = vmax.f32 %v5241_v38, 0.0  ;;  %v3816_v62 = vadd.f32 %v13792_v33, %v8027_v27  ;;  %v15596_v6 = vmax.f32 %v13918_v51, 0.0  ;;  %v5260_v50 = vpop.f32.mrb[29].mxu1 }
 0x367   :  { %v6277_v40 = vmax.f32 %v5989_v23, %v6133_v22  ;;  %v5992_v61 = vmax.f32 %v15595_v58, %v5560_v43  ;;  %v15597_v8 = vmax.f32 %v13929_v11, 0.0  ;;  %v5256_v17 = vadd.f32 %v13792_v33, %v8459_v10  ;;  %v8465_v58 = vpop.f32.mrb[30].mxu1 }
 0x368   :  { %6423 = vst.msk [vmem:[%s14289_s3 + $0x438] sm:$0xff] %vm6287_vm4, %v6278_v31  ;;  %v6136_v47 = vmax.f32 %v15596_v6, %v5848_v28  ;;  %v3811_v35 = vadd.f32 %v13792_v33, %v3810_v34  ;;  %v4556_v44 = vadd.f32 %v13792_v33, %v15598_v37  ;;  %v15599_v1 = vmax.f32 %v13946_v30, 0.0  ;;  %v3820_v30 = vpop.f32.mrb[29].mxu0 }
 0x369   :  { %v5991_v2 = vmax.f32 %v15597_v8, %v5559_v32  ;;  %6422 = vst.msk [vmem:[%s14289_s3 + $0x430] sm:$0xff] %vm6287_vm4, %v6277_v40  ;;  %v5562_v49 = vmax.f32 %v3816_v62, 0.0  ;;  %v5251_v11 = vadd.f32 %v13792_v33, %v5250_v4  ;;  %v3111_v25 = vadd.f32 %v13792_v33, %v15600_v29  ;;  %v8033_v31 = vpop.f32.mrb[30].mxu0 }
 0x36a   :  { %v6135_v51 = vmax.f32 %v15599_v1, %v5847_v19  ;;  %v6280_v55 = vmax.f32 %v5992_v61, %v6136_v47  ;;  %v5850_v53 = vmax.f32 %v5256_v17, 0.0  ;;  %v5561_v12 = vmax.f32 %v3811_v35, 0.0  ;;  %v3830_v61 = vpop.f32.mrb[31].mxu0 }
 0x36b   :  { %v15601_v48 = vmax.f32 %v14001_v20, 0.0  ;;  %v5849_v56 = vmax.f32 %v5251_v11, 0.0  ;;  %v3826_v9 = vadd.f32 %v13792_v33, %v8030_v21  ;;  %v15602_v63 = vmax.f32 %v14018_v5, 0.0 }
 0x36c   :  { %v6279_v0 = vmax.f32 %v5991_v2, %v6135_v51  ;;  %6425 = vst.msk [vmem:[%s14289_s3 + $0x448] sm:$0xff] %vm6287_vm4, %v6280_v55  ;;  %v5993_v23 = vmax.f32 %v5417_v14, %v5561_v12  ;;  %v5266_v52 = vadd.f32 %v13792_v33, %v8462_v36  ;;  %v3821_v20 = vadd.f32 %v13792_v33, %v3820_v30 }
 0x36d   :  { %v5994_v41 = vmax.f32 %v15601_v48, %v5562_v49  ;;  %v6138_v39 = vmax.f32 %v15602_v63, %v5850_v53  ;;  %v4551_v15 = vadd.f32 %v13792_v33, %v15603_v13  ;;  %v6137_v5 = vmax.f32 %v5705_v57, %v5849_v56 }
 0x36e   :  { %6424 = vst.msk [vmem:[%s14289_s3 + $0x440] sm:$0xff] %vm6287_vm4, %v6279_v0  ;;  %v5564_v22 = vmax.f32 %v3826_v9, 0.0  ;;  %v5261_v3 = vadd.f32 %v13792_v33, %v5260_v50  ;;  %v5422_v14 = vmax.f32 %v14201_v54, 0.0  ;;  %v5852_v38 = vmax.f32 %v5266_v52, 0.0 }
 0x36f   :  { %v6282_v43 = vmax.f32 %v5994_v41, %v6138_v39  ;;  %v5563_v45 = vmax.f32 %v3821_v20, 0.0  ;;  %v6281_v28 = vmax.f32 %v5993_v23, %v6137_v5  ;;  %v3836_v40 = vadd.f32 %v13792_v33, %v8033_v31 }
 0x370   :  { %v5996_v32 = vmax.f32 %v5420_v26, %v5564_v22  ;;  %v5851_v27 = vmax.f32 %v5261_v3, 0.0  ;;  %v6140_v59 = vmax.f32 %v5708_v60, %v5852_v38  ;;  %v5276_v54 = vadd.f32 %v13792_v33, %v8465_v58  ;;  %v5270_v26 = vpop.f32.mrb[31].mxu1 }
 0x371   :  { %6427 = vst.msk [vmem:[%s14289_s3 + $0x458] sm:$0xff] %vm6287_vm4, %v6282_v43  ;;  %v5995_v57 = vmax.f32 %v5419_v7, %v5563_v45  ;;  %v3831_v16 = vadd.f32 %v13792_v33, %v3830_v61  ;;  %v5710_v19 = vmax.f32 %v4556_v44, 0.0  ;;  %6426 = vst.msk [vmem:[%s14289_s3 + $0x450] sm:$0xff] %vm6287_vm4, %v6281_v28  ;;  %v5566_v10 = vmax.f32 %v3836_v40, 0.0 }
 0x372   :  { %v6139_v62 = vmax.f32 %v5707_v18, %v5851_v27  ;;  %v5271_v24 = vadd.f32 %v13792_v33, %v5270_v26  ;;  %v5421_v60 = vmax.f32 %v3111_v25, 0.0  ;;  %v6284_v42 = vmax.f32 %v5996_v32, %v6140_v59 }
 0x373   :  { %v5854_v7 = vmax.f32 %v5276_v54, 0.0  ;;  %v5565_v34 = vmax.f32 %v3831_v16, 0.0  ;;  %v5709_v6 = vmax.f32 %v4551_v15, 0.0  ;;  %v5998_v8 = vmax.f32 %v5422_v14, %v5566_v10 }
 0x374   :  { %v6283_v47 = vmax.f32 %v5995_v57, %v6139_v62  ;;  %v5853_v2 = vmax.f32 %v5271_v24, 0.0  ;;  %6429 = vst.msk [vmem:[%s14289_s3 + $0x468] sm:$0xff] %vm6287_vm4, %v6284_v42 }
 0x375   :  { %v6142_v17 = vmax.f32 %v5710_v19, %v5854_v7  ;;  %v5997_v35 = vmax.f32 %v5421_v60, %v5565_v34 }
 0x376   :  { %6428 = vst.msk [vmem:[%s14289_s3 + $0x460] sm:$0xff] %vm6287_vm4, %v6283_v47  ;;  %v6141_v33 = vmax.f32 %v5709_v6, %v5853_v2 }
 0x377   :  { %v6286_v46 = vmax.f32 %v5998_v8, %v6142_v17 }
 0x378   :  { %v6285_v18 = vmax.f32 %v5997_v35, %v6141_v33 }
 0x379   :  { %6431 = vst.msk [vmem:[%s14289_s3 + $0x478] sm:$0xff] %vm6287_vm4, %v6286_v46 }
 0x37a   :  { %6430 = vst.msk [vmem:[%s14289_s3 + $0x470] sm:$0xff] %vm6287_vm4, %v6285_v18 }

// kernel: lenet5_forward.3
= control target key start
LH: loop header
LB: loop body
LE: loop exit
PB: predicated region body
PF: predicated region fallthrough
CT: control target
= control target key end

     0   :  { %v2839_v3 = vmov 0.0|0.0   ;;  %vm187_vm0 = vcmask 179200   ;;  %v2840_v30 = vmov 0.0   ;;  %vm380_vm1 = vcmask 1045504   ;;  %s3950_s0 = inlined_call_operand.vmem [shape: f32[512,150], index: 0, kind: input, shape index: {}]   ;;  %s3951_s1 = inlined_call_operand.vmem [shape: f32[150,16], index: 1, kind: input, shape index: {}]   ;;  %s3952_s2 = inlined_call_operand.vmem [shape: f32[1,16], index: 2, kind: input, shape index: {}]   ;;  %s3953_s3 = inlined_call_operand.vmem [shape: f32[256,120], index: 3, kind: input, shape index: {}]   ;;  %s3954_s4 = inlined_call_operand.vmem [shape: f32[1,120], index: 4, kind: input, shape index: {}]   ;;  %s3955_s5 = inlined_call_operand.vmem [shape: f32[120,82], index: 5, kind: input, shape index: {}]   ;;  %s3956_s6 = inlined_call_operand.vmem [shape: f32[1,82], index: 6, kind: input, shape index: {}]   ;;  %s3957_s7 = inlined_call_operand.vmem [shape: f32[82,10], index: 7, kind: input, shape index: {}]   ;;  %s3958_s8 = inlined_call_operand.vmem [shape: f32[1,10], index: 8, kind: input, shape index: {}]   ;;  %s3959_s9 = inlined_call_operand.hbm [shape: f32[8,10], index: 9, kind: output, shape index: {}]  }
   0x1   :  { %v161_v0 = vld [vmem:[%s3951_s1] sm:$0xff]  ;;  %v162_v1 = vld [vmem:[%s3951_s1 + $0x8] sm:$0xff]  ;;  %v163_v2 = vld [vmem:[%s3951_s1 + $0x10] sm:$0xff]  ;;  %2649 = vmatprep.subr.bf16.mxu0 %v2839_v3  ;;  %2760 = vmatprep.subr.bf16.mxu1 %v2839_v3 }
   0x2   :  { %v2650_v4 = vpack.c.bf16 %v162_v1, %v161_v0  ;;  %v164_v5 = vld [vmem:[%s3951_s1 + $0x18] sm:$0xff]  ;;  %v165_v7 = vld [vmem:[%s3951_s1 + $0x20] sm:$0xff]  ;;  %v166_v8 = vld [vmem:[%s3951_s1 + $0x28] sm:$0xff] }
   0x3   :  { %v2653_v6 = vpack.c.bf16 %v164_v5, %v163_v2  ;;  %v34_v9 = vld [vmem:[%s3950_s0 + $0x8] sm:$0xff]  ;;  %v2656_v10 = vpack.c.bf16 %v166_v8, %v165_v7  ;;  %v167_v11 = vld [vmem:[%s3951_s1 + $0x30] sm:$0xff]  ;;  %v168_v12 = vld [vmem:[%s3951_s1 + $0x38] sm:$0xff] }
   0x4   :  { %2651 = vmatpush1.bf16.msra.mxu0 %v2650_v4  ;;  %2770 = vmatpush1.bf16.msra.mxu1 %v2650_v4  ;;  %v2659_v13 = vpack.c.bf16 %v168_v12, %v167_v11  ;;  %v169_v14 = vld [vmem:[%s3951_s1 + $0x40] sm:$0xff]  ;;  %v170_v15 = vld [vmem:[%s3951_s1 + $0x48] sm:$0xff]  ;;  %v171_v17 = vld [vmem:[%s3951_s1 + $0x50] sm:$0xff] }
   0x5   :  { %2652 = vmatprep.subr.bf16.mxu0 %v2839_v3  ;;  %2761 = vmatprep.subr.bf16.mxu1 %v2839_v3  ;;  %v2662_v16 = vpack.c.bf16 %v170_v15, %v169_v14  ;;  %v172_v18 = vld [vmem:[%s3951_s1 + $0x58] sm:$0xff]  ;;  %v173_v21 = vld [vmem:[%s3951_s1 + $0x60] sm:$0xff]  ;;  %v174_v22 = vld [vmem:[%s3951_s1 + $0x68] sm:$0xff] }
   0x6   :  { %2317 = vmatprep.mubr.msk.f32.mxu0 %vm187_vm0, %v34_v9  ;;  %v128_v19 = vld [vmem:[%s3950_s0 + $0x2f8] sm:$0xff]  ;;  %v2665_v20 = vpack.c.bf16 %v172_v18, %v171_v17  ;;  %v2668_v23 = vpack.c.bf16 %v174_v22, %v173_v21  ;;  %v175_v24 = vld [vmem:[%s3951_s1 + $0x70] sm:$0xff]  ;;  %v177_v27 = vld [vmem:[%s3951_s1 + $0x80] sm:$0xff] }
   0x7   :  { %2364 = vmatprep.mubr.msk.f32.mxu1 %vm187_vm0, %v128_v19  ;;  %v176_v25 = vld [vmem:[%s3951_s1 + $0x78] sm:$0xff]  ;;  %v178_v28 = vld [vmem:[%s3951_s1 + $0x88] sm:$0xff]  ;;  %v179_v31 = vld [vmem:[%s3951_s1 + $0x90] sm:$0x3f] }
   0x8   :  { %2654 = vmatpush1.bf16.msra.mxu0 %v2653_v6  ;;  %2771 = vmatpush1.bf16.msra.mxu1 %v2653_v6  ;;  %v2671_v26 = vpack.c.bf16 %v176_v25, %v175_v24  ;;  %v2674_v29 = vpack.c.bf16 %v178_v28, %v177_v27  ;;  %v33_v32 = vld [vmem:[%s3950_s0] sm:$0xff]  ;;  %v36_v33 = vld [vmem:[%s3950_s0 + $0x18] sm:$0xff]  ;;  %v127_v34 = vld [vmem:[%s3950_s0 + $0x2f0] sm:$0xff] }
   0x9   :  { %2655 = vmatprep.subr.bf16.mxu0 %v2839_v3  ;;  %2762 = vmatprep.subr.bf16.mxu1 %v2839_v3  ;;  %v130_v35 = vld [vmem:[%s3950_s0 + $0x308] sm:$0xff] }
   0xc   :  { %2657 = vmatpush1.bf16.msra.mxu0 %v2656_v10  ;;  %2772 = vmatpush1.bf16.msra.mxu1 %v2656_v10 }
   0xd   :  { %2658 = vmatprep.subr.bf16.mxu0 %v2839_v3  ;;  %2763 = vmatprep.subr.bf16.mxu1 %v2839_v3 }
  0x10   :  { %2660 = vmatpush1.bf16.msra.mxu0 %v2659_v13  ;;  %2773 = vmatpush1.bf16.msra.mxu1 %v2659_v13 }
  0x11   :  { %2661 = vmatprep.subr.bf16.mxu0 %v2839_v3  ;;  %2764 = vmatprep.subr.bf16.mxu1 %v2839_v3 }
  0x14   :  { %2663 = vmatpush1.bf16.msra.mxu0 %v2662_v16  ;;  %2774 = vmatpush1.bf16.msra.mxu1 %v2662_v16 }
  0x15   :  { %2664 = vmatprep.subr.bf16.mxu0 %v2839_v3  ;;  %2765 = vmatprep.subr.bf16.mxu1 %v2839_v3 }
  0x18   :  { %2666 = vmatpush1.bf16.msra.mxu0 %v2665_v20  ;;  %2775 = vmatpush1.bf16.msra.mxu1 %v2665_v20 }
  0x19   :  { %2667 = vmatprep.subr.bf16.mxu0 %v2839_v3  ;;  %2766 = vmatprep.subr.bf16.mxu1 %v2839_v3 }
  0x1c   :  { %2669 = vmatpush1.bf16.msra.mxu0 %v2668_v23  ;;  %2776 = vmatpush1.bf16.msra.mxu1 %v2668_v23 }
  0x1d   :  { %2670 = vmatprep.subr.bf16.mxu0 %v2839_v3  ;;  %2767 = vmatprep.subr.bf16.mxu1 %v2839_v3 }
  0x20   :  { %2672 = vmatpush1.bf16.msra.mxu0 %v2671_v26  ;;  %2777 = vmatpush1.bf16.msra.mxu1 %v2671_v26 }
  0x21   :  { %2673 = vmatprep.subr.bf16.mxu0 %v2839_v3  ;;  %2768 = vmatprep.subr.bf16.mxu1 %v2839_v3 }
  0x24   :  { %2675 = vmatpush1.bf16.msra.mxu0 %v2674_v29  ;;  %2778 = vmatpush1.bf16.msra.mxu1 %v2674_v29 }
  0x25   :  { %420 = vmatprep.subr.mxu0 %v2840_v30  ;;  %2769 = vmatprep.subr.mxu1 %v2840_v30 }
  0x28   :  { %2316 = vmatpush1.msk.msra.mxu0 %vm380_vm1, %v179_v31 }
  0x29   :  { %14 = vsyncpa [#allocation3], 0  ;;  %449 = vmatmul.mubr.f32.vlgmr.msra.gmra.mrb[0].mxu0 %v33_v32  ;;  %2779 = vmatpush1.msk.msra.mxu1 %vm380_vm1, %v179_v31  ;;  %v35_v36 = vld [vmem:[%s3950_s0 + $0x10] sm:$0xff]  ;;  %v38_v37 = vld [vmem:[%s3950_s0 + $0x28] sm:$0xff]  ;;  %vm2841_vm2 = vmmov 0   ;;  %vm884_vm3 = vcmask 130048  }
  0x2a   :  { %2318 = vmatprep.mubr.msk.f32.mxu0 %vm187_vm0, %v36_v33  ;;  %684 = vmatmul.mubr.f32.vlgmr.msra.gmra.mrb[0].mxu1 %v127_v34  ;;  %v129_v38 = vld [vmem:[%s3950_s0 + $0x300] sm:$0xff]  ;;  %v132_v39 = vld [vmem:[%s3950_s0 + $0x318] sm:$0xff]  ;;  %v131_v42 = vld [vmem:[%s3950_s0 + $0x310] sm:$0xff]  ;;  %vm2128_vm4 = vcmask 982016   ;;  %vm2225_vm5 = vcmask 1041408   ;;  %vm2221_vm6 = vcmask 670720  }
  0x2b   :  { %2365 = vmatprep.mubr.msk.f32.mxu1 %vm187_vm0, %v130_v35  ;;  %2676 = vmatprep.subr.bf16.mxu1 %v2839_v3  ;;  %v37_v40 = vld [vmem:[%s3950_s0 + $0x20] sm:$0xff]  ;;  %v40_v41 = vld [vmem:[%s3950_s0 + $0x38] sm:$0xff]  ;;  %v134_v43 = vld [vmem:[%s3950_s0 + $0x328] sm:$0xff]  ;;  %s2842_s17 = smov [#allocation2]   ;;  %vm2299_vm7 = vcmask 80896  }
  0x2c   :  { %v39_v44 = vld [vmem:[%s3950_s0 + $0x30] sm:$0xff]  ;;  %v42_v45 = vld [vmem:[%s3950_s0 + $0x48] sm:$0xff]  ;;  %v133_v46 = vld [vmem:[%s3950_s0 + $0x320] sm:$0xff]  ;;  %s2307_s18 = sshll.u32 %s2842_s17, 4  ;;  %s2308_s18 = int_to_ptr.vmem [resolvable:$true] %s2307_s18 }
  0x2d   :  { %454 = vmatmul.mubr.f32.gmra.mrb[2].mxu0 %v35_v36  ;;  %v136_v47 = vld [vmem:[%s3950_s0 + $0x338] sm:$0xff]  ;;  %v41_v48 = vld [vmem:[%s3950_s0 + $0x40] sm:$0xff]  ;;  %v135_v50 = vld [vmem:[%s3950_s0 + $0x330] sm:$0xff]  ;;  %p2820_p1 = scmp.lt.s32.totalorder %s2308_s18, %s2308_s18 }
  0x2e   :  { %2319 = vmatprep.mubr.msk.f32.mxu0 %vm187_vm0, %v38_v37  ;;  %689 = vmatmul.mubr.f32.gmra.mrb[2].mxu1 %v129_v38  ;;  %v44_v49 = vld [vmem:[%s3950_s0 + $0x58] sm:$0xff]  ;;  %v138_v51 = vld [vmem:[%s3950_s0 + $0x348] sm:$0xff]  ;;  %v43_v52 = vld [vmem:[%s3950_s0 + $0x50] sm:$0xff] }
  0x2f   :  { %2366 = vmatprep.mubr.msk.f32.mxu1 %vm187_vm0, %v132_v39  ;;  %v46_v53 = vld [vmem:[%s3950_s0 + $0x68] sm:$0xff]  ;;  %v137_v54 = vld [vmem:[%s3950_s0 + $0x340] sm:$0xff]  ;;  %v140_v55 = vld [vmem:[%s3950_s0 + $0x358] sm:$0xff] }
  0x30   :  { %v45_v56 = vld [vmem:[%s3950_s0 + $0x60] sm:$0xff]  ;;  %v48_v57 = vld [vmem:[%s3950_s0 + $0x78] sm:$0xff]  ;;  %v139_v58 = vld [vmem:[%s3950_s0 + $0x350] sm:$0xff] }
  0x31   :  { %459 = vmatmul.mubr.f32.gmra.mrb[4].mxu0 %v37_v40  ;;  %v142_v59 = vld [vmem:[%s3950_s0 + $0x368] sm:$0xff]  ;;  %v47_v60 = vld [vmem:[%s3950_s0 + $0x70] sm:$0xff]  ;;  %v141_v62 = vld [vmem:[%s3950_s0 + $0x360] sm:$0xff] }
  0x32   :  { %2320 = vmatprep.mubr.msk.f32.mxu0 %vm187_vm0, %v40_v41  ;;  %694 = vmatmul.mubr.f32.gmra.mrb[4].mxu1 %v131_v42  ;;  %v50_v61 = vld [vmem:[%s3950_s0 + $0x88] sm:$0xff]  ;;  %v144_v63 = vld [vmem:[%s3950_s0 + $0x378] sm:$0xff]  ;;  %v49_v0 = vld [vmem:[%s3950_s0 + $0x80] sm:$0xff] }
  0x33   :  { %2367 = vmatprep.mubr.msk.f32.mxu1 %vm187_vm0, %v134_v43  ;;  %v52_v1 = vld [vmem:[%s3950_s0 + $0x98] sm:$0xff]  ;;  %v143_v2 = vld [vmem:[%s3950_s0 + $0x370] sm:$0xff]  ;;  %v146_v4 = vld [vmem:[%s3950_s0 + $0x388] sm:$0xff] }
  0x34   :  { %v51_v5 = vld [vmem:[%s3950_s0 + $0x90] sm:$0xff]  ;;  %v54_v6 = vld [vmem:[%s3950_s0 + $0xa8] sm:$0xff]  ;;  %v145_v7 = vld [vmem:[%s3950_s0 + $0x380] sm:$0xff] }
  0x35   :  { %464 = vmatmul.mubr.f32.gmra.mrb[6].mxu0 %v39_v44  ;;  %v148_v8 = vld [vmem:[%s3950_s0 + $0x398] sm:$0xff]  ;;  %v53_v9 = vld [vmem:[%s3950_s0 + $0xa0] sm:$0xff]  ;;  %v147_v11 = vld [vmem:[%s3950_s0 + $0x390] sm:$0xff] }
  0x36   :  { %2321 = vmatprep.mubr.msk.f32.mxu0 %vm187_vm0, %v42_v45  ;;  %699 = vmatmul.mubr.f32.gmra.mrb[6].mxu1 %v133_v46  ;;  %v56_v10 = vld [vmem:[%s3950_s0 + $0xb8] sm:$0xff]  ;;  %v150_v12 = vld [vmem:[%s3950_s0 + $0x3a8] sm:$0xff]  ;;  %v55_v13 = vld [vmem:[%s3950_s0 + $0xb0] sm:$0xff] }
  0x37   :  { %2368 = vmatprep.mubr.msk.f32.mxu1 %vm187_vm0, %v136_v47  ;;  %v58_v14 = vld [vmem:[%s3950_s0 + $0xc8] sm:$0xff]  ;;  %v149_v15 = vld [vmem:[%s3950_s0 + $0x3a0] sm:$0xff]  ;;  %v152_v16 = vld [vmem:[%s3950_s0 + $0x3b8] sm:$0xff] }
  0x38   :  { %v57_v17 = vld [vmem:[%s3950_s0 + $0xc0] sm:$0xff]  ;;  %v60_v18 = vld [vmem:[%s3950_s0 + $0xd8] sm:$0xff]  ;;  %v151_v19 = vld [vmem:[%s3950_s0 + $0x3b0] sm:$0xff] }
  0x39   :  { %469 = vmatmul.mubr.f32.gmra.mrb[8].mxu0 %v41_v48  ;;  %v154_v20 = vld [vmem:[%s3950_s0 + $0x3c8] sm:$0xff]  ;;  %v59_v21 = vld [vmem:[%s3950_s0 + $0xd0] sm:$0xff]  ;;  %v153_v23 = vld [vmem:[%s3950_s0 + $0x3c0] sm:$0xff] }
  0x3a   :  { %2322 = vmatprep.mubr.msk.f32.mxu0 %vm187_vm0, %v44_v49  ;;  %704 = vmatmul.mubr.f32.gmra.mrb[8].mxu1 %v135_v50  ;;  %v62_v22 = vld [vmem:[%s3950_s0 + $0xe8] sm:$0xff]  ;;  %v156_v24 = vld [vmem:[%s3950_s0 + $0x3d8] sm:$0xff]  ;;  %v61_v25 = vld [vmem:[%s3950_s0 + $0xe0] sm:$0xff] }
  0x3b   :  { %2369 = vmatprep.mubr.msk.f32.mxu1 %vm187_vm0, %v138_v51  ;;  %v64_v26 = vld [vmem:[%s3950_s0 + $0xf8] sm:$0xff]  ;;  %v155_v27 = vld [vmem:[%s3950_s0 + $0x3d0] sm:$0xff]  ;;  %v158_v28 = vld [vmem:[%s3950_s0 + $0x3e8] sm:$0xff] }
  0x3c   :  { %v63_v29 = vld [vmem:[%s3950_s0 + $0xf0] sm:$0xff]  ;;  %v66_v31 = vld [vmem:[%s3950_s0 + $0x108] sm:$0xff]  ;;  %v157_v32 = vld [vmem:[%s3950_s0 + $0x3e0] sm:$0xff] }
  0x3d   :  { %474 = vmatmul.mubr.f32.gmra.mrb[10].mxu0 %v43_v52  ;;  %v160_v33 = vld [vmem:[%s3950_s0 + $0x3f8] sm:$0xff]  ;;  %v65_v34 = vld [vmem:[%s3950_s0 + $0x100] sm:$0xff]  ;;  %v159_v36 = vld [vmem:[%s3950_s0 + $0x3f0] sm:$0xff] }
  0x3e   :  { %2323 = vmatprep.mubr.msk.f32.mxu0 %vm187_vm0, %v46_v53  ;;  %709 = vmatmul.mubr.f32.gmra.mrb[10].mxu1 %v137_v54  ;;  %v68_v35 = vld [vmem:[%s3950_s0 + $0x118] sm:$0xff]  ;;  %v67_v37 = vld [vmem:[%s3950_s0 + $0x110] sm:$0xff]  ;;  %v70_v38 = vld [vmem:[%s3950_s0 + $0x128] sm:$0xff] }
  0x3f   :  { %2370 = vmatprep.mubr.msk.f32.mxu1 %vm187_vm0, %v140_v55  ;;  %v69_v39 = vld [vmem:[%s3950_s0 + $0x120] sm:$0xff]  ;;  %v72_v40 = vld [vmem:[%s3950_s0 + $0x138] sm:$0xff]  ;;  %v71_v41 = vld [vmem:[%s3950_s0 + $0x130] sm:$0xff] }
  0x40   :  { %v74_v42 = vld [vmem:[%s3950_s0 + $0x148] sm:$0xff]  ;;  %v73_v43 = vld [vmem:[%s3950_s0 + $0x140] sm:$0xff]  ;;  %v76_v44 = vld [vmem:[%s3950_s0 + $0x158] sm:$0xff] }
  0x41   :  { %479 = vmatmul.mubr.f32.gmra.mrb[12].mxu0 %v45_v56  ;;  %v75_v45 = vld [vmem:[%s3950_s0 + $0x150] sm:$0xff]  ;;  %v78_v46 = vld [vmem:[%s3950_s0 + $0x168] sm:$0xff]  ;;  %v77_v47 = vld [vmem:[%s3950_s0 + $0x160] sm:$0xff] }
  0x42   :  { %2324 = vmatprep.mubr.msk.f32.mxu0 %vm187_vm0, %v48_v57  ;;  %714 = vmatmul.mubr.f32.gmra.mrb[12].mxu1 %v139_v58  ;;  %v80_v48 = vld [vmem:[%s3950_s0 + $0x178] sm:$0xff]  ;;  %v79_v49 = vld [vmem:[%s3950_s0 + $0x170] sm:$0xff]  ;;  %v82_v50 = vld [vmem:[%s3950_s0 + $0x188] sm:$0xff] }
  0x43   :  { %2371 = vmatprep.mubr.msk.f32.mxu1 %vm187_vm0, %v142_v59  ;;  %v81_v51 = vld [vmem:[%s3950_s0 + $0x180] sm:$0xff]  ;;  %v84_v52 = vld [vmem:[%s3950_s0 + $0x198] sm:$0xff]  ;;  %v83_v53 = vld [vmem:[%s3950_s0 + $0x190] sm:$0xff] }
  0x44   :  { %v86_v54 = vld [vmem:[%s3950_s0 + $0x1a8] sm:$0xff]  ;;  %v85_v55 = vld [vmem:[%s3950_s0 + $0x1a0] sm:$0xff]  ;;  %v88_v56 = vld [vmem:[%s3950_s0 + $0x1b8] sm:$0xff] }
  0x45   :  { %484 = vmatmul.mubr.f32.gmra.mrb[14].mxu0 %v47_v60  ;;  %v87_v57 = vld [vmem:[%s3950_s0 + $0x1b0] sm:$0xff]  ;;  %v90_v58 = vld [vmem:[%s3950_s0 + $0x1c8] sm:$0xff]  ;;  %v89_v59 = vld [vmem:[%s3950_s0 + $0x1c0] sm:$0xff] }
  0x46   :  { %2325 = vmatprep.mubr.msk.f32.mxu0 %vm187_vm0, %v50_v61  ;;  %719 = vmatmul.mubr.f32.gmra.mrb[14].mxu1 %v141_v62  ;;  %v92_v60 = vld [vmem:[%s3950_s0 + $0x1d8] sm:$0xff]  ;;  %v91_v61 = vld [vmem:[%s3950_s0 + $0x1d0] sm:$0xff]  ;;  %v94_v62 = vld [vmem:[%s3950_s0 + $0x1e8] sm:$0xff] }
  0x47   :  { %2372 = vmatprep.mubr.msk.f32.mxu1 %vm187_vm0, %v144_v63  ;;  %v93_v63 = vld [vmem:[%s3950_s0 + $0x1e0] sm:$0xff] }
  0x49   :  { %489 = vmatmul.mubr.f32.gmra.mrb[16].mxu0 %v49_v0  ;;  %v96_v0 = vld [vmem:[%s3950_s0 + $0x1f8] sm:$0xff] }
  0x4a   :  { %2326 = vmatprep.mubr.msk.f32.mxu0 %vm187_vm0, %v52_v1  ;;  %724 = vmatmul.mubr.f32.gmra.mrb[16].mxu1 %v143_v2  ;;  %v95_v1 = vld [vmem:[%s3950_s0 + $0x1f0] sm:$0xff]  ;;  %v98_v2 = vld [vmem:[%s3950_s0 + $0x208] sm:$0xff] }
  0x4b   :  { %2373 = vmatprep.mubr.msk.f32.mxu1 %vm187_vm0, %v146_v4  ;;  %v97_v4 = vld [vmem:[%s3950_s0 + $0x200] sm:$0xff] }
  0x4d   :  { %494 = vmatmul.mubr.f32.gmra.mrb[18].mxu0 %v51_v5  ;;  %v100_v5 = vld [vmem:[%s3950_s0 + $0x218] sm:$0xff] }
  0x4e   :  { %2327 = vmatprep.mubr.msk.f32.mxu0 %vm187_vm0, %v54_v6  ;;  %729 = vmatmul.mubr.f32.gmra.mrb[18].mxu1 %v145_v7  ;;  %v99_v6 = vld [vmem:[%s3950_s0 + $0x210] sm:$0xff]  ;;  %v102_v7 = vld [vmem:[%s3950_s0 + $0x228] sm:$0xff] }
  0x4f   :  { %2374 = vmatprep.mubr.msk.f32.mxu1 %vm187_vm0, %v148_v8  ;;  %v101_v8 = vld [vmem:[%s3950_s0 + $0x220] sm:$0xff] }
  0x51   :  { %499 = vmatmul.mubr.f32.gmra.mrb[20].mxu0 %v53_v9  ;;  %v104_v9 = vld [vmem:[%s3950_s0 + $0x238] sm:$0xff] }
  0x52   :  { %2328 = vmatprep.mubr.msk.f32.mxu0 %vm187_vm0, %v56_v10  ;;  %734 = vmatmul.mubr.f32.gmra.mrb[20].mxu1 %v147_v11  ;;  %v103_v10 = vld [vmem:[%s3950_s0 + $0x230] sm:$0xff]  ;;  %v106_v11 = vld [vmem:[%s3950_s0 + $0x248] sm:$0xff] }
  0x53   :  { %2375 = vmatprep.mubr.msk.f32.mxu1 %vm187_vm0, %v150_v12  ;;  %v105_v12 = vld [vmem:[%s3950_s0 + $0x240] sm:$0xff] }
  0x55   :  { %504 = vmatmul.mubr.f32.gmra.mrb[22].mxu0 %v55_v13  ;;  %v108_v13 = vld [vmem:[%s3950_s0 + $0x258] sm:$0xff] }
  0x56   :  { %2329 = vmatprep.mubr.msk.f32.mxu0 %vm187_vm0, %v58_v14  ;;  %739 = vmatmul.mubr.f32.gmra.mrb[22].mxu1 %v149_v15  ;;  %v107_v14 = vld [vmem:[%s3950_s0 + $0x250] sm:$0xff]  ;;  %v110_v15 = vld [vmem:[%s3950_s0 + $0x268] sm:$0xff] }
  0x57   :  { %2376 = vmatprep.mubr.msk.f32.mxu1 %vm187_vm0, %v152_v16  ;;  %v109_v16 = vld [vmem:[%s3950_s0 + $0x260] sm:$0xff] }
  0x59   :  { %509 = vmatmul.mubr.f32.gmra.mrb[24].mxu0 %v57_v17  ;;  %v112_v17 = vld [vmem:[%s3950_s0 + $0x278] sm:$0xff] }
  0x5a   :  { %2330 = vmatprep.mubr.msk.f32.mxu0 %vm187_vm0, %v60_v18  ;;  %744 = vmatmul.mubr.f32.gmra.mrb[24].mxu1 %v151_v19  ;;  %v111_v18 = vld [vmem:[%s3950_s0 + $0x270] sm:$0xff]  ;;  %v114_v19 = vld [vmem:[%s3950_s0 + $0x288] sm:$0xff] }
  0x5b   :  { %2377 = vmatprep.mubr.msk.f32.mxu1 %vm187_vm0, %v154_v20  ;;  %v882_v20 = vld [vmem:[%s3953_s3] sm:$0xff] }
  0x5d   :  { %514 = vmatmul.mubr.f32.gmra.mrb[26].mxu0 %v59_v21  ;;  %v883_v21 = vld [vmem:[%s3953_s3 + $0x8] sm:$0xff] }
  0x5e   :  { %2331 = vmatprep.mubr.msk.f32.mxu0 %vm187_vm0, %v62_v22  ;;  %749 = vmatmul.mubr.f32.gmra.mrb[26].mxu1 %v153_v23  ;;  %v113_v22 = vld [vmem:[%s3950_s0 + $0x280] sm:$0xff]  ;;  %v2677_v23 = vpack.c.bf16 %v883_v21, %v882_v20 }
  0x5f   :  { %2378 = vmatprep.mubr.msk.f32.mxu1 %vm187_vm0, %v156_v24  ;;  %v116_v24 = vld [vmem:[%s3950_s0 + $0x298] sm:$0xff] }
  0x60   :  { %2678 = vmatpush3.bf16.msra.mxu1 %v2677_v23 }
  0x61   :  { %519 = vmatmul.mubr.f32.gmra.mrb[28].mxu0 %v61_v25  ;;  %2679 = vmatprep.subr.bf16.mxu1 %v2839_v3  ;;  %v115_v25 = vld [vmem:[%s3950_s0 + $0x290] sm:$0xff] }
  0x62   :  { %2332 = vmatprep.mubr.msk.f32.mxu0 %vm187_vm0, %v64_v26  ;;  %754 = vmatmul.mubr.f32.gmra.mrb[28].mxu1 %v155_v27  ;;  %v118_v26 = vld [vmem:[%s3950_s0 + $0x2a8] sm:$0xff]  ;;  %v117_v27 = vld [vmem:[%s3950_s0 + $0x2a0] sm:$0xff] }
  0x63   :  { %2379 = vmatprep.mubr.msk.f32.mxu1 %vm187_vm0, %v158_v28  ;;  %v120_v28 = vld [vmem:[%s3950_s0 + $0x2b8] sm:$0xff] }
  0x65   :  { %524 = vmatmul.mubr.f32.gmra.mrb[30].mxu0 %v63_v29  ;;  %v119_v29 = vld [vmem:[%s3950_s0 + $0x2b0] sm:$0xff] }
  0x66   :  { %2333 = vmatprep.mubr.msk.f32.mxu0 %vm187_vm0, %v66_v31  ;;  %759 = vmatmul.mubr.f32.gmra.mrb[30].mxu1 %v157_v32  ;;  %v122_v31 = vld [vmem:[%s3950_s0 + $0x2c8] sm:$0xff]  ;;  %v121_v32 = vld [vmem:[%s3950_s0 + $0x2c0] sm:$0xff] }
  0x67   :  { %2380 = vmatprep.mubr.msk.f32.mxu1 %vm187_vm0, %v160_v33  ;;  %v124_v33 = vld [vmem:[%s3950_s0 + $0x2d8] sm:$0xff] }
  0x69   :  { %529 = vmatmul.mubr.f32.gmra.mrb[32].mxu0 %v65_v34  ;;  %v123_v34 = vld [vmem:[%s3950_s0 + $0x2d0] sm:$0xff] }
  0x6a   :  { %2334 = vmatprep.mubr.msk.f32.mxu0 %vm187_vm0, %v68_v35  ;;  %764 = vmatmul.mubr.f32.gmra.mrb[32].mxu1 %v159_v36  ;;  %v126_v35 = vld [vmem:[%s3950_s0 + $0x2e8] sm:$0xff]  ;;  %v125_v36 = vld [vmem:[%s3950_s0 + $0x2e0] sm:$0xff] }
  0x6b   :  { %2483 = vmatprep.mubr.msk.f32.mxu1 %vm2841_vm2, %v2840_v30 }
  0x6d   :  { %534 = vmatmul.mubr.f32.gmra.mrb[34].mxu0 %v67_v37 }
  0x6e   :  { %2335 = vmatprep.mubr.msk.f32.mxu0 %vm187_vm0, %v70_v38 }
  0x71   :  { %539 = vmatmul.mubr.f32.gmra.mrb[36].mxu0 %v69_v39 }
  0x72   :  { %2336 = vmatprep.mubr.msk.f32.mxu0 %vm187_vm0, %v72_v40 }
  0x75   :  { %544 = vmatmul.mubr.f32.gmra.mrb[38].mxu0 %v71_v41 }
  0x76   :  { %2337 = vmatprep.mubr.msk.f32.mxu0 %vm187_vm0, %v74_v42 }
  0x79   :  { %549 = vmatmul.mubr.f32.gmra.mrb[40].mxu0 %v73_v43 }
  0x7a   :  { %2338 = vmatprep.mubr.msk.f32.mxu0 %vm187_vm0, %v76_v44 }
  0x7d   :  { %554 = vmatmul.mubr.f32.gmra.mrb[42].mxu0 %v75_v45 }
  0x7e   :  { %2339 = vmatprep.mubr.msk.f32.mxu0 %vm187_vm0, %v78_v46 }
  0x81   :  { %559 = vmatmul.mubr.f32.gmra.mrb[44].mxu0 %v77_v47 }
  0x82   :  { %2340 = vmatprep.mubr.msk.f32.mxu0 %vm187_vm0, %v80_v48 }
  0x85   :  { %564 = vmatmul.mubr.f32.gmra.mrb[46].mxu0 %v79_v49 }
  0x86   :  { %2341 = vmatprep.mubr.msk.f32.mxu0 %vm187_vm0, %v82_v50 }
  0x89   :  { %569 = vmatmul.mubr.f32.gmra.mrb[48].mxu0 %v81_v51 }
  0x8a   :  { %2342 = vmatprep.mubr.msk.f32.mxu0 %vm187_vm0, %v84_v52 }
  0x8d   :  { %574 = vmatmul.mubr.f32.gmra.mrb[50].mxu0 %v83_v53 }
  0x8e   :  { %2343 = vmatprep.mubr.msk.f32.mxu0 %vm187_vm0, %v86_v54 }
  0x91   :  { %579 = vmatmul.mubr.f32.gmra.mrb[52].mxu0 %v85_v55 }
  0x92   :  { %2344 = vmatprep.mubr.msk.f32.mxu0 %vm187_vm0, %v88_v56 }
  0x95   :  { %584 = vmatmul.mubr.f32.gmra.mrb[54].mxu0 %v87_v57 }
  0x96   :  { %2345 = vmatprep.mubr.msk.f32.mxu0 %vm187_vm0, %v90_v58 }
  0x99   :  { %589 = vmatmul.mubr.f32.gmra.mrb[56].mxu0 %v89_v59 }
  0x9a   :  { %2346 = vmatprep.mubr.msk.f32.mxu0 %vm187_vm0, %v92_v60 }
  0x9d   :  { %594 = vmatmul.mubr.f32.gmra.mrb[58].mxu0 %v91_v61 }
  0x9e   :  { %2347 = vmatprep.mubr.msk.f32.mxu0 %vm187_vm0, %v94_v62 }
  0xa1   :  { %599 = vmatmul.mubr.f32.gmra.mrb[60].mxu0 %v93_v63 }
  0xa2   :  { %2348 = vmatprep.mubr.msk.f32.mxu0 %vm187_vm0, %v96_v0 }
  0xa5   :  { %604 = vmatmul.mubr.f32.gmra.mrb[62].mxu0 %v95_v1 }
  0xa6   :  { %2349 = vmatprep.mubr.msk.f32.mxu0 %vm187_vm0, %v98_v2 }
  0xa9   :  { %609 = vmatmul.mubr.f32.gmra.mrb[64].mxu0 %v97_v4 }
  0xaa   :  { %2350 = vmatprep.mubr.msk.f32.mxu0 %vm187_vm0, %v100_v5 }
  0xad   :  { %614 = vmatmul.mubr.f32.gmra.mrb[66].mxu0 %v99_v6 }
  0xae   :  { %2351 = vmatprep.mubr.msk.f32.mxu0 %vm187_vm0, %v102_v7 }
  0xb1   :  { %619 = vmatmul.mubr.f32.gmra.mrb[68].mxu0 %v101_v8 }
  0xb2   :  { %2352 = vmatprep.mubr.msk.f32.mxu0 %vm187_vm0, %v104_v9 }
  0xb5   :  { %624 = vmatmul.mubr.f32.gmra.mrb[70].mxu0 %v103_v10 }
  0xb6   :  { %2353 = vmatprep.mubr.msk.f32.mxu0 %vm187_vm0, %v106_v11 }
  0xb9   :  { %629 = vmatmul.mubr.f32.gmra.mrb[72].mxu0 %v105_v12 }
  0xba   :  { %2354 = vmatprep.mubr.msk.f32.mxu0 %vm187_vm0, %v108_v13 }
  0xbd   :  { %634 = vmatmul.mubr.f32.gmra.mrb[74].mxu0 %v107_v14 }
  0xbe   :  { %2355 = vmatprep.mubr.msk.f32.mxu0 %vm187_vm0, %v110_v15 }
  0xc1   :  { %639 = vmatmul.mubr.f32.gmra.mrb[76].mxu0 %v109_v16 }
  0xc2   :  { %2356 = vmatprep.mubr.msk.f32.mxu0 %vm187_vm0, %v112_v17 }
  0xc5   :  { %644 = vmatmul.mubr.f32.gmra.mrb[78].mxu0 %v111_v18 }
  0xc6   :  { %2357 = vmatprep.mubr.msk.f32.mxu0 %vm187_vm0, %v114_v19 }
  0xc9   :  { %649 = vmatmul.mubr.f32.gmra.mrb[80].mxu0 %v113_v22 }
  0xca   :  { %2358 = vmatprep.mubr.msk.f32.mxu0 %vm187_vm0, %v116_v24 }
  0xcd   :  { %654 = vmatmul.mubr.f32.gmra.mrb[82].mxu0 %v115_v25 }
  0xce   :  { %2359 = vmatprep.mubr.msk.f32.mxu0 %vm187_vm0, %v118_v26 }
  0xd1   :  { %659 = vmatmul.mubr.f32.gmra.mrb[84].mxu0 %v117_v27 }
  0xd2   :  { %2360 = vmatprep.mubr.msk.f32.mxu0 %vm187_vm0, %v120_v28 }
  0xd5   :  { %664 = vmatmul.mubr.f32.gmra.mrb[86].mxu0 %v119_v29 }
  0xd6   :  { %2361 = vmatprep.mubr.msk.f32.mxu0 %vm187_vm0, %v122_v31 }
  0xd9   :  { %669 = vmatmul.mubr.f32.gmra.mrb[88].mxu0 %v121_v32 }
  0xda   :  { %2362 = vmatprep.mubr.msk.f32.mxu0 %vm187_vm0, %v124_v33 }
  0xdd   :  { %674 = vmatmul.mubr.f32.gmra.mrb[90].mxu0 %v123_v34 }
  0xde   :  { %2363 = vmatprep.mubr.msk.f32.mxu0 %vm187_vm0, %v126_v35  ;;  %v3491_v35 = vld [vmem:[%s3952_s2] ss:$0 sm:$0xff] }
  0xe1   :  { %679 = vmatmul.mubr.f32.gmra.mrb[92].mxu0 %v125_v36 }
  0xfc   :  { %v3426_v37 = vpop.f32.mrb[0].mxu0 }
  0xfd   :  { %v452_v38 = vpop.f32.mrb[1].mxu0  ;;  %v3428_v39 = vpop.f32.mrb[0].mxu1 }
  0xfe   :  { %v687_v40 = vpop.f32.mrb[1].mxu1 }
 0x100   :  { %v3430_v41 = vpop.f32.mrb[2].mxu0 }
 0x101   :  { %v457_v42 = vpop.f32.mrb[3].mxu0  ;;  %v3432_v43 = vpop.f32.mrb[2].mxu1 }
 0x102   :  { %v692_v44 = vpop.f32.mrb[3].mxu1  ;;  %v686_v42 = vadd.f32 %v3491_v35, %v3428_v39 }
 0x104   :  { %v3434_v45 = vpop.f32.mrb[4].mxu0 }
 0x105   :  { %v462_v46 = vpop.f32.mrb[5].mxu0  ;;  %v3438_v47 = vpop.f32.mrb[4].mxu1 }
 0x106   :  { %v697_v48 = vpop.f32.mrb[5].mxu1  ;;  %v451_v46 = vadd.f32 %v3491_v35, %v3426_v37 }
 0x108   :  { %v3440_v49 = vpop.f32.mrb[6].mxu0 }
 0x109   :  { %v467_v50 = vpop.f32.mrb[7].mxu0  ;;  %v3442_v51 = vpop.f32.mrb[6].mxu1 }
 0x10a   :  { %v702_v52 = vpop.f32.mrb[7].mxu1 }
 0x10c   :  { %v3444_v53 = vpop.f32.mrb[8].mxu0 }
 0x10d   :  { %v472_v54 = vpop.f32.mrb[9].mxu0  ;;  %v3446_v55 = vpop.f32.mrb[8].mxu1 }
 0x10e   :  { %v707_v56 = vpop.f32.mrb[9].mxu1 }
 0x10f   :  { %v816_v56 = vmax.f32 %v686_v42, 0.0 }
 0x110   :  { %v3448_v57 = vpop.f32.mrb[10].mxu0 }
 0x111   :  { %v477_v58 = vpop.f32.mrb[11].mxu0  ;;  %v3450_v59 = vpop.f32.mrb[10].mxu1 }
 0x112   :  { %v712_v60 = vpop.f32.mrb[11].mxu1 }
 0x114   :  { %v3452_v61 = vpop.f32.mrb[12].mxu0 }
 0x115   :  { %v482_v62 = vpop.f32.mrb[13].mxu0  ;;  %v3454_v63 = vpop.f32.mrb[12].mxu1 }
 0x116   :  { %v717_v0 = vpop.f32.mrb[13].mxu1  ;;  %v769_v62 = vmax.f32 %v451_v46, 0.0 }
 0x117   :  { %v456_v0 = vadd.f32 %v3491_v35, %v3430_v41 }
 0x118   :  { %v3456_v1 = vpop.f32.mrb[14].mxu0 }
 0x119   :  { %v487_v2 = vpop.f32.mrb[15].mxu0  ;;  %v3458_v4 = vpop.f32.mrb[14].mxu1 }
 0x11a   :  { %v722_v5 = vpop.f32.mrb[15].mxu1 }
 0x11c   :  { %v3460_v6 = vpop.f32.mrb[16].mxu0 }
 0x11d   :  { %v492_v7 = vpop.f32.mrb[17].mxu0  ;;  %v3462_v8 = vpop.f32.mrb[16].mxu1 }
 0x11e   :  { %v727_v9 = vpop.f32.mrb[17].mxu1 }
 0x120   :  { %v3464_v10 = vpop.f32.mrb[18].mxu0 }
 0x121   :  { %v497_v11 = vpop.f32.mrb[19].mxu0  ;;  %v3466_v12 = vpop.f32.mrb[18].mxu1 }
 0x122   :  { %v732_v13 = vpop.f32.mrb[19].mxu1 }
 0x123   :  { %v770_v13 = vmax.f32 %v456_v0, 0.0 }
 0x124   :  { %v3468_v14 = vpop.f32.mrb[20].mxu0 }
 0x125   :  { %v502_v15 = vpop.f32.mrb[21].mxu0  ;;  %v3470_v16 = vpop.f32.mrb[20].mxu1 }
 0x126   :  { %v737_v17 = vpop.f32.mrb[21].mxu1  ;;  %v461_v15 = vadd.f32 %v3491_v35, %v3434_v45  ;;  %v471_v45 = vadd.f32 %v3491_v35, %v3444_v53  ;;  %v481_v53 = vadd.f32 %v3491_v35, %v3452_v61  ;;  %v491_v61 = vadd.f32 %v3491_v35, %v3460_v6 }
 0x127   :  { %v501_v6 = vadd.f32 %v3491_v35, %v3468_v14 }
 0x128   :  { %v3472_v18 = vpop.f32.mrb[22].mxu0 }
 0x129   :  { %v507_v19 = vpop.f32.mrb[23].mxu0  ;;  %v3474_v20 = vpop.f32.mrb[22].mxu1 }
 0x12a   :  { %v742_v21 = vpop.f32.mrb[23].mxu1 }
 0x12c   :  { %v3476_v22 = vpop.f32.mrb[24].mxu0 }
 0x12d   :  { %v512_v23 = vpop.f32.mrb[25].mxu0  ;;  %v3478_v24 = vpop.f32.mrb[24].mxu1  ;;  %v511_v14 = vadd.f32 %v3491_v35, %v3476_v22 }
 0x12e   :  { %v747_v25 = vpop.f32.mrb[25].mxu1 }
 0x12f   :  { %v771_v25 = vmax.f32 %v461_v15, 0.0 }
 0x130   :  { %v3480_v26 = vpop.f32.mrb[26].mxu0 }
 0x131   :  { %v517_v27 = vpop.f32.mrb[27].mxu0  ;;  %v3482_v28 = vpop.f32.mrb[26].mxu1 }
 0x132   :  { %v752_v29 = vpop.f32.mrb[27].mxu1  ;;  %v466_v27 = vadd.f32 %v3491_v35, %v3440_v49  ;;  %v476_v49 = vadd.f32 %v3491_v35, %v3448_v57  ;;  %v486_v57 = vadd.f32 %v3491_v35, %v3456_v1  ;;  %v496_v1 = vadd.f32 %v3491_v35, %v3464_v10 }
 0x133   :  { %v506_v10 = vadd.f32 %v3491_v35, %v3472_v18  ;;  %v516_v18 = vadd.f32 %v3491_v35, %v3480_v26 }
 0x134   :  { %v3484_v31 = vpop.f32.mrb[28].mxu0 }
 0x135   :  { %v522_v32 = vpop.f32.mrb[29].mxu0  ;;  %v3486_v33 = vpop.f32.mrb[28].mxu1  ;;  %v521_v22 = vadd.f32 %v3491_v35, %v3484_v31 }
 0x136   :  { %v757_v34 = vpop.f32.mrb[29].mxu1 }
 0x138   :  { %v3493_v36 = vpop.f32.mrb[30].mxu0 }
 0x139   :  { %v527_v38 = vpop.f32.mrb[31].mxu0  ;;  %v3495_v40 = vpop.f32.mrb[30].mxu1  ;;  %v526_v26 = vadd.f32 %v3491_v35, %v3493_v36 }
 0x13a   :  { %v762_v44 = vpop.f32.mrb[31].mxu1 }
 0x13b   :  { %v772_v44 = vmax.f32 %v466_v27, 0.0 }
 0x13c   :  { %v530_v48 = vpop.f32.mrb[32].mxu0 }
 0x13d   :  { %v531_v50 = vadd.f32 %v3491_v35, %v530_v48  ;;  %v532_v52 = vpop.f32.mrb[33].mxu0  ;;  %v765_v54 = vpop.f32.mrb[32].mxu1 }
 0x13e   :  { %v766_v58 = vadd.f32 %v3491_v35, %v765_v54  ;;  %v767_v60 = vpop.f32.mrb[33].mxu1 }
 0x13f   :  { %v785_v2 = vmax.f32 %v531_v50, 0.0 }
 0x140   :  { %v535_v5 = vpop.f32.mrb[34].mxu0  ;;  %v832_v39 = vmax.f32 %v766_v58, 0.0 }
 0x141   :  { %v3505_v7 = vmax.f32 %v769_v62, %v785_v2  ;;  %v536_v37 = vadd.f32 %v3491_v35, %v535_v5  ;;  %v537_v9 = vpop.f32.mrb[35].mxu0  ;;  %v774_v5 = vmax.f32 %v476_v49, 0.0 }
 0x142   :  { %v3508_v11 = vmax.f32 %v816_v56, %v832_v39  ;;  %v773_v56 = vmax.f32 %v471_v45, 0.0 }
 0x143   :  { %v786_v17 = vmax.f32 %v536_v37, 0.0 }
 0x144   :  { %v540_v19 = vpop.f32.mrb[36].mxu0 }
 0x145   :  { %v3512_v21 = vmax.f32 %v770_v13, %v786_v17  ;;  %v541_v41 = vadd.f32 %v3491_v35, %v540_v19  ;;  %v542_v23 = vpop.f32.mrb[37].mxu0  ;;  %v775_v17 = vmax.f32 %v481_v53, 0.0 }
 0x147   :  { %v787_v29 = vmax.f32 %v541_v41, 0.0 }
 0x148   :  { %v545_v32 = vpop.f32.mrb[38].mxu0 }
 0x149   :  { %v3517_v34 = vmax.f32 %v771_v25, %v787_v29  ;;  %v546_v38 = vadd.f32 %v3491_v35, %v545_v32  ;;  %v547_v42 = vpop.f32.mrb[39].mxu0  ;;  %v776_v29 = vmax.f32 %v486_v57, 0.0 }
 0x14b   :  { %v788_v46 = vmax.f32 %v546_v38, 0.0 }
 0x14c   :  { %v550_v48 = vpop.f32.mrb[40].mxu0 }
 0x14d   :  { %v3522_v50 = vmax.f32 %v772_v44, %v788_v46  ;;  %v551_v52 = vadd.f32 %v3491_v35, %v550_v48  ;;  %v552_v54 = vpop.f32.mrb[41].mxu0  ;;  %v777_v46 = vmax.f32 %v491_v61, 0.0 }
 0x14f   :  { %v789_v58 = vmax.f32 %v551_v52, 0.0 }
 0x150   :  { %v555_v60 = vpop.f32.mrb[42].mxu0 }
 0x151   :  { %v3527_v62 = vmax.f32 %v773_v56, %v789_v58  ;;  %v556_v0 = vadd.f32 %v3491_v35, %v555_v60  ;;  %v557_v2 = vpop.f32.mrb[43].mxu0  ;;  %v778_v58 = vmax.f32 %v496_v1, 0.0 }
 0x153   :  { %v790_v39 = vmax.f32 %v556_v0, 0.0 }
 0x154   :  { %v560_v37 = vpop.f32.mrb[44].mxu0 }
 0x155   :  { %v3532_v9 = vmax.f32 %v774_v5, %v790_v39  ;;  %v561_v13 = vadd.f32 %v3491_v35, %v560_v37  ;;  %v562_v15 = vpop.f32.mrb[45].mxu0  ;;  %v779_v39 = vmax.f32 %v501_v6, 0.0 }
 0x157   :  { %v791_v19 = vmax.f32 %v561_v13, 0.0 }
 0x158   :  { %v565_v41 = vpop.f32.mrb[46].mxu0 }
 0x159   :  { %v3537_v23 = vmax.f32 %v775_v17, %v791_v19  ;;  %v566_v25 = vadd.f32 %v3491_v35, %v565_v41  ;;  %v567_v27 = vpop.f32.mrb[47].mxu0  ;;  %v780_v19 = vmax.f32 %v506_v10, 0.0 }
 0x15b   :  { %v792_v32 = vmax.f32 %v566_v25, 0.0 }
 0x15c   :  { %v570_v38 = vpop.f32.mrb[48].mxu0 }
 0x15d   :  { %v3542_v42 = vmax.f32 %v776_v29, %v792_v32  ;;  %v571_v44 = vadd.f32 %v3491_v35, %v570_v38  ;;  %v572_v45 = vpop.f32.mrb[49].mxu0  ;;  %v781_v32 = vmax.f32 %v511_v14, 0.0 }
 0x15f   :  { %v793_v48 = vmax.f32 %v571_v44, 0.0 }
 0x160   :  { %v575_v52 = vpop.f32.mrb[50].mxu0 }
 0x161   :  { %v3547_v54 = vmax.f32 %v777_v46, %v793_v48  ;;  %v576_v56 = vadd.f32 %v3491_v35, %v575_v52  ;;  %v577_v49 = vpop.f32.mrb[51].mxu0  ;;  %v782_v48 = vmax.f32 %v516_v18, 0.0 }
 0x163   :  { %v794_v60 = vmax.f32 %v576_v56, 0.0 }
 0x164   :  { %v580_v0 = vpop.f32.mrb[52].mxu0 }
 0x165   :  { %v3552_v2 = vmax.f32 %v778_v58, %v794_v60  ;;  %v581_v5 = vadd.f32 %v3491_v35, %v580_v0  ;;  %v582_v53 = vpop.f32.mrb[53].mxu0  ;;  %v783_v60 = vmax.f32 %v521_v22, 0.0 }
 0x166   :  { %v691_v53 = vadd.f32 %v3491_v35, %v3432_v43 }
 0x167   :  { %v795_v37 = vmax.f32 %v581_v5, 0.0 }
 0x168   :  { %v585_v13 = vpop.f32.mrb[54].mxu0 }
 0x169   :  { %v3557_v15 = vmax.f32 %v779_v39, %v795_v37  ;;  %v586_v17 = vadd.f32 %v3491_v35, %v585_v13  ;;  %v587_v57 = vpop.f32.mrb[55].mxu0  ;;  %v784_v37 = vmax.f32 %v526_v26, 0.0 }
 0x16a   :  { %v817_v57 = vmax.f32 %v691_v53, 0.0 }
 0x16b   :  { %v796_v41 = vmax.f32 %v586_v17, 0.0 }
 0x16c   :  { %v590_v25 = vpop.f32.mrb[56].mxu0 }
 0x16d   :  { %v3562_v27 = vmax.f32 %v780_v19, %v796_v41  ;;  %v591_v29 = vadd.f32 %v3491_v35, %v590_v25  ;;  %v592_v61 = vpop.f32.mrb[57].mxu0  ;;  %v696_v19 = vadd.f32 %v3491_v35, %v3438_v47  ;;  %v701_v47 = vadd.f32 %v3491_v35, %v3442_v51 }
 0x16e   :  { %v966_v61 = vld [vmem:[%s3953_s3 + $0x18] sm:$0xff] }
 0x16f   :  { %v797_v38 = vmax.f32 %v591_v29, 0.0  ;;  %v965_v29 = vld [vmem:[%s3953_s3 + $0x10] sm:$0xff]  ;;  %v818_v18 = vmax.f32 %v696_v19, 0.0 }
 0x170   :  { %v595_v44 = vpop.f32.mrb[58].mxu0 }
 0x171   :  { %v3567_v45 = vmax.f32 %v781_v32, %v797_v38  ;;  %v596_v46 = vadd.f32 %v3491_v35, %v595_v44  ;;  %v597_v1 = vpop.f32.mrb[59].mxu0 }
 0x172   :  { %v2680_v1 = vpack.c.bf16 %v966_v61, %v965_v29 }
 0x173   :  { %v798_v52 = vmax.f32 %v596_v46, 0.0 }
 0x174   :  { %v600_v56 = vpop.f32.mrb[60].mxu0 }
 0x175   :  { %v3572_v49 = vmax.f32 %v782_v48, %v798_v52  ;;  %v601_v58 = vadd.f32 %v3491_v35, %v600_v56  ;;  %v602_v6 = vpop.f32.mrb[61].mxu0  ;;  %v819_v56 = vmax.f32 %v701_v47, 0.0 }
 0x177   :  { %v799_v0 = vmax.f32 %v601_v58, 0.0  ;;  %v706_v58 = vadd.f32 %v3491_v35, %v3446_v55  ;;  %v1042_v55 = vld [vmem:[%s3953_s3 + $0x28] sm:$0xff] }
 0x178   :  { %v605_v5 = vpop.f32.mrb[62].mxu0 }
 0x179   :  { %v3579_v39 = vmax.f32 %v783_v60, %v799_v0  ;;  %v606_v31 = vadd.f32 %v3491_v35, %v605_v5  ;;  %v607_v10 = vpop.f32.mrb[63].mxu0  ;;  %v820_v53 = vmax.f32 %v706_v58, 0.0  ;;  %v726_v58 = vadd.f32 %v3491_v35, %v3462_v8  ;;  %v1193_v8 = vld [vmem:[%s3953_s3 + $0x40] sm:$0xff] }
 0x17b   :  { %v800_v13 = vmax.f32 %v606_v31, 0.0  ;;  %v711_v31 = vadd.f32 %v3491_v35, %v3450_v59 }
 0x17c   :  { %v610_v17 = vpop.f32.mrb[64].mxu0 }
 0x17d   :  { %v3584_v14 = vmax.f32 %v784_v37, %v800_v13  ;;  %v611_v36 = vadd.f32 %v3491_v35, %v610_v17  ;;  %v612_v41 = vpop.f32.mrb[65].mxu0 }
 0x17e   :  { %v716_v41 = vadd.f32 %v3491_v35, %v3454_v63  ;;  %v1118_v63 = vld [vmem:[%s3953_s3 + $0x38] sm:$0xff] }
 0x17f   :  { %v880_v43 = vmax.f32 %v3584_v14, %v3508_v11  ;;  %v801_v25 = vmax.f32 %v611_v36, 0.0  ;;  %v821_v36 = vmax.f32 %v711_v31, 0.0  ;;  %v2112_v11 = vld [vmem:[%s3955_s5 + $0x30] sm:$0xff]  ;;  %v2113_v14 = vld [vmem:[%s3955_s5 + $0x38] sm:$0xff] }
 0x180   :  { %v615_v32 = vpop.f32.mrb[66].mxu0  ;;  %v822_v47 = vmax.f32 %v716_v41, 0.0 }
 0x181   :  { %v849_v38 = vmax.f32 %v801_v25, %v817_v57  ;;  %v616_v44 = vadd.f32 %v3491_v35, %v615_v32  ;;  %v617_v46 = vpop.f32.mrb[67].mxu0 }
 0x183   :  { %v865_v48 = vmax.f32 %v3505_v7, %v849_v38  ;;  %v802_v22 = vmax.f32 %v616_v44, 0.0  ;;  %v1041_v7 = vld [vmem:[%s3953_s3 + $0x20] sm:$0xff]  ;;  %v721_v38 = vadd.f32 %v3491_v35, %v3458_v4 }
 0x184   :  { %v620_v52 = vpop.f32.mrb[68].mxu0  ;;  %v2683_v13 = vpack.c.bf16 %v1042_v55, %v1041_v7  ;;  %v824_v7 = vmax.f32 %v726_v58, 0.0  ;;  %v731_v55 = vadd.f32 %v3491_v35, %v3466_v12 }
 0x185   :  { %v850_v6 = vmax.f32 %v802_v22, %v818_v18  ;;  %v621_v60 = vadd.f32 %v3491_v35, %v620_v52  ;;  %2484 = vmatmul.mubr.msk.f32.vlgmr.msra.gmra.mrb[34].mxu1 %vm884_vm3, %v865_v48  ;;  %v622_v51 = vpop.f32.mrb[69].mxu0 }
 0x186   :  { %2681 = vmatpush3.bf16.msra.mxu1 %v2680_v1  ;;  %2490 = vmatprep.mubr.msk.f32.mxu1 %vm2841_vm2, %v2840_v30 }
 0x187   :  { %v866_v26 = vmax.f32 %v3512_v21, %v850_v6  ;;  %v803_v0 = vmax.f32 %v621_v60, 0.0  ;;  %2682 = vmatprep.subr.bf16.mxu1 %v2839_v3 }
 0x188   :  { %v625_v5 = vpop.f32.mrb[70].mxu0 }
 0x189   :  { %v851_v10 = vmax.f32 %v803_v0, %v819_v56  ;;  %v626_v37 = vadd.f32 %v3491_v35, %v625_v5  ;;  %v627_v21 = vpop.f32.mrb[71].mxu0  ;;  %v823_v56 = vmax.f32 %v721_v38, 0.0 }
 0x18b   :  { %v867_v17 = vmax.f32 %v3517_v34, %v851_v10  ;;  %v804_v57 = vmax.f32 %v626_v37, 0.0  ;;  %v1117_v34 = vld [vmem:[%s3953_s3 + $0x30] sm:$0xff] }
 0x18c   :  { %v630_v19 = vpop.f32.mrb[72].mxu0  ;;  %v2686_v1 = vpack.c.bf16 %v1118_v63, %v1117_v34 }
 0x18d   :  { %v852_v25 = vmax.f32 %v804_v57, %v820_v53  ;;  %v631_v29 = vadd.f32 %v3491_v35, %v630_v19  ;;  %2491 = vmatmul.mubr.msk.f32.vlgmr.msra.gmra.mrb[34].mxu1 %vm884_vm3, %v866_v26  ;;  %v632_v61 = vpop.f32.mrb[73].mxu0  ;;  %v1194_v26 = vld [vmem:[%s3953_s3 + $0x48] sm:$0xff]  ;;  %v736_v57 = vadd.f32 %v3491_v35, %v3470_v16  ;;  %v1269_v16 = vld [vmem:[%s3953_s3 + $0x50] sm:$0xff] }
 0x18e   :  { %2684 = vmatpush3.bf16.msra.mxu1 %v2683_v13  ;;  %2497 = vmatprep.mubr.msk.f32.mxu1 %vm2841_vm2, %v2840_v30  ;;  %v2689_v10 = vpack.c.bf16 %v1194_v26, %v1193_v8 }
 0x18f   :  { %v868_v59 = vmax.f32 %v3522_v50, %v852_v25  ;;  %v805_v32 = vmax.f32 %v631_v29, 0.0  ;;  %2685 = vmatprep.subr.bf16.mxu1 %v2839_v3  ;;  %v1270_v29 = vld [vmem:[%s3953_s3 + $0x58] sm:$0xff] }
 0x190   :  { %v635_v18 = vpop.f32.mrb[74].mxu0 }
 0x191   :  { %v853_v44 = vmax.f32 %v805_v32, %v821_v36  ;;  %v636_v46 = vadd.f32 %v3491_v35, %v635_v18  ;;  %v637_v50 = vpop.f32.mrb[75].mxu0  ;;  %v741_v32 = vadd.f32 %v3491_v35, %v3474_v20 }
 0x193   :  { %v869_v48 = vmax.f32 %v3527_v62, %v853_v44  ;;  %v806_v22 = vmax.f32 %v636_v46, 0.0  ;;  %v827_v50 = vmax.f32 %v741_v32, 0.0 }
 0x194   :  { %v640_v52 = vpop.f32.mrb[76].mxu0 }
 0x195   :  { %v3637_v6 = vmax.f32 %v806_v22, %v822_v47  ;;  %v641_v60 = vadd.f32 %v3491_v35, %v640_v52  ;;  %2498 = vmatmul.mubr.msk.f32.vlgmr.msra.gmra.mrb[34].mxu1 %vm884_vm3, %v867_v17  ;;  %v642_v4 = vpop.f32.mrb[77].mxu0  ;;  %v825_v17 = vmax.f32 %v731_v55, 0.0  ;;  %v2692_v47 = vpack.c.bf16 %v1270_v29, %v1269_v16 }
 0x196   :  { %2687 = vmatpush3.bf16.msra.mxu1 %v2686_v1  ;;  %2504 = vmatprep.mubr.msk.f32.mxu1 %vm2841_vm2, %v2840_v30  ;;  %v746_v1 = vadd.f32 %v3491_v35, %v3478_v24  ;;  %v1345_v24 = vld [vmem:[%s3953_s3 + $0x60] sm:$0xff] }
 0x197   :  { %v870_v62 = vmax.f32 %v3532_v9, %v3637_v6  ;;  %v807_v51 = vmax.f32 %v641_v60, 0.0  ;;  %2688 = vmatprep.subr.bf16.mxu1 %v2839_v3  ;;  %v1346_v60 = vld [vmem:[%s3953_s3 + $0x68] sm:$0xff]  ;;  %v1422_v9 = vld [vmem:[%s3953_s3 + $0x78] sm:$0xff] }
 0x198   :  { %v645_v0 = vpop.f32.mrb[78].mxu0  ;;  %v828_v4 = vmax.f32 %v746_v1, 0.0 }
 0x199   :  { %v3654_v5 = vmax.f32 %v807_v51, %v823_v56  ;;  %v646_v53 = vadd.f32 %v3491_v35, %v645_v0  ;;  %v647_v31 = vpop.f32.mrb[79].mxu0  ;;  %v751_v51 = vadd.f32 %v3491_v35, %v3482_v28 }
 0x19b   :  { %v871_v37 = vmax.f32 %v3537_v23, %v3654_v5  ;;  %v808_v21 = vmax.f32 %v646_v53, 0.0 }
 0x19c   :  { %v650_v13 = vpop.f32.mrb[80].mxu0 }
 0x19d   :  { %v3661_v19 = vmax.f32 %v808_v21, %v824_v7  ;;  %v651_v36 = vadd.f32 %v3491_v35, %v650_v13  ;;  %2505 = vmatmul.mubr.msk.f32.vlgmr.msra.gmra.mrb[34].mxu1 %vm884_vm3, %v868_v59  ;;  %v652_v12 = vpop.f32.mrb[81].mxu0  ;;  %v826_v59 = vmax.f32 %v736_v57, 0.0  ;;  %v2695_v7 = vpack.c.bf16 %v1346_v60, %v1345_v24  ;;  %v2029_v60 = vld [vmem:[%s3953_s3 + $0xf0] sm:$0xff] }
 0x19e   :  { %2690 = vmatpush3.bf16.msra.mxu1 %v2689_v10  ;;  %2511 = vmatprep.mubr.msk.f32.mxu1 %vm2841_vm2, %v2840_v30  ;;  %v829_v10 = vmax.f32 %v751_v51, 0.0  ;;  %v756_v21 = vadd.f32 %v3491_v35, %v3486_v33  ;;  %v1421_v33 = vld [vmem:[%s3953_s3 + $0x70] sm:$0xff]  ;;  %v2106_v51 = vld [vmem:[%s3955_s5] sm:$0xff] }
 0x19f   :  { %v872_v41 = vmax.f32 %v3542_v42, %v3661_v19  ;;  %v809_v25 = vmax.f32 %v651_v36, 0.0  ;;  %2691 = vmatprep.subr.bf16.mxu1 %v2839_v3  ;;  %v761_v36 = vadd.f32 %v3491_v35, %v3495_v40  ;;  %v2698_v16 = vpack.c.bf16 %v1422_v9, %v1421_v33  ;;  %v1649_v42 = vld [vmem:[%s3953_s3 + $0xa0] sm:$0xff]  ;;  %v1650_v19 = vld [vmem:[%s3953_s3 + $0xa8] sm:$0xff] }
 0x1a0   :  { %v655_v61 = vpop.f32.mrb[82].mxu0  ;;  %v2118_v33 = vld [vmem:[%s3955_s5 + $0x60] sm:$0xff]  ;;  %v2119_v9 = vld [vmem:[%s3955_s5 + $0x68] sm:$0xff] }
 0x1a1   :  { %v3678_v34 = vmax.f32 %v809_v25, %v825_v17  ;;  %v656_v63 = vadd.f32 %v3491_v35, %v655_v61  ;;  %v657_v18 = vpop.f32.mrb[83].mxu0  ;;  %v831_v32 = vmax.f32 %v761_v36, 0.0  ;;  %v2382_v36 = vld [vmem:[%s3954_s4] ss:$0 sm:$0xff] }
 0x1a3   :  { %v873_v38 = vmax.f32 %v3547_v54, %v3678_v34  ;;  %v810_v44 = vmax.f32 %v656_v63, 0.0  ;;  %v1725_v54 = vld [vmem:[%s3953_s3 + $0xb0] sm:$0xff]  ;;  %v1726_v34 = vld [vmem:[%s3953_s3 + $0xb8] sm:$0xff] }
 0x1a4   :  { %v660_v46 = vpop.f32.mrb[84].mxu0 }
 0x1a5   :  { %v3685_v22 = vmax.f32 %v810_v44, %v826_v59  ;;  %v661_v52 = vadd.f32 %v3491_v35, %v660_v46  ;;  %2512 = vmatmul.mubr.msk.f32.vlgmr.msra.gmra.mrb[34].mxu1 %vm884_vm3, %v869_v48  ;;  %v662_v20 = vpop.f32.mrb[85].mxu0  ;;  %v1574_v46 = vld [vmem:[%s3953_s3 + $0x98] sm:$0xff] }
 0x1a6   :  { %2693 = vmatpush3.bf16.msra.mxu1 %v2692_v47  ;;  %2518 = vmatprep.mubr.msk.f32.mxu1 %vm2841_vm2, %v2840_v30 }
 0x1a7   :  { %v874_v56 = vmax.f32 %v3552_v2, %v3685_v22  ;;  %v811_v58 = vmax.f32 %v661_v52, 0.0  ;;  %2694 = vmatprep.subr.bf16.mxu1 %v2839_v3  ;;  %v1801_v2 = vld [vmem:[%s3953_s3 + $0xc0] sm:$0xff]  ;;  %v1877_v22 = vld [vmem:[%s3953_s3 + $0xd0] sm:$0xff]  ;;  %v1878_v52 = vld [vmem:[%s3953_s3 + $0xd8] sm:$0xff] }
 0x1a8   :  { %v665_v48 = vpop.f32.mrb[86].mxu0  ;;  %v2716_v20 = vpack.c.bf16 %v1878_v52, %v1877_v22 }
 0x1a9   :  { %v3702_v8 = vmax.f32 %v811_v58, %v827_v50  ;;  %v666_v26 = vadd.f32 %v3491_v35, %v665_v48  ;;  %v667_v0 = vpop.f32.mrb[87].mxu0  ;;  %v1802_v50 = vld [vmem:[%s3953_s3 + $0xc8] sm:$0xff]  ;;  %v2030_v48 = vld [vmem:[%s3953_s3 + $0xf8] sm:$0xff] }
 0x1aa   :  { %v2713_v1 = vpack.c.bf16 %v1802_v50, %v1801_v2  ;;  %v1954_v58 = vld [vmem:[%s3953_s3 + $0xe8] sm:$0xff]  ;;  %v2108_v0 = vld [vmem:[%s3955_s5 + $0x10] sm:$0xff] }
 0x1ab   :  { %v875_v55 = vmax.f32 %v3557_v15, %v3702_v8  ;;  %v812_v53 = vmax.f32 %v666_v26, 0.0  ;;  %v2107_v8 = vld [vmem:[%s3955_s5 + $0x8] sm:$0xff] }
 0x1ac   :  { %v670_v31 = vpop.f32.mrb[88].mxu0  ;;  %v2725_v26 = vpack.c.bf16 %v2107_v8, %v2106_v51 }
 0x1ad   :  { %v3709_v13 = vmax.f32 %v812_v53, %v828_v4  ;;  %v671_v17 = vadd.f32 %v3491_v35, %v670_v31  ;;  %2519 = vmatmul.mubr.msk.f32.vlgmr.msra.gmra.mrb[34].mxu1 %vm884_vm3, %v870_v62  ;;  %v672_v28 = vpop.f32.mrb[89].mxu0  ;;  %v830_v62 = vmax.f32 %v756_v21, 0.0  ;;  %v2722_v4 = vpack.c.bf16 %v2030_v48, %v2029_v60  ;;  %v2110_v53 = vld [vmem:[%s3955_s5 + $0x20] sm:$0xff]  ;;  %v2111_v31 = vld [vmem:[%s3955_s5 + $0x28] sm:$0xff] }
 0x1ae   :  { %2696 = vmatpush3.bf16.msra.mxu1 %v2695_v7  ;;  %2525 = vmatprep.mubr.msk.f32.mxu1 %vm2841_vm2, %v2840_v30  ;;  %v2109_v7 = vld [vmem:[%s3955_s5 + $0x18] sm:$0xff]  ;;  %v2114_v21 = vld [vmem:[%s3955_s5 + $0x40] sm:$0xff]  ;;  %v2116_v28 = vld [vmem:[%s3955_s5 + $0x50] sm:$0xff] }
 0x1af   :  { %v876_v15 = vmax.f32 %v3562_v27, %v3709_v13  ;;  %v813_v57 = vmax.f32 %v671_v17, 0.0  ;;  %2697 = vmatprep.subr.bf16.mxu1 %v2839_v3  ;;  %v2115_v13 = vld [vmem:[%s3955_s5 + $0x48] sm:$0xff] }
 0x1b0   :  { %v675_v6 = vpop.f32.mrb[90].mxu0  ;;  %v2737_v17 = vpack.c.bf16 %v2115_v13, %v2114_v21 }
 0x1b1   :  { %v861_v12 = vmax.f32 %v813_v57, %v829_v10  ;;  %v676_v25 = vadd.f32 %v3491_v35, %v675_v6  ;;  %v677_v27 = vpop.f32.mrb[91].mxu0  ;;  %v2731_v10 = vpack.c.bf16 %v2111_v31, %v2110_v53  ;;  %v2743_v6 = vpack.c.bf16 %v2119_v9, %v2118_v33 }
 0x1b3   :  { %v877_v29 = vmax.f32 %v3567_v45, %v861_v12  ;;  %v814_v61 = vmax.f32 %v676_v25, 0.0  ;;  %v1497_v45 = vld [vmem:[%s3953_s3 + $0x80] sm:$0xff]  ;;  %v2204_v25 = vld [vmem:[%s3957_s7 + $0x8] sm:$0xff] }
 0x1b4   :  { %v680_v59 = vpop.f32.mrb[92].mxu0  ;;  %v2203_v12 = vld [vmem:[%s3957_s7] sm:$0xff] }
 0x1b5   :  { %v862_v63 = vmax.f32 %v814_v61, %v830_v62  ;;  %v681_v18 = vadd.f32 %v3491_v35, %v680_v59  ;;  %2526 = vmatmul.mubr.msk.f32.vlgmr.msra.gmra.mrb[34].mxu1 %vm884_vm3, %v871_v37  ;;  %v682_v47 = vpop.f32.mrb[93].mxu0  ;;  %v1498_v35 = vld [vmem:[%s3953_s3 + $0x88] sm:$0xff]  ;;  %v2120_v62 = vld [vmem:[%s3955_s5 + $0x70] sm:$0xff]  ;;  %v2746_v61 = vpack.c.bf16 %v2204_v25, %v2203_v12 }
 0x1b6   :  { %2699 = vmatpush3.bf16.msra.mxu1 %v2698_v16  ;;  %2532 = vmatprep.mubr.msk.f32.mxu1 %vm2841_vm2, %v2840_v30  ;;  %v2701_v5 = vpack.c.bf16 %v1498_v35, %v1497_v45  ;;  %v2207_v47 = vld [vmem:[%s3957_s7 + $0x20] sm:$0xff]  ;;  %v2209_v45 = vld [vmem:[%s3957_s7 + $0x30] sm:$0xff]  ;;  %v2210_v35 = vld [vmem:[%s3957_s7 + $0x38] sm:$0xff] }
 0x1b7   :  { %v878_v40 = vmax.f32 %v3572_v49, %v862_v63  ;;  %v815_v44 = vmax.f32 %v681_v18, 0.0  ;;  %2700 = vmatprep.subr.bf16.mxu1 %v2839_v3  ;;  %v1573_v49 = vld [vmem:[%s3953_s3 + $0x90] sm:$0xff]  ;;  %v2206_v63 = vld [vmem:[%s3957_s7 + $0x18] sm:$0xff] }
 0x1b9   :  { %v863_v23 = vmax.f32 %v815_v44, %v831_v32  ;;  %v2205_v32 = vld [vmem:[%s3957_s7 + $0x10] sm:$0xff] }
 0x1ba   :  { %v2749_v18 = vpack.c.bf16 %v2206_v63, %v2205_v32 }
 0x1bb   :  { %v879_v37 = vmax.f32 %v3579_v39, %v863_v23  ;;  %v2704_v39 = vpack.c.bf16 %v1574_v46, %v1573_v49  ;;  %v2755_v23 = vpack.c.bf16 %v2210_v35, %v2209_v45  ;;  %v2213_v46 = vld [vmem:[%s3957_s7 + $0x50] sm:$0x3] }
 0x1bd   :  { %2533 = vmatmul.mubr.msk.f32.vlgmr.msra.gmra.mrb[34].mxu1 %vm884_vm3, %v872_v41  ;;  %v2707_v41 = vpack.c.bf16 %v1650_v19, %v1649_v42 }
 0x1be   :  { %2702 = vmatpush3.bf16.msra.mxu1 %v2701_v5  ;;  %2539 = vmatprep.mubr.msk.f32.mxu1 %vm2841_vm2, %v2840_v30  ;;  %v2211_v5 = vld [vmem:[%s3957_s7 + $0x40] sm:$0xff] }
 0x1bf   :  { %2703 = vmatprep.subr.bf16.mxu1 %v2839_v3 }
 0x1c5   :  { %2540 = vmatmul.mubr.msk.f32.vlgmr.msra.gmra.mrb[34].mxu1 %vm884_vm3, %v873_v38  ;;  %v2710_v38 = vpack.c.bf16 %v1726_v34, %v1725_v54 }
 0x1c6   :  { %2705 = vmatpush3.bf16.msra.mxu1 %v2704_v39  ;;  %2546 = vmatprep.mubr.msk.f32.mxu1 %vm2841_vm2, %v2840_v30 }
 0x1c7   :  { %2706 = vmatprep.subr.bf16.mxu1 %v2839_v3 }
 0x1cd   :  { %2547 = vmatmul.mubr.msk.f32.vlgmr.msra.gmra.mrb[34].mxu1 %vm884_vm3, %v874_v56  ;;  %v1953_v56 = vld [vmem:[%s3953_s3 + $0xe0] sm:$0xff] }
 0x1ce   :  { %2708 = vmatpush3.bf16.msra.mxu1 %v2707_v41  ;;  %2553 = vmatprep.mubr.msk.f32.mxu1 %vm2841_vm2, %v2840_v30  ;;  %v2719_v24 = vpack.c.bf16 %v1954_v58, %v1953_v56 }
 0x1cf   :  { %2709 = vmatprep.subr.bf16.mxu1 %v2839_v3 }
 0x1d5   :  { %2554 = vmatmul.mubr.msk.f32.vlgmr.msra.gmra.mrb[34].mxu1 %vm884_vm3, %v875_v55  ;;  %v2728_v55 = vpack.c.bf16 %v2109_v7, %v2108_v0 }
 0x1d6   :  { %2711 = vmatpush3.bf16.msra.mxu1 %v2710_v38  ;;  %2560 = vmatprep.mubr.msk.f32.mxu1 %vm2841_vm2, %v2840_v30 }
 0x1d7   :  { %2712 = vmatprep.subr.bf16.mxu1 %v2839_v3 }
 0x1dd   :  { %2561 = vmatmul.mubr.msk.f32.vlgmr.msra.gmra.mrb[34].mxu1 %vm884_vm3, %v876_v15  ;;  %v2117_v15 = vld [vmem:[%s3955_s5 + $0x58] sm:$0xff] }
 0x1de   :  { %2714 = vmatpush3.bf16.msra.mxu1 %v2713_v1  ;;  %2567 = vmatprep.mubr.msk.f32.mxu1 %vm2841_vm2, %v2840_v30  ;;  %v2740_v57 = vpack.c.bf16 %v2117_v15, %v2116_v28 }
 0x1df   :  { %2715 = vmatprep.subr.bf16.mxu1 %v2839_v3 }
 0x1e5   :  { %2568 = vmatmul.mubr.msk.f32.vlgmr.msra.gmra.mrb[34].mxu1 %vm884_vm3, %v877_v29 }
 0x1e6   :  { %2717 = vmatpush3.bf16.msra.mxu1 %v2716_v20  ;;  %2574 = vmatprep.mubr.msk.f32.mxu1 %vm2841_vm2, %v2840_v30 }
 0x1e7   :  { %2718 = vmatprep.subr.bf16.mxu1 %v2839_v3 }
 0x1ed   :  { %2575 = vmatmul.mubr.msk.f32.vlgmr.msra.gmra.mrb[34].mxu1 %vm884_vm3, %v878_v40  ;;  %v2208_v40 = vld [vmem:[%s3957_s7 + $0x28] sm:$0xff] }
 0x1ee   :  { %2720 = vmatpush3.bf16.msra.mxu1 %v2719_v24  ;;  %2581 = vmatprep.mubr.msk.f32.mxu1 %vm2841_vm2, %v2840_v30  ;;  %v2752_v44 = vpack.c.bf16 %v2208_v40, %v2207_v47 }
 0x1ef   :  { %2721 = vmatprep.subr.bf16.mxu1 %v2839_v3 }
 0x1f5   :  { %2582 = vmatmul.mubr.msk.f32.vlgmr.msra.gmra.mrb[34].mxu1 %vm884_vm3, %v879_v37  ;;  %v2212_v37 = vld [vmem:[%s3957_s7 + $0x48] sm:$0xff]  ;;  %s2815_s7 = scalar_lea.vmem %s2308_s18, 128 }
 0x1f6   :  { %2723 = vmatpush3.bf16.msra.mxu1 %v2722_v4  ;;  %2588 = vmatprep.mubr.msk.f32.mxu1 %vm2841_vm2, %v2840_v30  ;;  %v2758_v49 = vpack.c.bf16 %v2212_v37, %v2211_v5  ;;  %p2816_p0 = scmp.ne.s32.totalorder %s2308_s18, %s2815_s7  ;;  %p2821_p2 = scmp.lt.s32.totalorder %s2815_s7, %s2815_s7 }
 0x1f7   :  { %2724 = vmatprep.subr.bf16.mxu1 %v2839_v3 }
 0x1f8   :  { %p2822_p3 = por %p2821_p2, %p2820_p1 }
 0x1fa   :  { %p2823_p4 = pnand %p2822_p3, %p2816_p0 }
 0x1fd   :  { %2589 = vmatmul.mubr.msk.f32.vlgmr.msra.gmra.mrb[34].mxu1 %vm884_vm3, %v880_v43  ;;  %v2734_v43 = vpack.c.bf16 %v2113_v14, %v2112_v11 }
 0x1fe   :  { %2726 = vmatpush3.bf16.msra.mxu1 %v2725_v26  ;;  %2621 = vmatprep.mubr.msk.f32.mxu1 %vm2841_vm2, %v2840_v30 }
 0x1ff   :  { %2727 = vmatprep.subr.bf16.mxu1 %v2839_v3 }
 0x202   :  { %2729 = vmatpush3.bf16.msra.mxu1 %v2728_v55 }
 0x203   :  { %2730 = vmatprep.subr.bf16.mxu1 %v2839_v3 }
 0x206   :  { %2732 = vmatpush3.bf16.msra.mxu1 %v2731_v10 }
 0x207   :  { %2733 = vmatprep.subr.bf16.mxu1 %v2839_v3 }
 0x20a   :  { %2735 = vmatpush3.bf16.msra.mxu1 %v2734_v43 }
 0x20b   :  { %2736 = vmatprep.subr.bf16.mxu1 %v2839_v3 }
 0x20e   :  { %2738 = vmatpush3.bf16.msra.mxu1 %v2737_v17 }
 0x20f   :  { %2739 = vmatprep.subr.bf16.mxu1 %v2839_v3 }
 0x212   :  { %2741 = vmatpush3.bf16.msra.mxu1 %v2740_v57 }
 0x213   :  { %2742 = vmatprep.subr.bf16.mxu1 %v2839_v3 }
 0x216   :  { %2744 = vmatpush3.bf16.msra.mxu1 %v2743_v6 }
 0x217   :  { %2619 = vmatprep.subr.mxu1 %v2840_v30 }
 0x21a   :  { %2620 = vmatpush3.msra.mxu1 %v2120_v62 }
 0x21b   :  { %2745 = vmatprep.subr.bf16.mxu1 %v2839_v3 }
 0x2d0   :  { %v2100_v27 = vpop.f32.mrb[34].mxu1 }
 0x2d1   :  { %v2780_v16 = vadd.f32 %v2382_v36, %v2100_v27  ;;  %v2590_v29 = vpop.f32.mrb[35].mxu1 }
 0x2d3   :  { %v2105_v59 = vmax.f32 %v2780_v16, 0.0 }
 0x2d5   :  { %2622 = vmatmul.mubr.msk.f32.vlgmr.msra.gmra.mrb[36].mxu1 %vm2128_vm4, %v2105_v59 }
 0x2d6   :  { %2747 = vmatpush3.bf16.msra.mxu1 %v2746_v61  ;;  %2646 = vmatprep.mubr.msk.f32.mxu1 %vm2841_vm2, %v2840_v30 }
 0x2d7   :  { %2748 = vmatprep.subr.bf16.mxu1 %v2839_v3 }
 0x2da   :  { %2750 = vmatpush3.bf16.msra.mxu1 %v2749_v18 }
 0x2db   :  { %2751 = vmatprep.subr.bf16.mxu1 %v2839_v3 }
 0x2de   :  { %2753 = vmatpush3.bf16.msra.mxu1 %v2752_v44 }
 0x2df   :  { %2754 = vmatprep.subr.bf16.mxu1 %v2839_v3 }
 0x2e2   :  { %2756 = vmatpush3.bf16.msra.mxu1 %v2755_v23 }
 0x2e3   :  { %2757 = vmatprep.subr.bf16.mxu1 %v2839_v3  ;;  %v2398_v3 = vld [vmem:[%s3956_s6] ss:$0 sm:$0xff] }
 0x2e6   :  { %2759 = vmatpush3.bf16.msra.mxu1 %v2758_v49 }
 0x2e7   :  { %2644 = vmatprep.subr.mxu1 %v2840_v30  ;;  %v2400_v30 = vld [vmem:[%s3958_s8] ss:$0 sm:$0xff] }
 0x2ea   :  { %2645 = vmatpush3.msk.msra.mxu1 %vm2225_vm5, %v2213_v46 }
 0x3a8   :  { %v2198_v39 = vpop.f32.mrb[36].mxu1 }
 0x3a9   :  { %v2199_v42 = vadd.f32 %v2398_v3, %v2198_v39  ;;  %v2623_v19 = vpop.f32.mrb[37].mxu1 }
 0x3ab   :  { %v2202_v41 = vmax.f32 %v2199_v42, 0.0 }
 0x3ad   :  { %2647 = vmatmul.mubr.msk.f32.vlgmr.msra.gmra.mrb[38].mxu1 %vm2221_vm6, %v2202_v41 }
 0x480   :  { %v2295_v54 = vpop.f32.mrb[38].mxu1 }
 0x481   :  { %v2296_v34 = vadd.f32 %v2400_v30, %v2295_v54  ;;  %v2648_v38 = vpop.f32.mrb[39].mxu1 }
 0x483   :  { %2300 = vst.msk [vmem:[#allocation2] sm:$0xff] %vm2299_vm7, %v2296_v34 }
 0x484   :  { %2826 = shalt.err (!%p2823_p4)
}
 0x485   :  { %s2827_s20 = scalar_lea.hbm %s3959_s9, 128 }
 0x486   :  { %p2828_p5 = scmp.ne.s32.totalorder %s3959_s9, %s2827_s20  ;;  %p2831_p6 = scmp.lt.u32.totalorder %s2827_s20, %s3959_s9 }
 0x488   :  { %p2833_p7 = pnand %p2831_p6, %p2828_p5 }
 0x48a   :  { %2836 = shalt.err (!%p2833_p7)
}
 0x48b   :  { %2310 = dma.vmem_to_hbm [thread:$0]  %s2308_s18, 128, %s3959_s9, [#allocation3]  }
 0x48c   :  { %2837 = dma.done.wait [#allocation3], 128  }
 0x48d   :  { %2838 = vsyncadd [#allocation3], 4294967168 }
 0x48e   :  { %2314 = vsyncpa [#allocation3], 1 }

</bundles_post_ra>
